<compile_context>
chip_gen: v5e
topology: v5e:2x2
jax: 0.10.0
libtpu: 0.0.40
codegen_flags: <defaults>
</compile_context>

<pallas_src>
import jax
import jax.numpy as jnp
from jax.experimental import pallas as pl
from jax.experimental.pallas import tpu as pltpu


def dense_vae_kernel(
    x_ref,        # [TB, Fp]    bf16 input tile
    eps_ref,      # [TB, Lp]    f32 reparameterization noise tile
    we_ref,       # [Fp, Zp]    bf16 encoder weight   (resident)
    be_ref,       # [1,  Zp]    f32  encoder bias     (resident)
    wml_ref,      # [Zp, 2*Lp]  bf16 fused mean||logvar weight (resident)
    bml_ref,      # [1,  2*Lp]  f32  fused mean||logvar bias   (resident)
    wf_ref,       # [Lp, Fp]    bf16 folded reconstruct@decoder weight (resident)
    bf_ref,       # [1,  Fp]    f32  folded bias (resident)
    recon_ref,    # [TB, Fp]    f32 out
    mean_ref,     # [TB, Lp]    f32 out
    logvar_ref,   # [TB, Lp]    f32 out
):
    lp = mean_ref.shape[-1]

    # --- Encoder: Linear + ReLU (dropout == 0 -> identity) ------------------
    h = jnp.dot(x_ref[...], we_ref[...], preferred_element_type=jnp.float32)
    h = jnp.maximum(h + be_ref[...], 0.0)                      # [TB, Zp] f32

    # --- fused mean/logvar heads: one MXU pass over 2*Lp lanes ---------------
    ml = jnp.dot(h.astype(wml_ref.dtype), wml_ref[...],
                 preferred_element_type=jnp.float32) + bml_ref[...]
    mean = ml[:, :lp]                                          # vreg-aligned slice
    logvar = jnp.clip(ml[:, lp:], -30.0, 20.0)                 # torch.clamp

    # --- reparameterize: z = mean + eps * exp(0.5 * logvar) ------------------
    z = mean + eps_ref[...] * jnp.exp(0.5 * logvar)            # [TB, Lp] f32

    # --- layer_reconstruct folded into decoder Linear, then Sigmoid ----------
    logits = jnp.dot(z.astype(wf_ref.dtype), wf_ref[...],
                     preferred_element_type=jnp.float32) + bf_ref[...]
    recon_ref[...] = jax.nn.sigmoid(logits).astype(recon_ref.dtype)
    mean_ref[...] = mean.astype(mean_ref.dtype)
    logvar_ref[...] = logvar.astype(logvar_ref.dtype)


def init_params(key, in_features, z_features, latent_dim):
    """Synthetic torch.nn.Linear-style params. Weights stored as [in, out]."""
    ks = jax.random.split(key, 10)

    def lin(kw, kb, fan_in, fan_out):
        scale = 1.0 / jnp.sqrt(jnp.float32(fan_in))
        w = jax.random.uniform(kw, (fan_in, fan_out), jnp.float32, -scale, scale)
        b = jax.random.uniform(kb, (1, fan_out), jnp.float32, -scale, scale)
        return w, b

    we, be = lin(ks[0], ks[1], in_features, z_features)     # encoder
    wm, bm = lin(ks[2], ks[3], z_features, latent_dim)      # layer_mean
    wl, bl = lin(ks[4], ks[5], z_features, latent_dim)      # layer_logvar
    wr, br = lin(ks[6], ks[7], latent_dim, z_features)      # layer_reconstruct
    wd, bd = lin(ks[8], ks[9], z_features, in_features)     # decoder
    return (we, be, wm, bm, wl, bl, wr, br, wd, bd)


def _round_up(n, m):
    return ((n + m - 1) // m) * m


def dense_vae_forward(x, params, eps, *, tb=256, compute_dtype=jnp.bfloat16):
    B, F = x.shape
    L = eps.shape[1]
    we, be, wm, bm, wl, bl, wr, br, wd, bd = params
    Z = we.shape[1]

    # Lane-dense kernel-facing shapes.
    Fp = _round_up(F, 128)
    Zp = _round_up(Z, 128)
    Lp = _round_up(L, 128)
    TB = min(tb, _round_up(B, 8))
    Bp = _round_up(B, TB)

    def pad2(a, r, c):
        return jnp.pad(a, ((0, r - a.shape[0]), (0, c - a.shape[1])))

    hi = jax.lax.Precision.HIGHEST

    # Packed / folded / padded parameters (weights bf16, biases stay f32).
    we_p = pad2(we, Fp, Zp).astype(compute_dtype)
    be_p = pad2(be, 1, Zp)
    wml_p = jnp.concatenate([pad2(wm, Zp, Lp), pad2(wl, Zp, Lp)],
                            axis=1).astype(compute_dtype)
    bml_p = jnp.concatenate([pad2(bm, 1, Lp), pad2(bl, 1, Lp)], axis=1)
    wf = jnp.dot(wr, wd, precision=hi)            # [L, F] fold (no nonlinearity between)
    bf = jnp.dot(br, wd, precision=hi) + bd       # [1, F]
    wf_p = pad2(wf, Lp, Fp).astype(compute_dtype)
    bf_p = pad2(bf, 1, Fp)

    x_p = pad2(x, Bp, Fp).astype(compute_dtype)
    eps_p = pad2(eps, Bp, Lp)                     # f32, VPU epilogue only

    grid = (Bp // TB,)

    def tile_spec(cols):
        return pl.BlockSpec((TB, cols), lambda i: (i, 0))

    def resident(shape):
        return pl.BlockSpec(shape, lambda i: (0, 0))

    in_specs = [
        tile_spec(Fp), tile_spec(Lp),
        resident((Fp, Zp)), resident((1, Zp)),
        resident((Zp, 2 * Lp)), resident((1, 2 * Lp)),
        resident((Lp, Fp)), resident((1, Fp)),
    ]
    out_specs = (tile_spec(Fp), tile_spec(Lp), tile_spec(Lp))
    out_shape = (
        jax.ShapeDtypeStruct((Bp, Fp), jnp.float32),   # reconstructed_x (padded)
        jax.ShapeDtypeStruct((Bp, Lp), jnp.float32),   # mean (padded)
        jax.ShapeDtypeStruct((Bp, Lp), jnp.float32),   # logvar (padded)
    )

    itemsize = jnp.dtype(compute_dtype).itemsize
    flops = 2 * Bp * (Fp * Zp + Zp * 2 * Lp + Lp * Fp)
    transcendentals = Bp * (Fp + Lp)                   # sigmoid + exp
    bytes_accessed = (
        Bp * Fp * itemsize + Bp * Lp * 4                        # x, eps
        + (Fp * Zp + Zp * 2 * Lp + Lp * Fp) * itemsize          # weights
        + (Zp + 2 * Lp + Fp) * 4                                # biases
        + Bp * (Fp + 2 * Lp) * 4                                # outputs
    )

    recon_p, mean_p, logvar_p = pl.pallas_call(
        dense_vae_kernel,
        out_shape=out_shape,
        grid=grid,
        in_specs=in_specs,
        out_specs=out_specs,
        compiler_params=pltpu.CompilerParams(
            dimension_semantics=("parallel",),
            vmem_limit_bytes=32 * 1024 * 1024,
        ),
        cost_estimate=pl.CostEstimate(
            flops=flops,
            transcendentals=transcendentals,
            bytes_accessed=bytes_accessed,
        ),
    )(x_p, eps_p, we_p, be_p, wml_p, bml_p, wf_p, bf_p)

    return recon_p[:B, :F], mean_p[:B, :L], logvar_p[:B, :L]


if __name__ == "__main__":
    # Module-default feature sizes; batch sized to exercise the batch grid
    # (2 tiles of 256 rows) while staying tiny (<1 MiB of activations).
    batch = 512
    in_features = 400
    z_features = 50
    latent_dim = 10

    root = jax.random.PRNGKey(0)
    k_x, k_eps, k_params = jax.random.split(root, 3)

    x = jax.random.normal(k_x, (batch, in_features), jnp.float32)
    # torch.randn_like(stddev) equivalent: noise drawn outside the kernel so
    # the kernel stays deterministic.
    eps = jax.random.normal(k_eps, (batch, latent_dim), jnp.float32)
    params = init_params(k_params, in_features, z_features, latent_dim)

    recon, mean, logvar = dense_vae_forward(x, params, eps)
    jax.block_until_ready((recon, mean, logvar))

    assert recon.shape == (batch, in_features)
    assert mean.shape == (batch, latent_dim)
    assert logvar.shape == (batch, latent_dim)

    # --- Reference 1: same math with bf16-quantized operands (tight check of
    # the kernel: fused heads + folded decoder + padding are equivalent). -----
    we, be, wm, bm, wl, bl, wr, br, wd, bd = params
    q = lambda a: a.astype(jnp.bfloat16).astype(jnp.float32)
    dot = lambda a, b: jnp.dot(a, b, precision=jax.lax.Precision.HIGHEST)

    h_q = jnp.maximum(dot(q(x), q(we)) + be, 0.0)
    mean_q = dot(h_q, q(wm)) + bm
    logvar_q = jnp.clip(dot(h_q, q(wl)) + bl, -30.0, 20.0)
    z_q = mean_q + eps * jnp.exp(0.5 * logvar_q)
    recon_q = jax.nn.sigmoid(dot(dot(z_q, q(wr)) + br, q(wd)) + bd)

    assert jnp.allclose(mean, mean_q, atol=2e-2), float(jnp.max(jnp.abs(mean - mean_q)))
    assert jnp.allclose(logvar, logvar_q, atol=2e-2), float(jnp.max(jnp.abs(logvar - logvar_q)))
    assert jnp.allclose(recon, recon_q, atol=3e-2), float(jnp.max(jnp.abs(recon - recon_q)))

    # --- Reference 2: pure f32 module semantics (loose check; difference is
    # only the declared bf16 operand cast). -----------------------------------
    h_f = jnp.maximum(dot(x, we) + be, 0.0)
    mean_f = dot(h_f, wm) + bm
    logvar_f = jnp.clip(dot(h_f, wl) + bl, -30.0, 20.0)
    z_f = mean_f + eps * jnp.exp(0.5 * logvar_f)
    recon_f = jax.nn.sigmoid(dot(dot(z_f, wr) + br, wd) + bd)

    assert jnp.allclose(mean, mean_f, atol=1e-1)
    assert jnp.allclose(logvar, logvar_f, atol=1e-1)
    assert jnp.allclose(recon, recon_f, atol=1e-1)

    print("KERNEL_OK")
</pallas_src>

<mosaic_0001>
module attributes {stable_mosaic.version = 11 : i64} {
  func.func @dense_vae_kernel(%arg0: i32, %arg1: memref<256x512xbf16, #tpu.memory_space<vmem>>, %arg2: memref<256x128xf32, #tpu.memory_space<vmem>>, %arg3: memref<512x128xbf16, #tpu.memory_space<vmem>>, %arg4: memref<1x128xf32, #tpu.memory_space<vmem>>, %arg5: memref<128x256xbf16, #tpu.memory_space<vmem>>, %arg6: memref<1x256xf32, #tpu.memory_space<vmem>>, %arg7: memref<128x512xbf16, #tpu.memory_space<vmem>>, %arg8: memref<1x512xf32, #tpu.memory_space<vmem>>, %arg9: memref<256x512xf32, #tpu.memory_space<vmem>>, %arg10: memref<256x128xf32, #tpu.memory_space<vmem>>, %arg11: memref<256x128xf32, #tpu.memory_space<vmem>>) attributes {dimension_semantics = [#tpu.dimension_semantics<parallel>], iteration_bounds = array<i64: 2>, scalar_prefetch = 0 : i64, scratch_operands = 0 : i64, tpu.core_type = #tpu.core_type<tc>, window_params = [{transform_indices = @transform_0, window_bounds = array<i64: 256, 512>}, {transform_indices = @transform_1, window_bounds = array<i64: 256, 128>}, {pipeline_mode = #tpu.pipeline_mode<synchronous>, transform_indices = @transform_2, window_bounds = array<i64: 512, 128>}, {pipeline_mode = #tpu.pipeline_mode<synchronous>, transform_indices = @transform_3, window_bounds = array<i64: 1, 128>}, {pipeline_mode = #tpu.pipeline_mode<synchronous>, transform_indices = @transform_4, window_bounds = array<i64: 128, 256>}, {pipeline_mode = #tpu.pipeline_mode<synchronous>, transform_indices = @transform_5, window_bounds = array<i64: 1, 256>}, {pipeline_mode = #tpu.pipeline_mode<synchronous>, transform_indices = @transform_6, window_bounds = array<i64: 128, 512>}, {pipeline_mode = #tpu.pipeline_mode<synchronous>, transform_indices = @transform_7, window_bounds = array<i64: 1, 512>}, {transform_indices = @transform_8, window_bounds = array<i64: 256, 512>}, {transform_indices = @transform_9, window_bounds = array<i64: 256, 128>}, {transform_indices = @transform_10, window_bounds = array<i64: 256, 128>}]} {
    %c0 = arith.constant 0 : index
    %c0_0 = arith.constant 0 : index
    %0 = vector.load %arg1[%c0, %c0_0] : memref<256x512xbf16, #tpu.memory_space<vmem>>, vector<256x512xbf16>
    %c0_1 = arith.constant 0 : index
    %c0_2 = arith.constant 0 : index
    %1 = vector.load %arg3[%c0_1, %c0_2] : memref<512x128xbf16, #tpu.memory_space<vmem>>, vector<512x128xbf16>
    %cst = arith.constant dense<0.000000e+00> : vector<256x128xf32>
    %2 = tpu.matmul %0, %1, %cst {dimension_numbers = #tpu.dot_dimension_numbers<[1], [0], [0], [1], [0, 0, 1, 1], [], []>} : vector<256x512xbf16>, vector<512x128xbf16>, vector<256x128xf32> -> vector<256x128xf32>
    %c0_3 = arith.constant 0 : index
    %c0_4 = arith.constant 0 : index
    %3 = vector.load %arg4[%c0_3, %c0_4] : memref<1x128xf32, #tpu.memory_space<vmem>>, vector<1x128xf32>
    %4 = vector.broadcast %3 : vector<1x128xf32> to vector<256x128xf32>
    %5 = arith.addf %2, %4 : vector<256x128xf32>
    %cst_5 = arith.constant 0.000000e+00 : f32
    %6 = vector.broadcast %cst_5 : f32 to vector<256x128xf32>
    %7 = arith.maximumf %5, %6 : vector<256x128xf32>
    %8 = arith.truncf %7 : vector<256x128xf32> to vector<256x128xbf16>
    %c0_6 = arith.constant 0 : index
    %c0_7 = arith.constant 0 : index
    %9 = vector.load %arg5[%c0_6, %c0_7] : memref<128x256xbf16, #tpu.memory_space<vmem>>, vector<128x256xbf16>
    %cst_8 = arith.constant dense<0.000000e+00> : vector<256x256xf32>
    %10 = tpu.matmul %8, %9, %cst_8 {dimension_numbers = #tpu.dot_dimension_numbers<[1], [0], [0], [1], [0, 0, 1, 1], [], []>} : vector<256x128xbf16>, vector<128x256xbf16>, vector<256x256xf32> -> vector<256x256xf32>
    %c0_9 = arith.constant 0 : index
    %c0_10 = arith.constant 0 : index
    %11 = vector.load %arg6[%c0_9, %c0_10] : memref<1x256xf32, #tpu.memory_space<vmem>>, vector<1x256xf32>
    %12 = vector.broadcast %11 : vector<1x256xf32> to vector<256x256xf32>
    %13 = arith.addf %10, %12 : vector<256x256xf32>
    %14 = vector.extract_strided_slice %13 {offsets = [0, 0], sizes = [256, 128], strides = [1, 1]} : vector<256x256xf32> to vector<256x128xf32>
    %15 = vector.extract_strided_slice %13 {offsets = [0, 128], sizes = [256, 128], strides = [1, 1]} : vector<256x256xf32> to vector<256x128xf32>
    %cst_11 = arith.constant -3.000000e+01 : f32
    %cst_12 = arith.constant 2.000000e+01 : f32
    %16 = vector.broadcast %cst_11 : f32 to vector<256x128xf32>
    %17 = arith.maximumf %16, %15 : vector<256x128xf32>
    %18 = vector.broadcast %cst_12 : f32 to vector<256x128xf32>
    %19 = arith.minimumf %18, %17 : vector<256x128xf32>
    %c0_13 = arith.constant 0 : index
    %c0_14 = arith.constant 0 : index
    %20 = vector.load %arg2[%c0_13, %c0_14] : memref<256x128xf32, #tpu.memory_space<vmem>>, vector<256x128xf32>
    %cst_15 = arith.constant 5.000000e-01 : f32
    %21 = vector.broadcast %cst_15 : f32 to vector<256x128xf32>
    %22 = arith.mulf %21, %19 : vector<256x128xf32>
    %23 = math.exp %22 : vector<256x128xf32>
    %24 = arith.mulf %20, %23 : vector<256x128xf32>
    %25 = arith.addf %14, %24 : vector<256x128xf32>
    %26 = arith.truncf %25 : vector<256x128xf32> to vector<256x128xbf16>
    %c0_16 = arith.constant 0 : index
    %c0_17 = arith.constant 0 : index
    %27 = vector.load %arg7[%c0_16, %c0_17] : memref<128x512xbf16, #tpu.memory_space<vmem>>, vector<128x512xbf16>
    %cst_18 = arith.constant dense<0.000000e+00> : vector<256x512xf32>
    %28 = tpu.matmul %26, %27, %cst_18 {dimension_numbers = #tpu.dot_dimension_numbers<[1], [0], [0], [1], [0, 0, 1, 1], [], []>} : vector<256x128xbf16>, vector<128x512xbf16>, vector<256x512xf32> -> vector<256x512xf32>
    %c0_19 = arith.constant 0 : index
    %c0_20 = arith.constant 0 : index
    %29 = vector.load %arg8[%c0_19, %c0_20] : memref<1x512xf32, #tpu.memory_space<vmem>>, vector<1x512xf32>
    %30 = vector.broadcast %29 : vector<1x512xf32> to vector<256x512xf32>
    %31 = arith.addf %28, %30 : vector<256x512xf32>
    %32 = arith.negf %31 : vector<256x512xf32>
    %33 = math.exp %32 : vector<256x512xf32>
    %cst_21 = arith.constant 1.000000e+00 : f32
    %34 = vector.broadcast %cst_21 : f32 to vector<256x512xf32>
    %35 = arith.addf %34, %33 : vector<256x512xf32>
    %36 = arith.divf %34, %35 : vector<256x512xf32>
    %c0_22 = arith.constant 0 : index
    %c0_23 = arith.constant 0 : index
    %37 = vector.load %arg9[%c0_22, %c0_23] : memref<256x512xf32, #tpu.memory_space<vmem>>, vector<256x512xf32>
    tpu.vector_store %arg9[%c0_22, %c0_23], %36 {strides = array<i32>} : memref<256x512xf32, #tpu.memory_space<vmem>>, vector<256x512xf32>,
    %c0_24 = arith.constant 0 : index
    %c0_25 = arith.constant 0 : index
    %38 = vector.load %arg10[%c0_24, %c0_25] : memref<256x128xf32, #tpu.memory_space<vmem>>, vector<256x128xf32>
    tpu.vector_store %arg10[%c0_24, %c0_25], %14 {strides = array<i32>} : memref<256x128xf32, #tpu.memory_space<vmem>>, vector<256x128xf32>,
    %c0_26 = arith.constant 0 : index
    %c0_27 = arith.constant 0 : index
    %39 = vector.load %arg11[%c0_26, %c0_27] : memref<256x128xf32, #tpu.memory_space<vmem>>, vector<256x128xf32>
    tpu.vector_store %arg11[%c0_26, %c0_27], %19 {strides = array<i32>} : memref<256x128xf32, #tpu.memory_space<vmem>>, vector<256x128xf32>,
    return
  }
  func.func @transform_0(%arg0: i32) -> (i32, i32) {
    %c0_i32 = arith.constant 0 : i32
    %c0_i32_0 = arith.constant 0 : i32
    return %arg0, %c0_i32 : i32, i32
  }
  func.func @transform_1(%arg0: i32) -> (i32, i32) {
    %c0_i32 = arith.constant 0 : i32
    %c0_i32_0 = arith.constant 0 : i32
    return %arg0, %c0_i32 : i32, i32
  }
  func.func @transform_2(%arg0: i32) -> (i32, i32) {
    %c0_i32 = arith.constant 0 : i32
    %c0_i32_0 = arith.constant 0 : i32
    %c0_i32_1 = arith.constant 0 : i32
    return %c0_i32, %c0_i32_0 : i32, i32
  }
  func.func @transform_3(%arg0: i32) -> (i32, i32) {
    %c0_i32 = arith.constant 0 : i32
    %c0_i32_0 = arith.constant 0 : i32
    %c0_i32_1 = arith.constant 0 : i32
    return %c0_i32, %c0_i32_0 : i32, i32
  }
  func.func @transform_4(%arg0: i32) -> (i32, i32) {
    %c0_i32 = arith.constant 0 : i32
    %c0_i32_0 = arith.constant 0 : i32
    %c0_i32_1 = arith.constant 0 : i32
    return %c0_i32, %c0_i32_0 : i32, i32
  }
  func.func @transform_5(%arg0: i32) -> (i32, i32) {
    %c0_i32 = arith.constant 0 : i32
    %c0_i32_0 = arith.constant 0 : i32
    %c0_i32_1 = arith.constant 0 : i32
    return %c0_i32, %c0_i32_0 : i32, i32
  }
  func.func @transform_6(%arg0: i32) -> (i32, i32) {
    %c0_i32 = arith.constant 0 : i32
    %c0_i32_0 = arith.constant 0 : i32
    %c0_i32_1 = arith.constant 0 : i32
    return %c0_i32, %c0_i32_0 : i32, i32
  }
  func.func @transform_7(%arg0: i32) -> (i32, i32) {
    %c0_i32 = arith.constant 0 : i32
    %c0_i32_0 = arith.constant 0 : i32
    %c0_i32_1 = arith.constant 0 : i32
    return %c0_i32, %c0_i32_0 : i32, i32
  }
  func.func @transform_8(%arg0: i32) -> (i32, i32) {
    %c0_i32 = arith.constant 0 : i32
    %c0_i32_0 = arith.constant 0 : i32
    return %arg0, %c0_i32 : i32, i32
  }
  func.func @transform_9(%arg0: i32) -> (i32, i32) {
    %c0_i32 = arith.constant 0 : i32
    %c0_i32_0 = arith.constant 0 : i32
    return %arg0, %c0_i32 : i32, i32
  }
  func.func @transform_10(%arg0: i32) -> (i32, i32) {
    %c0_i32 = arith.constant 0 : i32
    %c0_i32_0 = arith.constant 0 : i32
    return %arg0, %c0_i32 : i32, i32
  }
}

</mosaic_0001>

<bundles_post_ra>
// kernel: tpu_custom_call.1
= control target key start
LH: loop header
LB: loop body
LE: loop exit
PB: predicated region body
PF: predicated region fallthrough
CT: control target
= control target key end

     0   :  { %s10690_s0 = inlined_call_operand.hbm [shape: bf16[512,512], index: 0, kind: input, shape index: {}]   ;;  %s10691_s1 = inlined_call_operand.hbm [shape: f32[512,128], index: 1, kind: input, shape index: {}]   ;;  %s10692_s2 = inlined_call_operand.hbm [shape: bf16[512,128], index: 2, kind: input, shape index: {}]   ;;  %s10693_s3 = inlined_call_operand.hbm [shape: f32[1,128], index: 3, kind: input, shape index: {}]   ;;  %s10694_s4 = inlined_call_operand.hbm [shape: bf16[128,256], index: 4, kind: input, shape index: {}]   ;;  %s10695_s5 = inlined_call_operand.vmem [shape: f32[1,256], index: 5, kind: input, shape index: {}]   ;;  %s10696_s6 = inlined_call_operand.hbm [shape: bf16[128,512], index: 6, kind: input, shape index: {}]   ;;  %s10697_s7 = inlined_call_operand.vmem [shape: f32[1,512], index: 7, kind: input, shape index: {}]   ;;  %s10698_s8 = inlined_call_operand.hbm [shape: f32[512,512], index: 8, kind: output, shape index: {0}]   ;;  %s10699_s9 = inlined_call_operand.hbm [shape: f32[512,128], index: 9, kind: output, shape index: {1}]   ;;  %s10700_s10 = inlined_call_operand.hbm [shape: f32[512,128], index: 10, kind: output, shape index: {2}]  }
   0x1   :  { %10711 = sst [smem:[#allocation29_spill]] %s10692_s2 }
   0x2   :  { %10712 = sst [smem:[#allocation30_spill]] %s10693_s3 }
   0x3   :  { %10713 = sst [smem:[#allocation31_spill]] %s10694_s4 }
   0x4   :  { %10714 = sst [smem:[#allocation32_spill]] %s10696_s6 }
   0x5   :  { %16 = vsyncpa [#allocation3], 0 }
   0x6   :  { %18 = vsyncpa [#allocation3 + $0x1], 0 }
   0x7   :  { %19 = vsyncpa [#allocation6], 0 }
   0x8   :  { %21 = vsyncpa [#allocation6 + $0x1], 0 }
   0x9   :  { %22 = vsyncpa [#allocation9], 0 }
   0xa   :  { %23 = vsyncpa [#allocation12], 0 }
   0xb   :  { %24 = vsyncpa [#allocation4], 0 }
   0xc   :  { %26 = vsyncpa [#allocation4 + $0x1], 0 }
   0xd   :  { %27 = vsyncpa [#allocation15], 0 }
   0xe   :  { %29 = vsyncpa [#allocation15 + $0x1], 0  ;;  %s7540_s13 = smov 0   ;;  %s7542_s14 = smov 0  }
   0xf   :  { %s7544_s15 = smov 0   ;;  %s7546_s16 = smov 0  }
  0x10 LB: > { %10715 = sst [smem:[#allocation24_spill]] %s7457_s13  ;;  %s7561_s17 = sadd.s32 4294967295, %s7469_s16   ;;  %s7469_s16 = sphi %s7546_s16, %s10952_s16   ;;  %s7465_s15 = sphi %s7544_s15, %s10954_s15   ;;  %s7461_s14 = sphi %s7542_s14, %s10956_s14   ;;  %s7457_s13 = sphi %s7540_s13, %s10955_s13  }
  0x11   : > { %10716 = sst [smem:[#allocation25_spill]] %s7465_s15  ;;  %s10701_s18 = sadd.s32 4294967294, %s7469_s16  }
  0x12   : > { %p55_p0 = scmp.ne.s32.totalorder %s7461_s14, %s7457_s13  ;;  %p56_p1 = scmp.eq.s32.totalorder %s7561_s17, 0 }
  0x13   : > { %p231_p2 = scmp.eq.s32.totalorder %s7561_s17, 1  ;;  %p237_p3 = scmp.eq.s32.totalorder %s10701_s18, 1 }
  0x14   : > { %p7572_p4 = por %p56_p1, %p55_p0  ;;  %p5551_p5 = scmp.ge.s32.totalorder %s7469_s16, 1 }
  0x15   : > { %p7577_p6 = por %p237_p3, %p55_p0  ;;  %p296_p7 = scmp.lt.s32.totalorder %s7469_s16, 3 }
  0x16   : > { %s10720_s2 = sld [smem:[#allocation29_spill]]  ;;  %s7471_s25 = smov [#allocation7]  }
  0x17   : > { %s10718_s20 = scalar_select %p7577_p6, 1, 0 }
  0x18   : > { %p7585_p8 = pnand %p5551_p5, %p296_p7  ;;  %s309_s26 = sshll.u32 %s7471_s25, 4  ;;  %s310_s26 = int_to_ptr.vmem [resolvable:$true] %s309_s26 }
  0x19   : > { %10719 = sst [smem:[#allocation26_spill]] %s10718_s20  ;;  %s7472_s11 = smov 64  }
  0x1a   : > { %p6483_p9 = pneg %p7585_p8  ;;  %s10723_s3 = sld [smem:[#allocation30_spill]] }
  0x1b   : > { %s7473_s12 = smov 4   ;;  %s7474_s21 = smov [#allocation8]  }
  0x1c   : > { %s307_s23 = sshll.u32 %s10720_s2, 4  ;;  %p7593_p10 = pnand %p6483_p9, %p56_p1  ;;  %s308_s23 = int_to_ptr.hbm [resolvable:$true] %s307_s23 }
  0x1d   : > { %s324_s22 = sshll.u32 %s7474_s21, 4  ;;  %s10724_s4 = sld [smem:[#allocation31_spill]]  ;;  %s325_s22 = int_to_ptr.vmem [resolvable:$true] %s324_s22 }
  0x1e   : > { %6486 = dma.hbm_to_vmem [thread:$0]  (!%p7593_p10), %s308_s23, 4096, %s310_s26, [#allocation6], %s7472_s11, %s7472_s11, %s7473_s12  }
  0x1f   : > { %s7475_s28 = smov [#allocation10]   ;;  %s10725_s6 = sld [smem:[#allocation32_spill]] }
  0x20   : > { %s322_s30 = sshll.u32 %s10723_s3, 4  ;;  %s335_s29 = sshll.u32 %s7475_s28, 4  ;;  %s323_s30 = int_to_ptr.hbm [resolvable:$true] %s322_s30  ;;  %s336_s29 = int_to_ptr.vmem [resolvable:$true] %s335_s29 }
  0x21   : > { %6489 = dma.hbm_to_vmem [thread:$0]  (!%p7593_p10), %s323_s30, 16, %s325_s22, [#allocation9]  }
  0x22   : > { %s10703_s18 = smov 128   ;;  %s10704_s26 = smov 8  }
  0x23   : > { %s333_s2 = sshll.u32 %s10724_s4, 4  ;;  %s7478_s30 = smov [#allocation11]   ;;  %s334_s2 = int_to_ptr.hbm [resolvable:$true] %s333_s2 }
  0x24   : > { %6492 = dma.hbm_to_vmem [thread:$0]  (!%p7593_p10), %s334_s2, 2048, %s336_s29, [#allocation9], %s10703_s18, %s10703_s18, %s10704_s26  }
  0x25   : > { %s350_s23 = sshll.u32 %s10725_s6, 4  ;;  %s352_s11 = sshll.u32 %s7478_s30, 4  ;;  %s351_s23 = int_to_ptr.hbm [resolvable:$true] %s350_s23  ;;  %s353_s11 = int_to_ptr.vmem [resolvable:$true] %s352_s11 }
  0x26   : > { %s10705_s3 = smov 256   ;;  %s10706_s20 = smov 16  }
  0x27   : > { %6495 = dma.hbm_to_vmem [thread:$0]  (!%p7593_p10), %s351_s23, 4096, %s353_s11, [#allocation12], %s10705_s3, %s10705_s3, %s10706_s20  }
  0x28   : > { %s7622_s12 = sadd.s32 1, %s7469_s16   ;;  %s42_s2 = sadd.s32 1, %s7465_s15 }
  0x29   : > { %10726 = sst [smem:[#allocation27_spill]] %s7622_s12  ;;  %s39_s21 = ssub.s32 %s7469_s16, %s7622_s12 }
  0x2a   : > { %p40_p12 = scmp.eq.s32.totalorder %s39_s21, 0  ;;  %p49_p13 = scmp.ne.s32.totalorder %s7465_s15, %s7461_s14 }
  0x2b   : > { %p50_p0 = scmp.eq.s32.totalorder %s7469_s16, 0  ;;  %p6517_p7 = scmp.lt.s32.totalorder %s7469_s16, 2 }
  0x2c   : > { %s7631_s22 = scalar_select %p40_p12, %s7465_s15, %s42_s2  }
  0x2d   : > { %p51_p3 = por %p50_p0, %p49_p13  ;;  %p7635_p5 = por %p231_p2, %p49_p13 }
  0x2e   : > { %10727 = sst [smem:[#allocation28_spill]] %s7631_s22  ;;  %s7641_s27 = sand.u32 1, %s7465_s15  }
  0x2f   : > { %s5557_s28 = sshll.u32 %s7641_s27, 9  ;;  %s6291_s29 = sshll.u32 %s7469_s16, 9 }
  0x30   : > { %s379_s11 = scalar_lea.hbm %s10690_s0, %s6291_s29  ;;  %s373_s21 = scalar_lea.vmem [#allocation2], %s5557_s28 }
  0x31   : > { %s382_s2 = sshll.u32 %s373_s21, 4  ;;  %s380_s18 = sshll.u32 %s379_s11, 4  ;;  %s383_s2 = int_to_ptr.vmem [resolvable:$true] %s382_s2  ;;  %s381_s18 = int_to_ptr.hbm [resolvable:$true] %s380_s18 }
  0x32   : > { %p7648_p2 = pnand %p6517_p7, %p51_p3  ;;  %s392_s3 = sand.u32 1, %s7469_s16  }
  0x33   : > { %s5561_s20 = sshll.u32 %s7641_s27, 8  ;;  %s370_s4 = scalar_lea.sflag [#allocation3], %s7641_s27 }
  0x34   : > { %s7267_s6 = sshra.s32 %s381_s18, 4  ;;  %p7271_p10 = pneg %p7648_p2  ;;  %s7268_s6 = int_to_ptr.hbm [resolvable:$true] %s7267_s6 }
  0x35   : > { %s7269_s22 = scalar_lea.hbm %s7268_s6, 512  ;;  %s7274_s23 = scalar_lea.hbm %s10690_s0, 1024 }
  0x36   : > { %p7270_p9 = scmp.ne.s32.totalorder %s7268_s6, %s7269_s22  ;;  %p7275_p0 = scmp.lt.s32.totalorder %s7268_s6, %s10690_s0 }
  0x37   : > { %p7276_p3 = scmp.lt.s32.totalorder %s7274_s23, %s7269_s22 }
  0x38   : > { %p7272_p12 = pnand %p7271_p10, %p7270_p9 }
  0x39   : > { %p7277_p7 = por %p7276_p3, %p7275_p0 }
  0x3a   : > { %p7273_p13 = pneg %p7272_p12 }
  0x3c   : > { %p7278_p11 = pnand %p7277_p7, %p7273_p13 }
  0x3e   : > { %7281 = shalt.err (!%p7278_p11)
}
  0x3f   : > { %s10730_s27 = smov 16   ;;  %s10731_s21 = smov 256  }
  0x40   : > { %6499 = dma.hbm_to_vmem [thread:$0]  (!%p7648_p2), %s381_s18, 8192, %s383_s2, %s370_s4, %s10731_s21, %s10731_s21, %s10730_s27  }
  0x41   : > { %s6292_s15 = sshll.u32 %s7469_s16, 8  ;;  %s396_s13 = scalar_lea.vmem [#allocation5], %s5561_s20 }
  0x42   : > { %s401_s29 = scalar_lea.hbm %s10691_s1, %s6292_s15  ;;  %s404_s30 = sshll.u32 %s396_s13, 4  ;;  %s405_s30 = int_to_ptr.vmem [resolvable:$true] %s404_s30 }
  0x43   : > { %s402_s6 = sshll.u32 %s401_s29, 4  ;;  %s393_s22 = scalar_lea.sflag [#allocation6], %s392_s3  ;;  %s403_s6 = int_to_ptr.hbm [resolvable:$true] %s402_s6 }
  0x44   : > { %s7297_s23 = sshra.s32 %s403_s6, 4  ;;  %s7304_s2 = scalar_lea.hbm %s10691_s1, 512  ;;  %s7298_s23 = int_to_ptr.hbm [resolvable:$true] %s7297_s23 }
  0x45   : > { %s7299_s11 = scalar_lea.hbm %s7298_s23, 256  ;;  %p7305_p13 = scmp.lt.s32.totalorder %s7298_s23, %s10691_s1 }
  0x46   : > { %p7300_p11 = scmp.ne.s32.totalorder %s7298_s23, %s7299_s11  ;;  %p7306_p0 = scmp.lt.s32.totalorder %s7304_s2, %s7299_s11 }
  0x48   : > { %p7302_p9 = pnand %p7300_p11, %p7271_p10  ;;  %p7307_p3 = por %p7306_p0, %p7305_p13 }
  0x4a   : > { %p7303_p12 = pneg %p7302_p9 }
  0x4c   : > { %p7308_p7 = pnand %p7307_p3, %p7303_p12 }
  0x4e   : > { %7311 = shalt.err (!%p7308_p7)
}
  0x4f   : > { %s10732_s13 = smov 8   ;;  %s10733_s3 = smov 128  }
  0x50   : > { %6502 = dma.hbm_to_vmem [thread:$0]  (!%p7648_p2), %s403_s6, 4096, %s405_s30, %s393_s22, %s10733_s3, %s10733_s3, %s10732_s13  }
  0x51   : > { %416 = sbr.rel (%p7585_p8) target bundleno = 1291 (0x50b), region = 52  ;;  %s7692_s20 = sand.u32 (!%p7585_p8), 1, %s7461_s14  }
  0x52   : > { %s5565_s27 = sshll.u32 (!%p7585_p8), %s7692_s20, 9  ;;  %s419_s21 = scalar_lea.sflag (!%p7585_p8), [#allocation3], %s7692_s20 }
  0x53   : > { %s7696_s28 = scalar_lea.vmem (!%p7585_p8), [#allocation2], %s5565_s27 }
  0x56   : > { %7428 = dma.done.wait (%p7572_p4), %s419_s21, 8192  }
  0x57   : > { %7430 = vsyncadd (%p7572_p4), %s419_s21, 4294959104  ;;  %s428_s24 = sand.u32 1, %s7561_s17   ;;  %s7704_s26 = sshll.u32 %s7692_s20, 8 }
  0x58   : > { %s429_s29 = scalar_lea.sflag [#allocation6], %s428_s24  ;;  %s7709_s30 = scalar_lea.vmem [#allocation5], %s7704_s26 }
  0x59   : > { %7432 = dma.done.wait (%p7572_p4), %s429_s29, 4096  }
  0x5a   : > { %7434 = vsyncadd (%p7572_p4), %s429_s29, 4294963200 }
  0x5b   : > { %7436 = dma.done.wait (%p56_p1), [#allocation6], 4096  }
  0x5c   : > { %7438 = vsyncadd (%p56_p1), [#allocation6], 4294963200 }
  0x5d   : > { %7440 = dma.done.wait (%p56_p1), [#allocation9], 2064  }
  0x5e   : > { %7442 = vsyncadd (%p56_p1), [#allocation9], 4294965232 }
  0x5f   : > { %7444 = dma.done.wait (%p56_p1), [#allocation12], 4096  }
  0x60   : > { %7446 = vsyncadd (%p56_p1), [#allocation12], 4294963200  ;;  %v6364_v0 = vld [vmem:[#allocation7 + $0x38] sm:$0xff]  ;;  %v6363_v2 = vld [vmem:[#allocation7 + $0x30] sm:$0xff]  ;;  %s7947_s22 = scalar_lea.vmem [#allocation14], %s7704_s26  ;;  %s7952_s23 = scalar_lea.vmem [#allocation16], %s7704_s26 }
  0x61   : > { %v6372_v1 = vld [vmem:[#allocation7 + $0x78] sm:$0xff]  ;;  %6441 = vmatpush.bf16.msra.mxu2 %v6364_v0  ;;  %v6371_v3 = vld [vmem:[#allocation7 + $0x70] sm:$0xff]  ;;  %1154 = vmatpush.bf16.msra.mxu0 %v6364_v0  ;;  %v6362_v4 = vld [vmem:[#allocation7 + $0x28] sm:$0xff]  ;;  %s5571_s18 = sshll.u32 %s7692_s20, 10  ;;  %s6439_s13 = sshll.u32 %s7561_s17, 8 }
  0x62   : > { %6449 = vmatpush.bf16.msra.mxu3 %v6372_v1  ;;  %1243 = vmatpush.bf16.msra.mxu1 %v6372_v1  ;;  %v6370_v5 = vld [vmem:[#allocation7 + $0x68] sm:$0xff]  ;;  %v6361_v6 = vld [vmem:[#allocation7 + $0x20] sm:$0xff]  ;;  %v6360_v8 = vld [vmem:[#allocation7 + $0x18] sm:$0xff]  ;;  %s8252_s2 = scalar_lea.vmem [#allocation13], %s5571_s18  ;;  %s5332_s21 = scalar_lea.hbm %s10699_s9, %s6439_s13 }
  0x63   : > { %v6369_v7 = vld [vmem:[#allocation7 + $0x60] sm:$0xff]  ;;  %v6368_v9 = vld [vmem:[#allocation7 + $0x58] sm:$0xff]  ;;  %v6359_v10 = vld [vmem:[#allocation7 + $0x10] sm:$0xff]  ;;  %s5335_s26 = sshll.u32 %s5332_s21, 4  ;;  %s10144_s19 = scalar_lea.hbm %s10700_s10, %s6439_s13  ;;  %s10127_s26 = int_to_ptr.hbm [resolvable:$true] %s5335_s26 }
  0x64   : > { %v6367_v11 = vld [vmem:[#allocation7 + $0x50] sm:$0xff]  ;;  %v6358_v12 = vld [vmem:[#allocation7 + $0x8] sm:$0xff]  ;;  %v6357_v14 = vld [vmem:[#allocation7] sm:$0xff]  ;;  %s10156_s6 = scalar_lea.sflag [#allocation15], %s428_s24  ;;  %s7347_s12 = scalar_lea.hbm %s10699_s9, 512 }
  0x65   : > { %6442 = vmatpush.bf16.msra.mxu2 %v6363_v2  ;;  %1155 = vmatpush.bf16.msra.mxu0 %v6363_v2  ;;  %v6366_v13 = vld [vmem:[#allocation7 + $0x48] sm:$0xff]  ;;  %v6365_v15 = vld [vmem:[#allocation7 + $0x40] sm:$0xff]  ;;  %v6327_v17 = vld [vmem:[%s7696_s28 + $0x10c] sm:$0xf0] }
  0x66   : > { %6450 = vmatpush.bf16.msra.mxu3 %v6371_v3  ;;  %1244 = vmatpush.bf16.msra.mxu1 %v6371_v3  ;;  %v5704_v16 = vld [vmem:[%s7696_s28 + $0x100] sm:$0xf]  ;;  %v6325_v18 = vld [vmem:[%s7696_s28 + $0x104] sm:$0xf]  ;;  %v5706_v19 = vld [vmem:[%s7696_s28 + $0x110] sm:$0xf0] }
  0x67   : > { %v6380_v20 = vld [vmem:[#allocation7 + $0xb8] sm:$0xff]  ;;  %v5705_v22 = vor.u32 %v6327_v17, %v5704_v16  ;;  %v5709_v23 = vor.u32 %v6325_v18, %v5706_v19  ;;  %v6379_v24 = vld [vmem:[#allocation7 + $0xb0] sm:$0xff]  ;;  %v6378_v26 = vld [vmem:[#allocation7 + $0xa8] sm:$0xff] }
  0x68   : > { %v6388_v21 = vld [vmem:[#allocation7 + $0xf8] sm:$0xff]  ;;  %v6387_v25 = vld [vmem:[#allocation7 + $0xf0] sm:$0xff]  ;;  %v6386_v27 = vld [vmem:[#allocation7 + $0xe8] sm:$0xff] }
  0x69   : > { %6443 = vmatpush.bf16.msra.mxu2 %v6362_v4  ;;  %1156 = vmatpush.bf16.msra.mxu0 %v6362_v4  ;;  %v5720_v28 = vld [vmem:[%s7696_s28 + $0x120] sm:$0xf]  ;;  %v6331_v29 = vld [vmem:[%s7696_s28 + $0x12c] sm:$0xf0]  ;;  %v6329_v30 = vld [vmem:[%s7696_s28 + $0x124] sm:$0xf] }
  0x6a   : > { %6451 = vmatpush.bf16.msra.mxu3 %v6370_v5  ;;  %1245 = vmatpush.bf16.msra.mxu1 %v6370_v5  ;;  %v5722_v31 = vld [vmem:[%s7696_s28 + $0x130] sm:$0xf0]  ;;  %v5721_v32 = vor.u32 %v6331_v29, %v5720_v28  ;;  %v6377_v34 = vld [vmem:[#allocation7 + $0xa0] sm:$0xff]  ;;  %v6335_v37 = vld [vmem:[%s7696_s28 + $0x14c] sm:$0xf0] }
  0x6b   : > { %v5725_v33 = vor.u32 %v6329_v30, %v5722_v31  ;;  %v6385_v35 = vld [vmem:[#allocation7 + $0xe0] sm:$0xff]  ;;  %v5738_v39 = vld [vmem:[%s7696_s28 + $0x150] sm:$0xf0]  ;;  %v6376_v42 = vld [vmem:[#allocation7 + $0x98] sm:$0xff] }
  0x6c   : > { %v5736_v36 = vld [vmem:[%s7696_s28 + $0x140] sm:$0xf]  ;;  %v6333_v38 = vld [vmem:[%s7696_s28 + $0x144] sm:$0xf]  ;;  %v6384_v43 = vld [vmem:[#allocation7 + $0xd8] sm:$0xff] }
  0x6d   : > { %6444 = vmatpush.bf16.msra.mxu2 %v6361_v6  ;;  %1157 = vmatpush.bf16.msra.mxu0 %v6361_v6  ;;  %v5737_v40 = vor.u32 %v6335_v37, %v5736_v36  ;;  %v5741_v41 = vor.u32 %v6333_v38, %v5738_v39  ;;  %v5752_v44 = vld [vmem:[%s7696_s28 + $0x160] sm:$0xf]  ;;  %v6339_v45 = vld [vmem:[%s7696_s28 + $0x16c] sm:$0xf0]  ;;  %v6337_v46 = vld [vmem:[%s7696_s28 + $0x164] sm:$0xf] }
  0x6e   : > { %6452 = vmatpush.bf16.msra.mxu3 %v6369_v7  ;;  %1246 = vmatpush.bf16.msra.mxu1 %v6369_v7  ;;  %v5754_v47 = vld [vmem:[%s7696_s28 + $0x170] sm:$0xf0]  ;;  %v5753_v48 = vor.u32 %v6339_v45, %v5752_v44  ;;  %v5768_v52 = vld [vmem:[%s7696_s28 + $0x180] sm:$0xf]  ;;  %v6343_v53 = vld [vmem:[%s7696_s28 + $0x18c] sm:$0xf0] }
  0x6f   : > { %v5757_v49 = vor.u32 %v6337_v46, %v5754_v47  ;;  %v6375_v50 = vld [vmem:[#allocation7 + $0x90] sm:$0xff]  ;;  %v6341_v54 = vld [vmem:[%s7696_s28 + $0x184] sm:$0xf]  ;;  %v5769_v56 = vor.u32 %v6343_v53, %v5768_v52  ;;  %v6374_v58 = vld [vmem:[#allocation7 + $0x88] sm:$0xff] }
  0x70   : > { %v6383_v51 = vld [vmem:[#allocation7 + $0xd0] sm:$0xff]  ;;  %v6382_v59 = vld [vmem:[#allocation7 + $0xc8] sm:$0xff]  ;;  %v5784_v60 = vld [vmem:[%s7696_s28 + $0x1a0] sm:$0xf] }
  0x71   : > { %6445 = vmatpush.bf16.msra.mxu2 %v6360_v8  ;;  %1158 = vmatpush.bf16.msra.mxu0 %v6360_v8  ;;  %v5770_v55 = vld [vmem:[%s7696_s28 + $0x190] sm:$0xf0]  ;;  %v6347_v61 = vld [vmem:[%s7696_s28 + $0x1ac] sm:$0xf0]  ;;  %v6345_v62 = vld [vmem:[%s7696_s28 + $0x1a4] sm:$0xf] }
  0x72   : > { %6453 = vmatpush.bf16.msra.mxu3 %v6368_v9  ;;  %1247 = vmatpush.bf16.msra.mxu1 %v6368_v9  ;;  %v5773_v57 = vor.u32 %v6341_v54, %v5770_v55  ;;  %v5786_v63 = vld [vmem:[%s7696_s28 + $0x1b0] sm:$0xf0]  ;;  %v5785_v0 = vor.u32 %v6347_v61, %v5784_v60  ;;  %v6373_v2 = vld [vmem:[#allocation7 + $0x80] sm:$0xff]  ;;  %v6295_v5 = vld [vmem:[%s7696_s28 + $0xc] sm:$0xf0] }
  0x73   : > { %v5789_v1 = vor.u32 %v6345_v62, %v5786_v63  ;;  %v6381_v3 = vld [vmem:[#allocation7 + $0xc0] sm:$0xff]  ;;  %v5578_v7 = vld [vmem:[%s7696_s28 + $0x10] sm:$0xf0]  ;;  %v6299_v17 = vld [vmem:[%s7696_s28 + $0x2c] sm:$0xf0] }
  0x74   : > { %v5576_v4 = vld [vmem:[%s7696_s28] sm:$0xf]  ;;  %v6293_v6 = vld [vmem:[%s7696_s28 + $0x4] sm:$0xf]  ;;  %v6016_v28 = vld [vmem:[#allocation10 + $0x70] sm:$0xf] }
  0x75   : > { %6446 = vmatpush.bf16.msra.mxu2 %v6359_v10  ;;  %1159 = vmatpush.bf16.msra.mxu0 %v6359_v10  ;;  %v5577_v8 = vor.u32 %v6295_v5, %v5576_v4  ;;  %v5581_v9 = vor.u32 %v6293_v6, %v5578_v7  ;;  %v5800_v10 = vld [vmem:[%s7696_s28 + $0x1c0] sm:$0xf]  ;;  %v6404_v29 = vld [vmem:[#allocation10 + $0x74] sm:$0xf0]  ;;  %v6403_v30 = vld [vmem:[#allocation10 + $0x74] sm:$0xf] }
  0x76   : > { %6454 = vmatpush.bf16.msra.mxu3 %v6367_v11  ;;  %1248 = vmatpush.bf16.msra.mxu1 %v6367_v11  ;;  %v6351_v11 = vld [vmem:[%s7696_s28 + $0x1cc] sm:$0xf0]  ;;  %v5592_v16 = vld [vmem:[%s7696_s28 + $0x20] sm:$0xf]  ;;  %v6017_v31 = vor.u32 %v6404_v29, %v6016_v28  ;;  %v6296_v36 = vld [vmem:[%s7696_s28 + $0x14] sm:$0xf0] }
  0x77   : > { %v5593_v18 = vor.u32 %v6299_v17, %v5592_v16  ;;  %v5816_v19 = vld [vmem:[%s7696_s28 + $0x1e0] sm:$0xf]  ;;  %v6294_v37 = vld [vmem:[%s7696_s28 + $0xc] sm:$0xf]  ;;  %v6401_v53 = vld [vmem:[#allocation10 + $0x64] sm:$0xf] }
  0x78   : > { %v7775_v46 = vld [vmem:[#allocation8] ss:$0 sm:$0xff]  ;;  %v6402_v52 = vld [vmem:[#allocation10 + $0x64] sm:$0xf0]  ;;  %v6010_v55 = vld [vmem:[#allocation10 + $0x68] sm:$0xf0] }
  0x79   : > { %6447 = vmatpush.bf16.msra.mxu2 %v6358_v12  ;;  %1160 = vmatpush.bf16.msra.mxu0 %v6358_v12  ;;  %v6349_v12 = vld [vmem:[%s7696_s28 + $0x1c4] sm:$0xf]  ;;  %v6298_v60 = vld [vmem:[%s7696_s28 + $0x2c] sm:$0xf]  ;;  %v6013_v61 = vor.u32 %v6401_v53, %v6010_v55  ;;  %v5602_v63 = vld [vmem:[%s7696_s28 + $0x38] sm:$0xf0] }
  0x7a   : > { %6455 = vmatpush.bf16.msra.mxu3 %v6366_v13  ;;  %1249 = vmatpush.bf16.msra.mxu1 %v6366_v13  ;;  %v5802_v13 = vld [vmem:[%s7696_s28 + $0x1d0] sm:$0xf0]  ;;  %v5605_v7 = vor.u32 %v6298_v60, %v5602_v63  ;;  %v6002_v17 = vld [vmem:[#allocation10 + $0x58] sm:$0xf0] }
  0x7b   : > { %v5634_v53 = vld [vmem:[%s7696_s28 + $0x78] sm:$0xf0]  ;;  %v5658_v55 = vld [vmem:[%s7696_s28 + $0xb0] sm:$0xf0] }
  0x7d   : > { %6448 = vmatpush.bf16.msra.mxu2 %v6357_v14  ;;  %1161 = vmatpush.bf16.msra.mxu0 %v6357_v14  ;;  %v5801_v14 = vor.u32 %v6351_v11, %v5800_v10 }
  0x7e   : > { %6456 = vmatpush.bf16.msra.mxu3 %v6365_v15  ;;  %1250 = vmatpush.bf16.msra.mxu1 %v6365_v15  ;;  %v5805_v15 = vor.u32 %v6349_v12, %v5802_v13  ;;  %v6000_v13 = vld [vmem:[#allocation10 + $0x50] sm:$0xf] }
  0x80   : > { %1202 = vmatmul.bf16.vlgmr.msra.gmra.mxu2 %v5705_v22  ;;  %1162 = vmatmul.bf16.vlgmr.msra.gmra.mxu0 %v5577_v8  ;;  %v5818_v22 = vld [vmem:[%s7696_s28 + $0x1f0] sm:$0xf0] }
  0x81   : > { %1332 = vmatpush.bf16.msrb.mxu2 %v6380_v20  ;;  %1291 = vmatmul.bf16.vlgmr.msra.gmra.mxu3 %v5709_v23  ;;  %v6355_v20 = vld [vmem:[%s7696_s28 + $0x1ec] sm:$0xf0]  ;;  %v6297_v23 = vld [vmem:[%s7696_s28 + $0x24] sm:$0xf] }
  0x82   : > { %1421 = vmatpush.bf16.msrb.mxu3 %v6388_v21  ;;  %1251 = vmatmul.bf16.vlgmr.msra.gmra.mxu1 %v5581_v9  ;;  %v6353_v21 = vld [vmem:[%s7696_s28 + $0x1e4] sm:$0xf] }
  0x83   : > { %1660 = vmatpush.bf16.msrb.mxu0 %v6017_v31 }
  0x85   : > { %1333 = vmatpush.bf16.msrb.mxu2 %v6379_v24  ;;  %v5594_v24 = vld [vmem:[%s7696_s28 + $0x30] sm:$0xf0] }
  0x86   : > { %1422 = vmatpush.bf16.msrb.mxu3 %v6387_v25  ;;  %v5597_v25 = vor.u32 %v6297_v23, %v5594_v24 }
  0x89   : > { %1334 = vmatpush.bf16.msrb.mxu2 %v6378_v26  ;;  %v5817_v26 = vor.u32 %v6355_v20, %v5816_v19  ;;  %v6311_v19 = vld [vmem:[%s7696_s28 + $0x8c] sm:$0xf0]  ;;  %v5616_v20 = vld [vmem:[%s7696_s28 + $0x48] sm:$0xf] }
  0x8a   : > { %1423 = vmatpush.bf16.msrb.mxu3 %v6386_v27  ;;  %v5821_v27 = vor.u32 %v6353_v21, %v5818_v22  ;;  %v6304_v21 = vld [vmem:[%s7696_s28 + $0x54] sm:$0xf0]  ;;  %v6302_v22 = vld [vmem:[%s7696_s28 + $0x4c] sm:$0xf] }
  0x8d   : > { %1335 = vmatpush.bf16.msrb.mxu2 %v6377_v34  ;;  %v6303_v34 = vld [vmem:[%s7696_s28 + $0x4c] sm:$0xf0] }
  0x8e   : > { %1424 = vmatpush.bf16.msrb.mxu3 %v6385_v35  ;;  %v5584_v35 = vld [vmem:[%s7696_s28 + $0x8] sm:$0xf] }
  0x8f   : > { %v5585_v44 = vor.u32 %v6296_v36, %v5584_v35 }
  0x90   : > { %1207 = vmatmul.bf16.gmra.mxu2 %v5721_v32  ;;  %1167 = vmatmul.bf16.gmra.mxu0 %v5593_v18  ;;  %v6018_v32 = vld [vmem:[#allocation10 + $0x78] sm:$0xf0] }
  0x91   : > { %1296 = vmatmul.bf16.gmra.mxu3 %v5725_v33  ;;  %1336 = vmatpush.bf16.msrb.mxu2 %v6376_v42  ;;  %v5608_v33 = vld [vmem:[%s7696_s28 + $0x40] sm:$0xf]  ;;  %v6021_v38 = vor.u32 %v6403_v30, %v6018_v32  ;;  %v5610_v42 = vld [vmem:[%s7696_s28 + $0x50] sm:$0xf0]  ;;  %v5617_v32 = vor.u32 %v6304_v21, %v5616_v20 }
  0x92   : > { %1425 = vmatpush.bf16.msrb.mxu3 %v6384_v43  ;;  %1256 = vmatmul.bf16.gmra.mxu1 %v5597_v25  ;;  %v5609_v39 = vor.u32 %v6303_v34, %v5608_v33  ;;  %v5640_v18 = vld [vmem:[%s7696_s28 + $0x80] sm:$0xf]  ;;  %v5618_v25 = vld [vmem:[%s7696_s28 + $0x58] sm:$0xf0] }
  0x93   : > { %1749 = vmatpush.bf16.msrb.mxu1 %v6021_v38  ;;  %v5641_v24 = vor.u32 %v6311_v19, %v5640_v18  ;;  %v5621_v33 = vor.u32 %v6302_v22, %v5618_v25  ;;  %v6317_v18 = vld [vmem:[%s7696_s28 + $0xc4] sm:$0xf]  ;;  %v5674_v19 = vld [vmem:[%s7696_s28 + $0xd0] sm:$0xf0] }
  0x94   : > { %v5677_v20 = vor.u32 %v6317_v18, %v5674_v19 }
  0x95   : > { %1337 = vmatpush.bf16.msrb.mxu2 %v6375_v50 }
  0x96   : > { %1426 = vmatpush.bf16.msrb.mxu3 %v6383_v51  ;;  %v6008_v51 = vld [vmem:[#allocation10 + $0x60] sm:$0xf] }
  0x97   : > { %v6009_v54 = vor.u32 %v6402_v52, %v6008_v51  ;;  %1750 = vmatpush.bf16.msrb.mxu1 %v6013_v61 }
  0x99   : > { %1338 = vmatpush.bf16.msrb.mxu2 %v6374_v58  ;;  %v5600_v58 = vld [vmem:[%s7696_s28 + $0x28] sm:$0xf]  ;;  %1661 = vmatpush.bf16.msrb.mxu0 %v6009_v54  ;;  %v6313_v54 = vld [vmem:[%s7696_s28 + $0xa4] sm:$0xf] }
  0x9a   : > { %1427 = vmatpush.bf16.msrb.mxu3 %v6382_v59  ;;  %v6300_v59 = vld [vmem:[%s7696_s28 + $0x34] sm:$0xf0] }
  0x9b   : > { %v5601_v6 = vor.u32 %v6300_v59, %v5600_v58 }
  0x9d   : > { %1339 = vmatpush.bf16.msrb.mxu2 %v6373_v2 }
  0x9e   : > { %1428 = vmatpush.bf16.msrb.mxu3 %v6381_v3 }
  0xa0   : > { %1212 = vmatmul.bf16.gmra.mxu2 %v5737_v40  ;;  %v5586_v40 = vld [vmem:[%s7696_s28 + $0x18] sm:$0xf0]  ;;  %1172 = vmatmul.bf16.gmra.mxu0 %v5609_v39  ;;  %v5992_v39 = vld [vmem:[#allocation10 + $0x40] sm:$0xf] }
  0xa1   : > { %1301 = vmatmul.bf16.gmra.mxu3 %v5741_v41  ;;  %v6301_v41 = vld [vmem:[%s7696_s28 + $0x44] sm:$0xf]  ;;  %v5589_v45 = vor.u32 %v6294_v37, %v5586_v40  ;;  %v6398_v40 = vld [vmem:[#allocation10 + $0x44] sm:$0xf0] }
  0xa2   : > { %v5613_v43 = vor.u32 %v6301_v41, %v5610_v42  ;;  %v6397_v41 = vld [vmem:[#allocation10 + $0x44] sm:$0xf]  ;;  %v5993_v42 = vor.u32 %v6398_v40, %v5992_v39  ;;  %v6323_v39 = vld [vmem:[%s7696_s28 + $0xec] sm:$0xf0] }
  0xa3   : > { %v5664_v40 = vld [vmem:[%s7696_s28 + $0xa8] sm:$0xf] }
  0xa4   : > { %1261 = vmatmul.bf16.gmra.mxu1 %v5613_v43  ;;  %v5994_v43 = vld [vmem:[#allocation10 + $0x48] sm:$0xf0] }
  0xa5   : > { %v5997_v51 = vor.u32 %v6397_v41, %v5994_v43  ;;  %v6316_v41 = vld [vmem:[%s7696_s28 + $0xb4] sm:$0xf0] }
  0xb0   : > { %1217 = vmatmul.bf16.gmra.mxu2 %v5753_v48 }
  0xb1   : > { %1306 = vmatmul.bf16.gmra.mxu3 %v5757_v49 }
  0xc0   : > { %1222 = vmatmul.bf16.gmra.mxu2 %v5769_v56  ;;  %v5624_v56 = vld [vmem:[%s7696_s28 + $0x60] sm:$0xf] }
  0xc1   : > { %1311 = vmatmul.bf16.gmra.mxu3 %v5773_v57  ;;  %v6307_v57 = vld [vmem:[%s7696_s28 + $0x6c] sm:$0xf0] }
  0xc2   : > { %v5625_v62 = vor.u32 %v6307_v57, %v5624_v56  ;;  %v5661_v56 = vor.u32 %v6313_v54, %v5658_v55  ;;  %v5665_v54 = vor.u32 %v6316_v41, %v5664_v40 }
  0xc4   : > { %1177 = vmatmul.bf16.gmra.mxu0 %v5625_v62 }
  0xd0   : > { %1227 = vmatmul.bf16.gmra.mxu2 %v5785_v0  ;;  %v6305_v0 = vld [vmem:[%s7696_s28 + $0x64] sm:$0xf] }
  0xd1   : > { %1316 = vmatmul.bf16.gmra.mxu3 %v5789_v1  ;;  %v5626_v1 = vld [vmem:[%s7696_s28 + $0x70] sm:$0xf0] }
  0xd2   : > { %v5629_v2 = vor.u32 %v6305_v0, %v5626_v1 }
  0xd4   : > { %1266 = vmatmul.bf16.gmra.mxu1 %v5629_v2  ;;  %1182 = vmatmul.bf16.gmra.mxu0 %v5641_v24 }
  0xe0   : > { %1232 = vmatmul.bf16.gmra.mxu2 %v5801_v14  ;;  %v6400_v14 = vld [vmem:[#allocation10 + $0x54] sm:$0xf0] }
  0xe1   : > { %1321 = vmatmul.bf16.gmra.mxu3 %v5805_v15  ;;  %v6399_v15 = vld [vmem:[#allocation10 + $0x54] sm:$0xf]  ;;  %v6001_v16 = vor.u32 %v6400_v14, %v6000_v13  ;;  %v6310_v14 = vld [vmem:[%s7696_s28 + $0x8c] sm:$0xf] }
  0xe2   : > { %v6005_v23 = vor.u32 %v6399_v15, %v6002_v17  ;;  %v6312_v13 = vld [vmem:[%s7696_s28 + $0x94] sm:$0xf0]  ;;  %v5650_v17 = vld [vmem:[%s7696_s28 + $0x98] sm:$0xf0] }
  0xe3   : > { %1662 = vmatpush.bf16.msrb.mxu0 %v6001_v16  ;;  %v5653_v25 = vor.u32 %v6310_v14, %v5650_v17 }
  0xe4   : > { %1751 = vmatpush.bf16.msrb.mxu1 %v6005_v23 }
  0xe7   : > { %1663 = vmatpush.bf16.msrb.mxu0 %v5993_v42  ;;  %v6314_v42 = vld [vmem:[%s7696_s28 + $0xac] sm:$0xf] }
  0xe8   : > { %1752 = vmatpush.bf16.msrb.mxu1 %v5997_v51 }
  0xf0   : > { %1237 = vmatmul.bf16.gmra.mxu2 %v5817_v26  ;;  %v6309_v26 = vld [vmem:[%s7696_s28 + $0x84] sm:$0xf] }
  0xf1   : > { %1326 = vmatmul.bf16.gmra.mxu3 %v5821_v27  ;;  %v5642_v27 = vld [vmem:[%s7696_s28 + $0x90] sm:$0xf0] }
  0xf2   : > { %v5645_v28 = vor.u32 %v6309_v26, %v5642_v27 }
  0xf4   : > { %1271 = vmatmul.bf16.gmra.mxu1 %v5645_v28 }
  0xff   : > { %v7859_v18 = vpop.f32.mrf.mxu1 }
 0x100   : > { %1340 = vmatmul.bf16.vlgmr.msrb.gmra.mxu2 %v5585_v44  ;;  %v5656_v44 = vld [vmem:[%s7696_s28 + $0xa0] sm:$0xf] }
 0x101   : > { %1429 = vmatmul.bf16.vlgmr.msrb.gmra.mxu3 %v5589_v45  ;;  %v6315_v45 = vld [vmem:[%s7696_s28 + $0xac] sm:$0xf0] }
 0x102   : > { %v5657_v52 = vor.u32 %v6315_v45, %v5656_v44  ;;  %v5666_v45 = vld [vmem:[%s7696_s28 + $0xb8] sm:$0xf0] }
 0x103   : > { %v1203_v47 = vpop.f32.mrf.mxu2  ;;  %v5669_v55 = vor.u32 %v6314_v42, %v5666_v45 }
 0x104   : > { %v1292_v48 = vpop.f32.mrf.mxu3  ;;  %v1204_v49 = vadd.f32 %v7775_v46, %v1203_v47  ;;  %v5632_v47 = vld [vmem:[%s7696_s28 + $0x68] sm:$0xf]  ;;  %1187 = vmatmul.bf16.gmra.mxu0 %v5657_v52  ;;  %1276 = vmatmul.bf16.gmra.mxu1 %v5661_v56 }
 0x106   : > { %v7778_v50 = vadd.f32 %v1292_v48, %v1204_v49  ;;  %v6308_v48 = vld [vmem:[%s7696_s28 + $0x74] sm:$0xf0]  ;;  %v6306_v49 = vld [vmem:[%s7696_s28 + $0x6c] sm:$0xf] }
 0x107   : > { %v5633_v60 = vor.u32 %v6308_v48, %v5632_v47  ;;  %v5637_v61 = vor.u32 %v6306_v49, %v5634_v53  ;;  %v6321_v47 = vld [vmem:[%s7696_s28 + $0xe4] sm:$0xf]  ;;  %v5690_v48 = vld [vmem:[%s7696_s28 + $0xf0] sm:$0xf0] }
 0x108   : > { %v5693_v49 = vor.u32 %v6321_v47, %v5690_v48  ;;  %v6136_v47 = vld [vmem:[#allocation11 + $0xe0] sm:$0xf]  ;;  %v6435_v48 = vld [vmem:[#allocation11 + $0xec] sm:$0xf0] }
 0x10b   : > { %v1205_v3 = vpop.f32.mrf.mxu2 }
 0x10c   : > { %v1294_v4 = vpop.f32.mrf.mxu3  ;;  %v1206_v5 = vadd.f32 %v7775_v46, %v1205_v3  ;;  %v5984_v3 = vld [vmem:[#allocation10 + $0x30] sm:$0xf] }
 0x10e   : > { %v7789_v8 = vadd.f32 %v1294_v4, %v1206_v5  ;;  %v6396_v4 = vld [vmem:[#allocation10 + $0x34] sm:$0xf0]  ;;  %v6395_v5 = vld [vmem:[#allocation10 + $0x34] sm:$0xf] }
 0x110   : > { %1345 = vmatmul.bf16.gmra.mxu2 %v5601_v6  ;;  %v5985_v6 = vor.u32 %v6396_v4, %v5984_v3  ;;  %v5970_v3 = vld [vmem:[#allocation10 + $0x18] sm:$0xf0]  ;;  %v5680_v4 = vld [vmem:[%s7696_s28 + $0xc8] sm:$0xf] }
 0x111   : > { %1434 = vmatmul.bf16.gmra.mxu3 %v5605_v7  ;;  %v5986_v7 = vld [vmem:[#allocation10 + $0x38] sm:$0xf0] }
 0x112   : > { %v5989_v15 = vor.u32 %v6395_v5, %v5986_v7  ;;  %1664 = vmatpush.bf16.msrb.mxu0 %v5985_v6  ;;  %v6320_v6 = vld [vmem:[%s7696_s28 + $0xd4] sm:$0xf0]  ;;  %v6318_v7 = vld [vmem:[%s7696_s28 + $0xcc] sm:$0xf] }
 0x113   : > { %v1208_v9 = vpop.f32.mrf.mxu2  ;;  %v5681_v14 = vor.u32 %v6320_v6, %v5680_v4  ;;  %v6326_v4 = vld [vmem:[%s7696_s28 + $0x10c] sm:$0xf] }
 0x114   : > { %v1297_v10 = vpop.f32.mrf.mxu3  ;;  %v1209_v11 = vadd.f32 %v7775_v46, %v1208_v9  ;;  %v5672_v9 = vld [vmem:[%s7696_s28 + $0xc0] sm:$0xf]  ;;  %1753 = vmatpush.bf16.msrb.mxu1 %v5989_v15 }
 0x115   : > { %1281 = vmatmul.bf16.gmra.mxu1 %v5677_v20 }
 0x116   : > { %v7792_v12 = vadd.f32 %v1297_v10, %v1209_v11  ;;  %v6319_v10 = vld [vmem:[%s7696_s28 + $0xcc] sm:$0xf0]  ;;  %v5648_v11 = vld [vmem:[%s7696_s28 + $0x88] sm:$0xf] }
 0x117   : > { %v5673_v16 = vor.u32 %v6319_v10, %v5672_v9  ;;  %v5649_v24 = vor.u32 %v6312_v13, %v5648_v11  ;;  %v5682_v9 = vld [vmem:[%s7696_s28 + $0xd8] sm:$0xf0] }
 0x118   : > { %v5685_v15 = vor.u32 %v6318_v7, %v5682_v9  ;;  %v6146_v7 = vld [vmem:[#allocation11 + $0xf8] sm:$0xf0] }
 0x119   : > { %1192 = vmatmul.bf16.gmra.mxu0 %v5673_v16  ;;  %v7855_v16 = vpop.f32.mrf.mxu0 }
 0x11b   : > { %v1210_v29 = vpop.f32.mrf.mxu2 }
 0x11c   : > { %v1299_v30 = vpop.f32.mrf.mxu3  ;;  %v1211_v31 = vadd.f32 %v7775_v46, %v1210_v29 }
 0x11e   : > { %v7803_v34 = vadd.f32 %v1299_v30, %v1211_v31  ;;  %v5976_v31 = vld [vmem:[#allocation10 + $0x20] sm:$0xf] }
 0x120   : > { %1350 = vmatmul.bf16.gmra.mxu2 %v5617_v32  ;;  %v6394_v32 = vld [vmem:[#allocation10 + $0x24] sm:$0xf0] }
 0x121   : > { %1439 = vmatmul.bf16.gmra.mxu3 %v5621_v33  ;;  %v6393_v33 = vld [vmem:[#allocation10 + $0x24] sm:$0xf] }
 0x123   : > { %v1213_v35 = vpop.f32.mrf.mxu2 }
 0x124   : > { %v1302_v36 = vpop.f32.mrf.mxu3  ;;  %v1214_v37 = vadd.f32 %v7775_v46, %v1213_v35  ;;  %v5977_v35 = vor.u32 %v6394_v32, %v5976_v31  ;;  %v6322_v31 = vld [vmem:[%s7696_s28 + $0xec] sm:$0xf]  ;;  %v5698_v32 = vld [vmem:[%s7696_s28 + $0xf8] sm:$0xf0] }
 0x125   : > { %1286 = vmatmul.bf16.gmra.mxu1 %v5693_v49  ;;  %v6433_v49 = vld [vmem:[#allocation11 + $0xe4] sm:$0xf] }
 0x126   : > { %v7806_v38 = vadd.f32 %v1302_v36, %v1214_v37  ;;  %v5978_v36 = vld [vmem:[#allocation10 + $0x28] sm:$0xf0]  ;;  %v5688_v37 = vld [vmem:[%s7696_s28 + $0xe0] sm:$0xf]  ;;  %1665 = vmatpush.bf16.msrb.mxu0 %v5977_v35 }
 0x127   : > { %v5981_v43 = vor.u32 %v6393_v33, %v5978_v36  ;;  %v5689_v44 = vor.u32 %v6323_v39, %v5688_v37  ;;  %v5962_v35 = vld [vmem:[#allocation10 + $0x8] sm:$0xf0]  ;;  %v1254_v36 = vpop.f32.mrf.mxu1 }
 0x129   : > { %1754 = vmatpush.bf16.msrb.mxu1 %v5981_v43  ;;  %1197 = vmatmul.bf16.gmra.mxu0 %v5689_v44  ;;  %v5701_v43 = vor.u32 %v6322_v31, %v5698_v32 }
 0x12b   : > { %v1215_v57 = vpop.f32.mrf.mxu2 }
 0x12c   : > { %v1304_v58 = vpop.f32.mrf.mxu3  ;;  %v1216_v59 = vadd.f32 %v7775_v46, %v1215_v57 }
 0x12e   : > { %v7817_v62 = vadd.f32 %v1304_v58, %v1216_v59 }
 0x130   : > { %1355 = vmatmul.bf16.gmra.mxu2 %v5633_v60 }
 0x131   : > { %1444 = vmatmul.bf16.gmra.mxu3 %v5637_v61  ;;  %v5968_v61 = vld [vmem:[#allocation10 + $0x10] sm:$0xf] }
 0x133   : > { %v1218_v63 = vpop.f32.mrf.mxu2 }
 0x134   : > { %v1307_v0 = vpop.f32.mrf.mxu3  ;;  %v1219_v1 = vadd.f32 %v7775_v46, %v1218_v63  ;;  %v6392_v63 = vld [vmem:[#allocation10 + $0x14] sm:$0xf0] }
 0x136   : > { %v7820_v2 = vadd.f32 %v1307_v0, %v1219_v1  ;;  %v6391_v0 = vld [vmem:[#allocation10 + $0x14] sm:$0xf]  ;;  %v5969_v1 = vor.u32 %v6392_v63, %v5968_v61  ;;  %v5712_v61 = vld [vmem:[%s7696_s28 + $0x108] sm:$0xf] }
 0x137   : > { %v5973_v5 = vor.u32 %v6391_v0, %v5970_v3  ;;  %v6328_v63 = vld [vmem:[%s7696_s28 + $0x114] sm:$0xf0]  ;;  %v6144_v0 = vld [vmem:[#allocation11 + $0xe8] sm:$0xf]  ;;  %v6434_v3 = vld [vmem:[#allocation11 + $0xec] sm:$0xf] }
 0x138   : > { %1666 = vmatpush.bf16.msrb.mxu0 %v5969_v1  ;;  %v6436_v1 = vld [vmem:[#allocation11 + $0xf4] sm:$0xf0] }
 0x139   : > { %1755 = vmatpush.bf16.msrb.mxu1 %v5973_v5  ;;  %v5714_v5 = vld [vmem:[%s7696_s28 + $0x118] sm:$0xf0]  ;;  %v6145_v6 = vor.u32 %v6436_v1, %v6144_v0 }
 0x13b   : > { %v1220_v21 = vpop.f32.mrf.mxu2 }
 0x13c   : > { %v1309_v22 = vpop.f32.mrf.mxu3  ;;  %v1221_v23 = vadd.f32 %v7775_v46, %v1220_v21 }
 0x13e   : > { %v7831_v26 = vadd.f32 %v1309_v22, %v1221_v23  ;;  %v7864_v23 = vpop.f32.mrf.mxu0 }
 0x13f   : > { %v1166_v31 = vadd.f32 %v7775_v46, %v7864_v23 }
 0x140   : > { %1360 = vmatmul.bf16.gmra.mxu2 %v5649_v24  ;;  %v5696_v24 = vld [vmem:[%s7696_s28 + $0xe8] sm:$0xf] }
 0x141   : > { %1449 = vmatmul.bf16.gmra.mxu3 %v5653_v25  ;;  %v6324_v25 = vld [vmem:[%s7696_s28 + $0xf4] sm:$0xf0] }
 0x142   : > { %v5697_v42 = vor.u32 %v6324_v25, %v5696_v24  ;;  %v1164_v24 = vadd.f32 %v7775_v46, %v7855_v16 }
 0x143   : > { %v1223_v27 = vpop.f32.mrf.mxu2 }
 0x144   : > { %v1312_v28 = vpop.f32.mrf.mxu3  ;;  %v1224_v29 = vadd.f32 %v7775_v46, %v1223_v27  ;;  %v5960_v27 = vld [vmem:[#allocation10] sm:$0xf] }
 0x146   : > { %v7834_v30 = vadd.f32 %v1312_v28, %v1224_v29  ;;  %v6390_v28 = vld [vmem:[#allocation10 + $0x4] sm:$0xf0]  ;;  %v6389_v29 = vld [vmem:[#allocation10 + $0x4] sm:$0xf]  ;;  %v1168_v45 = vpop.f32.mrf.mxu0 }
 0x147   : > { %v5961_v33 = vor.u32 %v6390_v28, %v5960_v27  ;;  %v5965_v37 = vor.u32 %v6389_v29, %v5962_v35  ;;  %v1253_v28 = vadd.f32 %v7859_v18, %v1164_v24 }
 0x149   : > { %1667 = vmatpush.bf16.msrb.mxu0 %v5961_v33  ;;  %1756 = vmatpush.bf16.msrb.mxu1 %v5965_v37  ;;  %v5728_v33 = vld [vmem:[%s7696_s28 + $0x128] sm:$0xf]  ;;  %v6332_v37 = vld [vmem:[%s7696_s28 + $0x134] sm:$0xf0] }
 0x14b   : > { %v1225_v51 = vpop.f32.mrf.mxu2 }
 0x14c   : > { %v1314_v52 = vpop.f32.mrf.mxu3  ;;  %v1226_v53 = vadd.f32 %v7775_v46, %v1225_v51  ;;  %v6137_v51 = vor.u32 %v6435_v48, %v6136_v47  ;;  %v5729_v48 = vor.u32 %v6332_v37, %v5728_v33 }
 0x14d   : > { %2490 = vmatpush.bf16.msra.mxu0 %v6145_v6  ;;  %v5744_v6 = vld [vmem:[%s7696_s28 + $0x148] sm:$0xf] }
 0x14e   : > { %v7845_v56 = vadd.f32 %v1314_v52, %v1226_v53  ;;  %v6138_v52 = vld [vmem:[#allocation11 + $0xf0] sm:$0xf0]  ;;  %2312 = vmatpush.bf16.msra.mxu2 %v6137_v51  ;;  %v1170_v9 = vpop.f32.mrf.mxu0 }
 0x14f   : > { %v6141_v53 = vor.u32 %v6433_v49, %v6138_v52 }
 0x150   : > { %1365 = vmatmul.bf16.gmra.mxu2 %v5665_v54 }
 0x151   : > { %1454 = vmatmul.bf16.gmra.mxu3 %v5669_v55 }
 0x152   : > { %2401 = vmatpush.bf16.msra.mxu3 %v6141_v53  ;;  %v1169_v53 = vadd.f32 %v7775_v46, %v1168_v45  ;;  %v1171_v45 = vadd.f32 %v7775_v46, %v1170_v9 }
 0x153   : > { %v1228_v57 = vpop.f32.mrf.mxu2 }
 0x154   : > { %v1317_v58 = vpop.f32.mrf.mxu3  ;;  %v1229_v59 = vadd.f32 %v7775_v46, %v1228_v57 }
 0x156   : > { %v7848_v60 = vadd.f32 %v1317_v58, %v1229_v59  ;;  %v1257_v58 = vpop.f32.mrf.mxu1  ;;  %v1173_v29 = vpop.f32.mrf.mxu0 }
 0x15b   : > { %v1230_v10 = vpop.f32.mrf.mxu2 }
 0x15c   : > { %v1319_v11 = vpop.f32.mrf.mxu3  ;;  %v1231_v13 = vadd.f32 %v7775_v46, %v1230_v10  ;;  %v6149_v10 = vor.u32 %v6434_v3, %v6146_v7  ;;  %v6336_v7 = vld [vmem:[%s7696_s28 + $0x154] sm:$0xf0] }
 0x15e   : > { %v7857_v17 = vadd.f32 %v1319_v11, %v1231_v13  ;;  %2579 = vmatpush.bf16.msra.mxu1 %v6149_v10  ;;  %v1175_v18 = vpop.f32.mrf.mxu0 }
 0x160   : > { %1370 = vmatmul.bf16.gmra.mxu2 %v5681_v14 }
 0x161   : > { %1459 = vmatmul.bf16.gmra.mxu3 %v5685_v15  ;;  %v5713_v15 = vor.u32 %v6328_v63, %v5712_v61  ;;  %v6122_v61 = vld [vmem:[#allocation11 + $0xd0] sm:$0xf0] }
 0x163   : > { %v1233_v19 = vpop.f32.mrf.mxu2 }
 0x164   : > { %v1322_v20 = vpop.f32.mrf.mxu3  ;;  %v1234_v21 = vadd.f32 %v7775_v46, %v1233_v19  ;;  %v5717_v19 = vor.u32 %v6326_v4, %v5714_v5  ;;  %v1258_v5 = vadd.f32 %v1257_v58, %v1169_v53 }
 0x166   : > { %v7862_v22 = vadd.f32 %v1322_v20, %v1234_v21  ;;  %v1259_v21 = vpop.f32.mrf.mxu1 }
 0x16b   : > { %v1235_v39 = vpop.f32.mrf.mxu2 }
 0x16c   : > { %v1324_v40 = vpop.f32.mrf.mxu3  ;;  %v1236_v41 = vadd.f32 %v7775_v46, %v1235_v39  ;;  %v6330_v39 = vld [vmem:[%s7696_s28 + $0x12c] sm:$0xf] }
 0x16e   : > { %v7871_v44 = vadd.f32 %v1324_v40, %v1236_v41  ;;  %v7889_v35 = vpop.f32.mrf.mxu1  ;;  %v5730_v40 = vld [vmem:[%s7696_s28 + $0x138] sm:$0xf0]  ;;  %v1255_v41 = vadd.f32 %v1254_v36, %v1166_v31  ;;  %v6429_v36 = vld [vmem:[#allocation11 + $0xc4] sm:$0xf] }
 0x16f   : > { %v5733_v49 = vor.u32 %v6330_v39, %v5730_v40  ;;  %v6125_v1 = vor.u32 %v6429_v36, %v6122_v61  ;;  %v5745_v39 = vor.u32 %v6336_v7, %v5744_v6 }
 0x170   : > { %1375 = vmatmul.bf16.gmra.mxu2 %v5697_v42 }
 0x171   : > { %1464 = vmatmul.bf16.gmra.mxu3 %v5701_v43 }
 0x172   : > { %2402 = vmatpush.bf16.msra.mxu3 %v6125_v1 }
 0x173   : > { %v1238_v54 = vpop.f32.mrf.mxu2 }
 0x174   : > { %v1327_v55 = vpop.f32.mrf.mxu3  ;;  %v1239_v57 = vadd.f32 %v7775_v46, %v1238_v54  ;;  %v6120_v54 = vld [vmem:[#allocation11 + $0xc0] sm:$0xf] }
 0x176   : > { %v7874_v59 = vadd.f32 %v1327_v55, %v1239_v57  ;;  %v6431_v55 = vld [vmem:[#allocation11 + $0xcc] sm:$0xf0]  ;;  %v1264_v0 = vpop.f32.mrf.mxu1 }
 0x177   : > { %v6121_v57 = vor.u32 %v6431_v55, %v6120_v54  ;;  %v5760_v54 = vld [vmem:[%s7696_s28 + $0x168] sm:$0xf]  ;;  %v6340_v55 = vld [vmem:[%s7696_s28 + $0x174] sm:$0xf0] }
 0x179   : > { %2313 = vmatpush.bf16.msra.mxu2 %v6121_v57  ;;  %v5762_v57 = vld [vmem:[%s7696_s28 + $0x178] sm:$0xf0] }
 0x17b   : > { %v1240_v11 = vpop.f32.mrf.mxu2 }
 0x17c   : > { %v1329_v13 = vpop.f32.mrf.mxu3  ;;  %v1241_v14 = vadd.f32 %v7775_v46, %v1240_v11  ;;  %v6334_v11 = vld [vmem:[%s7696_s28 + $0x14c] sm:$0xf] }
 0x17e   : > { %v7881_v20 = vadd.f32 %v1329_v13, %v1241_v14  ;;  %v1178_v13 = vpop.f32.mrf.mxu0  ;;  %v6128_v14 = vld [vmem:[#allocation11 + $0xc8] sm:$0xf]  ;;  %v1267_v40 = vpop.f32.mrf.mxu1 }
 0x17f   : > { %v1179_v7 = vadd.f32 %v7775_v46, %v1178_v13 }
 0x180   : > { %1380 = vmatmul.bf16.gmra.mxu2 %v5713_v15  ;;  %v6432_v15 = vld [vmem:[#allocation11 + $0xd4] sm:$0xf0] }
 0x181   : > { %1469 = vmatmul.bf16.gmra.mxu3 %v5717_v19  ;;  %v5746_v19 = vld [vmem:[%s7696_s28 + $0x158] sm:$0xf0]  ;;  %v6129_v24 = vor.u32 %v6432_v15, %v6128_v14  ;;  %v6427_v14 = vld [vmem:[#allocation11 + $0xac] sm:$0xf0]  ;;  %v6425_v15 = vld [vmem:[#allocation11 + $0xa4] sm:$0xf] }
 0x182   : > { %v5749_v9 = vor.u32 %v6334_v11, %v5746_v19  ;;  %v6104_v11 = vld [vmem:[#allocation11 + $0xa0] sm:$0xf]  ;;  %v6106_v19 = vld [vmem:[#allocation11 + $0xb0] sm:$0xf0] }
 0x183   : > { %v1341_v25 = vpop.f32.mrf.mxu2  ;;  %2491 = vmatpush.bf16.msra.mxu0 %v6129_v24 }
 0x184   : > { %v1430_v27 = vpop.f32.mrf.mxu3  ;;  %v1342_v32 = vadd.f32 %v1341_v25, %v1253_v28  ;;  %v6430_v25 = vld [vmem:[#allocation11 + $0xcc] sm:$0xf]  ;;  %v1260_v28 = vadd.f32 %v1259_v21, %v1171_v45 }
 0x186   : > { %v1431_v43 = vadd.f32 %v1430_v27, %v1342_v32  ;;  %v6130_v27 = vld [vmem:[#allocation11 + $0xd8] sm:$0xf0]  ;;  %v1269_v53 = vpop.f32.mrf.mxu1 }
 0x187   : > { %v6133_v31 = vor.u32 %v6430_v25, %v6130_v27  ;;  %v6109_v25 = vor.u32 %v6425_v15, %v6106_v19 }
 0x188   : > { %v1510_v52 = vmax.f32 %v1431_v43, 0.0 }
 0x189   : > { %2580 = vmatpush.bf16.msra.mxu1 %v6133_v31  ;;  %v1268_v31 = vadd.f32 %v1267_v40, %v1179_v7  ;;  %2403 = vmatpush.bf16.msra.mxu3 %v6109_v25  ;;  %v5792_v7 = vld [vmem:[%s7696_s28 + $0x1a8] sm:$0xf] }
 0x18b   : > { %v1343_v42 = vpop.f32.mrf.mxu2 }
 0x18c   : > { %v1432_v16 = vpop.f32.mrf.mxu3  ;;  %v1344_v47 = vadd.f32 %v1343_v42, %v1255_v41 }
 0x18e   : > { %v1433_v51 = vadd.f32 %v1432_v16, %v1344_v47  ;;  %v1174_v16 = vadd.f32 %v7775_v46, %v1173_v29  ;;  %v1180_v47 = vpop.f32.mrf.mxu0  ;;  %v6338_v29 = vld [vmem:[%s7696_s28 + $0x16c] sm:$0xf] }
 0x18f   : > { %v1181_v13 = vadd.f32 %v7775_v46, %v1180_v47 }
 0x190   : > { %v1511_v23 = vmax.f32 %v1433_v51, 0.0  ;;  %1385 = vmatmul.bf16.gmra.mxu2 %v5729_v48  ;;  %v1263_v51 = vadd.f32 %v7889_v35, %v1174_v16 }
 0x191   : > { %1474 = vmatmul.bf16.gmra.mxu3 %v5733_v49 }
 0x192   : > { %v1542_v63 = vpack.c.bf16 %v1511_v23, %v1510_v52  ;;  %v1176_v52 = vadd.f32 %v7775_v46, %v1175_v18  ;;  %v1272_v18 = vpop.f32.mrf.mxu1 }
 0x193   : > { %v1346_v3 = vpop.f32.mrf.mxu2 }
 0x194   : > { %v1435_v4 = vpop.f32.mrf.mxu3  ;;  %1668 = vmatmul.bf16.vlgmr.msrb.gmra.mxu0 %v1542_v63  ;;  %1757 = vmatmul.bf16.vlgmr.msrb.gmra.mxu1 %v1542_v63  ;;  %v1347_v10 = vadd.f32 %v1346_v3, %v1258_v5  ;;  %v1265_v36 = vadd.f32 %v1264_v0, %v1176_v52  ;;  %v5765_v5 = vor.u32 %v6338_v29, %v5762_v57 }
 0x195   : > { %v6105_v0 = vor.u32 %v6427_v14, %v6104_v11  ;;  %v6346_v11 = vld [vmem:[%s7696_s28 + $0x1ac] sm:$0xf] }
 0x196   : > { %v1436_v33 = vadd.f32 %v1435_v4, %v1347_v10  ;;  %v5761_v4 = vor.u32 %v6340_v55, %v5760_v54  ;;  %v1183_v45 = vpop.f32.mrf.mxu0 }
 0x197   : > { %2314 = vmatpush.bf16.msra.mxu2 %v6105_v0 }
 0x198   : > { %v1512_v42 = vmax.f32 %v1436_v33, 0.0  ;;  %v6344_v33 = vld [vmem:[%s7696_s28 + $0x194] sm:$0xf0] }
 0x19b   : > { %v1348_v32 = vpop.f32.mrf.mxu2 }
 0x19c   : > { %v1437_v58 = vpop.f32.mrf.mxu3  ;;  %v1349_v37 = vadd.f32 %v1348_v32, %v1260_v28 }
 0x19e   : > { %v1438_v41 = vadd.f32 %v1437_v58, %v1349_v37  ;;  %v1185_v32 = vpop.f32.mrf.mxu0  ;;  %v5776_v58 = vld [vmem:[%s7696_s28 + $0x188] sm:$0xf] }
 0x19f   : > { %v5777_v47 = vor.u32 %v6344_v33, %v5776_v58 }
 0x1a0   : > { %v1513_v43 = vmax.f32 %v1438_v41, 0.0  ;;  %1390 = vmatmul.bf16.gmra.mxu2 %v5745_v39  ;;  %v6342_v39 = vld [vmem:[%s7696_s28 + $0x18c] sm:$0xf]  ;;  %v6428_v41 = vld [vmem:[#allocation11 + $0xb4] sm:$0xf0] }
 0x1a1   : > { %1479 = vmatmul.bf16.gmra.mxu3 %v5749_v9  ;;  %v6112_v9 = vld [vmem:[#allocation11 + $0xa8] sm:$0xf] }
 0x1a2   : > { %v1543_v21 = vpack.c.bf16 %v1513_v43, %v1512_v42  ;;  %v5778_v42 = vld [vmem:[%s7696_s28 + $0x198] sm:$0xf0]  ;;  %v6113_v16 = vor.u32 %v6428_v41, %v6112_v9  ;;  %v6426_v43 = vld [vmem:[#allocation11 + $0xac] sm:$0xf]  ;;  %v6421_v9 = vld [vmem:[#allocation11 + $0x84] sm:$0xf] }
 0x1a3   : > { %v1351_v48 = vpop.f32.mrf.mxu2  ;;  %v5781_v55 = vor.u32 %v6342_v39, %v5778_v42  ;;  %v6090_v41 = vld [vmem:[#allocation11 + $0x90] sm:$0xf0] }
 0x1a4   : > { %v1440_v49 = vpop.f32.mrf.mxu3  ;;  %1673 = vmatmul.bf16.gmra.mxu0 %v1543_v21  ;;  %1762 = vmatmul.bf16.gmra.mxu1 %v1543_v21  ;;  %v1352_v23 = vadd.f32 %v1351_v48, %v1263_v51  ;;  %v6114_v21 = vld [vmem:[#allocation11 + $0xb8] sm:$0xf0]  ;;  %v1270_v48 = vadd.f32 %v1269_v53, %v1181_v13 }
 0x1a5   : > { %v6117_v51 = vor.u32 %v6426_v43, %v6114_v21  ;;  %2492 = vmatpush.bf16.msra.mxu0 %v6113_v16  ;;  %v6093_v16 = vor.u32 %v6421_v9, %v6090_v41 }
 0x1a6   : > { %v1441_v1 = vadd.f32 %v1440_v49, %v1352_v23  ;;  %v1274_v49 = vpop.f32.mrf.mxu1  ;;  %v1188_v53 = vpop.f32.mrf.mxu0 }
 0x1a7   : > { %2581 = vmatpush.bf16.msra.mxu1 %v6117_v51  ;;  %v1189_v58 = vadd.f32 %v7775_v46, %v1188_v53  ;;  %2404 = vmatpush.bf16.msra.mxu3 %v6093_v16  ;;  %v6098_v53 = vld [vmem:[#allocation11 + $0x98] sm:$0xf0] }
 0x1a8   : > { %v1514_v35 = vmax.f32 %v1441_v1, 0.0 }
 0x1ab   : > { %v1353_v61 = vpop.f32.mrf.mxu2 }
 0x1ac   : > { %v1442_v63 = vpop.f32.mrf.mxu3  ;;  %v1354_v3 = vadd.f32 %v1353_v61, %v1265_v36  ;;  %v1184_v36 = vadd.f32 %v7775_v46, %v1183_v45  ;;  %v5794_v45 = vld [vmem:[%s7696_s28 + $0x1b8] sm:$0xf0] }
 0x1ae   : > { %v1443_v6 = vadd.f32 %v1442_v63, %v1354_v3  ;;  %v1190_v0 = vpop.f32.mrf.mxu0 }
 0x1af   : > { %v1191_v51 = vadd.f32 %v7775_v46, %v1190_v0 }
 0x1b0   : > { %v1515_v10 = vmax.f32 %v1443_v6, 0.0  ;;  %1395 = vmatmul.bf16.gmra.mxu2 %v5761_v4  ;;  %v1273_v4 = vadd.f32 %v1272_v18, %v1184_v36  ;;  %v1186_v6 = vadd.f32 %v7775_v46, %v1185_v32  ;;  %v6088_v32 = vld [vmem:[#allocation11 + $0x80] sm:$0xf] }
 0x1b1   : > { %1484 = vmatmul.bf16.gmra.mxu3 %v5765_v5  ;;  %v1277_v5 = vpop.f32.mrf.mxu1 }
 0x1b2   : > { %v1544_v24 = vpack.c.bf16 %v1515_v10, %v1514_v35  ;;  %v6348_v10 = vld [vmem:[%s7696_s28 + $0x1b4] sm:$0xf0]  ;;  %v1275_v14 = vadd.f32 %v1274_v49, %v1186_v6 }
 0x1b3   : > { %v1356_v27 = vpop.f32.mrf.mxu2 }
 0x1b4   : > { %v1445_v28 = vpop.f32.mrf.mxu3  ;;  %1678 = vmatmul.bf16.gmra.mxu0 %v1544_v24  ;;  %1767 = vmatmul.bf16.gmra.mxu1 %v1544_v24  ;;  %v1357_v37 = vadd.f32 %v1356_v27, %v1268_v31  ;;  %v5793_v27 = vor.u32 %v6348_v10, %v5792_v7 }
 0x1b6   : > { %v1446_v23 = vadd.f32 %v1445_v28, %v1357_v37  ;;  %v5797_v28 = vor.u32 %v6346_v11, %v5794_v45  ;;  %v6423_v37 = vld [vmem:[#allocation11 + $0x8c] sm:$0xf0]  ;;  %v1193_v49 = vpop.f32.mrf.mxu0 }
 0x1b7   : > { %v6089_v39 = vor.u32 %v6423_v37, %v6088_v32  ;;  %v5826_v32 = vld [vmem:[%s7696_s28 + $0x1f8] sm:$0xf0] }
 0x1b8   : > { %v1516_v57 = vmax.f32 %v1446_v23, 0.0 }
 0x1b9   : > { %v1279_v18 = vpop.f32.mrf.mxu1  ;;  %2315 = vmatpush.bf16.msra.mxu2 %v6089_v39 }
 0x1bb   : > { %v1358_v40 = vpop.f32.mrf.mxu2 }
 0x1bc   : > { %v1447_v52 = vpop.f32.mrf.mxu3  ;;  %v1359_v54 = vadd.f32 %v1358_v40, %v1270_v48  ;;  %v1278_v48 = vadd.f32 %v1277_v5, %v1189_v58  ;;  %v5808_v40 = vld [vmem:[%s7696_s28 + $0x1c8] sm:$0xf]  ;;  %v6356_v58 = vld [vmem:[%s7696_s28 + $0x1f4] sm:$0xf0] }
 0x1be   : > { %v1448_v29 = vadd.f32 %v1447_v52, %v1359_v54  ;;  %v6352_v52 = vld [vmem:[%s7696_s28 + $0x1d4] sm:$0xf0]  ;;  %v1195_v11 = vpop.f32.mrf.mxu0 }
 0x1c0   : > { %v1517_v61 = vmax.f32 %v1448_v29, 0.0  ;;  %1400 = vmatmul.bf16.gmra.mxu2 %v5777_v47  ;;  %v6350_v47 = vld [vmem:[%s7696_s28 + $0x1cc] sm:$0xf]  ;;  %v6424_v29 = vld [vmem:[#allocation11 + $0x94] sm:$0xf0] }
 0x1c1   : > { %1489 = vmatmul.bf16.gmra.mxu3 %v5781_v55  ;;  %v1282_v54 = vpop.f32.mrf.mxu1  ;;  %v6096_v55 = vld [vmem:[#allocation11 + $0x88] sm:$0xf] }
 0x1c2   : > { %v1545_v63 = vpack.c.bf16 %v1517_v61, %v1516_v57  ;;  %v5810_v57 = vld [vmem:[%s7696_s28 + $0x1d8] sm:$0xf0]  ;;  %v6097_v36 = vor.u32 %v6424_v29, %v6096_v55  ;;  %v6422_v61 = vld [vmem:[#allocation11 + $0x8c] sm:$0xf]  ;;  %v6074_v55 = vld [vmem:[#allocation11 + $0x70] sm:$0xf0] }
 0x1c3   : > { %v1361_v1 = vpop.f32.mrf.mxu2  ;;  %v5813_v7 = vor.u32 %v6350_v47, %v5810_v57  ;;  %v6417_v47 = vld [vmem:[#allocation11 + $0x64] sm:$0xf] }
 0x1c4   : > { %v1450_v3 = vpop.f32.mrf.mxu3  ;;  %1683 = vmatmul.bf16.gmra.mxu0 %v1545_v63  ;;  %1772 = vmatmul.bf16.gmra.mxu1 %v1545_v63  ;;  %v1362_v35 = vadd.f32 %v1361_v1, %v1273_v4  ;;  %v1280_v63 = vadd.f32 %v1279_v18, %v1191_v51  ;;  %v6101_v1 = vor.u32 %v6422_v61, %v6098_v53 }
 0x1c5   : > { %2493 = vmatpush.bf16.msra.mxu0 %v6097_v36  ;;  %v6077_v36 = vor.u32 %v6417_v47, %v6074_v55  ;;  %v6026_v55 = vld [vmem:[#allocation11 + $0x10] sm:$0xf0] }
 0x1c6   : > { %v1451_v24 = vadd.f32 %v1450_v3, %v1362_v35  ;;  %v5809_v35 = vor.u32 %v6352_v52, %v5808_v40  ;;  %2582 = vmatpush.bf16.msra.mxu1 %v6101_v1  ;;  %v1198_v18 = vpop.f32.mrf.mxu0  ;;  %v6072_v52 = vld [vmem:[#allocation11 + $0x60] sm:$0xf] }
 0x1c7   : > { %v1199_v51 = vadd.f32 %v7775_v46, %v1198_v18  ;;  %2405 = vmatpush.bf16.msra.mxu3 %v6077_v36  ;;  %v6420_v18 = vld [vmem:[#allocation11 + $0x74] sm:$0xf0] }
 0x1c8   : > { %v1518_v13 = vmax.f32 %v1451_v24, 0.0 }
 0x1cb   : > { %v1363_v15 = vpop.f32.mrf.mxu2 }
 0x1cc   : > { %v1452_v19 = vpop.f32.mrf.mxu3  ;;  %v1364_v25 = vadd.f32 %v1363_v15, %v1275_v14  ;;  %v1194_v14 = vadd.f32 %v7775_v46, %v1193_v49  ;;  %v1284_v15 = vpop.f32.mrf.mxu1 }
 0x1ce   : > { %v1453_v31 = vadd.f32 %v1452_v19, %v1364_v25  ;;  %v1200_v29 = vpop.f32.mrf.mxu0 }
 0x1cf   : > { %v1201_v1 = vadd.f32 %v7775_v46, %v1200_v29 }
 0x1d0   : > { %v1519_v33 = vmax.f32 %v1453_v31, 0.0  ;;  %1405 = vmatmul.bf16.gmra.mxu2 %v5793_v27  ;;  %v1283_v27 = vadd.f32 %v1282_v54, %v1194_v14 }
 0x1d1   : > { %1494 = vmatmul.bf16.gmra.mxu3 %v5797_v28  ;;  %v1196_v28 = vadd.f32 %v7775_v46, %v1195_v11  ;;  %v6058_v46 = vld [vmem:[#allocation11 + $0x50] sm:$0xf0] }
 0x1d2   : > { %v1546_v42 = vpack.c.bf16 %v1519_v33, %v1518_v13  ;;  %v5824_v13 = vld [vmem:[%s7696_s28 + $0x1e8] sm:$0xf]  ;;  %v6354_v33 = vld [vmem:[%s7696_s28 + $0x1ec] sm:$0xf]  ;;  %s5333_s28 = sshll.u32 %s7947_s22, 4  ;;  %s10121_s28 = int_to_ptr.vmem [resolvable:$true] %s5333_s28 }
 0x1d3   : > { %v1366_v43 = vpop.f32.mrf.mxu2  ;;  %v1285_v37 = vadd.f32 %v1284_v15, %v1196_v28  ;;  %v5825_v16 = vor.u32 %v6356_v58, %v5824_v13  ;;  %v6418_v13 = vld [vmem:[#allocation11 + $0x6c] sm:$0xf] }
 0x1d4   : > { %v1455_v21 = vpop.f32.mrf.mxu3  ;;  %1688 = vmatmul.bf16.gmra.mxu0 %v1546_v42  ;;  %1777 = vmatmul.bf16.gmra.mxu1 %v1546_v42  ;;  %v1367_v23 = vadd.f32 %v1366_v43, %v1278_v48  ;;  %v5829_v43 = vor.u32 %v6354_v33, %v5826_v32  ;;  %v6082_v32 = vld [vmem:[#allocation11 + $0x78] sm:$0xf0] }
 0x1d6   : > { %v1456_v5 = vadd.f32 %v1455_v21, %v1367_v23  ;;  %v1287_v21 = vpop.f32.mrf.mxu1  ;;  %v6419_v23 = vld [vmem:[#allocation11 + $0x6c] sm:$0xf0] }
 0x1d7   : > { %v6073_v54 = vor.u32 %v6419_v23, %v6072_v52  ;;  %v6407_v52 = vld [vmem:[#allocation11 + $0xc] sm:$0xf0]  ;;  %v6405_v23 = vld [vmem:[#allocation11 + $0x4] sm:$0xf] }
 0x1d8   : > { %v1520_v45 = vmax.f32 %v1456_v5, 0.0  ;;  %v6029_v29 = vor.u32 %v6405_v23, %v6026_v55 }
 0x1d9   : > { %2316 = vmatpush.bf16.msra.mxu2 %v6073_v54 }
 0x1db   : > { %v1368_v3 = vpop.f32.mrf.mxu2 }
 0x1dc   : > { %v1457_v4 = vpop.f32.mrf.mxu3  ;;  %v1369_v6 = vadd.f32 %v1368_v3, %v1280_v63  ;;  %v1288_v63 = vadd.f32 %v1287_v21, %v1199_v51 }
 0x1de   : > { %v1458_v10 = vadd.f32 %v1457_v4, %v1369_v6  ;;  %v1289_v3 = vpop.f32.mrf.mxu1 }
 0x1df   : > { %v1290_v5 = vadd.f32 %v1289_v3, %v1201_v1 }
 0x1e0   : > { %v1521_v0 = vmax.f32 %v1458_v10, 0.0  ;;  %1410 = vmatmul.bf16.gmra.mxu2 %v5809_v35 }
 0x1e1   : > { %1499 = vmatmul.bf16.gmra.mxu3 %v5813_v7 }
 0x1e2   : > { %v1547_v19 = vpack.c.bf16 %v1521_v0, %v1520_v45 }
 0x1e3   : > { %v1371_v24 = vpop.f32.mrf.mxu2 }
 0x1e4   : > { %v1460_v25 = vpop.f32.mrf.mxu3  ;;  %1693 = vmatmul.bf16.gmra.mxu0 %v1547_v19  ;;  %1782 = vmatmul.bf16.gmra.mxu1 %v1547_v19  ;;  %v1372_v31 = vadd.f32 %v1371_v24, %v1283_v27  ;;  %v6056_v24 = vld [vmem:[#allocation11 + $0x40] sm:$0xf]  ;;  %v6413_v27 = vld [vmem:[#allocation11 + $0x44] sm:$0xf] }
 0x1e5   : > { %v6061_v58 = vor.u32 %v6413_v27, %v6058_v46 }
 0x1e6   : > { %v1461_v41 = vadd.f32 %v1460_v25, %v1372_v31  ;;  %v6415_v25 = vld [vmem:[#allocation11 + $0x4c] sm:$0xf0]  ;;  %v6080_v31 = vld [vmem:[#allocation11 + $0x68] sm:$0xf] }
 0x1e7   : > { %v6057_v28 = vor.u32 %v6415_v25, %v6056_v24  ;;  %v6081_v33 = vor.u32 %v6420_v18, %v6080_v31  ;;  %2406 = vmatpush.bf16.msra.mxu3 %v6061_v58  ;;  %v6064_v18 = vld [vmem:[#allocation11 + $0x48] sm:$0xf] }
 0x1e8   : > { %v1522_v49 = vmax.f32 %v1461_v41, 0.0  ;;  %v6409_v41 = vld [vmem:[#allocation11 + $0x24] sm:$0xf] }
 0x1e9   : > { %2317 = vmatpush.bf16.msra.mxu2 %v6057_v28  ;;  %2494 = vmatpush.bf16.msra.mxu0 %v6081_v33  ;;  %v6414_v33 = vld [vmem:[#allocation11 + $0x4c] sm:$0xf] }
 0x1eb   : > { %v1373_v39 = vpop.f32.mrf.mxu2 }
 0x1ec   : > { %v1462_v9 = vpop.f32.mrf.mxu3  ;;  %v1374_v42 = vadd.f32 %v1373_v39, %v1285_v37  ;;  %v6085_v37 = vor.u32 %v6418_v13, %v6082_v32  ;;  %v6040_v39 = vld [vmem:[#allocation11 + $0x20] sm:$0xf]  ;;  %v6416_v13 = vld [vmem:[#allocation11 + $0x54] sm:$0xf0] }
 0x1ed   : > { %v6065_v58 = vor.u32 %v6416_v13, %v6064_v18 }
 0x1ee   : > { %v1463_v48 = vadd.f32 %v1462_v9, %v1374_v42  ;;  %v6411_v9 = vld [vmem:[#allocation11 + $0x2c] sm:$0xf0]  ;;  %2583 = vmatpush.bf16.msra.mxu1 %v6085_v37 }
 0x1ef   : > { %2495 = vmatpush.bf16.msra.mxu0 %v6065_v58 }
 0x1f0   : > { %v1523_v40 = vmax.f32 %v1463_v48, 0.0  ;;  %1415 = vmatmul.bf16.gmra.mxu2 %v5825_v16  ;;  %v6041_v16 = vor.u32 %v6411_v9, %v6040_v39  ;;  %v1574_v48 = vld [vmem:[%s10695_s5] sm:$0x3] }
 0x1f1   : > { %1504 = vmatmul.bf16.gmra.mxu3 %v5829_v43  ;;  %v6042_v43 = vld [vmem:[#allocation11 + $0x30] sm:$0xf0]  ;;  %v7938_v36 = vperm.slane %v1574_v48, 0 }
 0x1f2   : > { %v1548_v57 = vpack.c.bf16 %v1523_v40, %v1522_v49  ;;  %v6045_v21 = vor.u32 %v6409_v41, %v6042_v43  ;;  %2318 = vmatpush.bf16.msra.mxu2 %v6041_v16  ;;  %v6024_v40 = vld [vmem:[#allocation11] sm:$0xf] }
 0x1f3   : > { %v1376_v61 = vpop.f32.mrf.mxu2 }
 0x1f4   : > { %v1465_v53 = vpop.f32.mrf.mxu3  ;;  %1698 = vmatmul.bf16.gmra.mxu0 %v1548_v57  ;;  %1787 = vmatmul.bf16.gmra.mxu1 %v1548_v57  ;;  %v1377_v4 = vadd.f32 %v1376_v61, %v1288_v63  ;;  %v7940_v61 = vperm.slane %v1574_v48, 1 }
 0x1f5   : > { %2407 = vmatpush.bf16.msra.mxu3 %v6045_v21 }
 0x1f6   : > { %v1466_v7 = vadd.f32 %v1465_v53, %v1377_v4 }
 0x1f8   : > { %v1524_v45 = vmax.f32 %v1466_v7, 0.0 }
 0x1f9   : > { %2408 = vmatpush.bf16.msra.mxu3 %v6029_v29 }
 0x1fb   : > { %v1378_v6 = vpop.f32.mrf.mxu2 }
 0x1fc   : > { %v1467_v35 = vpop.f32.mrf.mxu3  ;;  %v1379_v10 = vadd.f32 %v1378_v6, %v1290_v5 }
 0x1fe   : > { %v1468_v11 = vadd.f32 %v1467_v35, %v1379_v10 }
 0x200   : > { %v1525_v14 = vmax.f32 %v1468_v11, 0.0 }
 0x202   : > { %v1549_v0 = vpack.c.bf16 %v1525_v14, %v1524_v45 }
 0x203   : > { %v1381_v15 = vpop.f32.mrf.mxu2 }
 0x204   : > { %v1470_v19 = vpop.f32.mrf.mxu3  ;;  %1703 = vmatmul.bf16.gmra.mxu0 %v1549_v0  ;;  %1792 = vmatmul.bf16.gmra.mxu1 %v1549_v0  ;;  %v1382_v42 = vadd.f32 %v1381_v15, %v7778_v50  ;;  %v6025_v50 = vor.u32 %v6407_v52, %v6024_v40 }
 0x206   : > { %v1471_v54 = vadd.f32 %v1470_v19, %v1382_v42  ;;  %2319 = vmatpush.bf16.msra.mxu2 %v6025_v50  ;;  %v1903_v50 = vld [vmem:[%s7709_s30 + $0x8] sm:$0xff] }
 0x208   : > { %v1526_v53 = vmax.f32 %v1471_v54, 0.0  ;;  %v1902_v54 = vld [vmem:[%s7709_s30] sm:$0xff] }
 0x20b   : > { %v1383_v49 = vpop.f32.mrf.mxu2 }
 0x20c   : > { %v1472_v51 = vpop.f32.mrf.mxu3  ;;  %v1384_v47 = vadd.f32 %v1383_v49, %v7789_v8 }
 0x20e   : > { %v1473_v57 = vadd.f32 %v1472_v51, %v1384_v47 }
 0x210   : > { %v1527_v63 = vmax.f32 %v1473_v57, 0.0 }
 0x211   : > { %v1669_v1 = vpop.f32.mrf.mxu0  ;;  %v1758_v3 = vpop.f32.mrf.mxu1 }
 0x212   : > { %v7943_v4 = vadd.f32 %v1669_v1, %v7938_v36  ;;  %v1759_v8 = vadd.f32 %v1758_v3, %v7940_v61  ;;  %v1550_v5 = vpack.c.bf16 %v1527_v63, %v1526_v53 }
 0x213   : > { %v1386_v6 = vpop.f32.mrf.mxu2 }
 0x214   : > { %v1475_v35 = vpop.f32.mrf.mxu3  ;;  %5228 = vst [vmem:[%s7947_s22] sm:$0xff] %v7943_v4  ;;  %v1838_v7 = vmax.f32 %v1759_v8, -30.0  ;;  %1708 = vmatmul.bf16.gmra.mxu0 %v1550_v5  ;;  %1797 = vmatmul.bf16.gmra.mxu1 %v1550_v5  ;;  %v1387_v45 = vadd.f32 %v1386_v6, %v7792_v12  ;;  %v6066_v12 = vld [vmem:[#allocation11 + $0x58] sm:$0xf0] }
 0x215   : > { %v6069_v39 = vor.u32 %v6414_v33, %v6066_v12 }
 0x216   : > { %v1870_v10 = vmin.f32 %v1838_v7, 20.0  ;;  %v1476_v28 = vadd.f32 %v1475_v35, %v1387_v45 }
 0x217   : > { %2584 = vmatpush.bf16.msra.mxu1 %v6069_v39 }
 0x218   : > { %v1934_v11 = vmul.f32 0.5, %v1870_v10  ;;  %5260 = vst [vmem:[%s7952_s23] sm:$0xff] %v1870_v10  ;;  %v1528_v9 = vmax.f32 %v1476_v28, 0.0 }
 0x219   : > { %v1671_v14 = vpop.f32.mrf.mxu0  ;;  %v1760_v0 = vpop.f32.mrf.mxu1 }
 0x21a   : > { %v1672_v15 = vadd.f32 %v1671_v14, %v7938_v36  ;;  %v1761_v19 = vadd.f32 %v1760_v0, %v7940_v61  ;;  %v1966_v24 = vmul.f32 1.442695, %v1934_v11 }
 0x21b   : > { %v1388_v25 = vpop.f32.mrf.mxu2 }
 0x21c   : > { %v1477_v27 = vpop.f32.mrf.mxu3  ;;  %5229 = vst [vmem:[%s7947_s22 + $0x8] sm:$0xff] %v1672_v15  ;;  %v1839_v46 = vmax.f32 %v1761_v19, -30.0  ;;  %v1389_v31 = vadd.f32 %v1388_v25, %v7803_v34  ;;  %6570 = vpow2.f32 %v1966_v24 }
 0x21e   : > { %v1871_v32 = vmin.f32 %v1839_v46, 20.0  ;;  %v1478_v37 = vadd.f32 %v1477_v27, %v1389_v31 }
 0x220   : > { %v1935_v41 = vmul.f32 0.5, %v1871_v32  ;;  %5261 = vst [vmem:[%s7952_s23 + $0x8] sm:$0xff] %v1871_v32  ;;  %v1529_v42 = vmax.f32 %v1478_v37, 0.0  ;;  %v1904_v37 = vld [vmem:[%s7709_s30 + $0x10] sm:$0xff] }
 0x221   : > { %v1674_v16 = vpop.f32.mrf.mxu0  ;;  %v1763_v34 = vpop.f32.mrf.mxu1 }
 0x222   : > { %v1968_v43 = vmul.f32 1.442695, %v1935_v41  ;;  %v7962_v21 = vadd.f32 %v1674_v16, %v7938_v36  ;;  %v1764_v48 = vadd.f32 %v1763_v34, %v7940_v61  ;;  %v1551_v49 = vpack.c.bf16 %v1529_v42, %v1528_v9  ;;  %v6571_v23 = vpop.eup %6570  ;;  %v1905_v41 = vld [vmem:[%s7709_s30 + $0x18] sm:$0xff] }
 0x223   : > { %v1391_v51 = vpop.f32.mrf.mxu2  ;;  %v2030_v57 = vmul.f32 %v6571_v23, %v1902_v54 }
 0x224   : > { %v1480_v40 = vpop.f32.mrf.mxu3  ;;  %6572 = vpow2.f32 %v1968_v43  ;;  %5230 = vst [vmem:[%s7947_s22 + $0x10] sm:$0xff] %v7962_v21  ;;  %v1840_v52 = vmax.f32 %v1764_v48, -30.0  ;;  %1713 = vmatmul.bf16.gmra.mxu0 %v1551_v49  ;;  %1802 = vmatmul.bf16.gmra.mxu1 %v1551_v49  ;;  %v1392_v29 = vadd.f32 %v1391_v51, %v7806_v38 }
 0x225   : > { %v2062_v38 = vadd.f32 %v2030_v57, %v7943_v4 }
 0x226   : > { %v1872_v47 = vmin.f32 %v1840_v52, 20.0  ;;  %v1481_v10 = vadd.f32 %v1480_v40, %v1392_v29 }
 0x228   : > { %v1936_v55 = vmul.f32 0.5, %v1872_v47  ;;  %5262 = vst [vmem:[%s7952_s23 + $0x10] sm:$0xff] %v1872_v47  ;;  %v1530_v25 = vmax.f32 %v1481_v10, 0.0 }
 0x229   : > { %v1676_v53 = vpop.f32.mrf.mxu0  ;;  %v1765_v63 = vpop.f32.mrf.mxu1 }
 0x22a   : > { %v6573_v1 = vpop.eup %6572  ;;  %v1677_v3 = vadd.f32 %v1676_v53, %v7938_v36  ;;  %v1766_v8 = vadd.f32 %v1765_v63, %v7940_v61  ;;  %v1970_v7 = vmul.f32 1.442695, %v1936_v55  ;;  %v6412_v55 = vld [vmem:[#allocation11 + $0x34] sm:$0xf0]  ;;  %v6410_v63 = vld [vmem:[#allocation11 + $0x2c] sm:$0xf] }
 0x22b   : > { %v2031_v5 = vmul.f32 %v6573_v1, %v1903_v50  ;;  %v1393_v6 = vpop.f32.mrf.mxu2  ;;  %v6048_v50 = vld [vmem:[#allocation11 + $0x28] sm:$0xf]  ;;  %v6050_v1 = vld [vmem:[#allocation11 + $0x38] sm:$0xf0] }
 0x22c   : > { %v1482_v35 = vpop.f32.mrf.mxu3  ;;  %5231 = vst [vmem:[%s7947_s22 + $0x18] sm:$0xff] %v1677_v3  ;;  %v1841_v11 = vmax.f32 %v1766_v8, -30.0  ;;  %v1394_v45 = vadd.f32 %v1393_v6, %v7817_v62  ;;  %6574 = vpow2.f32 %v1970_v7  ;;  %v6049_v53 = vor.u32 %v6412_v55, %v6048_v50 }
 0x22d   : > { %v2063_v14 = vadd.f32 %v2031_v5, %v1672_v15  ;;  %v6053_v6 = vor.u32 %v6410_v63, %v6050_v1  ;;  %v1908_v1 = vld [vmem:[%s7709_s30 + $0x30] sm:$0xff] }
 0x22e   : > { %v1873_v0 = vmin.f32 %v1841_v11, 20.0  ;;  %v1483_v19 = vadd.f32 %v1482_v35, %v1394_v45  ;;  %2496 = vmatpush.bf16.msra.mxu0 %v6049_v53 }
 0x22f   : > { %v7976_v24 = vpack.c.bf16 %v2063_v14, %v2062_v38  ;;  %2585 = vmatpush.bf16.msra.mxu1 %v6053_v6  ;;  %v1909_v6 = vld [vmem:[%s7709_s30 + $0x38] sm:$0xff] }
 0x230   : > { %v1937_v27 = vmul.f32 0.5, %v1873_v0  ;;  %5263 = vst [vmem:[%s7952_s23 + $0x18] sm:$0xff] %v1873_v0  ;;  %v1531_v28 = vmax.f32 %v1483_v19, 0.0 }
 0x231   : > { %v1679_v46 = vpop.f32.mrf.mxu0  ;;  %v1768_v31 = vpop.f32.mrf.mxu1  ;;  %2320 = vmatmul.bf16.vlgmr.msra.gmra.mxu2 %v7976_v24  ;;  %2409 = vmatmul.bf16.vlgmr.msra.gmra.mxu3 %v7976_v24 }
 0x232   : > { %v1972_v62 = vmul.f32 1.442695, %v1937_v27  ;;  %v7982_v4 = vadd.f32 %v1679_v46, %v7938_v36  ;;  %v1769_v15 = vadd.f32 %v1768_v31, %v7940_v61  ;;  %v1552_v18 = vpack.c.bf16 %v1531_v28, %v1530_v25  ;;  %v6575_v12 = vpop.eup %6574  ;;  %v1906_v46 = vld [vmem:[%s7709_s30 + $0x20] sm:$0xff] }
 0x233   : > { %v1396_v13 = vpop.f32.mrf.mxu2  ;;  %v2032_v34 = vmul.f32 %v6575_v12, %v1904_v37 }
 0x234   : > { %v1485_v58 = vpop.f32.mrf.mxu3  ;;  %6576 = vpow2.f32 %v1972_v62  ;;  %5232 = vst [vmem:[%s7947_s22 + $0x20] sm:$0xff] %v7982_v4  ;;  %v1842_v33 = vmax.f32 %v1769_v15, -30.0  ;;  %1718 = vmatmul.bf16.gmra.mxu0 %v1552_v18  ;;  %1807 = vmatmul.bf16.gmra.mxu1 %v1552_v18  ;;  %v1397_v9 = vadd.f32 %v1396_v13, %v7820_v2  ;;  %v1907_v15 = vld [vmem:[%s7709_s30 + $0x28] sm:$0xff] }
 0x235   : > { %v2064_v29 = vadd.f32 %v2032_v34, %v7962_v21 }
 0x236   : > { %v1874_v32 = vmin.f32 %v1842_v33, 20.0  ;;  %v1486_v54 = vadd.f32 %v1485_v58, %v1397_v9 }
 0x238   : > { %v1938_v39 = vmul.f32 0.5, %v1874_v32  ;;  %5264 = vst [vmem:[%s7952_s23 + $0x20] sm:$0xff] %v1874_v32  ;;  %v1532_v7 = vmax.f32 %v1486_v54, 0.0 }
 0x239   : > { %v1681_v42 = vpop.f32.mrf.mxu0  ;;  %v1770_v16 = vpop.f32.mrf.mxu1 }
 0x23a   : > { %v6577_v43 = vpop.eup %6576  ;;  %v7992_v48 = vadd.f32 %v1681_v42, %v7938_v36  ;;  %v1771_v49 = vadd.f32 %v1770_v16, %v7940_v61  ;;  %v1974_v51 = vmul.f32 1.442695, %v1938_v39 }
 0x23b   : > { %v1398_v40 = vpop.f32.mrf.mxu2  ;;  %v2033_v23 = vmul.f32 %v6577_v43, %v1905_v41 }
 0x23c   : > { %v1487_v52 = vpop.f32.mrf.mxu3  ;;  %5233 = vst [vmem:[%s7947_s22 + $0x28] sm:$0xff] %v7992_v48  ;;  %v1843_v47 = vmax.f32 %v1771_v49, -30.0  ;;  %v1399_v2 = vadd.f32 %v1398_v40, %v7831_v26  ;;  %6578 = vpow2.f32 %v1974_v51 }
 0x23d   : > { %v2065_v57 = vadd.f32 %v2033_v23, %v1677_v3 }
 0x23e   : > { %v1875_v8 = vmin.f32 %v1843_v47, 20.0  ;;  %v1488_v5 = vadd.f32 %v1487_v52, %v1399_v2 }
 0x23f   : > { %v7999_v35 = vpack.c.bf16 %v2065_v57, %v2064_v29 }
 0x240   : > { %v1939_v10 = vmul.f32 0.5, %v1875_v8  ;;  %5265 = vst [vmem:[%s7952_s23 + $0x28] sm:$0xff] %v1875_v8  ;;  %v1533_v26 = vmax.f32 %v1488_v5, 0.0 }
 0x241   : > { %v1684_v11 = vpop.f32.mrf.mxu0  ;;  %v1773_v45 = vpop.f32.mrf.mxu1  ;;  %2325 = vmatmul.bf16.gmra.mxu2 %v7999_v35  ;;  %2414 = vmatmul.bf16.gmra.mxu3 %v7999_v35 }
 0x242   : > { %v1976_v21 = vmul.f32 1.442695, %v1939_v10  ;;  %v8005_v3 = vadd.f32 %v1684_v11, %v7938_v36  ;;  %v1774_v38 = vadd.f32 %v1773_v45, %v7940_v61  ;;  %v1553_v14 = vpack.c.bf16 %v1533_v26, %v1532_v7  ;;  %v6579_v27 = vpop.eup %6578 }
 0x243   : > { %v1401_v0 = vpop.f32.mrf.mxu2  ;;  %v2034_v58 = vmul.f32 %v6579_v27, %v1906_v46  ;;  %v6408_v46 = vld [vmem:[#allocation11 + $0x14] sm:$0xf0] }
 0x244   : > { %v1490_v19 = vpop.f32.mrf.mxu3  ;;  %6580 = vpow2.f32 %v1976_v21  ;;  %5234 = vst [vmem:[%s7947_s22 + $0x30] sm:$0xff] %v8005_v3  ;;  %v1844_v25 = vmax.f32 %v1774_v38, -30.0  ;;  %1723 = vmatmul.bf16.gmra.mxu0 %v1553_v14  ;;  %1812 = vmatmul.bf16.gmra.mxu1 %v1553_v14  ;;  %v1402_v62 = vadd.f32 %v1401_v0, %v7834_v30 }
 0x245   : > { %v2066_v30 = vadd.f32 %v2034_v58, %v7982_v4 }
 0x246   : > { %v1876_v28 = vmin.f32 %v1844_v25, 20.0  ;;  %v1491_v42 = vadd.f32 %v1490_v19, %v1402_v62 }
 0x248   : > { %v1940_v31 = vmul.f32 0.5, %v1876_v28  ;;  %5266 = vst [vmem:[%s7952_s23 + $0x30] sm:$0xff] %v1876_v28  ;;  %v1534_v52 = vmax.f32 %v1491_v42, 0.0  ;;  %v6032_v28 = vld [vmem:[#allocation11 + $0x8] sm:$0xf] }
 0x249   : > { %v1686_v18 = vpop.f32.mrf.mxu0  ;;  %v1775_v13 = vpop.f32.mrf.mxu1 }
 0x24a   : > { %v6581_v33 = vpop.eup %6580  ;;  %v1687_v12 = vadd.f32 %v1686_v18, %v7938_v36  ;;  %v1776_v32 = vadd.f32 %v1775_v13, %v7940_v61  ;;  %v1978_v41 = vmul.f32 1.442695, %v1940_v31  ;;  %v6406_v18 = vld [vmem:[#allocation11 + $0xc] sm:$0xf]  ;;  %v6034_v13 = vld [vmem:[#allocation11 + $0x18] sm:$0xf0] }
 0x24b   : > { %v1403_v37 = vpop.f32.mrf.mxu2  ;;  %v2035_v9 = vmul.f32 %v6581_v33, %v1907_v15  ;;  %v6033_v15 = vor.u32 %v6408_v46, %v6032_v28 }
 0x24c   : > { %v1492_v39 = vpop.f32.mrf.mxu3  ;;  %5235 = vst [vmem:[%s7947_s22 + $0x38] sm:$0xff] %v1687_v12  ;;  %v1845_v16 = vmax.f32 %v1776_v32, -30.0  ;;  %v1404_v34 = vadd.f32 %v1403_v37, %v7845_v56  ;;  %6582 = vpow2.f32 %v1978_v41  ;;  %v6037_v32 = vor.u32 %v6406_v18, %v6034_v13 }
 0x24d   : > { %v2067_v43 = vadd.f32 %v2035_v9, %v7992_v48  ;;  %2497 = vmatpush.bf16.msra.mxu0 %v6033_v15  ;;  %v1912_v15 = vld [vmem:[%s7709_s30 + $0x50] sm:$0xff] }
 0x24e   : > { %v1877_v49 = vmin.f32 %v1845_v16, 20.0  ;;  %v1493_v51 = vadd.f32 %v1492_v39, %v1404_v34  ;;  %2586 = vmatpush.bf16.msra.mxu1 %v6037_v32 }
 0x24f   : > { %v8020_v40 = vpack.c.bf16 %v2067_v43, %v2066_v30 }
 0x250   : > { %v1941_v23 = vmul.f32 0.5, %v1877_v49  ;;  %5267 = vst [vmem:[%s7952_s23 + $0x38] sm:$0xff] %v1877_v49  ;;  %v1535_v54 = vmax.f32 %v1493_v51, 0.0 }
 0x251   : > { %v1689_v47 = vpop.f32.mrf.mxu0  ;;  %v1778_v2 = vpop.f32.mrf.mxu1  ;;  %2330 = vmatmul.bf16.gmra.mxu2 %v8020_v40  ;;  %2419 = vmatmul.bf16.gmra.mxu3 %v8020_v40 }
 0x252   : > { %v1980_v56 = vmul.f32 1.442695, %v1941_v23  ;;  %v8026_v4 = vadd.f32 %v1689_v47, %v7938_v36  ;;  %v1779_v48 = vadd.f32 %v1778_v2, %v7940_v61  ;;  %v1554_v50 = vpack.c.bf16 %v1535_v54, %v1534_v52  ;;  %v6583_v53 = vpop.eup %6582  ;;  %v1910_v23 = vld [vmem:[%s7709_s30 + $0x40] sm:$0xff]  ;;  %v1911_v2 = vld [vmem:[%s7709_s30 + $0x48] sm:$0xff] }
 0x253   : > { %v1406_v55 = vpop.f32.mrf.mxu2  ;;  %v2036_v26 = vmul.f32 %v6583_v53, %v1908_v1 }
 0x254   : > { %v1495_v29 = vpop.f32.mrf.mxu3  ;;  %6584 = vpow2.f32 %v1980_v56  ;;  %5236 = vst [vmem:[%s7947_s22 + $0x40] sm:$0xff] %v8026_v4  ;;  %v1846_v57 = vmax.f32 %v1779_v48, -30.0  ;;  %1728 = vmatmul.bf16.gmra.mxu0 %v1554_v50  ;;  %1817 = vmatmul.bf16.gmra.mxu1 %v1554_v50  ;;  %v1407_v5 = vadd.f32 %v1406_v55, %v7848_v60 }
 0x255   : > { %v2068_v31 = vadd.f32 %v2036_v26, %v8005_v3 }
 0x256   : > { %v1878_v63 = vmin.f32 %v1846_v57, 20.0  ;;  %v1496_v25 = vadd.f32 %v1495_v29, %v1407_v5 }
 0x258   : > { %v1942_v8 = vmul.f32 0.5, %v1878_v63  ;;  %5268 = vst [vmem:[%s7952_s23 + $0x40] sm:$0xff] %v1878_v63  ;;  %v1536_v39 = vmax.f32 %v1496_v25, 0.0 }
 0x259   : > { %v1691_v7 = vpop.f32.mrf.mxu0  ;;  %v1780_v10 = vpop.f32.mrf.mxu1 }
 0x25a   : > { %v6585_v11 = vpop.eup %6584  ;;  %v8036_v45 = vadd.f32 %v1691_v7, %v7938_v36  ;;  %v1781_v21 = vadd.f32 %v1780_v10, %v7940_v61  ;;  %v1982_v38 = vmul.f32 1.442695, %v1942_v8 }
 0x25b   : > { %v1408_v14 = vpop.f32.mrf.mxu2  ;;  %v2037_v19 = vmul.f32 %v6585_v11, %v1909_v6 }
 0x25c   : > { %v1497_v0 = vpop.f32.mrf.mxu3  ;;  %5237 = vst [vmem:[%s7947_s22 + $0x48] sm:$0xff] %v8036_v45  ;;  %v1847_v27 = vmax.f32 %v1781_v21, -30.0  ;;  %v1409_v60 = vadd.f32 %v1408_v14, %v7857_v17  ;;  %6586 = vpow2.f32 %v1982_v38 }
 0x25d   : > { %v2069_v62 = vadd.f32 %v2037_v19, %v1687_v12 }
 0x25e   : > { %v1879_v58 = vmin.f32 %v1847_v27, 20.0  ;;  %v1498_v33 = vadd.f32 %v1497_v0, %v1409_v60 }
 0x25f   : > { %v8043_v37 = vpack.c.bf16 %v2069_v62, %v2068_v31 }
 0x260   : > { %v1943_v9 = vmul.f32 0.5, %v1879_v58  ;;  %5269 = vst [vmem:[%s7952_s23 + $0x48] sm:$0xff] %v1879_v58  ;;  %v1537_v17 = vmax.f32 %v1498_v33, 0.0  ;;  %v1913_v58 = vld [vmem:[%s7709_s30 + $0x58] sm:$0xff] }
 0x261   : > { %v1694_v41 = vpop.f32.mrf.mxu0  ;;  %v1783_v42 = vpop.f32.mrf.mxu1  ;;  %2335 = vmatmul.bf16.gmra.mxu2 %v8043_v37  ;;  %2424 = vmatmul.bf16.gmra.mxu3 %v8043_v37 }
 0x262   : > { %v1984_v3 = vmul.f32 1.442695, %v1943_v9  ;;  %v8049_v12 = vadd.f32 %v1694_v41, %v7938_v36  ;;  %v1784_v16 = vadd.f32 %v1783_v42, %v7940_v61  ;;  %v1555_v34 = vpack.c.bf16 %v1537_v17, %v1536_v39  ;;  %v6587_v51 = vpop.eup %6586 }
 0x263   : > { %v1411_v30 = vpop.f32.mrf.mxu2  ;;  %v2038_v50 = vmul.f32 %v6587_v51, %v1910_v23 }
 0x264   : > { %v1500_v43 = vpop.f32.mrf.mxu3  ;;  %6588 = vpow2.f32 %v1984_v3  ;;  %5238 = vst [vmem:[%s7947_s22 + $0x50] sm:$0xff] %v8049_v12  ;;  %v1848_v49 = vmax.f32 %v1784_v16, -30.0  ;;  %1733 = vmatmul.bf16.gmra.mxu0 %v1555_v34  ;;  %1822 = vmatmul.bf16.gmra.mxu1 %v1555_v34  ;;  %v1412_v47 = vadd.f32 %v1411_v30, %v7862_v22 }
 0x265   : > { %v2070_v22 = vadd.f32 %v2038_v50, %v8026_v4 }
 0x266   : > { %v1880_v52 = vmin.f32 %v1848_v49, 20.0  ;;  %v1501_v5 = vadd.f32 %v1500_v43, %v1412_v47 }
 0x268   : > { %v1944_v54 = vmul.f32 0.5, %v1880_v52  ;;  %5270 = vst [vmem:[%s7952_s23 + $0x50] sm:$0xff] %v1880_v52  ;;  %v1538_v38 = vmax.f32 %v1501_v5, 0.0  ;;  %v1915_v5 = vld [vmem:[%s7709_s30 + $0x68] sm:$0xff] }
 0x269   : > { %v1696_v56 = vpop.f32.mrf.mxu0  ;;  %v1785_v48 = vpop.f32.mrf.mxu1 }
 0x26a   : > { %v6589_v55 = vpop.eup %6588  ;;  %v1697_v29 = vadd.f32 %v1696_v56, %v7938_v36  ;;  %v1786_v57 = vadd.f32 %v1785_v48, %v7940_v61  ;;  %v1986_v8 = vmul.f32 1.442695, %v1944_v54 }
 0x26b   : > { %v1413_v53 = vpop.f32.mrf.mxu2  ;;  %v2039_v1 = vmul.f32 %v6589_v55, %v1911_v2 }
 0x26c   : > { %v1502_v63 = vpop.f32.mrf.mxu3  ;;  %5239 = vst [vmem:[%s7947_s22 + $0x58] sm:$0xff] %v1697_v29  ;;  %v1849_v6 = vmax.f32 %v1786_v57, -30.0  ;;  %v1414_v7 = vadd.f32 %v1413_v53, %v7871_v44  ;;  %6590 = vpow2.f32 %v1986_v8 }
 0x26d   : > { %v2071_v10 = vadd.f32 %v2039_v1, %v8036_v45  ;;  %v1914_v1 = vld [vmem:[%s7709_s30 + $0x60] sm:$0xff] }
 0x26e   : > { %v1881_v26 = vmin.f32 %v1849_v6, 20.0  ;;  %v1503_v11 = vadd.f32 %v1502_v63, %v1414_v7 }
 0x26f   : > { %v8064_v21 = vpack.c.bf16 %v2071_v10, %v2070_v22 }
 0x270   : > { %v1945_v14 = vmul.f32 0.5, %v1881_v26  ;;  %5271 = vst [vmem:[%s7952_s23 + $0x58] sm:$0xff] %v1881_v26  ;;  %v1539_v0 = vmax.f32 %v1503_v11, 0.0 }
 0x271   : > { %v1699_v19 = vpop.f32.mrf.mxu0  ;;  %v1788_v25 = vpop.f32.mrf.mxu1  ;;  %2340 = vmatmul.bf16.gmra.mxu2 %v8064_v21  ;;  %2429 = vmatmul.bf16.gmra.mxu3 %v8064_v21 }
 0x272   : > { %v1988_v44 = vmul.f32 1.442695, %v1945_v14  ;;  %v8070_v4 = vadd.f32 %v1699_v19, %v7938_v36  ;;  %v1789_v45 = vadd.f32 %v1788_v25, %v7940_v61  ;;  %v1556_v27 = vpack.c.bf16 %v1539_v0, %v1538_v38  ;;  %v6591_v31 = vpop.eup %6590 }
 0x273   : > { %v1416_v60 = vpop.f32.mrf.mxu2  ;;  %v2040_v39 = vmul.f32 %v6591_v31, %v1912_v15 }
 0x274   : > { %v1505_v28 = vpop.f32.mrf.mxu3  ;;  %6592 = vpow2.f32 %v1988_v44  ;;  %5240 = vst [vmem:[%s7947_s22 + $0x60] sm:$0xff] %v8070_v4  ;;  %v1850_v46 = vmax.f32 %v1789_v45, -30.0  ;;  %1738 = vmatmul.bf16.gmra.mxu0 %v1556_v27  ;;  %1827 = vmatmul.bf16.gmra.mxu1 %v1556_v27  ;;  %v1417_v13 = vadd.f32 %v1416_v60, %v7874_v59 }
 0x275   : > { %v2072_v59 = vadd.f32 %v2040_v39, %v8049_v12 }
 0x276   : > { %v1882_v62 = vmin.f32 %v1850_v46, 20.0  ;;  %v1506_v34 = vadd.f32 %v1505_v28, %v1417_v13  ;;  %v1916_v13 = vld [vmem:[%s7709_s30 + $0x70] sm:$0xff] }
 0x278   : > { %v1946_v18 = vmul.f32 0.5, %v1882_v62  ;;  %5272 = vst [vmem:[%s7952_s23 + $0x60] sm:$0xff] %v1882_v62  ;;  %v1540_v47 = vmax.f32 %v1506_v34, 0.0 }
 0x279   : > { %v1701_v33 = vpop.f32.mrf.mxu0  ;;  %v1790_v32 = vpop.f32.mrf.mxu1 }
 0x27a   : > { %v6593_v9 = vpop.eup %6592  ;;  %v1702_v17 = vadd.f32 %v1701_v33, %v7938_v36  ;;  %v1791_v41 = vadd.f32 %v1790_v32, %v7940_v61  ;;  %v1990_v16 = vmul.f32 1.442695, %v1946_v18  ;;  %v1917_v33 = vld [vmem:[%s7709_s30 + $0x78] sm:$0xff] }
 0x27b   : > { %v1418_v42 = vpop.f32.mrf.mxu2  ;;  %v2041_v3 = vmul.f32 %v6593_v9, %v1913_v58 }
 0x27c   : > { %5241 = vst [vmem:[%s7947_s22 + $0x68] sm:$0xff] %v1702_v17  ;;  %v1851_v30 = vmax.f32 %v1791_v41, -30.0  ;;  %v1419_v43 = vadd.f32 %v1418_v42, %v7881_v20  ;;  %v1507_v49 = vpop.f32.mrf.mxu3  ;;  %6594 = vpow2.f32 %v1990_v16 }
 0x27d   : > { %v2073_v51 = vadd.f32 %v2041_v3, %v1697_v29 }
 0x27e   : > { %v1883_v52 = vmin.f32 %v1851_v30, 20.0  ;;  %v1508_v23 = vadd.f32 %v1507_v49, %v1419_v43 }
 0x27f   : > { %v8084_v54 = vpack.c.bf16 %v2073_v51, %v2072_v59 }
 0x280   : > { %v1947_v2 = vmul.f32 0.5, %v1883_v52  ;;  %5273 = vst [vmem:[%s7952_s23 + $0x68] sm:$0xff] %v1883_v52  ;;  %v1541_v56 = vmax.f32 %v1508_v23, 0.0 }
 0x281   : > { %v1704_v48 = vpop.f32.mrf.mxu0  ;;  %v1793_v50 = vpop.f32.mrf.mxu1  ;;  %2345 = vmatmul.bf16.gmra.mxu2 %v8084_v54  ;;  %2434 = vmatmul.bf16.gmra.mxu3 %v8084_v54 }
 0x282   : > { %v1992_v20 = vmul.f32 1.442695, %v1947_v2  ;;  %v1705_v12 = vadd.f32 %v1704_v48, %v7938_v36  ;;  %v1794_v55 = vadd.f32 %v1793_v50, %v7940_v61  ;;  %v1557_v29 = vpack.c.bf16 %v1541_v56, %v1540_v47  ;;  %v6595_v53 = vpop.eup %6594 }
 0x283   : > { %v2042_v22 = vmul.f32 %v6595_v53, %v1914_v1 }
 0x284   : > { %6596 = vpow2.f32 %v1992_v20  ;;  %5242 = vst [vmem:[%s7947_s22 + $0x70] sm:$0xff] %v1705_v12  ;;  %v1852_v57 = vmax.f32 %v1794_v55, -30.0  ;;  %1743 = vmatmul.bf16.gmra.mxu0 %v1557_v29  ;;  %1832 = vmatmul.bf16.gmra.mxu1 %v1557_v29  ;;  %v1918_v20 = vld [vmem:[%s7709_s30 + $0x80] sm:$0xff]  ;;  %v1919_v55 = vld [vmem:[%s7709_s30 + $0x88] sm:$0xff] }
 0x285   : > { %v2074_v19 = vadd.f32 %v2042_v22, %v8070_v4 }
 0x286   : > { %v1884_v63 = vmin.f32 %v1852_v57, 20.0 }
 0x288   : > { %v1948_v8 = vmul.f32 0.5, %v1884_v63  ;;  %5274 = vst [vmem:[%s7952_s23 + $0x70] sm:$0xff] %v1884_v63 }
 0x289   : > { %v1706_v6 = vpop.f32.mrf.mxu0  ;;  %v1795_v7 = vpop.f32.mrf.mxu1 }
 0x28a   : > { %v6597_v10 = vpop.eup %6596  ;;  %v1707_v26 = vadd.f32 %v1706_v6, %v7938_v36  ;;  %v1796_v11 = vadd.f32 %v1795_v7, %v7940_v61  ;;  %v1994_v14 = vmul.f32 1.442695, %v1948_v8 }
 0x28b   : > { %v2043_v38 = vmul.f32 %v6597_v10, %v1915_v5 }
 0x28c   : > { %5243 = vst [vmem:[%s7947_s22 + $0x78] sm:$0xff] %v1707_v26  ;;  %v1853_v0 = vmax.f32 %v1796_v11, -30.0  ;;  %6598 = vpow2.f32 %v1994_v14 }
 0x28d   : > { %v2075_v25 = vadd.f32 %v2043_v38, %v1702_v17 }
 0x28e   : > { %v1885_v44 = vmin.f32 %v1853_v0, 20.0 }
 0x28f   : > { %v8099_v45 = vpack.c.bf16 %v2075_v25, %v2074_v19 }
 0x290   : > { %v1949_v27 = vmul.f32 0.5, %v1885_v44  ;;  %5275 = vst [vmem:[%s7952_s23 + $0x78] sm:$0xff] %v1885_v44 }
 0x291   : > { %v1709_v60 = vpop.f32.mrf.mxu0  ;;  %v1798_v28 = vpop.f32.mrf.mxu1  ;;  %2350 = vmatmul.bf16.gmra.mxu2 %v8099_v45  ;;  %2439 = vmatmul.bf16.gmra.mxu3 %v8099_v45 }
 0x292   : > { %v1996_v46 = vmul.f32 1.442695, %v1949_v27  ;;  %v1710_v31 = vadd.f32 %v1709_v60, %v7938_v36  ;;  %v1799_v4 = vadd.f32 %v1798_v28, %v7940_v61  ;;  %v6599_v15 = vpop.eup %6598 }
 0x293   : > { %v2044_v9 = vmul.f32 %v6599_v15, %v1916_v13  ;;  %v1920_v13 = vld [vmem:[%s7709_s30 + $0x90] sm:$0xff] }
 0x294   : > { %6600 = vpow2.f32 %v1996_v46  ;;  %5244 = vst [vmem:[%s7947_s22 + $0x80] sm:$0xff] %v1710_v31  ;;  %v1854_v62 = vmax.f32 %v1799_v4, -30.0  ;;  %2498 = vmatmul.bf16.vlgmr.msra.gmra.mxu0 %v7976_v24  ;;  %2587 = vmatmul.bf16.vlgmr.msra.gmra.mxu1 %v7976_v24 }
 0x295   : > { %v2076_v24 = vadd.f32 %v2044_v9, %v1705_v12 }
 0x296   : > { %v1886_v18 = vmin.f32 %v1854_v62, 20.0 }
 0x298   : > { %v1950_v58 = vmul.f32 0.5, %v1886_v18  ;;  %5276 = vst [vmem:[%s7952_s23 + $0x80] sm:$0xff] %v1886_v18 }
 0x299   : > { %v1711_v32 = vpop.f32.mrf.mxu0  ;;  %v1800_v39 = vpop.f32.mrf.mxu1 }
 0x29a   : > { %v6601_v17 = vpop.eup %6600  ;;  %v1712_v41 = vadd.f32 %v1711_v32, %v7938_v36  ;;  %v1801_v42 = vadd.f32 %v1800_v39, %v7940_v61  ;;  %v1998_v16 = vmul.f32 1.442695, %v1950_v58  ;;  %v1921_v39 = vld [vmem:[%s7709_s30 + $0x98] sm:$0xff] }
 0x29b   : > { %v2045_v3 = vmul.f32 %v6601_v17, %v1917_v33 }
 0x29c   : > { %5245 = vst [vmem:[%s7947_s22 + $0x88] sm:$0xff] %v1712_v41  ;;  %v1855_v34 = vmax.f32 %v1801_v42, -30.0  ;;  %6602 = vpow2.f32 %v1998_v16 }
 0x29d   : > { %v2077_v30 = vadd.f32 %v2045_v3, %v1707_v26  ;;  %v2142_v26 = vld [vmem:[%s10697_s7] sm:$0xf] }
 0x29e   : > { %v1887_v43 = vmin.f32 %v1855_v34, 20.0  ;;  %v8142_v19 = vperm.slane %v2142_v26, 0  ;;  %v8144_v25 = vperm.slane %v2142_v26, 1 }
 0x29f   : > { %v8115_v49 = vpack.c.bf16 %v2077_v30, %v2076_v24 }
 0x2a0   : > { %v1951_v59 = vmul.f32 0.5, %v1887_v43  ;;  %5277 = vst [vmem:[%s7952_s23 + $0x88] sm:$0xff] %v1887_v43 }
 0x2a1   : > { %v1714_v51 = vpop.f32.mrf.mxu0  ;;  %v1803_v52 = vpop.f32.mrf.mxu1  ;;  %2355 = vmatmul.bf16.gmra.mxu2 %v8115_v49  ;;  %2444 = vmatmul.bf16.gmra.mxu3 %v8115_v49 }
 0x2a2   : > { %v2000_v23 = vmul.f32 1.442695, %v1951_v59  ;;  %v8121_v47 = vadd.f32 %v1714_v51, %v7938_v36  ;;  %v1804_v2 = vadd.f32 %v1803_v52, %v7940_v61  ;;  %v6603_v48 = vpop.eup %6602 }
 0x2a3   : > { %v2046_v53 = vmul.f32 %v6603_v48, %v1918_v20 }
 0x2a4   : > { %6604 = vpow2.f32 %v2000_v23  ;;  %5246 = vst [vmem:[%s7947_s22 + $0x90] sm:$0xff] %v8121_v47  ;;  %v1856_v56 = vmax.f32 %v1804_v2, -30.0  ;;  %2503 = vmatmul.bf16.gmra.mxu0 %v7999_v35  ;;  %2592 = vmatmul.bf16.gmra.mxu1 %v7999_v35 }
 0x2a5   : > { %v2078_v35 = vadd.f32 %v2046_v53, %v1710_v31 }
 0x2a6   : > { %v1888_v50 = vmin.f32 %v1856_v56, 20.0 }
 0x2a8   : > { %v1952_v12 = vmul.f32 0.5, %v1888_v50  ;;  %5278 = vst [vmem:[%s7952_s23 + $0x90] sm:$0xff] %v1888_v50 }
 0x2a9   : > { %v1716_v29 = vpop.f32.mrf.mxu0  ;;  %v1805_v57 = vpop.f32.mrf.mxu1 }
 0x2aa   : > { %v6605_v63 = vpop.eup %6604  ;;  %v1717_v1 = vadd.f32 %v1716_v29, %v7938_v36  ;;  %v1806_v8 = vadd.f32 %v1805_v57, %v7940_v61  ;;  %v2002_v6 = vmul.f32 1.442695, %v1952_v12 }
 0x2ab   : > { %v2047_v5 = vmul.f32 %v6605_v63, %v1919_v55 }
 0x2ac   : > { %5247 = vst [vmem:[%s7947_s22 + $0x98] sm:$0xff] %v1717_v1  ;;  %v1857_v7 = vmax.f32 %v1806_v8, -30.0  ;;  %6606 = vpow2.f32 %v2002_v6 }
 0x2ad   : > { %v2079_v22 = vadd.f32 %v2047_v5, %v1712_v41 }
 0x2ae   : > { %v1889_v10 = vmin.f32 %v1857_v7, 20.0 }
 0x2af   : > { %v8137_v11 = vpack.c.bf16 %v2079_v22, %v2078_v35 }
 0x2b0   : > { %v1953_v38 = vmul.f32 0.5, %v1889_v10  ;;  %5279 = vst [vmem:[%s7952_s23 + $0x98] sm:$0xff] %v1889_v10 }
 0x2b1   : > { %v1719_v14 = vpop.f32.mrf.mxu0  ;;  %v1808_v0 = vpop.f32.mrf.mxu1  ;;  %2360 = vmatmul.bf16.gmra.mxu2 %v8137_v11  ;;  %2449 = vmatmul.bf16.gmra.mxu3 %v8137_v11 }
 0x2b2   : > { %v2004_v44 = vmul.f32 1.442695, %v1953_v38  ;;  %v8147_v27 = vadd.f32 %v1719_v14, %v7938_v36  ;;  %v1809_v60 = vadd.f32 %v1808_v0, %v7940_v61  ;;  %v6607_v15 = vpop.eup %6606 }
 0x2b3   : > { %v2048_v41 = vmul.f32 %v6607_v15, %v1920_v13 }
 0x2b4   : > { %6608 = vpow2.f32 %v2004_v44  ;;  %5248 = vst [vmem:[%s7947_s22 + $0xa0] sm:$0xff] %v8147_v27  ;;  %v1858_v28 = vmax.f32 %v1809_v60, -30.0  ;;  %v2321_v46 = vpop.f32.mrf.mxu2  ;;  %v2410_v31 = vpop.f32.mrf.mxu3  ;;  %2508 = vmatmul.bf16.gmra.mxu0 %v8020_v40  ;;  %2597 = vmatmul.bf16.gmra.mxu1 %v8020_v40 }
 0x2b5   : > { %v2322_v4 = vadd.f32 %v2321_v46, %v8142_v19  ;;  %v2411_v62 = vadd.f32 %v2410_v31, %v8144_v25  ;;  %v2080_v52 = vadd.f32 %v2048_v41, %v8121_v47 }
 0x2b6   : > { %v1890_v18 = vmin.f32 %v1858_v28, 20.0  ;;  %v1922_v28 = vld [vmem:[%s7709_s30 + $0xa0] sm:$0xff] }
 0x2b7   : > { %v6150_v58 = vmul.f32 -1.442695, %v2322_v4  ;;  %v6151_v33 = vmul.f32 -1.442695, %v2411_v62 }
 0x2b8   : > { %v1954_v32 = vmul.f32 0.5, %v1890_v18  ;;  %5280 = vst [vmem:[%s7952_s23 + $0xa0] sm:$0xff] %v1890_v18 }
 0x2b9   : > { %6610 = vpow2.f32 %v6150_v58  ;;  %v1721_v9 = vpop.f32.mrf.mxu0  ;;  %v1810_v17 = vpop.f32.mrf.mxu1 }
 0x2ba   : > { %v6609_v42 = vpop.eup %6608  ;;  %6612 = vpow2.f32 %v6151_v33  ;;  %v8160_v40 = vadd.f32 %v1721_v9, %v7938_v36  ;;  %v1811_v3 = vadd.f32 %v1810_v17, %v7940_v61  ;;  %v2006_v34 = vmul.f32 1.442695, %v1954_v32 }
 0x2bb   : > { %v2049_v16 = vmul.f32 %v6609_v42, %v1921_v39 }
 0x2bc   : > { %5249 = vst [vmem:[%s7947_s22 + $0xa8] sm:$0xff] %v8160_v40  ;;  %v1859_v24 = vmax.f32 %v1811_v3, -30.0  ;;  %v2323_v30 = vpop.f32.mrf.mxu2  ;;  %v2412_v43 = vpop.f32.mrf.mxu3  ;;  %6614 = vpow2.f32 %v2006_v34 }
 0x2bd   : > { %v2324_v59 = vadd.f32 %v2323_v30, %v8142_v19  ;;  %v2413_v51 = vadd.f32 %v2412_v43, %v8144_v25  ;;  %v2081_v23 = vadd.f32 %v2049_v16, %v1717_v1 }
 0x2be   : > { %v1891_v2 = vmin.f32 %v1859_v24, 20.0 }
 0x2bf   : > { %v6611_v56 = vpop.eup %6610  ;;  %v6154_v48 = vmul.f32 -1.442695, %v2324_v59  ;;  %v8168_v50 = vpack.c.bf16 %v2081_v23, %v2080_v52  ;;  %v6155_v55 = vmul.f32 -1.442695, %v2413_v51 }
 0x2c0   : > { %v6613_v20 = vpop.eup %6612  ;;  %v8170_v12 = vadd.f32 1.0, %v6611_v56  ;;  %5281 = vst [vmem:[%s7952_s23 + $0xa8] sm:$0xff] %v1891_v2  ;;  %v1955_v22 = vmul.f32 0.5, %v1891_v2 }
 0x2c1   : > { %v8173_v29 = vadd.f32 1.0, %v6613_v20  ;;  %6616 = vpow2.f32 %v6154_v48  ;;  %v1724_v57 = vpop.f32.mrf.mxu0  ;;  %v1813_v53 = vpop.f32.mrf.mxu1  ;;  %2365 = vmatmul.bf16.gmra.mxu2 %v8168_v50  ;;  %2454 = vmatmul.bf16.gmra.mxu3 %v8168_v50 }
 0x2c2   : > { %6618 = vrcp.f32 %v8170_v12  ;;  %v3189_v1 = vand.u32 2147483647, %v8170_v12  ;;  %v3191_v8 = vand.u32 2147483648, %v8170_v12  ;;  %v8184_v5 = vadd.f32 %v1724_v57, %v7938_v36  ;;  %v6615_v7 = vpop.eup %6614 }
 0x2c3   : > { %6620 = vrcp.f32 %v8173_v29  ;;  %v1814_v6 = vadd.f32 %v1813_v53, %v7940_v61  ;;  %v3204_v35 = vand.u32 2147483647, %v8173_v29  ;;  %vm3185_vm0 = vweird.f32 %v8170_v12 }
 0x2c4   : > { %6622 = vpow2.f32 %v6155_v55  ;;  %v2326_v47 = vpop.f32.mrf.mxu2  ;;  %v2415_v63 = vpop.f32.mrf.mxu3  ;;  %2513 = vmatmul.bf16.gmra.mxu0 %v8043_v37  ;;  %2602 = vmatmul.bf16.gmra.mxu1 %v8043_v37  ;;  %5250 = vst [vmem:[%s7947_s22 + $0xb0] sm:$0xff] %v8184_v5  ;;  %vm3200_vm1 = vweird.f32 %v8173_v29  ;;  %v3206_v0 = vand.u32 2147483648, %v8173_v29  ;;  %vm8199_vm2 = vcmp.eq.f32.partialorder %v3189_v1, 8.507059e+37 }
 0x2c5   : > { %v2327_v10 = vadd.f32 %v2326_v47, %v8142_v19  ;;  %v1860_v37 = vmax.f32 %v1814_v6, -30.0  ;;  %v2416_v38 = vadd.f32 %v2415_v63, %v8144_v25  ;;  %v3192_v62 = vor.u32 1.1754944e-38, %v3191_v8 }
 0x2c6   : > { %vm8204_vm3 = vcmp.eq.f32.partialorder %v3204_v35, 8.507059e+37  ;;  %v2008_v39 = vmul.f32 1.442695, %v1955_v22  ;;  %v2050_v42 = vmul.f32 %v6615_v7, %v1922_v28  ;;  %v3207_v51 = vor.u32 1.1754944e-38, %v3206_v0 }
 0x2c7   : > { %v6617_v26 = vpop.eup %6616  ;;  %v6158_v60 = vmul.f32 -1.442695, %v2327_v10  ;;  %v1892_v15 = vmin.f32 %v1860_v37, 20.0  ;;  %v6159_v41 = vmul.f32 -1.442695, %v2416_v38 }
 0x2c8   : > { %v6619_v14 = vpop.eup %6618  ;;  %v8195_v44 = vadd.f32 1.0, %v6617_v26  ;;  %v8223_v2 = vadd.f32 %v2050_v42, %v8147_v27 }
 0x2c9   : > { %v6621_v46 = vpop.eup %6620  ;;  %v3181_v31 = vmul.f32 %v6619_v14, %v8170_v12  ;;  %v1726_v18 = vpop.f32.mrf.mxu0  ;;  %5282 = vst [vmem:[%s7952_s23 + $0xb0] sm:$0xff] %v1892_v15  ;;  %vm3186_vm4 = vweird.f32 %v6619_v14  ;;  %v1956_v20 = vmul.f32 0.5, %v1892_v15 }
 0x2ca   : > { %v1815_v13 = vpop.f32.mrf.mxu1  ;;  %v6623_v58 = vpop.eup %6622  ;;  %v3196_v33 = vmul.f32 %v6621_v46, %v8173_v29  ;;  %6624 = vrcp.f32 %v8195_v44  ;;  %v8213_v16 = vadd.f32 %v1726_v18, %v7938_v36  ;;  %v3249_v24 = vand.u32 2147483647, %v8195_v44  ;;  %vm3187_vm6 = vmor %vm3185_vm0, %vm3186_vm4 }
 0x2cb   : > { %v3182_v9 = vsub.f32 1.0, %v3181_v31  ;;  %v8209_v17 = vadd.f32 1.0, %v6623_v58  ;;  %6626 = vpow2.f32 %v6158_v60  ;;  %v3251_v30 = vand.u32 2147483648, %v8195_v44 }
 0x2cc   : > { %v3197_v3 = vsub.f32 1.0, %v3196_v33  ;;  %v2328_v43 = vpop.f32.mrf.mxu2  ;;  %vm3201_vm5 = vweird.f32 %v6621_v46  ;;  %5251 = vst [vmem:[%s7947_s22 + $0xb8] sm:$0xff] %v8213_v16  ;;  %v1816_v23 = vadd.f32 %v1815_v13, %v7940_v61  ;;  %vm3245_vm7 = vweird.f32 %v8195_v44  ;;  %v2417_v57 = vpop.f32.mrf.mxu3 }
 0x2cd   : > { %v3183_v34 = vmul.f32 %v6619_v14, %v3182_v9  ;;  %6628 = vrcp.f32 %v8209_v17  ;;  %v2329_v55 = vadd.f32 %v2328_v43, %v8142_v19  ;;  %vm8235_vm8 = vmor %vm3200_vm1, %vm3201_vm5  ;;  %vm8241_vm9 = vcmp.eq.f32.partialorder %v3249_v24, 8.507059e+37 }
 0x2ce   : > { %v3198_v59 = vmul.f32 %v6621_v46, %v3197_v3  ;;  %6630 = vpow2.f32 %v2008_v39  ;;  %v3252_v63 = vor.u32 1.1754944e-38, %v3251_v30  ;;  %v3264_v1 = vand.u32 2147483647, %v8209_v17 }
 0x2cf   : > { %v3184_v52 = vadd.f32 %v6619_v14, %v3183_v34  ;;  %6632 = vpow2.f32 %v6159_v41  ;;  %v1861_v35 = vmax.f32 %v1816_v23, -30.0  ;;  %v6162_v22 = vmul.f32 -1.442695, %v2329_v55 }
 0x2d0   : > { %v8225_v56 = vpop.eup %6624  ;;  %v3199_v48 = vadd.f32 %v6621_v46, %v3198_v59  ;;  %v2418_v0 = vadd.f32 %v2417_v57, %v8144_v25  ;;  %v2010_v15 = vmul.f32 1.442695, %v1956_v20  ;;  %vm3260_vm11 = vweird.f32 %v8209_v17 }
 0x2d1   : > { %v3188_v53 = vsel %vm3187_vm6, %v6619_v14, %v3184_v52  ;;  %v3241_v12 = vmul.f32 %v8225_v56, %v8195_v44  ;;  %v1729_v8 = vpop.f32.mrf.mxu0  ;;  %v6627_v6 = vpop.eup %6626  ;;  %v1893_v31 = vmin.f32 %v1861_v35, 20.0  ;;  %6634 = vpow2.f32 %v6162_v22 }
 0x2d2   : > { %v3193_v7 = vsel %vm8199_vm2, %v3192_v62, %v3188_v53  ;;  %v3203_v29 = vsel %vm8235_vm8, %v6621_v46, %v3199_v48  ;;  %v1818_v10 = vpop.f32.mrf.mxu1  ;;  %v8257_v14 = vadd.f32 1.0, %v6627_v6  ;;  %v3266_v46 = vand.u32 2147483648, %v8209_v17 }
 0x2d3   : > { %v6629_v26 = vpop.eup %6628  ;;  %5100 = vst [vmem:[%s8252_s2] sm:$0xff] %v3193_v7  ;;  %v3208_v37 = vsel %vm8204_vm3, %v3207_v51, %v3203_v29  ;;  %v3242_v38 = vsub.f32 1.0, %v3241_v12  ;;  %vm3246_vm10 = vweird.f32 %v8225_v56  ;;  %vm8269_vm12 = vcmp.eq.f32.partialorder %v3264_v1, 8.507059e+37  ;;  %v1923_v51 = vld [vmem:[%s7709_s30 + $0xa8] sm:$0xff] }
 0x2d4   : > { %v6631_v60 = vpop.eup %6630  ;;  %5101 = vst [vmem:[%s8252_s2 + $0x8] sm:$0xff] %v3208_v37  ;;  %v3256_v28 = vmul.f32 %v6629_v26, %v8209_v17  ;;  %2518 = vmatmul.bf16.gmra.mxu0 %v8064_v21  ;;  %2607 = vmatmul.bf16.gmra.mxu1 %v8064_v21  ;;  %6636 = vrcp.f32 %v8257_v14  ;;  %v1957_v33 = vmul.f32 0.5, %v1893_v31  ;;  %v6163_v32 = vmul.f32 -1.442695, %v2418_v0  ;;  %v2331_v9 = vpop.f32.mrf.mxu2  ;;  %vm3247_vm13 = vmor %vm3245_vm7, %vm3246_vm10 }
 0x2d5   : > { %v6633_v4 = vpop.eup %6632  ;;  %v3243_v62 = vmul.f32 %v8225_v56, %v3242_v38  ;;  %5283 = vst [vmem:[%s7952_s23 + $0xb8] sm:$0xff] %v1893_v31  ;;  %v8278_v39 = vadd.f32 %v1729_v8, %v7938_v36  ;;  %vm3261_vm14 = vweird.f32 %v6629_v26  ;;  %v3309_v42 = vand.u32 2147483647, %v8257_v14  ;;  %v2420_v52 = vpop.f32.mrf.mxu3 }
 0x2d6   : > { %v3257_v18 = vsub.f32 1.0, %v3256_v28  ;;  %v8273_v58 = vadd.f32 1.0, %v6633_v4  ;;  %v3267_v34 = vor.u32 1.1754944e-38, %v3266_v46  ;;  %v3311_v24 = vand.u32 2147483648, %v8257_v14  ;;  %vm3262_vm15 = vmor %vm3260_vm11, %vm3261_vm14 }
 0x2d7   : > { %v3244_v21 = vadd.f32 %v8225_v56, %v3243_v62  ;;  %5252 = vst [vmem:[%s7947_s22 + $0xc0] sm:$0xff] %v8278_v39  ;;  %v6635_v30 = vpop.eup %6634  ;;  %v1819_v59 = vadd.f32 %v1818_v10, %v7940_v61  ;;  %vm3305_vm0 = vweird.f32 %v8257_v14  ;;  %v2012_v48 = vmul.f32 1.442695, %v1957_v33 }
 0x2d8   : > { %v3258_v41 = vmul.f32 %v6629_v26, %v3257_v18  ;;  %6638 = vrcp.f32 %v8273_v58  ;;  %v8298_v20 = vadd.f32 1.0, %v6635_v30  ;;  %vm8301_vm1 = vcmp.eq.f32.partialorder %v3309_v42, 8.507059e+37 }
 0x2d9   : > { %v3248_v3 = vsel %vm3247_vm13, %v8225_v56, %v3244_v21  ;;  %6640 = vpow2.f32 %v2010_v15  ;;  %v3324_v56 = vand.u32 2147483647, %v8273_v58  ;;  %v1731_v55 = vpop.f32.mrf.mxu0  ;;  %v1862_v12 = vmax.f32 %v1819_v59, -30.0 }
 0x2da   : > { %v3253_v44 = vsel %vm8241_vm9, %v3252_v63, %v3248_v3  ;;  %v3259_v43 = vadd.f32 %v6629_v26, %v3258_v41  ;;  %6642 = vpow2.f32 %v6163_v32  ;;  %v6637_v23 = vpop.eup %6636  ;;  %v1820_v47 = vpop.f32.mrf.mxu1  ;;  %v3312_v63 = vor.u32 1.1754944e-38, %v3311_v24 }
 0x2db   : > { %5104 = vst [vmem:[%s8252_s2 + $0x20] sm:$0xff] %v3253_v44  ;;  %v3301_v53 = vmul.f32 %v6637_v23, %v8257_v14  ;;  %vm3320_vm2 = vweird.f32 %v8273_v58  ;;  %6644 = vrcp.f32 %v8298_v20  ;;  %v3326_v6 = vand.u32 2147483648, %v8273_v58 }
 0x2dc   : > { %v3263_v57 = vsel %vm3262_vm15, %v6629_v26, %v3259_v43  ;;  %v1894_v7 = vmin.f32 %v1862_v12, 20.0  ;;  %v2051_v29 = vmul.f32 %v6631_v60, %v1923_v51  ;;  %vm8314_vm3 = vcmp.eq.f32.partialorder %v3324_v56, 8.507059e+37  ;;  %v2333_v62 = vpop.f32.mrf.mxu2 }
 0x2dd   : > { %v3268_v17 = vsel %vm8269_vm12, %v3267_v34, %v3263_v57  ;;  %v3302_v8 = vsub.f32 1.0, %v3301_v53  ;;  %6646 = vpow2.f32 %v2012_v48  ;;  %v2332_v26 = vadd.f32 %v2331_v9, %v8142_v19  ;;  %v2422_v14 = vpop.f32.mrf.mxu3  ;;  %v1924_v48 = vld [vmem:[%s7709_s30 + $0xb0] sm:$0xff]  ;;  %v1925_v53 = vld [vmem:[%s7709_s30 + $0xb8] sm:$0xff] }
 0x2de   : > { %v6639_v1 = vpop.eup %6638  ;;  %5105 = vst [vmem:[%s8252_s2 + $0x28] sm:$0xff] %v3268_v17  ;;  %vm3306_vm4 = vweird.f32 %v6637_v23  ;;  %v3369_v0 = vand.u32 2147483647, %v8298_v20  ;;  %v2083_v28 = vadd.f32 %v2051_v29, %v8160_v40  ;;  %v3371_v46 = vand.u32 2147483648, %v8298_v20 }
 0x2df   : > { %v8311_v35 = vpop.eup %6640  ;;  %v3316_v22 = vmul.f32 %v6639_v1, %v8273_v58  ;;  %v3303_v38 = vmul.f32 %v6637_v23, %v3302_v8  ;;  %5284 = vst [vmem:[%s7952_s23 + $0xc0] sm:$0xff] %v1894_v7  ;;  %v6166_v4 = vmul.f32 -1.442695, %v2332_v26  ;;  %v2421_v13 = vadd.f32 %v2420_v52, %v8144_v25  ;;  %vm3307_vm5 = vmor %vm3305_vm0, %vm3306_vm4 }
 0x2e0   : > { %v6643_v37 = vpop.eup %6642  ;;  %v8326_v18 = vpack.c.bf16 %v2083_v28, %v8223_v2  ;;  %v8330_v21 = vadd.f32 %v1731_v55, %v7938_v36  ;;  %vm3321_vm6 = vweird.f32 %v6639_v1  ;;  %v3327_v32 = vor.u32 1.1754944e-38, %v3326_v6 }
 0x2e1   : > { %v3317_v60 = vsub.f32 1.0, %v3316_v22  ;;  %v8323_v31 = vadd.f32 1.0, %v6643_v37  ;;  %v3304_v15 = vadd.f32 %v6637_v23, %v3303_v38  ;;  %v8332_v33 = vpop.eup %6644  ;;  %vm3365_vm7 = vweird.f32 %v8298_v20  ;;  %v1734_v44 = vpop.f32.mrf.mxu0  ;;  %vm3322_vm9 = vmor %vm3320_vm2, %vm3321_vm6 }
 0x2e2   : > { %v3361_v2 = vmul.f32 %v8332_v33, %v8298_v20  ;;  %vm8340_vm8 = vcmp.eq.f32.partialorder %v3369_v0, 8.507059e+37  ;;  %2370 = vmatmul.bf16.gmra.mxu2 %v8326_v18  ;;  %2459 = vmatmul.bf16.gmra.mxu3 %v8326_v18  ;;  %5253 = vst [vmem:[%s7947_s22 + $0xc8] sm:$0xff] %v8330_v21  ;;  %v3372_v24 = vor.u32 1.1754944e-38, %v3371_v46  ;;  %v1958_v30 = vmul.f32 0.5, %v1894_v7  ;;  %v1823_v51 = vpop.f32.mrf.mxu1 }
 0x2e3   : > { %v3318_v40 = vmul.f32 %v6639_v1, %v3317_v60  ;;  %6648 = vrcp.f32 %v8323_v31  ;;  %v3308_v9 = vsel %vm3307_vm5, %v6637_v23, %v3304_v15  ;;  %v6647_v42 = vpop.eup %6646  ;;  %vm3366_vm10 = vweird.f32 %v8332_v33 }
 0x2e4   : > { %v3313_v3 = vsel %vm8301_vm1, %v3312_v63, %v3308_v9  ;;  %2523 = vmatmul.bf16.gmra.mxu0 %v8084_v54  ;;  %2612 = vmatmul.bf16.gmra.mxu1 %v8084_v54  ;;  %v3362_v43 = vsub.f32 1.0, %v3361_v2  ;;  %6650 = vpow2.f32 %v6166_v4  ;;  %v6167_v59 = vmul.f32 -1.442695, %v2421_v13  ;;  %vm3367_vm11 = vmor %vm3365_vm7, %vm3366_vm10  ;;  %v2336_v26 = vpop.f32.mrf.mxu2 }
 0x2e5   : > { %v3319_v34 = vadd.f32 %v6639_v1, %v3318_v40  ;;  %5108 = vst [vmem:[%s8252_s2 + $0x40] sm:$0xff] %v3313_v3  ;;  %v1821_v23 = vadd.f32 %v1820_v47, %v7940_v61  ;;  %v2334_v56 = vadd.f32 %v2333_v62, %v8142_v19  ;;  %v2423_v54 = vadd.f32 %v2422_v14, %v8144_v25  ;;  %v2425_v40 = vpop.f32.mrf.mxu3 }
 0x2e6   : > { %v3363_v55 = vmul.f32 %v8332_v33, %v3362_v43  ;;  %6652 = vpow2.f32 %v6167_v59  ;;  %v8365_v57 = vadd.f32 %v1734_v44, %v7938_v36  ;;  %v1824_v63 = vadd.f32 %v1823_v51, %v7940_v61 }
 0x2e7   : > { %v3323_v52 = vsel %vm3322_vm9, %v6639_v1, %v3319_v34  ;;  %v1863_v12 = vmax.f32 %v1821_v23, -30.0  ;;  %v6170_v47 = vmul.f32 -1.442695, %v2334_v56  ;;  %v6171_v17 = vmul.f32 -1.442695, %v2423_v54 }
 0x2e8   : > { %v3328_v58 = vsel %vm8314_vm3, %v3327_v32, %v3323_v52  ;;  %v3364_v1 = vadd.f32 %v8332_v33, %v3363_v55  ;;  %v2014_v6 = vmul.f32 1.442695, %v1958_v30  ;;  %5254 = vst [vmem:[%s7947_s22 + $0xd0] sm:$0xff] %v8365_v57  ;;  %v2052_v7 = vmul.f32 %v8311_v35, %v1924_v48 }
 0x2e9   : > { %v6649_v27 = vpop.eup %6648  ;;  %5109 = vst [vmem:[%s8252_s2 + $0x48] sm:$0xff] %v3328_v58  ;;  %v1895_v29 = vmin.f32 %v1863_v12, 20.0  ;;  %6654 = vpow2.f32 %v6170_v47  ;;  %v1864_v22 = vmax.f32 %v1824_v63, -30.0  ;;  %v2053_v10 = vmul.f32 %v6647_v42, %v1925_v53  ;;  %v1736_v44 = vpop.f32.mrf.mxu0 }
 0x2ea   : > { %v3376_v8 = vmul.f32 %v6649_v27, %v8323_v31  ;;  %v6651_v37 = vpop.eup %6650  ;;  %v3368_v38 = vsel %vm3367_vm11, %v8332_v33, %v3364_v1  ;;  %v3384_v28 = vand.u32 2147483647, %v8323_v31  ;;  %6656 = vpow2.f32 %v6171_v17  ;;  %v1825_v52 = vpop.f32.mrf.mxu1 }
 0x2eb   : > { %v3373_v35 = vsel %vm8340_vm8, %v3372_v24, %v3368_v38  ;;  %v3386_v20 = vand.u32 2147483648, %v8323_v31  ;;  %v8384_v60 = vadd.f32 1.0, %v6651_v37  ;;  %5285 = vst [vmem:[%s7952_s23 + $0xc8] sm:$0xff] %v1895_v29  ;;  %v1896_v46 = vmin.f32 %v1864_v22, 20.0 }
 0x2ec   : > { %v3377_v0 = vsub.f32 1.0, %v3376_v8  ;;  %v6653_v4 = vpop.eup %6652  ;;  %5112 = vst [vmem:[%s8252_s2 + $0x60] sm:$0xff] %v3373_v35  ;;  %vm3381_vm12 = vweird.f32 %v6649_v27  ;;  %v2085_v15 = vadd.f32 %v2053_v10, %v8213_v16  ;;  %v2337_v13 = vadd.f32 %v2336_v26, %v8142_v19 }
 0x2ed   : > { %6658 = vrcp.f32 %v8384_v60  ;;  %5286 = vst [vmem:[%s7952_s23 + $0xd0] sm:$0xff] %v1896_v46  ;;  %v2084_v33 = vadd.f32 %v2052_v7, %v8184_v5  ;;  %vm3380_vm13 = vweird.f32 %v8323_v31  ;;  %v8394_v9 = vadd.f32 1.0, %v6653_v4  ;;  %v2338_v7 = vpop.f32.mrf.mxu2 }
 0x2ee   : > { %v3378_v62 = vmul.f32 %v6649_v27, %v3377_v0  ;;  %v1959_v2 = vmul.f32 0.5, %v1895_v29  ;;  %vm3382_vm14 = vmor %vm3380_vm13, %vm3381_vm12  ;;  %v3387_v14 = vor.u32 1.1754944e-38, %v3386_v20  ;;  %6660 = vpow2.f32 %v2014_v6  ;;  %v2427_v29 = vpop.f32.mrf.mxu3 }
 0x2ef   : > { %v6655_v41 = vpop.eup %6654  ;;  %v8396_v16 = vpack.c.bf16 %v2085_v15, %v2084_v33  ;;  %v6174_v42 = vmul.f32 -1.442695, %v2337_v13  ;;  %vm3385_vm15 = vcmp.eq.f32.partialorder %v3384_v28, 8.507059e+37  ;;  %6662 = vrcp.f32 %v8394_v9 }
 0x2f0   : > { %v3379_v32 = vadd.f32 %v6649_v27, %v3378_v62  ;;  %v6657_v3 = vpop.eup %6656  ;;  %v3429_v24 = vand.u32 2147483647, %v8384_v60  ;;  %v3431_v31 = vand.u32 2147483648, %v8384_v60  ;;  %v8401_v30 = vadd.f32 1.0, %v6655_v41 }
 0x2f1   : > { %v2016_v43 = vmul.f32 1.442695, %v1959_v2  ;;  %v8404_v59 = vadd.f32 1.0, %v6657_v3  ;;  %6664 = vpow2.f32 %v6174_v42  ;;  %v2426_v51 = vadd.f32 %v2425_v40, %v8144_v25  ;;  %v1739_v2 = vpop.f32.mrf.mxu0 }
 0x2f2   : > { %v3383_v34 = vsel %vm3382_vm14, %v6649_v27, %v3379_v32  ;;  %2375 = vmatmul.bf16.gmra.mxu2 %v8396_v16  ;;  %2464 = vmatmul.bf16.gmra.mxu3 %v8396_v16  ;;  %v3444_v56 = vand.u32 2147483647, %v8394_v9  ;;  %v3446_v54 = vand.u32 2147483648, %v8394_v9  ;;  %6666 = vrcp.f32 %v8401_v30 }
 0x2f3   : > { %v3388_v5 = vsel %vm3385_vm15, %v3387_v14, %v3383_v34  ;;  %v6659_v23 = vpop.eup %6658  ;;  %v1960_v48 = vmul.f32 0.5, %v1896_v46  ;;  %6668 = vrcp.f32 %v8404_v59  ;;  %vm3425_vm0 = vweird.f32 %v8384_v60  ;;  %v1828_v34 = vpop.f32.mrf.mxu1 }
 0x2f4   : > { %5113 = vst [vmem:[%s8252_s2 + $0x68] sm:$0xff] %v3388_v5  ;;  %2528 = vmatmul.bf16.gmra.mxu0 %v8099_v45  ;;  %2617 = vmatmul.bf16.gmra.mxu1 %v8099_v45  ;;  %v3421_v58 = vmul.f32 %v6659_v23, %v8384_v60  ;;  %v8416_v55 = vpop.eup %6660  ;;  %vm8419_vm1 = vcmp.eq.f32.partialorder %v3429_v24, 8.507059e+37  ;;  %v3432_v27 = vor.u32 1.1754944e-38, %v3431_v31  ;;  %vm3440_vm2 = vweird.f32 %v8394_v9 }
 0x2f5   : > { %v6663_v12 = vpop.eup %6662  ;;  %6670 = vpow2.f32 %v2016_v43  ;;  %v3489_v45 = vand.u32 2147483647, %v8401_v30  ;;  %v6175_v17 = vmul.f32 -1.442695, %v2426_v51  ;;  %vm3426_vm3 = vweird.f32 %v6659_v23 }
 0x2f6   : > { %v3422_v47 = vsub.f32 1.0, %v3421_v58  ;;  %v3436_v63 = vmul.f32 %v6663_v12, %v8394_v9  ;;  %vm8426_vm4 = vcmp.eq.f32.partialorder %v3444_v56, 8.507059e+37  ;;  %v3447_v8 = vor.u32 1.1754944e-38, %v3446_v54  ;;  %vm3427_vm7 = vmor %vm3425_vm0, %vm3426_vm3 }
 0x2f7   : > { %v2018_v6 = vmul.f32 1.442695, %v1960_v48  ;;  %v6665_v22 = vpop.eup %6664  ;;  %vm3485_vm5 = vweird.f32 %v8401_v30  ;;  %6672 = vpow2.f32 %v6175_v17  ;;  %v8432_v26 = vadd.f32 %v1736_v44, %v7938_v36 }
 0x2f8   : > { %v3423_v10 = vmul.f32 %v6659_v23, %v3422_v47  ;;  %v1826_v37 = vadd.f32 %v1825_v52, %v7940_v61  ;;  %v6667_v38 = vpop.eup %6666  ;;  %v3437_v0 = vsub.f32 1.0, %v3436_v63  ;;  %v3491_v28 = vand.u32 2147483648, %v8401_v30  ;;  %v2341_v47 = vpop.f32.mrf.mxu2 }
 0x2f9   : > { %v3504_v35 = vand.u32 2147483647, %v8404_v59  ;;  %v8437_v20 = vadd.f32 1.0, %v6665_v22  ;;  %v8439_v46 = vpop.eup %6668  ;;  %v3481_v62 = vmul.f32 %v6667_v38, %v8401_v30  ;;  %vm8442_vm6 = vcmp.eq.f32.partialorder %v3489_v45, 8.507059e+37  ;;  %5255 = vst [vmem:[%s7947_s22 + $0xd8] sm:$0xff] %v8432_v26  ;;  %v2430_v45 = vpop.f32.mrf.mxu3 }
 0x2fa   : > { %v3424_v4 = vadd.f32 %v6659_v23, %v3423_v10  ;;  %v1865_v13 = vmax.f32 %v1826_v37, -30.0  ;;  %v2339_v33 = vadd.f32 %v2338_v7, %v8142_v19  ;;  %v3438_v40 = vmul.f32 %v6663_v12, %v3437_v0 }
 0x2fb   : > { %vm3441_vm8 = vweird.f32 %v6663_v12  ;;  %v3496_v32 = vmul.f32 %v8439_v46, %v8404_v59  ;;  %6674 = vrcp.f32 %v8437_v20  ;;  %v8455_v41 = vpop.eup %6670  ;;  %v3482_v42 = vsub.f32 1.0, %v3481_v62 }
 0x2fc   : > { %v3428_v14 = vsel %vm3427_vm7, %v6659_v23, %v3424_v4  ;;  %v3506_v3 = vand.u32 2147483648, %v8404_v59  ;;  %6676 = vpow2.f32 %v2018_v6  ;;  %v3439_v5 = vadd.f32 %v6663_v12, %v3438_v40  ;;  %vm3442_vm9 = vmor %vm3440_vm2, %vm3441_vm8  ;;  %v1741_v4 = vpop.f32.mrf.mxu0 }
 0x2fd   : > { %v3433_v60 = vsel %vm8419_vm1, %v3432_v27, %v3428_v14  ;;  %v3497_v24 = vsub.f32 1.0, %v3496_v32  ;;  %v2428_v31 = vadd.f32 %v2427_v29, %v8144_v25  ;;  %v6673_v44 = vpop.eup %6672  ;;  %v3483_v43 = vmul.f32 %v6667_v38, %v3482_v42  ;;  %v1927_v29 = vld [vmem:[%s7709_s30 + $0xc8] sm:$0xff] }
 0x2fe   : > { %5116 = vst [vmem:[%s8252_s2 + $0x80] sm:$0xff] %v3433_v60  ;;  %vm3486_vm10 = vweird.f32 %v6667_v38  ;;  %v1897_v51 = vmin.f32 %v1865_v13, 20.0  ;;  %v6178_v52 = vmul.f32 -1.442695, %v2339_v33  ;;  %v3443_v23 = vsel %vm3442_vm9, %v6663_v12, %v3439_v5  ;;  %v1830_v13 = vpop.f32.mrf.mxu1 }
 0x2ff   : > { %v3498_v56 = vmul.f32 %v8439_v46, %v3497_v24  ;;  %vm3501_vm11 = vweird.f32 %v8439_v46  ;;  %v8467_v54 = vadd.f32 1.0, %v6673_v44  ;;  %v3448_v48 = vsel %vm8426_vm4, %v3447_v8, %v3443_v23  ;;  %vm3487_vm12 = vmor %vm3485_vm5, %vm3486_vm10  ;;  %v1926_v8 = vld [vmem:[%s7709_s30 + $0xc0] sm:$0xff] }
 0x300   : > { %v3484_v58 = vadd.f32 %v6667_v38, %v3483_v43  ;;  %v3549_v53 = vand.u32 2147483647, %v8437_v20  ;;  %5287 = vst [vmem:[%s7952_s23 + $0xd8] sm:$0xff] %v1897_v51  ;;  %6678 = vpow2.f32 %v6178_v52  ;;  %v3492_v27 = vor.u32 1.1754944e-38, %v3491_v28 }
 0x301   : > { %v6675_v9 = vpop.eup %6674  ;;  %5117 = vst [vmem:[%s8252_s2 + $0x88] sm:$0xff] %v3448_v48  ;;  %v3499_v12 = vadd.f32 %v8439_v46, %v3498_v56  ;;  %vm3500_vm13 = vweird.f32 %v8404_v59  ;;  %6680 = vrcp.f32 %v8467_v54  ;;  %vm3505_vm15 = vcmp.eq.f32.partialorder %v3504_v35, 8.507059e+37  ;;  %v2432_v52 = vpop.f32.mrf.mxu3 }
 0x302   : > { %v8479_v17 = vpop.eup %6676  ;;  %v3488_v63 = vsel %vm3487_vm12, %v6667_v38, %v3484_v58  ;;  %vm3502_vm14 = vmor %vm3500_vm13, %vm3501_vm11  ;;  %v3507_v30 = vor.u32 1.1754944e-38, %v3506_v3  ;;  %v3541_v1 = vmul.f32 %v6675_v9, %v8437_v20  ;;  %vm3545_vm0 = vweird.f32 %v8437_v20 }
 0x303   : > { %v3493_v59 = vsel %vm8442_vm6, %v3492_v27, %v3488_v63  ;;  %v3503_v6 = vsel %vm3502_vm14, %v8439_v46, %v3499_v12  ;;  %v3551_v7 = vand.u32 2147483648, %v8437_v20  ;;  %vm8494_vm1 = vcmp.eq.f32.partialorder %v3549_v53, 8.507059e+37 }
 0x304   : > { %2533 = vmatmul.bf16.gmra.mxu0 %v8115_v49  ;;  %2622 = vmatmul.bf16.gmra.mxu1 %v8115_v49  ;;  %5120 = vst [vmem:[%s8252_s2 + $0xa0] sm:$0xff] %v3493_v59  ;;  %v3508_v22 = vsel %vm3505_vm15, %v3507_v30, %v3503_v6  ;;  %v3542_v10 = vsub.f32 1.0, %v3541_v1  ;;  %v6179_v38 = vmul.f32 -1.442695, %v2428_v31  ;;  %v1961_v0 = vmul.f32 0.5, %v1897_v51  ;;  %v2343_v51 = vpop.f32.mrf.mxu2  ;;  %v1744_v1 = vpop.f32.mrf.mxu0 }
 0x305   : > { %5121 = vst [vmem:[%s8252_s2 + $0xa8] sm:$0xff] %v3508_v22  ;;  %v8500_v28 = vadd.f32 %v1739_v2, %v7938_v36  ;;  %v1829_v35 = vadd.f32 %v1828_v34, %v7940_v61  ;;  %v2054_v46 = vmul.f32 %v8416_v55, %v1926_v8  ;;  %vm3546_vm2 = vweird.f32 %v6675_v9 }
 0x306   : > { %v6679_v49 = vpop.eup %6678  ;;  %v3543_v62 = vmul.f32 %v6675_v9, %v3542_v10  ;;  %6682 = vpow2.f32 %v6179_v38  ;;  %v2055_v15 = vmul.f32 %v8455_v41, %v1927_v29  ;;  %v2342_v14 = vadd.f32 %v2341_v47, %v8142_v19  ;;  %vm3547_vm3 = vmor %vm3545_vm0, %vm3546_vm2 }
 0x307   : > { %v6681_v33 = vpop.eup %6680  ;;  %v8505_v40 = vadd.f32 1.0, %v6679_v49  ;;  %5256 = vst [vmem:[%s7947_s22 + $0xe0] sm:$0xff] %v8500_v28  ;;  %v1866_v32 = vmax.f32 %v1829_v35, -30.0  ;;  %v2086_v2 = vadd.f32 %v2054_v46, %v8278_v39  ;;  %v2431_v34 = vadd.f32 %v2430_v45, %v8144_v25 }
 0x308   : > { %v3544_v42 = vadd.f32 %v6675_v9, %v3543_v62  ;;  %v3556_v55 = vmul.f32 %v6681_v33, %v8467_v54  ;;  %v2087_v3 = vadd.f32 %v2055_v15, %v8330_v21  ;;  %v3552_v41 = vor.u32 1.1754944e-38, %v3551_v7  ;;  %v1833_v7 = vpop.f32.mrf.mxu1 }
 0x309   : > { %v3564_v60 = vand.u32 2147483647, %v8467_v54  ;;  %v3566_v5 = vand.u32 2147483648, %v8467_v54  ;;  %6684 = vrcp.f32 %v8505_v40  ;;  %v1898_v31 = vmin.f32 %v1866_v32, 20.0 }
 0x30a   : > { %v3548_v39 = vsel %vm3547_vm3, %v6675_v9, %v3544_v42  ;;  %v3557_v24 = vsub.f32 1.0, %v3556_v55  ;;  %v8519_v44 = vpack.c.bf16 %v2087_v3, %v2086_v2  ;;  %vm3561_vm4 = vweird.f32 %v6681_v33 }
 0x30b   : > { %v3553_v21 = vsel %vm8494_vm1, %v3552_v41, %v3548_v39  ;;  %v2020_v20 = vmul.f32 1.442695, %v1961_v0  ;;  %v6182_v43 = vmul.f32 -1.442695, %v2342_v14  ;;  %v1962_v48 = vmul.f32 0.5, %v1898_v31  ;;  %5288 = vst [vmem:[%s7952_s23 + $0xe0] sm:$0xff] %v1898_v31 }
 0x30c   : > { %v6683_v23 = vpop.eup %6682  ;;  %5124 = vst [vmem:[%s8252_s2 + $0xc0] sm:$0xff] %v3553_v21  ;;  %v3558_v56 = vmul.f32 %v6681_v33, %v3557_v24  ;;  %2380 = vmatmul.bf16.gmra.mxu2 %v8519_v44  ;;  %2469 = vmatmul.bf16.gmra.mxu3 %v8519_v44  ;;  %v6183_v58 = vmul.f32 -1.442695, %v2431_v34  ;;  %v8527_v53 = vadd.f32 %v1741_v4, %v7938_v36  ;;  %vm3560_vm5 = vweird.f32 %v8467_v54  ;;  %v1929_v41 = vld [vmem:[%s7709_s30 + $0xd8] sm:$0xff]  ;;  %v1928_v21 = vld [vmem:[%s7709_s30 + $0xd0] sm:$0xff] }
 0x30d   : > { %v8530_v9 = vadd.f32 1.0, %v6683_v23  ;;  %6686 = vpow2.f32 %v6182_v43  ;;  %v1831_v27 = vadd.f32 %v1830_v13, %v7940_v61  ;;  %v2344_v47 = vadd.f32 %v2343_v51, %v8142_v19  ;;  %vm3562_vm6 = vmor %vm3560_vm5, %vm3561_vm4 }
 0x30e   : > { %v3559_v12 = vadd.f32 %v6681_v33, %v3558_v56  ;;  %6688 = vpow2.f32 %v6183_v58  ;;  %5257 = vst [vmem:[%s7947_s22 + $0xe8] sm:$0xff] %v8527_v53  ;;  %v2433_v45 = vadd.f32 %v2432_v52, %v8144_v25  ;;  %vm3565_vm7 = vcmp.eq.f32.partialorder %v3564_v60, 8.507059e+37 }
 0x30f   : > { %v6685_v63 = vpop.eup %6684  ;;  %v3567_v54 = vor.u32 1.1754944e-38, %v3566_v5  ;;  %6690 = vrcp.f32 %v8530_v9  ;;  %v2022_v30 = vmul.f32 1.442695, %v1962_v48  ;;  %v3609_v6 = vand.u32 2147483647, %v8505_v40 }
 0x310   : > { %v3563_v8 = vsel %vm3562_vm6, %v6681_v33, %v3559_v12  ;;  %6692 = vpow2.f32 %v2020_v20  ;;  %v3601_v59 = vmul.f32 %v6685_v63, %v8505_v40  ;;  %v3611_v22 = vand.u32 2147483648, %v8505_v40  ;;  %v2346_v20 = vpop.f32.mrf.mxu2 }
 0x311   : > { %v3568_v29 = vsel %vm3565_vm7, %v3567_v54, %v3563_v8  ;;  %v3624_v10 = vand.u32 2147483647, %v8530_v9  ;;  %v1867_v37 = vmax.f32 %v1831_v27, -30.0  ;;  %v6186_v0 = vmul.f32 -1.442695, %v2344_v47 }
 0x312   : > { %5125 = vst [vmem:[%s8252_s2 + $0xc8] sm:$0xff] %v3568_v29  ;;  %v3602_v38 = vsub.f32 1.0, %v3601_v59  ;;  %v6187_v35 = vmul.f32 -1.442695, %v2433_v45  ;;  %v8546_v46 = vadd.f32 %v1744_v1, %v7938_v36  ;;  %v3626_v49 = vand.u32 2147483648, %v8530_v9 }
 0x313   : > { %v6687_v4 = vpop.eup %6686  ;;  %6694 = vpow2.f32 %v2022_v30  ;;  %v1899_v62 = vmin.f32 %v1867_v37, 20.0  ;;  %v1834_v15 = vadd.f32 %v1833_v7, %v7940_v61  ;;  %vm3606_vm8 = vweird.f32 %v6685_v63  ;;  %v2435_v30 = vpop.f32.mrf.mxu3 }
 0x314   : > { %2538 = vmatmul.bf16.gmra.mxu0 %v8137_v11  ;;  %2627 = vmatmul.bf16.gmra.mxu1 %v8137_v11  ;;  %v6689_v13 = vpop.eup %6688  ;;  %v3603_v33 = vmul.f32 %v6685_v63, %v3602_v38  ;;  %v8552_v32 = vadd.f32 1.0, %v6687_v4  ;;  %6696 = vpow2.f32 %v6186_v0  ;;  %5258 = vst [vmem:[%s7947_s22 + $0xf0] sm:$0xff] %v8546_v46  ;;  %vm3605_vm9 = vweird.f32 %v8505_v40 }
 0x315   : > { %v6691_v2 = vpop.eup %6690  ;;  %vm8557_vm10 = vcmp.eq.f32.partialorder %v3609_v6, 8.507059e+37  ;;  %v8561_v42 = vadd.f32 1.0, %v6689_v13  ;;  %5289 = vst [vmem:[%s7952_s23 + $0xe8] sm:$0xff] %v1899_v62  ;;  %6698 = vpow2.f32 %v6187_v35  ;;  %v1868_v34 = vmax.f32 %v1834_v15, -30.0  ;;  %vm3607_vm11 = vmor %vm3605_vm9, %vm3606_vm8  ;;  %v1746_v35 = vpop.f32.mrf.mxu0 }
 0x316   : > { %v6693_v11 = vpop.eup %6692  ;;  %v3604_v55 = vadd.f32 %v6685_v63, %v3603_v33  ;;  %v3616_v3 = vmul.f32 %v6691_v2, %v8530_v9  ;;  %6700 = vrcp.f32 %v8552_v32  ;;  %v3612_v40 = vor.u32 1.1754944e-38, %v3611_v22 }
 0x317   : > { %vm3620_vm12 = vweird.f32 %v8530_v9  ;;  %vm8569_vm13 = vcmp.eq.f32.partialorder %v3624_v10, 8.507059e+37  ;;  %6702 = vrcp.f32 %v8561_v42  ;;  %v3627_v24 = vor.u32 1.1754944e-38, %v3626_v49 }
 0x318   : > { %v3608_v5 = vsel %vm3607_vm11, %v6685_v63, %v3604_v55  ;;  %v3617_v39 = vsub.f32 1.0, %v3616_v3  ;;  %v1963_v31 = vmul.f32 0.5, %v1899_v62  ;;  %v3669_v52 = vand.u32 2147483647, %v8552_v32  ;;  %v1835_v3 = vpop.f32.mrf.mxu1 }
 0x319   : > { %v8575_v43 = vpop.eup %6694  ;;  %v3613_v51 = vsel %vm8557_vm10, %v3612_v40, %v3608_v5  ;;  %v3671_v23 = vand.u32 2147483648, %v8552_v32  ;;  %v2057_v56 = vmul.f32 %v6693_v11, %v1929_v41  ;;  %vm3621_vm14 = vweird.f32 %v6691_v2 }
 0x31a   : > { %v6697_v48 = vpop.eup %6696  ;;  %5128 = vst [vmem:[%s8252_s2 + $0xe0] sm:$0xff] %v3613_v51  ;;  %v3618_v58 = vmul.f32 %v6691_v2, %v3617_v39  ;;  %v3684_v27 = vand.u32 2147483647, %v8561_v42  ;;  %v1900_v12 = vmin.f32 %v1868_v34, 20.0  ;;  %vm3665_vm15 = vweird.f32 %v8552_v32  ;;  %vm3622_vm1 = vmor %vm3620_vm12, %vm3621_vm14 }
 0x31b   : > { %v6699_v47 = vpop.eup %6698  ;;  %v8584_v45 = vadd.f32 1.0, %v6697_v48  ;;  %v2056_v63 = vmul.f32 %v8479_v17, %v1928_v21  ;;  %v2347_v54 = vadd.f32 %v2346_v20, %v8142_v19  ;;  %vm3680_vm0 = vweird.f32 %v8561_v42  ;;  %v2437_v48 = vpop.f32.mrf.mxu3 }
 0x31c   : > { %v8588_v1 = vpop.eup %6700  ;;  %v3619_v8 = vadd.f32 %v6691_v2, %v3618_v58  ;;  %v2024_v59 = vmul.f32 1.442695, %v1963_v31  ;;  %v8591_v6 = vadd.f32 1.0, %v6699_v47  ;;  %5290 = vst [vmem:[%s7952_s23 + $0xf0] sm:$0xff] %v1900_v12  ;;  %vm8601_vm2 = vcmp.eq.f32.partialorder %v3669_v52, 8.507059e+37 }
 0x31d   : > { %v8594_v7 = vpop.eup %6702  ;;  %v3661_v17 = vmul.f32 %v8588_v1, %v8552_v32  ;;  %v3672_v22 = vor.u32 1.1754944e-38, %v3671_v23  ;;  %v3686_v10 = vand.u32 2147483648, %v8561_v42  ;;  %6704 = vrcp.f32 %v8584_v45 }
 0x31e   : > { %v3623_v37 = vsel %vm3622_vm1, %v6691_v2, %v3619_v8  ;;  %v3676_v38 = vmul.f32 %v8594_v7, %v8561_v42  ;;  %vm8609_vm3 = vcmp.eq.f32.partialorder %v3684_v27, 8.507059e+37  ;;  %v2089_v0 = vadd.f32 %v2057_v56, %v8432_v26  ;;  %v2348_v56 = vpop.f32.mrf.mxu2 }
 0x31f   : > { %v3628_v4 = vsel %vm8569_vm13, %v3627_v24, %v3623_v37  ;;  %v3662_v49 = vsub.f32 1.0, %v3661_v17  ;;  %6706 = vrcp.f32 %v8591_v6  ;;  %v2088_v62 = vadd.f32 %v2056_v63, %v8365_v57  ;;  %v1931_v63 = vld [vmem:[%s7709_s30 + $0xe8] sm:$0xff] }
 0x320   : > { %5129 = vst [vmem:[%s8252_s2 + $0xe8] sm:$0xff] %v3628_v4  ;;  %v3677_v15 = vsub.f32 1.0, %v3676_v38  ;;  %6708 = vpow2.f32 %v2024_v59  ;;  %v3729_v13 = vand.u32 2147483647, %v8584_v45  ;;  %v1964_v33 = vmul.f32 0.5, %v1900_v12 }
 0x321   : > { %v3663_v2 = vmul.f32 %v8588_v1, %v3662_v49  ;;  %vm3666_vm4 = vweird.f32 %v8588_v1  ;;  %vm3681_vm5 = vweird.f32 %v8594_v7  ;;  %v3687_v26 = vor.u32 1.1754944e-38, %v3686_v10 }
 0x322   : > { %v3678_v14 = vmul.f32 %v8594_v7, %v3677_v15  ;;  %vm3725_vm6 = vweird.f32 %v8584_v45  ;;  %v3731_v11 = vand.u32 2147483648, %v8584_v45  ;;  %v8626_v57 = vpack.c.bf16 %v2089_v0, %v2088_v62  ;;  %vm8640_vm7 = vmor %vm3665_vm15, %vm3666_vm4 }
 0x323   : > { %v6190_v55 = vmul.f32 -1.442695, %v2347_v54  ;;  %v8628_v34 = vpop.eup %6704  ;;  %v3664_v41 = vadd.f32 %v8588_v1, %v3663_v2  ;;  %v3744_v40 = vand.u32 2147483647, %v8591_v6  ;;  %v3746_v60 = vand.u32 2147483648, %v8591_v6  ;;  %vm3682_vm10 = vmor %vm3680_vm0, %vm3681_vm5  ;;  %v1930_v54 = vld [vmem:[%s7709_s30 + $0xe0] sm:$0xff]  ;;  %v2440_v39 = vpop.f32.mrf.mxu3 }
 0x324   : > { %v2436_v5 = vadd.f32 %v2435_v30, %v8144_v25  ;;  %2543 = vmatmul.bf16.gmra.mxu0 %v8168_v50  ;;  %2632 = vmatmul.bf16.gmra.mxu1 %v8168_v50  ;;  %v3679_v24 = vadd.f32 %v8594_v7, %v3678_v14  ;;  %v3721_v31 = vmul.f32 %v8628_v34, %v8584_v45  ;;  %vm8647_vm8 = vcmp.eq.f32.partialorder %v3729_v13, 8.507059e+37 }
 0x325   : > { %vm3740_vm9 = vweird.f32 %v8591_v6  ;;  %v8652_v50 = vmul.f32 1.442695, %v1964_v33  ;;  %2385 = vmatmul.bf16.gmra.mxu2 %v8626_v57  ;;  %2474 = vmatmul.bf16.gmra.mxu3 %v8626_v57  ;;  %6710 = vpow2.f32 %v6190_v55  ;;  %v6707_v32 = vpop.eup %6706  ;;  %v3668_v20 = vsel %vm8640_vm7, %v8588_v1, %v3664_v41 }
 0x326   : > { %v6191_v51 = vmul.f32 -1.442695, %v2436_v5  ;;  %v8664_v52 = vadd.f32 %v1746_v35, %v7938_v36  ;;  %v1836_v23 = vadd.f32 %v1835_v3, %v7940_v61  ;;  %v6709_v58 = vpop.eup %6708  ;;  %v3673_v27 = vsel %vm8601_vm2, %v3672_v22, %v3668_v20  ;;  %v7146_v22 = vld [vmem:[%s10697_s7] sm:$0xf]  ;;  %v2351_v41 = vpop.f32.mrf.mxu2 }
 0x327   : > { %v3683_v12 = vsel %vm3682_vm10, %v8594_v7, %v3679_v24  ;;  %v3722_v47 = vsub.f32 1.0, %v3721_v31  ;;  %v3736_v42 = vmul.f32 %v6707_v32, %v8591_v6  ;;  %5132 = vst [vmem:[%s8252_s2 + $0x100] sm:$0xff] %v3673_v27  ;;  %vm3726_vm11 = vweird.f32 %v8628_v34  ;;  %v2499_v7 = vpop.f32.mrf.mxu0  ;;  %v2588_v5 = vpop.f32.mrf.mxu1 }
 0x328   : > { %v3688_v36 = vsel %vm8609_vm3, %v3687_v26, %v3683_v12  ;;  %6712 = vpow2.f32 %v6191_v51  ;;  %v1869_v61 = vmax.f32 %v1836_v23, -30.0  ;;  %v2349_v8 = vadd.f32 %v2348_v56, %v8142_v19  ;;  %5259 = vst [vmem:[%s7947_s22 + $0xf8] sm:$0xff] %v8664_v52  ;;  %vm3727_vm13 = vmor %vm3725_vm6, %vm3726_vm11  ;;  %s7341_s22 = sshra.s32 %s10127_s26, 4  ;;  %s7342_s22 = int_to_ptr.hbm [resolvable:$true] %s7341_s22 }
 0x329   : > { %5133 = vst [vmem:[%s8252_s2 + $0x108] sm:$0xff] %v3688_v36  ;;  %v3723_v30 = vmul.f32 %v8628_v34, %v3722_v47  ;;  %v3737_v1 = vsub.f32 1.0, %v3736_v42  ;;  %v2438_v59 = vadd.f32 %v2437_v48, %v8144_v25  ;;  %vm3741_vm12 = vweird.f32 %v6707_v32  ;;  %s7343_s11 = scalar_lea.hbm %s7342_s22, 256  ;;  %p7348_p2 = scmp.lt.s32.totalorder %s7342_s22, %s10699_s9 }
 0x32a   : > { %v1901_v17 = vmin.f32 %v1869_v61, 20.0  ;;  %v2059_v29 = vmul.f32 %v6709_v58, %v1931_v63  ;;  %v8686_v10 = vperm.slane %v7146_v22, 2  ;;  %v6194_v0 = vmul.f32 -1.442695, %v2349_v8  ;;  %vm3742_vm15 = vmor %vm3740_vm9, %vm3741_vm12  ;;  %p7344_p1 = scmp.ne.s32.totalorder %s7342_s22, %s7343_s11  ;;  %p7349_p10 = scmp.lt.s32.totalorder %s7347_s12, %s7343_s11 }
 0x32b   : > { %v6711_v37 = vpop.eup %6710  ;;  %v3724_v38 = vadd.f32 %v8628_v34, %v3723_v30  ;;  %v3738_v9 = vmul.f32 %v6707_v32, %v3737_v1  ;;  %v2058_v35 = vmul.f32 %v8575_v43, %v1930_v54  ;;  %v3732_v4 = vor.u32 1.1754944e-38, %v3731_v11 }
 0x32c   : > { %vm8694_vm14 = vcmp.eq.f32.partialorder %v3744_v40, 8.507059e+37  ;;  %v8698_v62 = vadd.f32 1.0, %v6711_v37  ;;  %5291 = vst [vmem:[%s7952_s23 + $0xf8] sm:$0xff] %v1901_v17  ;;  %v6195_v15 = vmul.f32 -1.442695, %v2438_v59  ;;  %6714 = vpow2.f32 %v6194_v0  ;;  %p7345_p4 = pnand %p7344_p1, %p7635_p5  ;;  %p7350_p11 = por %p7349_p10, %p7348_p2 }
 0x32d   : > { %v3728_v13 = vsel %vm3727_vm13, %v8628_v34, %v3724_v38  ;;  %v3739_v33 = vadd.f32 %v6707_v32, %v3738_v9  ;;  %v2091_v43 = vadd.f32 %v2059_v29, %v8527_v53  ;;  %v3747_v26 = vor.u32 1.1754944e-38, %v3746_v60 }
 0x32e   : > { %v6713_v2 = vpop.eup %6712  ;;  %v3733_v45 = vsel %vm8647_vm8, %v3732_v4, %v3728_v13  ;;  %6716 = vrcp.f32 %v8698_v62  ;;  %v2500_v14 = vadd.f32 %v2499_v7, %v8686_v10  ;;  %v1965_v53 = vmul.f32 0.5, %v1901_v17  ;;  %p7346_p8 = pneg %p7345_p4 }
 0x32f   : > { %5136 = vst [vmem:[%s8252_s2 + $0x120] sm:$0xff] %v3733_v45  ;;  %v3743_v11 = vsel %vm3742_vm15, %v6707_v32, %v3739_v33  ;;  %v8713_v55 = vadd.f32 1.0, %v6713_v2  ;;  %v2090_v3 = vadd.f32 %v2058_v35, %v8500_v28  ;;  %6718 = vpow2.f32 %v6195_v15  ;;  %v2501_v20 = vpop.f32.mrf.mxu0  ;;  %v2590_v13 = vpop.f32.mrf.mxu1 }
 0x330   : > { %v3748_v34 = vsel %vm8694_vm14, %v3747_v26, %v3743_v11  ;;  %v3789_v6 = vand.u32 2147483647, %v8698_v62  ;;  %v3791_v40 = vand.u32 2147483648, %v8698_v62  ;;  %v6152_v24 = vmul.f32 -1.442695, %v2500_v14  ;;  %p7351_p9 = pnand %p7350_p11, %p7346_p8 }
 0x331   : > { %5137 = vst [vmem:[%s8252_s2 + $0x128] sm:$0xff] %v3748_v34  ;;  %6720 = vrcp.f32 %v8713_v55  ;;  %v8722_v60 = vpack.c.bf16 %v2091_v43, %v2090_v3  ;;  %v8724_v31 = vperm.slane %v7146_v22, 3  ;;  %vm3785_vm0 = vweird.f32 %v8698_v62 }
 0x332   : > { %v6715_v28 = vpop.eup %6714  ;;  %6722 = vpow2.f32 %v8652_v50  ;;  %v2028_v21 = vmul.f32 1.442695, %v1965_v53  ;;  %v2352_v32 = vadd.f32 %v2351_v41, %v8142_v19  ;;  %v2441_v48 = vadd.f32 %v2440_v39, %v8144_v25 }
 0x333   : > { %v8729_v23 = vadd.f32 1.0, %v6715_v28  ;;  %6724 = vpow2.f32 %v6152_v24  ;;  %v2589_v56 = vadd.f32 %v2588_v5, %v8724_v31  ;;  %vm8736_vm1 = vcmp.eq.f32.partialorder %v3789_v6, 8.507059e+37 }
 0x334   : > { %v6717_v51 = vpop.eup %6716  ;;  %2548 = vmatmul.bf16.gmra.mxu0 %v8326_v18  ;;  %2637 = vmatmul.bf16.gmra.mxu1 %v8326_v18  ;;  %v3792_v27 = vor.u32 1.1754944e-38, %v3791_v40  ;;  %v6198_v12 = vmul.f32 -1.442695, %v2352_v32  ;;  %v3804_v42 = vand.u32 2147483647, %v8713_v55  ;;  %v3806_v63 = vand.u32 2147483648, %v8713_v55 }
 0x335   : > { %v3781_v50 = vmul.f32 %v6717_v51, %v8698_v62  ;;  %2390 = vmatmul.bf16.gmra.mxu2 %v8722_v60  ;;  %2479 = vmatmul.bf16.gmra.mxu3 %v8722_v60  ;;  %v6719_v47 = vpop.eup %6718  ;;  %6726 = vrcp.f32 %v8729_v23  ;;  %v2502_v18 = vadd.f32 %v2501_v20, %v8686_v10  ;;  %v6153_v30 = vmul.f32 -1.442695, %v2589_v56 }
 0x336   : > { %v8746_v54 = vadd.f32 1.0, %v6719_v47  ;;  %6728 = vpow2.f32 %v6198_v12  ;;  %vm3786_vm2 = vweird.f32 %v6717_v51  ;;  %v6199_v8 = vmul.f32 -1.442695, %v2441_v48 }
 0x337   : > { %v6721_v36 = vpop.eup %6720  ;;  %v3782_v61 = vsub.f32 1.0, %v3781_v50  ;;  %6730 = vpow2.f32 %v2028_v21  ;;  %v3849_v17 = vand.u32 2147483647, %v8729_v23  ;;  %v3851_v29 = vand.u32 2147483648, %v8729_v23  ;;  %vm3787_vm5 = vmor %vm3785_vm0, %vm3786_vm2 }
 0x338   : > { %v3796_v1 = vmul.f32 %v6721_v36, %v8713_v55  ;;  %v8749_v59 = vpop.eup %6722  ;;  %6732 = vrcp.f32 %v8746_v54  ;;  %vm3800_vm3 = vweird.f32 %v8713_v55  ;;  %v6156_v38 = vmul.f32 -1.442695, %v2502_v18 }
 0x339   : > { %v3783_v7 = vmul.f32 %v6717_v51, %v3782_v61  ;;  %v6725_v22 = vpop.eup %6724  ;;  %6734 = vpow2.f32 %v6153_v30  ;;  %vm8755_vm4 = vcmp.eq.f32.partialorder %v3804_v42, 8.507059e+37  ;;  %v3807_v35 = vor.u32 1.1754944e-38, %v3806_v63 }
 0x33a   : > { %v3797_v37 = vsub.f32 1.0, %v3796_v1  ;;  %v8759_v4 = vadd.f32 1.0, %v6725_v22  ;;  %vm3801_vm6 = vweird.f32 %v6721_v36  ;;  %vm3845_vm7 = vweird.f32 %v8729_v23 }
 0x33b   : > { %v3784_v9 = vadd.f32 %v6717_v51, %v3783_v7  ;;  %v6727_v49 = vpop.eup %6726  ;;  %6736 = vpow2.f32 %v6199_v8  ;;  %vm8766_vm8 = vcmp.eq.f32.partialorder %v3849_v17, 8.507059e+37  ;;  %v3852_v26 = vor.u32 1.1754944e-38, %v3851_v29  ;;  %vm3802_vm9 = vmor %vm3800_vm3, %vm3801_vm6 }
 0x33c   : > { %v3798_v15 = vmul.f32 %v6721_v36, %v3797_v37  ;;  %v6729_v33 = vpop.eup %6728  ;;  %v3841_v2 = vmul.f32 %v6727_v49, %v8729_v23  ;;  %6738 = vrcp.f32 %v8759_v4  ;;  %v3864_v53 = vand.u32 2147483647, %v8746_v54 }
 0x33d   : > { %v3788_v43 = vsel %vm3787_vm5, %v6717_v51, %v3784_v9  ;;  %v8771_v62 = vpop.eup %6730  ;;  %6740 = vpow2.f32 %v6156_v38  ;;  %v3866_v41 = vand.u32 2147483648, %v8746_v54  ;;  %v8781_v6 = vadd.f32 1.0, %v6729_v33  ;;  %v2353_v9 = vpop.f32.mrf.mxu2 }
 0x33e   : > { %v3793_v14 = vsel %vm8736_vm1, %v3792_v27, %v3788_v43  ;;  %v3799_v11 = vadd.f32 %v6721_v36, %v3798_v15  ;;  %v6733_v3 = vpop.eup %6732  ;;  %v3842_v34 = vsub.f32 1.0, %v3841_v2  ;;  %v2591_v40 = vadd.f32 %v2590_v13, %v8724_v31 }
 0x33f   : > { %5140 = vst [vmem:[%s8252_s2 + $0x140] sm:$0xff] %v3793_v14  ;;  %v6735_v5 = vpop.eup %6734  ;;  %vm3846_vm10 = vweird.f32 %v6727_v49  ;;  %v3856_v24 = vmul.f32 %v6733_v3, %v8746_v54  ;;  %v3219_v28 = vand.u32 2147483647, %v8759_v4  ;;  %v3221_v32 = vand.u32 2147483648, %v8759_v4 }
 0x340   : > { %v3803_v39 = vsel %vm3802_vm9, %v6721_v36, %v3799_v11  ;;  %v3843_v55 = vmul.f32 %v6727_v49, %v3842_v34  ;;  %v8789_v20 = vadd.f32 1.0, %v6735_v5  ;;  %vm3860_vm11 = vweird.f32 %v8746_v54  ;;  %vm3847_vm13 = vmor %vm3845_vm7, %vm3846_vm10 }
 0x341   : > { %v3808_v21 = vsel %vm8755_vm4, %v3807_v35, %v3803_v39  ;;  %v6737_v51 = vpop.eup %6736  ;;  %v3857_v56 = vsub.f32 1.0, %v3856_v24  ;;  %vm8793_vm12 = vcmp.eq.f32.partialorder %v3864_v53, 8.507059e+37  ;;  %6742 = vrcp.f32 %v8781_v6  ;;  %v2504_v39 = vpop.f32.mrf.mxu0 }
 0x342   : > { %5141 = vst [vmem:[%s8252_s2 + $0x148] sm:$0xff] %v3808_v21  ;;  %v6739_v50 = vpop.eup %6738  ;;  %v3844_v58 = vadd.f32 %v6727_v49, %v3843_v55  ;;  %v3867_v27 = vor.u32 1.1754944e-38, %v3866_v41  ;;  %6744 = vrcp.f32 %v8789_v20  ;;  %v6157_v12 = vmul.f32 -1.442695, %v2591_v40 }
 0x343   : > { %v6741_v47 = vpop.eup %6740  ;;  %v3858_v42 = vmul.f32 %v6733_v3, %v3857_v56  ;;  %vm3861_vm14 = vweird.f32 %v6733_v3  ;;  %v3211_v63 = vmul.f32 %v6739_v50, %v8759_v4  ;;  %vm3215_vm15 = vweird.f32 %v8759_v4 }
 0x344   : > { %2553 = vmatmul.bf16.gmra.mxu0 %v8396_v16  ;;  %2642 = vmatmul.bf16.gmra.mxu1 %v8396_v16  ;;  %v3848_v18 = vsel %vm3847_vm13, %v6727_v49, %v3844_v58  ;;  %vm8806_vm0 = vcmp.eq.f32.partialorder %v3219_v28, 8.507059e+37  ;;  %v3222_v61 = vor.u32 1.1754944e-38, %v3221_v32  ;;  %v3909_v23 = vand.u32 2147483647, %v8781_v6  ;;  %vm3862_vm1 = vmor %vm3860_vm11, %vm3861_vm14  ;;  %v2442_v49 = vpop.f32.mrf.mxu3 }
 0x345   : > { %v3853_v30 = vsel %vm8766_vm8, %v3852_v26, %v3848_v18  ;;  %v3859_v1 = vadd.f32 %v6733_v3, %v3858_v42  ;;  %v3212_v8 = vsub.f32 1.0, %v3211_v63  ;;  %v3234_v7 = vand.u32 2147483647, %v8789_v20  ;;  %v1933_v18 = vld [vmem:[%s7709_s30 + $0xf8] sm:$0xff] }
 0x346   : > { %5144 = vst [vmem:[%s8252_s2 + $0x160] sm:$0xff] %v3853_v30  ;;  %v3236_v16 = vand.u32 2147483648, %v8789_v20  ;;  %v8818_v17 = vadd.f32 1.0, %v6737_v51  ;;  %v8820_v29 = vadd.f32 1.0, %v6741_v47  ;;  %6746 = vpow2.f32 %v6157_v12  ;;  %v1932_v12 = vld [vmem:[%s7709_s30 + $0xf0] sm:$0xff] }
 0x347   : > { %v6743_v22 = vpop.eup %6742  ;;  %v3863_v37 = vsel %vm3862_vm1, %v6733_v3, %v3859_v1  ;;  %v3213_v38 = vmul.f32 %v6739_v50, %v3212_v8  ;;  %vm3216_vm2 = vweird.f32 %v6739_v50  ;;  %vm3905_vm3 = vweird.f32 %v8781_v6 }
 0x348   : > { %v6745_v0 = vpop.eup %6744  ;;  %v3868_v54 = vsel %vm8793_vm12, %v3867_v27, %v3863_v37  ;;  %vm3230_vm4 = vweird.f32 %v8789_v20  ;;  %v3901_v35 = vmul.f32 %v6743_v22, %v8781_v6  ;;  %6748 = vrcp.f32 %v8818_v17  ;;  %vm3217_vm7 = vmor %vm3215_vm15, %vm3216_vm2 }
 0x349   : > { %5145 = vst [vmem:[%s8252_s2 + $0x168] sm:$0xff] %v3868_v54  ;;  %v3214_v15 = vadd.f32 %v6739_v50, %v3213_v38  ;;  %v3226_v13 = vmul.f32 %v6745_v0, %v8789_v20  ;;  %vm8830_vm5 = vcmp.eq.f32.partialorder %v3234_v7, 8.507059e+37  ;;  %vm8834_vm6 = vcmp.eq.f32.partialorder %v3909_v23, 8.507059e+37  ;;  %v2593_v20 = vpop.f32.mrf.mxu1 }
 0x34a   : > { %v3911_v2 = vand.u32 2147483648, %v8781_v6  ;;  %v3237_v45 = vor.u32 1.1754944e-38, %v3236_v16  ;;  %v3902_v26 = vsub.f32 1.0, %v3901_v35  ;;  %6750 = vrcp.f32 %v8820_v29 }
 0x34b   : > { %v2354_v14 = vadd.f32 %v2353_v9, %v8142_v19  ;;  %v3218_v11 = vsel %vm3217_vm7, %v6739_v50, %v3214_v15  ;;  %v3227_v53 = vsub.f32 1.0, %v3226_v13  ;;  %v3924_v3 = vand.u32 2147483647, %v8818_v17  ;;  %v2356_v9 = vpop.f32.mrf.mxu2 }
 0x34c   : > { %v2443_v34 = vadd.f32 %v2442_v49, %v8144_v25  ;;  %v6747_v41 = vpop.eup %6746  ;;  %v3223_v40 = vsel %vm8806_vm0, %v3222_v61, %v3218_v11  ;;  %v3903_v5 = vmul.f32 %v6743_v22, %v3902_v26  ;;  %vm3906_vm8 = vweird.f32 %v6743_v22 }
 0x34d   : > { %v3926_v4 = vand.u32 2147483648, %v8818_v17  ;;  %5102 = vst [vmem:[%s8252_s2 + $0x10] sm:$0xff] %v3223_v40  ;;  %v3228_v24 = vmul.f32 %v6745_v0, %v3227_v53  ;;  %vm3231_vm9 = vweird.f32 %v6745_v0  ;;  %v3279_v28 = vand.u32 2147483647, %v8820_v29  ;;  %vm3907_vm11 = vmor %vm3905_vm3, %vm3906_vm8 }
 0x34e   : > { %v8851_v21 = vadd.f32 1.0, %v6747_v41  ;;  %v6749_v55 = vpop.eup %6748  ;;  %v3904_v32 = vadd.f32 %v6743_v22, %v3903_v5  ;;  %v3912_v51 = vor.u32 1.1754944e-38, %v3911_v2  ;;  %vm3920_vm10 = vweird.f32 %v8818_v17  ;;  %vm3232_vm14 = vmor %vm3230_vm4, %vm3231_vm9 }
 0x34f   : > { %v3281_v56 = vand.u32 2147483648, %v8820_v29  ;;  %v3229_v48 = vadd.f32 %v6745_v0, %v3228_v24  ;;  %v3916_v50 = vmul.f32 %v6749_v55, %v8818_v17  ;;  %vm8858_vm12 = vcmp.eq.f32.partialorder %v3924_v3, 8.507059e+37 }
 0x350   : > { %vm3275_vm13 = vweird.f32 %v8820_v29  ;;  %v6202_v27 = vmul.f32 -1.442695, %v2354_v14  ;;  %v6751_v47 = vpop.eup %6750  ;;  %v3908_v42 = vsel %vm3907_vm11, %v6743_v22, %v3904_v32  ;;  %v3927_v6 = vor.u32 1.1754944e-38, %v3926_v4 }
 0x351   : > { %6752 = vrcp.f32 %v8851_v21  ;;  %v6203_v63 = vmul.f32 -1.442695, %v2443_v34  ;;  %v3233_v36 = vsel %vm3232_vm14, %v6745_v0, %v3229_v48  ;;  %v3913_v61 = vsel %vm8834_vm6, %v3912_v51, %v3908_v42  ;;  %v2445_v0 = vpop.f32.mrf.mxu3  ;;  %v2595_v32 = vpop.f32.mrf.mxu1 }
 0x352   : > { %v3917_v23 = vsub.f32 1.0, %v3916_v50  ;;  %v3271_v30 = vmul.f32 %v6751_v47, %v8820_v29  ;;  %vm8872_vm15 = vcmp.eq.f32.partialorder %v3279_v28, 8.507059e+37  ;;  %v3238_v8 = vsel %vm8830_vm5, %v3237_v45, %v3233_v36  ;;  %5148 = vst [vmem:[%s8252_s2 + $0x180] sm:$0xff] %v3913_v61  ;;  %v2506_v45 = vpop.f32.mrf.mxu0 }
 0x353   : > { %vm3921_vm0 = vweird.f32 %v6749_v55  ;;  %v3282_v7 = vor.u32 1.1754944e-38, %v3281_v56  ;;  %v2060_v16 = vmul.f32 %v8749_v59, %v1932_v12  ;;  %5103 = vst [vmem:[%s8252_s2 + $0x18] sm:$0xff] %v3238_v8  ;;  %6754 = vpow2.f32 %v6202_v27 }
 0x354   : > { %v3918_v22 = vmul.f32 %v6749_v55, %v3917_v23  ;;  %v3272_v37 = vsub.f32 1.0, %v3271_v30  ;;  %v2061_v38 = vmul.f32 %v8771_v62, %v1933_v18  ;;  %2558 = vmatmul.bf16.gmra.mxu0 %v8519_v44  ;;  %2647 = vmatmul.bf16.gmra.mxu1 %v8519_v44  ;;  %vm3276_vm1 = vweird.f32 %v6751_v47  ;;  %vm3922_vm2 = vmor %vm3920_vm10, %vm3921_vm0 }
 0x355   : > { %v3294_v54 = vand.u32 2147483647, %v8851_v21  ;;  %6756 = vpow2.f32 %v6203_v63  ;;  %v2505_v35 = vadd.f32 %v2504_v39, %v8686_v10  ;;  %v2594_v13 = vadd.f32 %v2593_v20, %v8724_v31  ;;  %vm3277_vm3 = vmor %vm3275_vm13, %vm3276_vm1  ;;  %v2358_v63 = vpop.f32.mrf.mxu2 }
 0x356   : > { %v3919_v49 = vadd.f32 %v6749_v55, %v3918_v22  ;;  %v3273_v59 = vmul.f32 %v6751_v47, %v3272_v37  ;;  %v2093_v15 = vadd.f32 %v2061_v38, %v8664_v52  ;;  %v2092_v44 = vadd.f32 %v2060_v16, %v8546_v46 }
 0x357   : > { %v6753_v33 = vpop.eup %6752  ;;  %v6160_v62 = vmul.f32 -1.442695, %v2505_v35  ;;  %v2357_v43 = vadd.f32 %v2356_v9, %v8142_v19  ;;  %v2446_v2 = vadd.f32 %v2445_v0, %v8144_v25  ;;  %v3296_v11 = vand.u32 2147483648, %v8851_v21 }
 0x358   : > { %v3923_v26 = vsel %vm3922_vm2, %v6749_v55, %v3919_v49  ;;  %v3274_v14 = vadd.f32 %v6751_v47, %v3273_v59  ;;  %v3286_v52 = vmul.f32 %v6753_v33, %v8851_v21  ;;  %v8901_v46 = vpack.c.bf16 %v2093_v15, %v2092_v44 }
 0x359   : > { %v3928_v53 = vsel %vm8858_vm12, %v3927_v6, %v3923_v26  ;;  %6758 = vpow2.f32 %v6160_v62  ;;  %v6161_v17 = vmul.f32 -1.442695, %v2594_v13  ;;  %v6755_v3 = vpop.eup %6754  ;;  %v6206_v40 = vmul.f32 -1.442695, %v2357_v43 }
 0x35a   : > { %5149 = vst [vmem:[%s8252_s2 + $0x188] sm:$0xff] %v3928_v53  ;;  %v3278_v34 = vsel %vm3277_vm3, %v6751_v47, %v3274_v14  ;;  %v3287_v41 = vsub.f32 1.0, %v3286_v52  ;;  %v2507_v5 = vadd.f32 %v2506_v45, %v8686_v10  ;;  %v8907_v24 = vadd.f32 1.0, %v6755_v3  ;;  %2395 = vmatmul.bf16.gmra.mxu2 %v8901_v46  ;;  %2484 = vmatmul.bf16.gmra.mxu3 %v8901_v46  ;;  %v2509_v53 = vpop.f32.mrf.mxu0 }
 0x35b   : > { %v6757_v4 = vpop.eup %6756  ;;  %v3283_v39 = vsel %vm8872_vm15, %v3282_v7, %v3278_v34  ;;  %6760 = vpow2.f32 %v6161_v17  ;;  %v6207_v29 = vmul.f32 -1.442695, %v2446_v2  ;;  %vm3291_vm4 = vweird.f32 %v6753_v33  ;;  %v2598_v17 = vpop.f32.mrf.mxu1 }
 0x35c   : > { %5106 = vst [vmem:[%s8252_s2 + $0x30] sm:$0xff] %v3283_v39  ;;  %v3288_v28 = vmul.f32 %v6753_v33, %v3287_v41  ;;  %v8912_v55 = vadd.f32 1.0, %v6757_v4  ;;  %6762 = vpow2.f32 %v6206_v40  ;;  %vm3290_vm5 = vweird.f32 %v8851_v21 }
 0x35d   : > { %6764 = vrcp.f32 %v8907_v24  ;;  %vm3292_vm6 = vmor %vm3290_vm5, %vm3291_vm4  ;;  %v3297_v48 = vor.u32 1.1754944e-38, %v3296_v11  ;;  %v6164_v50 = vmul.f32 -1.442695, %v2507_v5  ;;  %v2596_v58 = vadd.f32 %v2595_v32, %v8724_v31 }
 0x35e   : > { %v3289_v51 = vadd.f32 %v6753_v33, %v3288_v28  ;;  %6766 = vrcp.f32 %v8912_v55  ;;  %vm3295_vm7 = vcmp.eq.f32.partialorder %v3294_v54, 8.507059e+37  ;;  %v3969_v12 = vand.u32 2147483647, %v8907_v24 }
 0x35f   : > { %v6759_v56 = vpop.eup %6758  ;;  %6768 = vpow2.f32 %v6207_v29  ;;  %vm3965_vm8 = vweird.f32 %v8907_v24  ;;  %v3971_v18 = vand.u32 2147483648, %v8907_v24  ;;  %v3984_v36 = vand.u32 2147483647, %v8912_v55 }
 0x360   : > { %v3293_v27 = vsel %vm3292_vm6, %v6753_v33, %v3289_v51  ;;  %v8919_v47 = vadd.f32 1.0, %v6759_v56  ;;  %v3986_v61 = vand.u32 2147483648, %v8912_v55  ;;  %v6165_v20 = vmul.f32 -1.442695, %v2596_v58 }
 0x361   : > { %v6761_v42 = vpop.eup %6760  ;;  %v3298_v6 = vsel %vm3295_vm7, %v3297_v48, %v3293_v27  ;;  %vm8932_vm9 = vcmp.eq.f32.partialorder %v3969_v12, 8.507059e+37  ;;  %vm3980_vm10 = vweird.f32 %v8912_v55  ;;  %v2359_v22 = vadd.f32 %v2358_v63, %v8142_v19  ;;  %v2447_v12 = vpop.f32.mrf.mxu3 }
 0x362   : > { %v6763_v21 = vpop.eup %6762  ;;  %5107 = vst [vmem:[%s8252_s2 + $0x38] sm:$0xff] %v3298_v6  ;;  %6770 = vrcp.f32 %v8919_v47  ;;  %v8927_v30 = vadd.f32 1.0, %v6761_v42  ;;  %v3339_v9 = vand.u32 2147483647, %v8919_v47  ;;  %v3341_v0 = vand.u32 2147483648, %v8919_v47  ;;  %v2511_v49 = vpop.f32.mrf.mxu0 }
 0x363   : > { %v6765_v23 = vpop.eup %6764  ;;  %v8929_v1 = vadd.f32 1.0, %v6763_v21  ;;  %6772 = vpow2.f32 %v6164_v50  ;;  %v3972_v35 = vor.u32 1.1754944e-38, %v3971_v18  ;;  %vm8944_vm11 = vcmp.eq.f32.partialorder %v3984_v36, 8.507059e+37 }
 0x364   : > { %v6767_v8 = vpop.eup %6766  ;;  %v3961_v7 = vmul.f32 %v6765_v23, %v8907_v24  ;;  %2563 = vmatmul.bf16.gmra.mxu0 %v8626_v57  ;;  %2652 = vmatmul.bf16.gmra.mxu1 %v8626_v57  ;;  %6774 = vrcp.f32 %v8927_v30  ;;  %v3987_v15 = vor.u32 1.1754944e-38, %v3986_v61  ;;  %vm3335_vm12 = vweird.f32 %v8919_v47 }
 0x365   : > { %v6769_v37 = vpop.eup %6768  ;;  %v3976_v38 = vmul.f32 %v6767_v8, %v8912_v55  ;;  %6776 = vrcp.f32 %v8929_v1  ;;  %vm3966_vm13 = vweird.f32 %v6765_v23  ;;  %v6210_v44 = vmul.f32 -1.442695, %v2359_v22 }
 0x366   : > { %v3962_v54 = vsub.f32 1.0, %v3961_v7  ;;  %6778 = vpow2.f32 %v6165_v20  ;;  %v8950_v33 = vadd.f32 1.0, %v6769_v37  ;;  %vm3981_vm14 = vweird.f32 %v6767_v8  ;;  %vm3967_vm1 = vmor %vm3965_vm8, %vm3966_vm13 }
 0x367   : > { %v3977_v59 = vsub.f32 1.0, %v3976_v38  ;;  %vm8953_vm15 = vcmp.eq.f32.partialorder %v3339_v9, 8.507059e+37  ;;  %v3342_v26 = vor.u32 1.1754944e-38, %v3341_v0  ;;  %vm3350_vm0 = vweird.f32 %v8927_v30  ;;  %vm3982_vm3 = vmor %vm3980_vm10, %vm3981_vm14 }
 0x368   : > { %v6771_v57 = vpop.eup %6770  ;;  %v3963_v13 = vmul.f32 %v6765_v23, %v3962_v54  ;;  %v3354_v52 = vand.u32 2147483647, %v8927_v30  ;;  %v3356_v11 = vand.u32 2147483648, %v8927_v30  ;;  %6780 = vrcp.f32 %v8950_v33 }
 0x369   : > { %v6773_v62 = vpop.eup %6772  ;;  %v3978_v43 = vmul.f32 %v6767_v8, %v3977_v59  ;;  %v3331_v2 = vmul.f32 %v6771_v57, %v8919_v47  ;;  %vm4025_vm2 = vweird.f32 %v8929_v1  ;;  %v4029_v40 = vand.u32 2147483647, %v8929_v1  ;;  %v9011_v59 = vpop.f32.mrf.mxu1 }
 0x36a   : > { %v3964_v14 = vadd.f32 %v6765_v23, %v3963_v13  ;;  %v6775_v3 = vpop.eup %6774  ;;  %v4031_v5 = vand.u32 2147483648, %v8929_v1  ;;  %vm3336_vm4 = vweird.f32 %v6771_v57  ;;  %v8971_v29 = vadd.f32 1.0, %v6773_v62 }
 0x36b   : > { %v3979_v34 = vadd.f32 %v6767_v8, %v3978_v43  ;;  %v3332_v41 = vsub.f32 1.0, %v3331_v2  ;;  %v6777_v4 = vpop.eup %6776  ;;  %v3346_v24 = vmul.f32 %v6775_v3, %v8927_v30  ;;  %vm8979_vm5 = vcmp.eq.f32.partialorder %v3354_v52, 8.507059e+37  ;;  %vm3337_vm7 = vmor %vm3335_vm12, %vm3336_vm4 }
 0x36c   : > { %v3968_v39 = vsel %vm3967_vm1, %v6765_v23, %v3964_v14  ;;  %v6779_v28 = vpop.eup %6778  ;;  %v4021_v48 = vmul.f32 %v6777_v4, %v8929_v1  ;;  %v3357_v27 = vor.u32 1.1754944e-38, %v3356_v11  ;;  %vm8984_vm6 = vcmp.eq.f32.partialorder %v4029_v40, 8.507059e+37 }
 0x36d   : > { %v3973_v32 = vsel %vm8932_vm9, %v3972_v35, %v3968_v39  ;;  %v3983_v51 = vsel %vm3982_vm3, %v6767_v8, %v3979_v34  ;;  %v3333_v56 = vmul.f32 %v6771_v57, %v3332_v41  ;;  %v3347_v55 = vsub.f32 1.0, %v3346_v24 }
 0x36e   : > { %5152 = vst [vmem:[%s8252_s2 + $0x1a0] sm:$0xff] %v3973_v32  ;;  %v3988_v50 = vsel %vm8944_vm11, %v3987_v15, %v3983_v51  ;;  %v4022_v6 = vsub.f32 1.0, %v4021_v48  ;;  %6782 = vrcp.f32 %v8971_v29  ;;  %v6781_v21 = vpop.eup %6780  ;;  %vm3351_vm8 = vweird.f32 %v6775_v3 }
 0x36f   : > { %5153 = vst [vmem:[%s8252_s2 + $0x1a8] sm:$0xff] %v3988_v50  ;;  %v3334_v42 = vadd.f32 %v6771_v57, %v3333_v56  ;;  %v3348_v18 = vmul.f32 %v6775_v3, %v3347_v55  ;;  %v4032_v36 = vor.u32 1.1754944e-38, %v4031_v5  ;;  %v4044_v61 = vand.u32 2147483647, %v8950_v33  ;;  %vm3352_vm11 = vmor %vm3350_vm0, %vm3351_vm8 }
 0x370   : > { %v4023_v20 = vmul.f32 %v6777_v4, %v4022_v6  ;;  %vm4026_vm9 = vweird.f32 %v6777_v4  ;;  %v4036_v8 = vmul.f32 %v6781_v21, %v8950_v33  ;;  %vm4041_vm10 = vweird.f32 %v6781_v21 }
 0x371   : > { %v3338_v23 = vsel %vm3337_vm7, %v6771_v57, %v3334_v42  ;;  %v3349_v16 = vadd.f32 %v6775_v3, %v3348_v18  ;;  %v4046_v22 = vand.u32 2147483648, %v8950_v33  ;;  %v9000_v38 = vadd.f32 1.0, %v6779_v28  ;;  %vm9004_vm12 = vmor %vm4025_vm2, %vm4026_vm9  ;;  %v9049_v42 = vpop.f32.mrf.mxu1 }
 0x372   : > { %v3343_v7 = vsel %vm8953_vm15, %v3342_v26, %v3338_v23  ;;  %v4024_v47 = vadd.f32 %v6777_v4, %v4023_v20  ;;  %v4037_v37 = vsub.f32 1.0, %v4036_v8  ;;  %6784 = vpow2.f32 %v6210_v44  ;;  %v2361_v44 = vpop.f32.mrf.mxu2 }
 0x373   : > { %5110 = vst [vmem:[%s8252_s2 + $0x50] sm:$0xff] %v3343_v7  ;;  %v3353_v9 = vsel %vm3352_vm11, %v6775_v3, %v3349_v16  ;;  %v2448_v54 = vadd.f32 %v2447_v12, %v8144_v25  ;;  %v2510_v35 = vadd.f32 %v2509_v53, %v8686_v10  ;;  %v2599_v30 = vadd.f32 %v2598_v17, %v8724_v31  ;;  %v2450_v17 = vpop.f32.mrf.mxu3  ;;  %v9047_v12 = vpop.f32.mrf.mxu0 }
 0x374   : > { %2568 = vmatmul.bf16.gmra.mxu0 %v8722_v60  ;;  %v6783_v15 = vpop.eup %6782  ;;  %v3358_v1 = vsel %vm8979_vm5, %v3357_v27, %v3353_v9  ;;  %v4028_v57 = vsel %vm9004_vm12, %v6777_v4, %v4024_v47  ;;  %v4038_v13 = vmul.f32 %v6781_v21, %v4037_v37  ;;  %6786 = vrcp.f32 %v9000_v38  ;;  %2657 = vmatmul.bf16.gmra.mxu1 %v8722_v60 }
 0x375   : > { %5111 = vst [vmem:[%s8252_s2 + $0x58] sm:$0xff] %v3358_v1  ;;  %v4033_v62 = vsel %vm8984_vm6, %v4032_v36, %v4028_v57  ;;  %vm4040_vm13 = vweird.f32 %v8950_v33  ;;  %vm9024_vm14 = vcmp.eq.f32.partialorder %v4044_v61, 8.507059e+37  ;;  %v3391_v2 = vmul.f32 %v6783_v15, %v8971_v29 }
 0x376   : > { %5156 = vst [vmem:[%s8252_s2 + $0x1c0] sm:$0xff] %v4033_v62  ;;  %v4039_v45 = vadd.f32 %v6781_v21, %v4038_v13  ;;  %v4047_v26 = vor.u32 1.1754944e-38, %v4046_v22  ;;  %v3399_v14 = vand.u32 2147483647, %v8971_v29  ;;  %v6211_v52 = vmul.f32 -1.442695, %v2448_v54  ;;  %vm4042_vm15 = vmor %vm4040_vm13, %vm4041_vm10 }
 0x377   : > { %v3392_v60 = vsub.f32 1.0, %v3391_v2  ;;  %v6168_v11 = vmul.f32 -1.442695, %v2510_v35  ;;  %v6169_v53 = vmul.f32 -1.442695, %v2599_v30  ;;  %v2362_v33 = vadd.f32 %v2361_v44, %v8142_v19 }
 0x378   : > { %v6785_v3 = vpop.eup %6784  ;;  %v4043_v34 = vsel %vm4042_vm15, %v6781_v21, %v4039_v45  ;;  %vm3396_vm0 = vweird.f32 %v6783_v15  ;;  %v3401_v41 = vand.u32 2147483648, %v8971_v29  ;;  %6788 = vpow2.f32 %v6211_v52 }
 0x379   : > { %v4048_v40 = vsel %vm9024_vm14, %v4047_v26, %v4043_v34  ;;  %v3393_v5 = vmul.f32 %v6783_v15, %v3392_v60  ;;  %v9036_v4 = vadd.f32 1.0, %v6785_v3  ;;  %6790 = vpow2.f32 %v6168_v11 }
 0x37a   : > { %v6787_v39 = vpop.eup %6786  ;;  %5157 = vst [vmem:[%s8252_s2 + $0x1c8] sm:$0xff] %v4048_v40  ;;  %vm3395_vm1 = vweird.f32 %v8971_v29  ;;  %6792 = vpow2.f32 %v6169_v53  ;;  %v6214_v24 = vmul.f32 -1.442695, %v2362_v33  ;;  %v2451_v28 = vadd.f32 %v2450_v17, %v8144_v25  ;;  %v2363_v30 = vpop.f32.mrf.mxu2 }
 0x37b   : > { %v3394_v32 = vadd.f32 %v6783_v15, %v3393_v5  ;;  %v3406_v51 = vmul.f32 %v6787_v39, %v9000_v38  ;;  %6794 = vrcp.f32 %v9036_v4  ;;  %v2512_v56 = vadd.f32 %v2511_v49, %v8686_v10  ;;  %vm3397_vm2 = vmor %vm3395_vm1, %vm3396_vm0  ;;  %v2452_v49 = vpop.f32.mrf.mxu3  ;;  %v9087_v53 = vpop.f32.mrf.mxu0 }
 0x37c   : > { %vm3400_vm3 = vcmp.eq.f32.partialorder %v3399_v14, 8.507059e+37  ;;  %v3402_v48 = vor.u32 1.1754944e-38, %v3401_v41  ;;  %v3414_v50 = vand.u32 2147483647, %v9000_v38  ;;  %6796 = vpow2.f32 %v6214_v24  ;;  %v9089_v33 = vpop.f32.mrf.mxu1 }
 0x37d   : > { %v3398_v29 = vsel %vm3397_vm2, %v6783_v15, %v3394_v32  ;;  %v3407_v55 = vsub.f32 1.0, %v3406_v51  ;;  %v3416_v58 = vand.u32 2147483648, %v9000_v38  ;;  %v6215_v27 = vmul.f32 -1.442695, %v2451_v28 }
 0x37e   : > { %v6789_v6 = vpop.eup %6788  ;;  %v3403_v63 = vsel %vm3400_vm3, %v3402_v48, %v3398_v29  ;;  %vm3411_vm4 = vweird.f32 %v6787_v39  ;;  %v4089_v21 = vand.u32 2147483647, %v9036_v4  ;;  %v4091_v18 = vand.u32 2147483648, %v9036_v4 }
 0x37f   : > { %v6791_v36 = vpop.eup %6790  ;;  %5114 = vst [vmem:[%s8252_s2 + $0x70] sm:$0xff] %v3403_v63  ;;  %v3408_v61 = vmul.f32 %v6787_v39, %v3407_v55  ;;  %v9054_v23 = vadd.f32 1.0, %v6789_v6  ;;  %6798 = vpow2.f32 %v6215_v27  ;;  %v6172_v20 = vmul.f32 -1.442695, %v2512_v56 }
 0x380   : > { %v6793_v8 = vpop.eup %6792  ;;  %v9056_v7 = vadd.f32 1.0, %v6791_v36  ;;  %v2601_v16 = vadd.f32 %v9011_v59, %v8724_v31  ;;  %vm3410_vm5 = vweird.f32 %v9000_v38  ;;  %vm3415_vm6 = vcmp.eq.f32.partialorder %v3414_v50, 8.507059e+37 }
 0x381   : > { %v6795_v22 = vpop.eup %6794  ;;  %v3409_v47 = vadd.f32 %v6787_v39, %v3408_v61  ;;  %6800 = vrcp.f32 %v9054_v23  ;;  %vm3412_vm7 = vmor %vm3410_vm5, %vm3411_vm4  ;;  %v3417_v9 = vor.u32 1.1754944e-38, %v3416_v58  ;;  %vm4085_vm8 = vweird.f32 %v9036_v4 }
 0x382   : > { %v6797_v37 = vpop.eup %6796  ;;  %v4081_v0 = vmul.f32 %v6795_v22, %v9036_v4  ;;  %6802 = vrcp.f32 %v9056_v7  ;;  %vm9066_vm9 = vcmp.eq.f32.partialorder %v4089_v21, 8.507059e+37  ;;  %v4092_v38 = vor.u32 1.1754944e-38, %v4091_v18 }
 0x383   : > { %v3413_v54 = vsel %vm3412_vm7, %v6787_v39, %v3409_v47  ;;  %6804 = vpow2.f32 %v6172_v20  ;;  %v4104_v1 = vand.u32 2147483647, %v9054_v23  ;;  %v6173_v57 = vmul.f32 -1.442695, %v2601_v16 }
 0x384   : > { %v3418_v59 = vsel %vm3415_vm6, %v3417_v9, %v3413_v54  ;;  %v4082_v15 = vsub.f32 1.0, %v4081_v0  ;;  %v4106_v44 = vand.u32 2147483648, %v9054_v23  ;;  %v3459_v62 = vand.u32 2147483647, %v9056_v7  ;;  %2573 = vmatmul.bf16.gmra.mxu0 %v8901_v46  ;;  %2662 = vmatmul.bf16.gmra.mxu1 %v8901_v46 }
 0x385   : > { %v6799_v13 = vpop.eup %6798  ;;  %5115 = vst [vmem:[%s8252_s2 + $0x78] sm:$0xff] %v3418_v59  ;;  %v9074_v43 = vadd.f32 1.0, %v6793_v8  ;;  %v9076_v2 = vadd.f32 1.0, %v6797_v37  ;;  %vm4086_vm10 = vweird.f32 %v6795_v22  ;;  %v2364_v26 = vadd.f32 %v2363_v30, %v8142_v19 }
 0x386   : > { %v4083_v45 = vmul.f32 %v6795_v22, %v4082_v15  ;;  %v9080_v14 = vadd.f32 %v2452_v49, %v8144_v25  ;;  %vm4100_vm11 = vweird.f32 %v9054_v23  ;;  %v3461_v60 = vand.u32 2147483648, %v9056_v7  ;;  %vm4087_vm14 = vmor %vm4085_vm8, %vm4086_vm10 }
 0x387   : > { %v6801_v52 = vpop.eup %6800  ;;  %6806 = vrcp.f32 %v9074_v43  ;;  %v9085_v11 = vadd.f32 1.0, %v6799_v13  ;;  %vm9094_vm12 = vcmp.eq.f32.partialorder %v4104_v1, 8.507059e+37  ;;  %vm3455_vm13 = vweird.f32 %v9056_v7 }
 0x388   : > { %v6803_v17 = vpop.eup %6802  ;;  %v4084_v3 = vadd.f32 %v6795_v22, %v4083_v45  ;;  %v4096_v34 = vmul.f32 %v6801_v52, %v9054_v23  ;;  %6808 = vrcp.f32 %v9076_v2  ;;  %v4107_v5 = vor.u32 1.1754944e-38, %v4106_v44 }
 0x389   : > { %v6805_v40 = vpop.eup %6804  ;;  %v3451_v46 = vmul.f32 %v6803_v17, %v9056_v7  ;;  %vm9104_vm15 = vcmp.eq.f32.partialorder %v3459_v62, 8.507059e+37  ;;  %6810 = vpow2.f32 %v6173_v57  ;;  %v3474_v32 = vand.u32 2147483647, %v9074_v43 }
 0x38a   : > { %v4088_v24 = vsel %vm4087_vm14, %v6795_v22, %v4084_v3  ;;  %v4097_v28 = vsub.f32 1.0, %v4096_v34  ;;  %v3476_v51 = vand.u32 2147483648, %v9074_v43  ;;  %v3462_v4 = vor.u32 1.1754944e-38, %v3461_v60 }
 0x38b   : > { %v4093_v56 = vsel %vm9066_vm9, %v4092_v38, %v4088_v24  ;;  %v3452_v48 = vsub.f32 1.0, %v3451_v46  ;;  %6812 = vrcp.f32 %v9085_v11  ;;  %vm4101_vm0 = vweird.f32 %v6801_v52 }
 0x38c   : > { %5160 = vst [vmem:[%s8252_s2 + $0x1e0] sm:$0xff] %v4093_v56  ;;  %v4098_v50 = vmul.f32 %v6801_v52, %v4097_v28  ;;  %v4149_v29 = vand.u32 2147483647, %v9076_v2  ;;  %v6218_v55 = vmul.f32 -1.442695, %v2364_v26  ;;  %vm3456_vm1 = vweird.f32 %v6803_v17  ;;  %vm4102_vm4 = vmor %vm4100_vm11, %vm4101_vm0 }
 0x38d   : > { %v6807_v58 = vpop.eup %6806  ;;  %v3453_v27 = vmul.f32 %v6803_v17, %v3452_v48  ;;  %vm3470_vm2 = vweird.f32 %v9074_v43  ;;  %v9116_v6 = vadd.f32 1.0, %v6805_v40  ;;  %vm9119_vm3 = vcmp.eq.f32.partialorder %v3474_v32, 8.507059e+37  ;;  %vm3457_vm6 = vmor %vm3455_vm13, %vm3456_vm1  ;;  %v2455_v40 = vpop.f32.mrf.mxu3 }
 0x38e   : > { %v6809_v63 = vpop.eup %6808  ;;  %v4099_v21 = vadd.f32 %v6801_v52, %v4098_v50  ;;  %v3466_v18 = vmul.f32 %v6807_v58, %v9074_v43  ;;  %v3477_v61 = vor.u32 1.1754944e-38, %v3476_v51  ;;  %vm4145_vm5 = vweird.f32 %v9076_v2 }
 0x38f   : > { %v6811_v20 = vpop.eup %6810  ;;  %v3454_v8 = vadd.f32 %v6803_v17, %v3453_v27  ;;  %v4141_v16 = vmul.f32 %v6809_v63, %v9076_v2  ;;  %v4151_v22 = vand.u32 2147483648, %v9076_v2  ;;  %vm9131_vm7 = vcmp.eq.f32.partialorder %v4149_v29, 8.507059e+37 }
 0x390   : > { %v4103_v47 = vsel %vm4102_vm4, %v6801_v52, %v4099_v21  ;;  %v3467_v37 = vsub.f32 1.0, %v3466_v18  ;;  %6814 = vrcp.f32 %v9116_v6  ;;  %v4164_v38 = vand.u32 2147483647, %v9085_v11 }
 0x391   : > { %v6813_v23 = vpop.eup %6812  ;;  %v4108_v0 = vsel %vm9094_vm12, %v4107_v5, %v4103_v47  ;;  %v3458_v54 = vsel %vm3457_vm6, %v6803_v17, %v3454_v8  ;;  %v4142_v35 = vsub.f32 1.0, %v4141_v16  ;;  %vm3471_vm8 = vweird.f32 %v6807_v58 }
 0x392   : > { %5161 = vst [vmem:[%s8252_s2 + $0x1e8] sm:$0xff] %v4108_v0  ;;  %v3463_v7 = vsel %vm9104_vm15, %v3462_v4, %v3458_v54  ;;  %v3468_v30 = vmul.f32 %v6807_v58, %v3467_v37  ;;  %v4156_v49 = vmul.f32 %v6813_v23, %v9085_v11  ;;  %vm4146_vm9 = vweird.f32 %v6809_v63  ;;  %vm3472_vm11 = vmor %vm3470_vm2, %vm3471_vm8 }
 0x393   : > { %5118 = vst [vmem:[%s8252_s2 + $0x90] sm:$0xff] %v3463_v7  ;;  %v4143_v59 = vmul.f32 %v6809_v63, %v4142_v35  ;;  %v4166_v15 = vand.u32 2147483648, %v9085_v11  ;;  %v9145_v1 = vadd.f32 1.0, %v6811_v20  ;;  %vm4160_vm10 = vweird.f32 %v9085_v11  ;;  %vm4147_vm12 = vmor %vm4145_vm5, %vm4146_vm9 }
 0x394   : > { %v3469_v57 = vadd.f32 %v6807_v58, %v3468_v30  ;;  %v4157_v13 = vsub.f32 1.0, %v4156_v49  ;;  %6816 = vpow2.f32 %v6218_v55  ;;  %v4152_v62 = vor.u32 1.1754944e-38, %v4151_v22 }
 0x395   : > { %v4144_v44 = vadd.f32 %v6809_v63, %v4143_v59  ;;  %6818 = vrcp.f32 %v9145_v1  ;;  %v6219_v45 = vmul.f32 -1.442695, %v9080_v14  ;;  %vm4161_vm13 = vweird.f32 %v6813_v23  ;;  %v2366_v14 = vpop.f32.mrf.mxu2 }
 0x396   : > { %v6815_v26 = vpop.eup %6814  ;;  %v3473_v52 = vsel %vm3472_vm11, %v6807_v58, %v3469_v57  ;;  %v4158_v60 = vmul.f32 %v6813_v23, %v4157_v13  ;;  %vm9154_vm14 = vcmp.eq.f32.partialorder %v4164_v38, 8.507059e+37  ;;  %v4167_v34 = vor.u32 1.1754944e-38, %v4166_v15  ;;  %vm4162_vm15 = vmor %vm4160_vm10, %vm4161_vm13  ;;  %v2457_v13 = vpop.f32.mrf.mxu3 }
 0x397   : > { %v3478_v43 = vsel %vm9119_vm3, %v3477_v61, %v3473_v52  ;;  %v4148_v3 = vsel %vm4147_vm12, %v6809_v63, %v4144_v44  ;;  %v3511_v41 = vmul.f32 %v6815_v26, %v9116_v6  ;;  %v3519_v46 = vand.u32 2147483647, %v9116_v6 }
 0x398   : > { %5119 = vst [vmem:[%s8252_s2 + $0x98] sm:$0xff] %v3478_v43  ;;  %v4153_v2 = vsel %vm9131_vm7, %v4152_v62, %v4148_v3  ;;  %v4159_v5 = vadd.f32 %v6813_v23, %v4158_v60  ;;  %v3521_v39 = vand.u32 2147483648, %v9116_v6  ;;  %6820 = vpow2.f32 %v6219_v45 }
 0x399   : > { %5164 = vst [vmem:[%s8252_s2 + $0x200] sm:$0xff] %v4153_v2  ;;  %v3512_v24 = vsub.f32 1.0, %v3511_v41  ;;  %v2515_v28 = vadd.f32 %v9047_v12, %v8686_v10  ;;  %v2604_v32 = vadd.f32 %v9049_v42, %v8724_v31  ;;  %vm3516_vm0 = vweird.f32 %v6815_v26 }
 0x39a   : > { %v6817_v51 = vpop.eup %6816  ;;  %v4163_v56 = vsel %vm4162_vm15, %v6813_v23, %v4159_v5  ;;  %v2367_v48 = vadd.f32 %v2366_v14, %v8142_v19  ;;  %v2456_v4 = vadd.f32 %v2455_v40, %v8144_v25  ;;  %vm3515_vm1 = vweird.f32 %v9116_v6 }
 0x39b   : > { %v6819_v50 = vpop.eup %6818  ;;  %v4168_v11 = vsel %vm9154_vm14, %v4167_v34, %v4163_v56  ;;  %v3513_v29 = vmul.f32 %v6815_v26, %v3512_v24  ;;  %v9177_v55 = vadd.f32 1.0, %v6817_v51  ;;  %v6176_v58 = vmul.f32 -1.442695, %v2515_v28  ;;  %vm3517_vm3 = vmor %vm3515_vm1, %vm3516_vm0 }
 0x39c   : > { %5165 = vst [vmem:[%s8252_s2 + $0x208] sm:$0xff] %v4168_v11  ;;  %vm9181_vm2 = vcmp.eq.f32.partialorder %v3519_v46, 8.507059e+37  ;;  %v3526_v42 = vmul.f32 %v6819_v50, %v9145_v1  ;;  %v6177_v27 = vmul.f32 -1.442695, %v2604_v32  ;;  %v3534_v21 = vand.u32 2147483647, %v9145_v1 }
 0x39d   : > { %v3514_v63 = vadd.f32 %v6815_v26, %v3513_v29  ;;  %6822 = vrcp.f32 %v9177_v55  ;;  %v6222_v18 = vmul.f32 -1.442695, %v2367_v48  ;;  %v3522_v36 = vor.u32 1.1754944e-38, %v3521_v39  ;;  %v2368_v0 = vpop.f32.mrf.mxu2 }
 0x39e   : > { %v3527_v61 = vsub.f32 1.0, %v3526_v42  ;;  %6824 = vpow2.f32 %v6176_v58  ;;  %v2517_v6 = vadd.f32 %v9087_v53, %v8686_v10  ;;  %v6821_v20 = vpop.eup %6820  ;;  %v3536_v16 = vand.u32 2147483648, %v9145_v1 }
 0x39f   : > { %v3518_v8 = vsel %vm3517_vm3, %v6815_v26, %v3514_v63  ;;  %6826 = vpow2.f32 %v6177_v27  ;;  %v6223_v22 = vmul.f32 -1.442695, %v2456_v4  ;;  %vm3531_vm4 = vweird.f32 %v6819_v50  ;;  %v2519_v63 = vpop.f32.mrf.mxu0 }
 0x3a0   : > { %v3523_v47 = vsel %vm9181_vm2, %v3522_v36, %v3518_v8  ;;  %v3528_v37 = vmul.f32 %v6819_v50, %v3527_v61  ;;  %v9194_v9 = vadd.f32 1.0, %v6821_v20  ;;  %vm3530_vm5 = vweird.f32 %v9145_v1 }
 0x3a1   : > { %5122 = vst [vmem:[%s8252_s2 + $0xb0] sm:$0xff] %v3523_v47  ;;  %vm9198_vm6 = vcmp.eq.f32.partialorder %v3534_v21, 8.507059e+37  ;;  %6828 = vpow2.f32 %v6222_v18  ;;  %v2606_v53 = vadd.f32 %v9089_v33, %v8724_v31  ;;  %v4209_v35 = vand.u32 2147483647, %v9177_v55  ;;  %vm3532_vm7 = vmor %vm3530_vm5, %vm3531_vm4 }
 0x3a2   : > { %v3529_v54 = vadd.f32 %v6819_v50, %v3528_v37  ;;  %6830 = vrcp.f32 %v9194_v9  ;;  %v6180_v38 = vmul.f32 -1.442695, %v2517_v6  ;;  %v3537_v30 = vor.u32 1.1754944e-38, %v3536_v16 }
 0x3a3   : > { %v6823_v7 = vpop.eup %6822  ;;  %vm4205_vm8 = vweird.f32 %v9177_v55  ;;  %v4211_v49 = vand.u32 2147483648, %v9177_v55  ;;  %6832 = vpow2.f32 %v6223_v22  ;;  %v4224_v1 = vand.u32 2147483647, %v9194_v9 }
 0x3a4   : > { %v6825_v59 = vpop.eup %6824  ;;  %v3533_v15 = vsel %vm3532_vm7, %v6819_v50, %v3529_v54  ;;  %v4201_v33 = vmul.f32 %v6823_v7, %v9177_v55  ;;  %v2369_v57 = vadd.f32 %v2368_v0, %v8142_v19  ;;  %v4226_v45 = vand.u32 2147483648, %v9194_v9 }
 0x3a5   : > { %v6827_v44 = vpop.eup %6826  ;;  %v3538_v62 = vsel %vm9198_vm6, %v3537_v30, %v3533_v15  ;;  %v9214_v26 = vadd.f32 1.0, %v6825_v59  ;;  %v6181_v52 = vmul.f32 -1.442695, %v2606_v53  ;;  %vm9217_vm9 = vcmp.eq.f32.partialorder %v4209_v35, 8.507059e+37 }
 0x3a6   : > { %5123 = vst [vmem:[%s8252_s2 + $0xb8] sm:$0xff] %v3538_v62  ;;  %v4202_v60 = vsub.f32 1.0, %v4201_v33  ;;  %v9221_v43 = vadd.f32 1.0, %v6827_v44  ;;  %6834 = vpow2.f32 %v6180_v38  ;;  %v4212_v34 = vor.u32 1.1754944e-38, %v4211_v49 }
 0x3a7   : > { %v6829_v3 = vpop.eup %6828  ;;  %vm4220_vm10 = vweird.f32 %v9194_v9  ;;  %6836 = vrcp.f32 %v9214_v26  ;;  %v2458_v41 = vadd.f32 %v2457_v13, %v8144_v25  ;;  %vm4206_vm11 = vweird.f32 %v6823_v7 }
 0x3a8   : > { %v6831_v14 = vpop.eup %6830  ;;  %v4203_v40 = vmul.f32 %v6823_v7, %v4202_v60  ;;  %6838 = vrcp.f32 %v9221_v43  ;;  %v6226_v2 = vmul.f32 -1.442695, %v2369_v57  ;;  %vm9228_vm12 = vcmp.eq.f32.partialorder %v4224_v1, 8.507059e+37  ;;  %vm4207_vm13 = vmor %vm4205_vm8, %vm4206_vm11 }
 0x3a9   : > { %v6833_v5 = vpop.eup %6832  ;;  %v4216_v46 = vmul.f32 %v6831_v14, %v9194_v9  ;;  %v4227_v24 = vor.u32 1.1754944e-38, %v4226_v45  ;;  %6840 = vpow2.f32 %v6181_v52  ;;  %v3579_v32 = vand.u32 2147483647, %v9214_v26 }
 0x3aa   : > { %v4204_v28 = vadd.f32 %v6823_v7, %v4203_v40  ;;  %v3581_v51 = vand.u32 2147483648, %v9214_v26  ;;  %v9234_v56 = vadd.f32 1.0, %v6829_v3  ;;  %v3594_v4 = vand.u32 2147483647, %v9221_v43 }
 0x3ab   : > { %v4217_v48 = vsub.f32 1.0, %v4216_v46  ;;  %v9239_v50 = vadd.f32 1.0, %v6833_v5  ;;  %v9241_v11 = vmul.f32 -1.442695, %v2458_v41  ;;  %vm3575_vm14 = vweird.f32 %v9214_v26 }
 0x3ac   : > { %v6835_v29 = vpop.eup %6834  ;;  %v4208_v58 = vsel %vm4207_vm13, %v6823_v7, %v4204_v28  ;;  %v3596_v12 = vand.u32 2147483648, %v9221_v43  ;;  %6842 = vrcp.f32 %v9234_v56  ;;  %vm4221_vm15 = vweird.f32 %v6831_v14 }
 0x3ad   : > { %v6837_v42 = vpop.eup %6836  ;;  %v4213_v55 = vsel %vm9217_vm9, %v4212_v34, %v4208_v58  ;;  %v4218_v27 = vmul.f32 %v6831_v14, %v4217_v48  ;;  %vm3590_vm0 = vweird.f32 %v9221_v43  ;;  %vm9251_vm1 = vcmp.eq.f32.partialorder %v3579_v32, 8.507059e+37  ;;  %vm4222_vm3 = vmor %vm4220_vm10, %vm4221_vm15  ;;  %v2371_v48 = vpop.f32.mrf.mxu2 }
 0x3ae   : > { %v6839_v21 = vpop.eup %6838  ;;  %5168 = vst [vmem:[%s8252_s2 + $0x220] sm:$0xff] %v4213_v55  ;;  %v3571_v18 = vmul.f32 %v6837_v42, %v9214_v26  ;;  %v3582_v61 = vor.u32 1.1754944e-38, %v3581_v51  ;;  %6844 = vrcp.f32 %v9239_v50  ;;  %vm9257_vm2 = vcmp.eq.f32.partialorder %v3594_v4, 8.507059e+37  ;;  %v2608_v26 = vpop.f32.mrf.mxu1 }
 0x3af   : > { %v6841_v6 = vpop.eup %6840  ;;  %v4219_v20 = vadd.f32 %v6831_v14, %v4218_v27  ;;  %v3586_v8 = vmul.f32 %v6839_v21, %v9221_v43  ;;  %6846 = vpow2.f32 %v6226_v2  ;;  %v3597_v47 = vor.u32 1.1754944e-38, %v3596_v12 }
 0x3b0   : > { %v3572_v22 = vsub.f32 1.0, %v3571_v18  ;;  %v4269_v37 = vand.u32 2147483647, %v9234_v56  ;;  %v9265_v23 = vadd.f32 %v2519_v63, %v8686_v10  ;;  %vm4265_vm4 = vweird.f32 %v9234_v56  ;;  %v2460_v18 = vpop.f32.mrf.mxu3 }
 0x3b1   : > { %v4223_v53 = vsel %vm4222_vm3, %v6831_v14, %v4219_v20  ;;  %v3587_v0 = vsub.f32 1.0, %v3586_v8  ;;  %v4271_v54 = vand.u32 2147483648, %v9234_v56  ;;  %v9269_v35 = vadd.f32 1.0, %v6835_v29 }
 0x3b2   : > { %v6843_v38 = vpop.eup %6842  ;;  %v4228_v9 = vsel %vm9228_vm12, %v4227_v24, %v4223_v53  ;;  %v3573_v7 = vmul.f32 %v6837_v42, %v3572_v22  ;;  %vm3576_vm5 = vweird.f32 %v6837_v42  ;;  %v9273_v30 = vadd.f32 1.0, %v6841_v6  ;;  %v2521_v6 = vpop.f32.mrf.mxu0 }
 0x3b3   : > { %5169 = vst [vmem:[%s8252_s2 + $0x228] sm:$0xff] %v4228_v9  ;;  %v3588_v49 = vmul.f32 %v6839_v21, %v3587_v0  ;;  %vm3591_vm6 = vweird.f32 %v6839_v21  ;;  %v4261_v59 = vmul.f32 %v6843_v38, %v9234_v56  ;;  %6848 = vrcp.f32 %v9269_v35  ;;  %vm3577_vm9 = vmor %vm3575_vm14, %vm3576_vm5 }
 0x3b4   : > { %v6845_v15 = vpop.eup %6844  ;;  %v3574_v33 = vadd.f32 %v6837_v42, %v3573_v7  ;;  %vm9278_vm7 = vcmp.eq.f32.partialorder %v4269_v37, 8.507059e+37  ;;  %vm4280_vm8 = vweird.f32 %v9239_v50  ;;  %v4284_v57 = vand.u32 2147483647, %v9239_v50  ;;  %vm3592_vm10 = vmor %vm3590_vm0, %vm3591_vm6 }
 0x3b5   : > { %v6847_v13 = vpop.eup %6846  ;;  %v3589_v44 = vadd.f32 %v6839_v21, %v3588_v49  ;;  %v4262_v62 = vsub.f32 1.0, %v4261_v59  ;;  %v4276_v45 = vmul.f32 %v6845_v15, %v9239_v50  ;;  %v4286_v52 = vand.u32 2147483648, %v9239_v50 }
 0x3b6   : > { %v3578_v60 = vsel %vm3577_vm9, %v6837_v42, %v3574_v33  ;;  %vm4266_vm11 = vweird.f32 %v6843_v38  ;;  %v3639_v17 = vand.u32 2147483647, %v9269_v35  ;;  %6850 = vrcp.f32 %v9273_v30  ;;  %v2610_v53 = vpop.f32.mrf.mxu1 }
 0x3b7   : > { %v3583_v3 = vsel %vm9251_vm1, %v3582_v61, %v3578_v60  ;;  %v3593_v34 = vsel %vm3592_vm10, %v6839_v21, %v3589_v44  ;;  %v4263_v41 = vmul.f32 %v6843_v38, %v4262_v62  ;;  %v4277_v14 = vsub.f32 1.0, %v4276_v45  ;;  %vm4267_vm13 = vmor %vm4265_vm4, %vm4266_vm11  ;;  %v2373_v45 = vpop.f32.mrf.mxu2 }
 0x3b8   : > { %5126 = vst [vmem:[%s8252_s2 + $0xd0] sm:$0xff] %v3583_v3  ;;  %v3598_v40 = vsel %vm9257_vm2, %v3597_v47, %v3593_v34  ;;  %v4272_v2 = vor.u32 1.1754944e-38, %v4271_v54  ;;  %vm4281_vm12 = vweird.f32 %v6845_v15  ;;  %v3641_v43 = vand.u32 2147483648, %v9269_v35 }
 0x3b9   : > { %v6849_v5 = vpop.eup %6848  ;;  %5127 = vst [vmem:[%s8252_s2 + $0xd8] sm:$0xff] %v3598_v40  ;;  %v4264_v46 = vadd.f32 %v6843_v38, %v4263_v41  ;;  %v4278_v39 = vmul.f32 %v6845_v15, %v4277_v14  ;;  %v9300_v24 = vadd.f32 1.0, %v6847_v13  ;;  %6852 = vpow2.f32 %v9241_v11  ;;  %vm4282_vm1 = vmor %vm4280_vm8, %vm4281_vm12 }
 0x3ba   : > { %vm9306_vm14 = vcmp.eq.f32.partialorder %v4284_v57, 8.507059e+37  ;;  %v4287_v32 = vor.u32 1.1754944e-38, %v4286_v52  ;;  %v3631_v51 = vmul.f32 %v6849_v5, %v9269_v35  ;;  %vm3635_vm15 = vweird.f32 %v9269_v35 }
 0x3bb   : > { %v4268_v4 = vsel %vm4267_vm13, %v6843_v38, %v4264_v46  ;;  %v4279_v29 = vadd.f32 %v6845_v15, %v4278_v39  ;;  %vm9312_vm0 = vcmp.eq.f32.partialorder %v3639_v17, 8.507059e+37  ;;  %6854 = vrcp.f32 %v9300_v24  ;;  %v2462_v39 = vpop.f32.mrf.mxu3 }
 0x3bc   : > { %v6851_v56 = vpop.eup %6850  ;;  %v4273_v11 = vsel %vm9278_vm7, %v4272_v2, %v4268_v4  ;;  %v3632_v12 = vsub.f32 1.0, %v3631_v51  ;;  %v3642_v42 = vor.u32 1.1754944e-38, %v3641_v43  ;;  %vm3650_vm2 = vweird.f32 %v9273_v30 }
 0x3bd   : > { %5172 = vst [vmem:[%s8252_s2 + $0x240] sm:$0xff] %v4273_v11  ;;  %v4283_v55 = vsel %vm4282_vm1, %v6845_v15, %v4279_v29  ;;  %v3646_v27 = vmul.f32 %v6851_v56, %v9273_v30  ;;  %v3654_v63 = vand.u32 2147483647, %v9273_v30  ;;  %v6184_v21 = vmul.f32 -1.442695, %v9265_v23 }
 0x3be   : > { %v4288_v36 = vsel %vm9306_vm14, %v4287_v32, %v4283_v55  ;;  %v3633_v61 = vmul.f32 %v6849_v5, %v3632_v12  ;;  %vm3636_vm3 = vweird.f32 %v6849_v5  ;;  %v3656_v50 = vand.u32 2147483648, %v9273_v30 }
 0x3bf   : > { %v6853_v20 = vpop.eup %6852  ;;  %5173 = vst [vmem:[%s8252_s2 + $0x248] sm:$0xff] %v4288_v36  ;;  %v3647_v8 = vsub.f32 1.0, %v3646_v27  ;;  %6856 = vpow2.f32 %v6184_v21  ;;  %v2609_v16 = vadd.f32 %v2608_v26, %v8724_v31  ;;  %v2372_v22 = vadd.f32 %v2371_v48, %v8142_v19  ;;  %vm3637_vm5 = vmor %vm3635_vm15, %vm3636_vm3 }
 0x3c0   : > { %v3634_v47 = vadd.f32 %v6849_v5, %v3633_v61  ;;  %vm3651_vm4 = vweird.f32 %v6851_v56  ;;  %v9333_v37 = vadd.f32 1.0, %v6853_v20  ;;  %v2461_v23 = vadd.f32 %v2460_v18, %v8144_v25  ;;  %v2524_v18 = vpop.f32.mrf.mxu0 }
 0x3c1   : > { %v6855_v0 = vpop.eup %6854  ;;  %v3648_v54 = vmul.f32 %v6851_v56, %v3647_v8  ;;  %v6185_v38 = vmul.f32 -1.442695, %v2609_v16  ;;  %v6230_v9 = vmul.f32 -1.442695, %v2372_v22  ;;  %v2522_v7 = vadd.f32 %v2521_v6, %v8686_v10  ;;  %vm3652_vm6 = vmor %vm3650_vm2, %vm3651_vm4 }
 0x3c2   : > { %v3638_v49 = vsel %vm3637_vm5, %v6849_v5, %v3634_v47  ;;  %v3657_v59 = vor.u32 1.1754944e-38, %v3656_v50  ;;  %v4321_v15 = vmul.f32 %v6855_v0, %v9300_v24  ;;  %6858 = vrcp.f32 %v9333_v37 }
 0x3c3   : > { %v3643_v33 = vsel %vm9312_vm0, %v3642_v42, %v3638_v49  ;;  %v3649_v1 = vadd.f32 %v6851_v56, %v3648_v54  ;;  %v4329_v57 = vand.u32 2147483647, %v9300_v24  ;;  %v2611_v35 = vadd.f32 %v2610_v53, %v8724_v31 }
 0x3c4   : > { %5130 = vst [vmem:[%s8252_s2 + $0xf0] sm:$0xff] %v3643_v33  ;;  %v4322_v13 = vsub.f32 1.0, %v4321_v15  ;;  %v4331_v44 = vand.u32 2147483648, %v9300_v24  ;;  %6860 = vpow2.f32 %v6185_v38  ;;  %v6231_v62 = vmul.f32 -1.442695, %v2461_v23 }
 0x3c5   : > { %v6857_v52 = vpop.eup %6856  ;;  %v3653_v60 = vsel %vm3652_vm6, %v6851_v56, %v3649_v1  ;;  %vm3655_vm7 = vcmp.eq.f32.partialorder %v3654_v63, 8.507059e+37  ;;  %6862 = vpow2.f32 %v6230_v9  ;;  %v6188_v17 = vmul.f32 -1.442695, %v2522_v7 }
 0x3c6   : > { %v3658_v26 = vsel %vm3655_vm7, %v3657_v59, %v3653_v60  ;;  %v4323_v3 = vmul.f32 %v6855_v0, %v4322_v13  ;;  %vm4326_vm8 = vweird.f32 %v6855_v0  ;;  %v9351_v34 = vadd.f32 1.0, %v6857_v52 }
 0x3c7   : > { %5131 = vst [vmem:[%s8252_s2 + $0xf8] sm:$0xff] %v3658_v26  ;;  %vm4325_vm9 = vweird.f32 %v9300_v24  ;;  %6864 = vpow2.f32 %v6231_v62  ;;  %v6189_v30 = vmul.f32 -1.442695, %v2611_v35  ;;  %v2374_v41 = vadd.f32 %v2373_v45, %v8142_v19 }
 0x3c8   : > { %v6859_v14 = vpop.eup %6858  ;;  %v4324_v40 = vadd.f32 %v6855_v0, %v4323_v3  ;;  %vm4330_vm10 = vcmp.eq.f32.partialorder %v4329_v57, 8.507059e+37  ;;  %v4332_v2 = vor.u32 1.1754944e-38, %v4331_v44  ;;  %6866 = vrcp.f32 %v9351_v34  ;;  %vm4327_vm11 = vmor %vm4325_vm9, %vm4326_vm8 }
 0x3c9   : > { %v4336_v43 = vmul.f32 %v6859_v14, %v9333_v37  ;;  %v4344_v5 = vand.u32 2147483647, %v9333_v37  ;;  %v4346_v46 = vand.u32 2147483648, %v9333_v37  ;;  %6868 = vpow2.f32 %v6188_v17 }
 0x3ca   : > { %v6861_v24 = vpop.eup %6860  ;;  %v4328_v28 = vsel %vm4327_vm11, %v6855_v0, %v4324_v40  ;;  %v3699_v32 = vand.u32 2147483647, %v9351_v34  ;;  %v3701_v51 = vand.u32 2147483648, %v9351_v34  ;;  %6870 = vpow2.f32 %v6189_v30 }
 0x3cb   : > { %v6863_v48 = vpop.eup %6862  ;;  %v4333_v4 = vsel %vm4330_vm10, %v4332_v2, %v4328_v28  ;;  %v4337_v29 = vsub.f32 1.0, %v4336_v43  ;;  %v9362_v58 = vadd.f32 1.0, %v6861_v24  ;;  %v6234_v56 = vmul.f32 -1.442695, %v2374_v41 }
 0x3cc   : > { %5176 = vst [vmem:[%s8252_s2 + $0x260] sm:$0xff] %v4333_v4  ;;  %v9365_v11 = vadd.f32 1.0, %v6863_v48  ;;  %v2463_v12 = vadd.f32 %v2462_v39, %v8144_v25  ;;  %vm4340_vm12 = vweird.f32 %v9333_v37  ;;  %vm4341_vm13 = vweird.f32 %v6859_v14 }
 0x3cd   : > { %v6865_v42 = vpop.eup %6864  ;;  %v4338_v55 = vmul.f32 %v6859_v14, %v4337_v29  ;;  %6872 = vrcp.f32 %v9362_v58  ;;  %vm9370_vm14 = vcmp.eq.f32.partialorder %v4344_v5, 8.507059e+37  ;;  %v4347_v21 = vor.u32 1.1754944e-38, %v4346_v46  ;;  %vm4342_vm1 = vmor %vm4340_vm12, %vm4341_vm13 }
 0x3ce   : > { %v6867_v27 = vpop.eup %6866  ;;  %vm3695_vm15 = vweird.f32 %v9351_v34  ;;  %6874 = vrcp.f32 %v9365_v11  ;;  %vm9377_vm0 = vcmp.eq.f32.partialorder %v3699_v32, 8.507059e+37  ;;  %v3702_v20 = vor.u32 1.1754944e-38, %v3701_v51 }
 0x3cf   : > { %v6869_v36 = vpop.eup %6868  ;;  %v4339_v61 = vadd.f32 %v6859_v14, %v4338_v55  ;;  %v3691_v50 = vmul.f32 %v6867_v27, %v9351_v34  ;;  %6876 = vpow2.f32 %v6234_v56  ;;  %v3714_v16 = vand.u32 2147483647, %v9362_v58  ;;  %v2613_v56 = vpop.f32.mrf.mxu1 }
 0x3d0   : > { %v6871_v8 = vpop.eup %6870  ;;  %v3716_v22 = vand.u32 2147483648, %v9362_v58  ;;  %v9386_v47 = vadd.f32 1.0, %v6865_v42  ;;  %v6235_v23 = vmul.f32 -1.442695, %v2463_v12  ;;  %v9388_v54 = vadd.f32 1.0, %v6869_v36 }
 0x3d1   : > { %v4343_v53 = vsel %vm4342_vm1, %v6859_v14, %v4339_v61  ;;  %v3692_v0 = vsub.f32 1.0, %v3691_v50  ;;  %v2525_v38 = vadd.f32 %v2524_v18, %v8686_v10  ;;  %vm3710_vm2 = vweird.f32 %v9362_v58  ;;  %v2376_v61 = vpop.f32.mrf.mxu2 }
 0x3d2   : > { %v4348_v9 = vsel %vm9370_vm14, %v4347_v21, %v4343_v53  ;;  %v4389_v37 = vand.u32 2147483647, %v9365_v11  ;;  %v4391_v7 = vand.u32 2147483648, %v9365_v11  ;;  %6878 = vrcp.f32 %v9386_v47 }
 0x3d3   : > { %v6873_v49 = vpop.eup %6872  ;;  %5177 = vst [vmem:[%s8252_s2 + $0x268] sm:$0xff] %v4348_v9  ;;  %v3693_v59 = vmul.f32 %v6867_v27, %v3692_v0  ;;  %vm3696_vm3 = vweird.f32 %v6867_v27  ;;  %6880 = vrcp.f32 %v9388_v54  ;;  %v9399_v15 = vadd.f32 1.0, %v6871_v8 }
 0x3d4   : > { %v6875_v33 = vpop.eup %6874  ;;  %v3706_v1 = vmul.f32 %v6873_v49, %v9362_v58  ;;  %vm9402_vm4 = vcmp.eq.f32.partialorder %v3714_v16, 8.507059e+37  ;;  %v3717_v35 = vor.u32 1.1754944e-38, %v3716_v22  ;;  %vm4385_vm5 = vweird.f32 %v9365_v11  ;;  %vm3697_vm6 = vmor %vm3695_vm15, %vm3696_vm3 }
 0x3d5   : > { %v6877_v13 = vpop.eup %6876  ;;  %v3694_v44 = vadd.f32 %v6867_v27, %v3693_v59  ;;  %v4381_v62 = vmul.f32 %v6875_v33, %v9365_v11  ;;  %v4404_v45 = vand.u32 2147483647, %v9386_v47  ;;  %v4406_v52 = vand.u32 2147483648, %v9386_v47 }
 0x3d6   : > { %v3707_v60 = vsub.f32 1.0, %v3706_v1  ;;  %vm9412_vm7 = vcmp.eq.f32.partialorder %v4389_v37, 8.507059e+37  ;;  %v4392_v26 = vor.u32 1.1754944e-38, %v4391_v7  ;;  %v3759_v3 = vand.u32 2147483647, %v9388_v54 }
 0x3d7   : > { %v3698_v30 = vsel %vm3697_vm6, %v6867_v27, %v3694_v44  ;;  %vm3711_vm8 = vweird.f32 %v6873_v49  ;;  %v4382_v41 = vsub.f32 1.0, %v4381_v62  ;;  %vm4400_vm9 = vweird.f32 %v9386_v47 }
 0x3d8   : > { %6882 = vrcp.f32 %v9399_v15  ;;  %v6879_v14 = vpop.eup %6878  ;;  %v3703_v34 = vsel %vm9377_vm0, %v3702_v20, %v3698_v30  ;;  %v3708_v40 = vmul.f32 %v6873_v49, %v3707_v60  ;;  %vm4386_vm10 = vweird.f32 %v6875_v33  ;;  %vm3712_vm14 = vmor %vm3710_vm2, %vm3711_vm8  ;;  %v2615_v60 = vpop.f32.mrf.mxu1 }
 0x3d9   : > { %vm3755_vm11 = vweird.f32 %v9388_v54  ;;  %v6881_v2 = vpop.eup %6880  ;;  %5134 = vst [vmem:[%s8252_s2 + $0x110] sm:$0xff] %v3703_v34  ;;  %v4383_v43 = vmul.f32 %v6875_v33, %v4382_v41  ;;  %v4396_v5 = vmul.f32 %v6879_v14, %v9386_v47  ;;  %vm9424_vm12 = vcmp.eq.f32.partialorder %v4404_v45, 8.507059e+37  ;;  %vm4387_vm0 = vmor %vm4385_vm5, %vm4386_vm10 }
 0x3da   : > { %v4407_v39 = vor.u32 1.1754944e-38, %v4406_v52  ;;  %v3709_v24 = vadd.f32 %v6873_v49, %v3708_v40  ;;  %v3751_v28 = vmul.f32 %v6881_v2, %v9388_v54  ;;  %vm9429_vm13 = vcmp.eq.f32.partialorder %v3759_v3, 8.507059e+37  ;;  %v2526_v52 = vpop.f32.mrf.mxu0 }
 0x3db   : > { %v3761_v51 = vand.u32 2147483648, %v9388_v54  ;;  %v4384_v48 = vadd.f32 %v6875_v33, %v4383_v43  ;;  %v4397_v4 = vsub.f32 1.0, %v4396_v5  ;;  %vm4401_vm15 = vweird.f32 %v6879_v14 }
 0x3dc   : > { %v9437_v29 = vadd.f32 1.0, %v6877_v13  ;;  %v3713_v12 = vsel %vm3712_vm14, %v6873_v49, %v3709_v24  ;;  %v3752_v42 = vsub.f32 1.0, %v3751_v28  ;;  %6884 = vpow2.f32 %v6235_v23  ;;  %vm4402_vm3 = vmor %vm4400_vm9, %vm4401_vm15  ;;  %v2465_v23 = vpop.f32.mrf.mxu3 }
 0x3dd   : > { %v6192_v55 = vmul.f32 -1.442695, %v2525_v38  ;;  %v3718_v58 = vsel %vm9402_vm4, %v3717_v35, %v3713_v12  ;;  %v4388_v63 = vsel %vm4387_vm0, %v6875_v33, %v4384_v48  ;;  %v4398_v21 = vmul.f32 %v6879_v14, %v4397_v4  ;;  %v2378_v4 = vpop.f32.mrf.mxu2 }
 0x3de   : > { %v6883_v27 = vpop.eup %6882  ;;  %6886 = vrcp.f32 %v9437_v29  ;;  %5135 = vst [vmem:[%s8252_s2 + $0x118] sm:$0xff] %v3718_v58  ;;  %v4393_v18 = vsel %vm9412_vm7, %v4392_v26, %v4388_v63  ;;  %v3753_v36 = vmul.f32 %v6881_v2, %v3752_v42  ;;  %vm3756_vm1 = vweird.f32 %v6881_v2 }
 0x3df   : > { %v3766_v11 = vmul.f32 %v6883_v27, %v9399_v15  ;;  %5180 = vst [vmem:[%s8252_s2 + $0x280] sm:$0xff] %v4393_v18  ;;  %v4399_v50 = vadd.f32 %v6879_v14, %v4398_v21  ;;  %v3762_v6 = vor.u32 1.1754944e-38, %v3761_v51  ;;  %vm3770_vm2 = vweird.f32 %v9399_v15  ;;  %vm3757_vm4 = vmor %vm3755_vm11, %vm3756_vm1 }
 0x3e0   : > { %v3774_v20 = vand.u32 2147483647, %v9399_v15  ;;  %v3754_v8 = vadd.f32 %v6881_v2, %v3753_v36  ;;  %6888 = vpow2.f32 %v6192_v55  ;;  %v2614_v22 = vadd.f32 %v2613_v56, %v8724_v31 }
 0x3e1   : > { %v3767_v16 = vsub.f32 1.0, %v3766_v11  ;;  %v4403_v53 = vsel %vm4402_vm3, %v6879_v14, %v4399_v50  ;;  %vm3771_vm5 = vweird.f32 %v6883_v27  ;;  %v3776_v0 = vand.u32 2147483648, %v9399_v15 }
 0x3e2   : > { %v2377_v38 = vadd.f32 %v2376_v61, %v8142_v19  ;;  %v6885_v47 = vpop.eup %6884  ;;  %v4408_v9 = vsel %vm9424_vm12, %v4407_v39, %v4403_v53  ;;  %v3758_v37 = vsel %vm3757_vm4, %v6881_v2, %v3754_v8  ;;  %v6193_v49 = vmul.f32 -1.442695, %v2614_v22  ;;  %vm3772_vm7 = vmor %vm3770_vm2, %vm3771_vm5  ;;  %v2529_v46 = vpop.f32.mrf.mxu0 }
 0x3e3   : > { %v3768_v7 = vmul.f32 %v6883_v27, %v3767_v16  ;;  %5181 = vst [vmem:[%s8252_s2 + $0x288] sm:$0xff] %v4408_v9  ;;  %v3763_v33 = vsel %vm9429_vm13, %v3762_v6, %v3758_v37  ;;  %v9466_v54 = vadd.f32 1.0, %v6885_v47  ;;  %v2466_v57 = vadd.f32 %v2465_v23, %v8144_v25 }
 0x3e4   : > { %v6887_v59 = vpop.eup %6886  ;;  %v6238_v1 = vmul.f32 -1.442695, %v2377_v38  ;;  %5138 = vst [vmem:[%s8252_s2 + $0x130] sm:$0xff] %v3763_v33  ;;  %vm3775_vm6 = vcmp.eq.f32.partialorder %v3774_v20, 8.507059e+37  ;;  %6890 = vpow2.f32 %v6193_v49  ;;  %v3777_v44 = vor.u32 1.1754944e-38, %v3776_v0  ;;  %v2467_v55 = vpop.f32.mrf.mxu3 }
 0x3e5   : > { %v3769_v35 = vadd.f32 %v6883_v27, %v3768_v7  ;;  %v4441_v13 = vmul.f32 %v6887_v59, %v9437_v29  ;;  %v4449_v62 = vand.u32 2147483647, %v9437_v29  ;;  %v4451_v45 = vand.u32 2147483648, %v9437_v29 }
 0x3e6   : > { %6892 = vrcp.f32 %v9466_v54  ;;  %v6889_v17 = vpop.eup %6888  ;;  %v6239_v30 = vmul.f32 -1.442695, %v2466_v57  ;;  %vm4446_vm8 = vweird.f32 %v6887_v59  ;;  %v4464_v15 = vand.u32 2147483647, %v9466_v54 }
 0x3e7   : > { %v3773_v26 = vsel %vm3772_vm7, %v6883_v27, %v3769_v35  ;;  %v4442_v3 = vsub.f32 1.0, %v4441_v13  ;;  %6894 = vpow2.f32 %v6238_v1  ;;  %v9478_v14 = vadd.f32 1.0, %v6889_v17 }
 0x3e8   : > { %v3778_v41 = vsel %vm3775_vm6, %v3777_v44, %v3773_v26  ;;  %6896 = vpow2.f32 %v6239_v30  ;;  %v2527_v40 = vadd.f32 %v2526_v52, %v8686_v10  ;;  %v2616_v2 = vadd.f32 %v2615_v60, %v8724_v31 }
 0x3e9   : > { %5139 = vst [vmem:[%s8252_s2 + $0x138] sm:$0xff] %v3778_v41  ;;  %v4443_v34 = vmul.f32 %v6887_v59, %v4442_v3  ;;  %vm4445_vm9 = vweird.f32 %v9437_v29  ;;  %6898 = vrcp.f32 %v9478_v14  ;;  %vm9485_vm10 = vcmp.eq.f32.partialorder %v4449_v62, 8.507059e+37 }
 0x3ea   : > { %v6891_v43 = vpop.eup %6890  ;;  %v6196_v39 = vmul.f32 -1.442695, %v2527_v40  ;;  %v6197_v24 = vmul.f32 -1.442695, %v2616_v2  ;;  %vm4447_vm11 = vmor %vm4445_vm9, %vm4446_vm8  ;;  %v4452_v32 = vor.u32 1.1754944e-38, %v4451_v45  ;;  %vm4460_vm12 = vweird.f32 %v9466_v54 }
 0x3eb   : > { %v4444_v5 = vadd.f32 %v6887_v59, %v4443_v34  ;;  %v4466_v51 = vand.u32 2147483648, %v9466_v54  ;;  %v9492_v48 = vadd.f32 1.0, %v6891_v43  ;;  %vm9495_vm13 = vcmp.eq.f32.partialorder %v4464_v15, 8.507059e+37 }
 0x3ec   : > { %v6893_v28 = vpop.eup %6892  ;;  %6900 = vpow2.f32 %v6196_v39  ;;  %v3819_v58 = vand.u32 2147483647, %v9478_v14  ;;  %v3821_v63 = vand.u32 2147483648, %v9478_v14  ;;  %v2379_v11 = vadd.f32 %v2378_v4, %v8142_v19 }
 0x3ed   : > { %v6895_v29 = vpop.eup %6894  ;;  %v4448_v56 = vsel %vm4447_vm11, %v6887_v59, %v4444_v5  ;;  %v4456_v12 = vmul.f32 %v6893_v28, %v9466_v54  ;;  %6902 = vrcp.f32 %v9492_v48  ;;  %v4467_v50 = vor.u32 1.1754944e-38, %v4466_v51 }
 0x3ee   : > { %v4453_v27 = vsel %vm9485_vm10, %v4452_v32, %v4448_v56  ;;  %v6897_v21 = vpop.eup %6896  ;;  %v9505_v36 = vadd.f32 1.0, %v6895_v29  ;;  %6904 = vpow2.f32 %v6197_v24  ;;  %v3836_v6 = vand.u32 2147483648, %v9492_v48 }
 0x3ef   : > { %5184 = vst [vmem:[%s8252_s2 + $0x2a0] sm:$0xff] %v4453_v27  ;;  %v4457_v18 = vsub.f32 1.0, %v4456_v12  ;;  %v6899_v61 = vpop.eup %6898  ;;  %v9509_v20 = vadd.f32 1.0, %v6897_v21  ;;  %v2468_v8 = vadd.f32 %v2467_v55, %v8144_v25  ;;  %vm4461_vm14 = vweird.f32 %v6893_v28  ;;  %v2618_v55 = vpop.f32.mrf.mxu1 }
 0x3f0   : > { %v3811_v22 = vmul.f32 %v6899_v61, %v9478_v14  ;;  %v3834_v23 = vand.u32 2147483647, %v9492_v48  ;;  %vm3815_vm15 = vweird.f32 %v9478_v14  ;;  %vm9515_vm0 = vcmp.eq.f32.partialorder %v3819_v58, 8.507059e+37  ;;  %vm4462_vm1 = vmor %vm4460_vm12, %vm4461_vm14 }
 0x3f1   : > { %v4458_v16 = vmul.f32 %v6893_v28, %v4457_v18  ;;  %v3822_v0 = vor.u32 1.1754944e-38, %v3821_v63  ;;  %6906 = vrcp.f32 %v9505_v36  ;;  %v6242_v37 = vmul.f32 -1.442695, %v2379_v11 }
 0x3f2   : > { %v6901_v38 = vpop.eup %6900  ;;  %v3812_v9 = vsub.f32 1.0, %v3811_v22  ;;  %6908 = vrcp.f32 %v9509_v20  ;;  %vm3816_vm2 = vweird.f32 %v6899_v61  ;;  %vm3830_vm3 = vweird.f32 %v9492_v48 }
 0x3f3   : > { %v4459_v47 = vadd.f32 %v6893_v28, %v4458_v16  ;;  %v6903_v7 = vpop.eup %6902  ;;  %v3837_v49 = vor.u32 1.1754944e-38, %v3836_v6  ;;  %v6243_v59 = vmul.f32 -1.442695, %v2468_v8  ;;  %vm9525_vm4 = vcmp.eq.f32.partialorder %v3834_v23, 8.507059e+37  ;;  %vm3817_vm5 = vmor %vm3815_vm15, %vm3816_vm2 }
 0x3f4   : > { %v6905_v33 = vpop.eup %6904  ;;  %v3813_v57 = vmul.f32 %v6899_v61, %v3812_v9  ;;  %v3826_v35 = vmul.f32 %v6903_v7, %v9492_v48  ;;  %v4509_v44 = vand.u32 2147483647, %v9505_v36  ;;  %v4511_v62 = vand.u32 2147483648, %v9505_v36  ;;  %v2381_v48 = vpop.f32.mrf.mxu2 }
 0x3f5   : > { %v4463_v1 = vsel %vm4462_vm1, %v6893_v28, %v4459_v47  ;;  %v4524_v45 = vand.u32 2147483647, %v9509_v20  ;;  %v9534_v52 = vadd.f32 1.0, %v6901_v38  ;;  %v9537_v26 = vadd.f32 1.0, %v6905_v33 }
 0x3f6   : > { %v4468_v54 = vsel %vm9495_vm13, %v4467_v50, %v4463_v1  ;;  %v3814_v60 = vadd.f32 %v6899_v61, %v3813_v57  ;;  %v3827_v17 = vsub.f32 1.0, %v3826_v35  ;;  %6910 = vpow2.f32 %v6242_v37  ;;  %v2470_v37 = vpop.f32.mrf.mxu3 }
 0x3f7   : > { %5185 = vst [vmem:[%s8252_s2 + $0x2a8] sm:$0xff] %v4468_v54  ;;  %v6907_v3 = vpop.eup %6906  ;;  %vm4505_vm6 = vweird.f32 %v9505_v36  ;;  %vm4520_vm7 = vweird.f32 %v9509_v20  ;;  %v4526_v30 = vand.u32 2147483648, %v9509_v20  ;;  %6912 = vrcp.f32 %v9534_v52 }
 0x3f8   : > { %v6909_v41 = vpop.eup %6908  ;;  %v3818_v15 = vsel %vm3817_vm5, %v6899_v61, %v3814_v60  ;;  %v3828_v34 = vmul.f32 %v6903_v7, %v3827_v17  ;;  %vm3831_vm8 = vweird.f32 %v6903_v7  ;;  %v4501_v40 = vmul.f32 %v6907_v3, %v9505_v36 }
 0x3f9   : > { %v3823_v2 = vsel %vm9515_vm0, %v3822_v0, %v3818_v15  ;;  %vm9549_vm9 = vcmp.eq.f32.partialorder %v4509_v44, 8.507059e+37  ;;  %v4512_v43 = vor.u32 1.1754944e-38, %v4511_v62  ;;  %v4516_v5 = vmul.f32 %v6909_v41, %v9509_v20  ;;  %vm3832_vm11 = vmor %vm3830_vm3, %vm3831_vm8 }
 0x3fa   : > { %5142 = vst [vmem:[%s8252_s2 + $0x150] sm:$0xff] %v3823_v2  ;;  %v3829_v39 = vadd.f32 %v6903_v7, %v3828_v34  ;;  %v4502_v24 = vsub.f32 1.0, %v4501_v40  ;;  %vm9555_vm10 = vcmp.eq.f32.partialorder %v4524_v45, 8.507059e+37  ;;  %6914 = vrcp.f32 %v9537_v26 }
 0x3fb   : > { %vm4506_vm12 = vweird.f32 %v6907_v3  ;;  %v4517_v32 = vsub.f32 1.0, %v4516_v5  ;;  %v4527_v51 = vor.u32 1.1754944e-38, %v4526_v30  ;;  %v3879_v4 = vand.u32 2147483647, %v9534_v52  ;;  %v2531_v30 = vpop.f32.mrf.mxu0 }
 0x3fc   : > { %v6911_v29 = vpop.eup %6910  ;;  %v3833_v56 = vsel %vm3832_vm11, %v6903_v7, %v3829_v39  ;;  %v4503_v12 = vmul.f32 %v6907_v3, %v4502_v24  ;;  %6916 = vpow2.f32 %v6243_v59  ;;  %v2530_v42 = vadd.f32 %v2529_v46, %v8686_v10  ;;  %vm4507_vm15 = vmor %vm4505_vm6, %vm4506_vm12  ;;  %v2383_v28 = vpop.f32.mrf.mxu2 }
 0x3fd   : > { %v6913_v27 = vpop.eup %6912  ;;  %v3838_v58 = vsel %vm9525_vm4, %v3837_v49, %v3833_v56  ;;  %v4518_v63 = vmul.f32 %v6909_v41, %v4517_v32  ;;  %vm4521_vm13 = vweird.f32 %v6909_v41  ;;  %vm3875_vm14 = vweird.f32 %v9534_v52 }
 0x3fe   : > { %5143 = vst [vmem:[%s8252_s2 + $0x158] sm:$0xff] %v3838_v58  ;;  %v4504_v21 = vadd.f32 %v6907_v3, %v4503_v12  ;;  %v3871_v18 = vmul.f32 %v6913_v27, %v9534_v52  ;;  %v3881_v11 = vand.u32 2147483648, %v9534_v52  ;;  %v9570_v61 = vadd.f32 1.0, %v6911_v29  ;;  %vm4522_vm1 = vmor %vm4520_vm7, %vm4521_vm13 }
 0x3ff   : > { %v4519_v50 = vadd.f32 %v6909_v41, %v4518_v63  ;;  %vm9575_vm0 = vcmp.eq.f32.partialorder %v3879_v4, 8.507059e+37  ;;  %v6200_v8 = vmul.f32 -1.442695, %v2530_v42  ;;  %v2619_v16 = vadd.f32 %v2618_v55, %v8724_v31  ;;  %v2472_v42 = vpop.f32.mrf.mxu3 }
 0x400   : > { %v6915_v22 = vpop.eup %6914  ;;  %v4508_v23 = vsel %vm4507_vm15, %v6907_v3, %v4504_v21  ;;  %v3872_v53 = vsub.f32 1.0, %v3871_v18  ;;  %6918 = vrcp.f32 %v9570_v61  ;;  %v2382_v36 = vadd.f32 %v2381_v48, %v8142_v19 }
 0x401   : > { %v4513_v0 = vsel %vm9549_vm9, %v4512_v43, %v4508_v23  ;;  %v4523_v38 = vsel %vm4522_vm1, %v6909_v41, %v4519_v50  ;;  %v3886_v47 = vmul.f32 %v6915_v22, %v9537_v26  ;;  %v3894_v9 = vand.u32 2147483647, %v9537_v26  ;;  %v2620_v41 = vpop.f32.mrf.mxu1 }
 0x402   : > { %v6917_v7 = vpop.eup %6916  ;;  %5188 = vst [vmem:[%s8252_s2 + $0x2c0] sm:$0xff] %v4513_v0  ;;  %v4528_v20 = vsel %vm9555_vm10, %v4527_v51, %v4523_v38  ;;  %v3873_v49 = vmul.f32 %v6913_v27, %v3872_v53  ;;  %vm3876_vm2 = vweird.f32 %v6913_v27  ;;  %v3882_v59 = vor.u32 1.1754944e-38, %v3881_v11 }
 0x403   : > { %5189 = vst [vmem:[%s8252_s2 + $0x2c8] sm:$0xff] %v4528_v20  ;;  %v3887_v33 = vsub.f32 1.0, %v3886_v47  ;;  %v9593_v1 = vadd.f32 1.0, %v6917_v7  ;;  %6920 = vpow2.f32 %v6200_v8  ;;  %v6201_v57 = vmul.f32 -1.442695, %v2619_v16  ;;  %vm3877_vm4 = vmor %vm3875_vm14, %vm3876_vm2 }
 0x404   : > { %v3874_v35 = vadd.f32 %v6913_v27, %v3873_v49  ;;  %vm3890_vm3 = vweird.f32 %v9537_v26  ;;  %v3896_v13 = vand.u32 2147483648, %v9537_v26  ;;  %v6246_v44 = vmul.f32 -1.442695, %v2382_v36 }
 0x405   : > { %v3888_v54 = vmul.f32 %v6915_v22, %v3887_v33  ;;  %vm3891_vm5 = vweird.f32 %v6915_v22  ;;  %vm9599_vm6 = vcmp.eq.f32.partialorder %v3894_v9, 8.507059e+37  ;;  %6922 = vrcp.f32 %v9593_v1 }
 0x406   : > { %v6919_v45 = vpop.eup %6918  ;;  %v3878_v60 = vsel %vm3877_vm4, %v6913_v27, %v3874_v35  ;;  %v4569_v17 = vand.u32 2147483647, %v9570_v61  ;;  %6924 = vpow2.f32 %v6201_v57  ;;  %v2471_v3 = vadd.f32 %v2470_v37, %v8144_v25  ;;  %vm3892_vm7 = vmor %vm3890_vm3, %vm3891_vm5  ;;  %v2534_v35 = vpop.f32.mrf.mxu0 }
 0x407   : > { %v3883_v52 = vsel %vm9575_vm0, %v3882_v59, %v3878_v60  ;;  %v3889_v15 = vadd.f32 %v6915_v22, %v3888_v54  ;;  %v4561_v34 = vmul.f32 %v6919_v45, %v9570_v61  ;;  %v4571_v40 = vand.u32 2147483648, %v9570_v61 }
 0x408   : > { %5146 = vst [vmem:[%s8252_s2 + $0x170] sm:$0xff] %v3883_v52  ;;  %v3897_v2 = vor.u32 1.1754944e-38, %v3896_v13  ;;  %vm4565_vm8 = vweird.f32 %v9570_v61  ;;  %6926 = vpow2.f32 %v6246_v44  ;;  %v6247_v14 = vmul.f32 -1.442695, %v2471_v3 }
 0x409   : > { %v6921_v43 = vpop.eup %6920  ;;  %v3893_v5 = vsel %vm3892_vm7, %v6915_v22, %v3889_v15  ;;  %v4562_v46 = vsub.f32 1.0, %v4561_v34  ;;  %v2532_v39 = vadd.f32 %v2531_v30, %v8686_v10  ;;  %v2621_v24 = vadd.f32 %v2620_v41, %v8724_v31 }
 0x40a   : > { %v3898_v32 = vsel %vm9599_vm6, %v3897_v2, %v3893_v5  ;;  %vm9619_vm9 = vcmp.eq.f32.partialorder %v4569_v17, 8.507059e+37  ;;  %v9623_v51 = vadd.f32 1.0, %v6921_v43  ;;  %6928 = vpow2.f32 %v6247_v14 }
 0x40b   : > { %v6923_v4 = vpop.eup %6922  ;;  %5147 = vst [vmem:[%s8252_s2 + $0x178] sm:$0xff] %v3898_v32  ;;  %v4563_v29 = vmul.f32 %v6919_v45, %v4562_v46  ;;  %vm4566_vm10 = vweird.f32 %v6919_v45  ;;  %v4572_v56 = vor.u32 1.1754944e-38, %v4571_v40  ;;  %v6204_v12 = vmul.f32 -1.442695, %v2532_v39 }
 0x40c   : > { %v6925_v55 = vpop.eup %6924  ;;  %v4576_v27 = vmul.f32 %v6923_v4, %v9593_v1  ;;  %vm4580_vm11 = vweird.f32 %v9593_v1  ;;  %6930 = vrcp.f32 %v9623_v51  ;;  %v2384_v58 = vadd.f32 %v2383_v28, %v8142_v19  ;;  %vm4567_vm12 = vmor %vm4565_vm8, %vm4566_vm10 }
 0x40d   : > { %v4564_v63 = vadd.f32 %v6919_v45, %v4563_v29  ;;  %v4584_v48 = vand.u32 2147483647, %v9593_v1  ;;  %v9631_v21 = vadd.f32 1.0, %v6925_v55  ;;  %v6205_v18 = vmul.f32 -1.442695, %v2621_v24 }
 0x40e   : > { %v6927_v11 = vpop.eup %6926  ;;  %v4577_v50 = vsub.f32 1.0, %v4576_v27  ;;  %v4586_v6 = vand.u32 2147483648, %v9593_v1  ;;  %6932 = vpow2.f32 %v6204_v12  ;;  %v2473_v8 = vadd.f32 %v2472_v42, %v8144_v25 }
 0x40f   : > { %v4568_v16 = vsel %vm4567_vm12, %v6919_v45, %v4564_v63  ;;  %vm4581_vm13 = vweird.f32 %v6923_v4  ;;  %v3939_v22 = vand.u32 2147483647, %v9623_v51  ;;  %6934 = vrcp.f32 %v9631_v21 }
 0x410   : > { %v6929_v23 = vpop.eup %6928  ;;  %v4573_v53 = vsel %vm9619_vm9, %v4572_v56, %v4568_v16  ;;  %v4578_v36 = vmul.f32 %v6923_v4, %v4577_v50  ;;  %v3941_v61 = vand.u32 2147483648, %v9623_v51  ;;  %v6250_v0 = vmul.f32 -1.442695, %v2384_v58  ;;  %vm4582_vm15 = vmor %vm4580_vm11, %vm4581_vm13 }
 0x411   : > { %5192 = vst [vmem:[%s8252_s2 + $0x2e0] sm:$0xff] %v4573_v53  ;;  %vm9643_vm14 = vcmp.eq.f32.partialorder %v4584_v48, 8.507059e+37  ;;  %v9647_v47 = vadd.f32 1.0, %v6927_v11  ;;  %v9649_v9 = vadd.f32 1.0, %v6929_v23  ;;  %6936 = vpow2.f32 %v6205_v18  ;;  %v2623_v53 = vpop.f32.mrf.mxu1 }
 0x412   : > { %v6931_v37 = vpop.eup %6930  ;;  %v4579_v7 = vadd.f32 %v6923_v4, %v4578_v36  ;;  %v4587_v20 = vor.u32 1.1754944e-38, %v4586_v6  ;;  %v3954_v49 = vand.u32 2147483647, %v9631_v21  ;;  %v3956_v59 = vand.u32 2147483648, %v9631_v21 }
 0x413   : > { %v3931_v33 = vmul.f32 %v6931_v37, %v9623_v51  ;;  %vm3935_vm0 = vweird.f32 %v9623_v51  ;;  %6938 = vrcp.f32 %v9647_v47  ;;  %v6251_v57 = vmul.f32 -1.442695, %v2473_v8 }
 0x414   : > { %v6933_v13 = vpop.eup %6932  ;;  %v4583_v44 = vsel %vm4582_vm15, %v6923_v4, %v4579_v7  ;;  %vm9659_vm1 = vcmp.eq.f32.partialorder %v3939_v22, 8.507059e+37  ;;  %v3942_v62 = vor.u32 1.1754944e-38, %v3941_v61  ;;  %6940 = vpow2.f32 %v6250_v0 }
 0x415   : > { %v6935_v45 = vpop.eup %6934  ;;  %v4588_v1 = vsel %vm9643_vm14, %v4587_v20, %v4583_v44  ;;  %v3932_v60 = vsub.f32 1.0, %v3931_v33  ;;  %vm3950_vm2 = vweird.f32 %v9631_v21  ;;  %6942 = vrcp.f32 %v9649_v9 }
 0x416   : > { %5193 = vst [vmem:[%s8252_s2 + $0x2e8] sm:$0xff] %v4588_v1  ;;  %vm3936_vm3 = vweird.f32 %v6931_v37  ;;  %v3946_v17 = vmul.f32 %v6935_v45, %v9631_v21  ;;  %vm9669_vm4 = vcmp.eq.f32.partialorder %v3954_v49, 8.507059e+37  ;;  %v3957_v30 = vor.u32 1.1754944e-38, %v3956_v59  ;;  %v2475_v1 = vpop.f32.mrf.mxu3 }
 0x417   : > { %v2535_v41 = vadd.f32 %v2534_v35, %v8686_v10  ;;  %v6937_v52 = vpop.eup %6936  ;;  %v3933_v15 = vmul.f32 %v6931_v37, %v3932_v60  ;;  %v4629_v34 = vand.u32 2147483647, %v9647_v47  ;;  %v4631_v40 = vand.u32 2147483648, %v9647_v47  ;;  %vm3937_vm6 = vmor %vm3935_vm0, %vm3936_vm3 }
 0x418   : > { %v9676_v2 = vadd.f32 1.0, %v6933_v13  ;;  %v3947_v14 = vsub.f32 1.0, %v3946_v17  ;;  %vm4625_vm5 = vweird.f32 %v9647_v47  ;;  %v9679_v43 = vadd.f32 1.0, %v6937_v52 }
 0x419   : > { %6944 = vpow2.f32 %v6251_v57  ;;  %v6939_v5 = vpop.eup %6938  ;;  %v3934_v46 = vadd.f32 %v6931_v37, %v3933_v15  ;;  %v4644_v39 = vand.u32 2147483647, %v9649_v9  ;;  %v4646_v24 = vand.u32 2147483648, %v9649_v9 }
 0x41a   : > { %6946 = vrcp.f32 %v9676_v2  ;;  %v6941_v28 = vpop.eup %6940  ;;  %v3948_v32 = vmul.f32 %v6935_v45, %v3947_v14  ;;  %vm3951_vm7 = vweird.f32 %v6935_v45  ;;  %v4621_v26 = vmul.f32 %v6939_v5, %v9647_v47 }
 0x41b   : > { %vm4640_vm8 = vweird.f32 %v9649_v9  ;;  %v6943_v4 = vpop.eup %6942  ;;  %v3938_v29 = vsel %vm3937_vm6, %v6931_v37, %v3934_v46  ;;  %vm9689_vm9 = vcmp.eq.f32.partialorder %v4629_v34, 8.507059e+37  ;;  %v4632_v12 = vor.u32 1.1754944e-38, %v4631_v40  ;;  %vm3952_vm10 = vmor %vm3950_vm2, %vm3951_vm7  ;;  %v2386_v37 = vpop.f32.mrf.mxu2 }
 0x41c   : > { %6948 = vrcp.f32 %v9679_v43  ;;  %v3943_v42 = vsel %vm9659_vm1, %v3942_v62, %v3938_v29  ;;  %v3949_v51 = vadd.f32 %v6935_v45, %v3948_v32  ;;  %v4622_v55 = vsub.f32 1.0, %v4621_v26  ;;  %v2536_v40 = vpop.f32.mrf.mxu0  ;;  %v2625_v26 = vpop.f32.mrf.mxu1 }
 0x41d   : > { %v4636_v27 = vmul.f32 %v6943_v4, %v9649_v9  ;;  %5150 = vst [vmem:[%s8252_s2 + $0x190] sm:$0xff] %v3943_v42  ;;  %vm4626_vm11 = vweird.f32 %v6939_v5  ;;  %vm9700_vm12 = vcmp.eq.f32.partialorder %v4644_v39, 8.507059e+37  ;;  %v4647_v63 = vor.u32 1.1754944e-38, %v4646_v24 }
 0x41e   : > { %v6208_v48 = vmul.f32 -1.442695, %v2535_v41  ;;  %v3953_v11 = vsel %vm3952_vm10, %v6935_v45, %v3949_v51  ;;  %v4623_v50 = vmul.f32 %v6939_v5, %v4622_v55  ;;  %v3999_v8 = vand.u32 2147483647, %v9676_v2  ;;  %vm4627_vm14 = vmor %vm4625_vm5, %vm4626_vm11 }
 0x41f   : > { %v6945_v18 = vpop.eup %6944  ;;  %v4637_v6 = vsub.f32 1.0, %v4636_v27  ;;  %v3958_v22 = vsel %vm9669_vm4, %v3957_v30, %v3953_v11  ;;  %vm4641_vm13 = vweird.f32 %v6943_v4  ;;  %v4001_v21 = vand.u32 2147483648, %v9676_v2 }
 0x420   : > { %v6947_v16 = vpop.eup %6946  ;;  %v9708_v23 = vadd.f32 1.0, %v6941_v28  ;;  %5151 = vst [vmem:[%s8252_s2 + $0x198] sm:$0xff] %v3958_v22  ;;  %v4624_v36 = vadd.f32 %v6939_v5, %v4623_v50  ;;  %v9712_v38 = vadd.f32 1.0, %v6945_v18  ;;  %vm3995_vm15 = vweird.f32 %v9676_v2  ;;  %vm4642_vm0 = vmor %vm4640_vm8, %vm4641_vm13 }
 0x421   : > { %v4638_v61 = vmul.f32 %v6943_v4, %v4637_v6  ;;  %v3991_v0 = vmul.f32 %v6947_v16, %v9676_v2  ;;  %v4014_v20 = vand.u32 2147483647, %v9679_v43  ;;  %v4016_v49 = vand.u32 2147483648, %v9679_v43 }
 0x422   : > { %v6949_v7 = vpop.eup %6948  ;;  %6950 = vrcp.f32 %v9708_v23  ;;  %v4628_v59 = vsel %vm4627_vm14, %v6939_v5, %v4624_v36  ;;  %vm3996_vm1 = vweird.f32 %v6947_v16  ;;  %vm9727_vm2 = vcmp.eq.f32.partialorder %v3999_v8, 8.507059e+37 }
 0x423   : > { %v4639_v33 = vadd.f32 %v6943_v4, %v4638_v61  ;;  %v3992_v57 = vsub.f32 1.0, %v3991_v0  ;;  %v4006_v35 = vmul.f32 %v6949_v7, %v9679_v43  ;;  %v4633_v13 = vsel %vm9689_vm9, %v4632_v12, %v4628_v59  ;;  %vm3997_vm7 = vmor %vm3995_vm15, %vm3996_vm1  ;;  %v2388_v51 = vpop.f32.mrf.mxu2  ;;  %v2477_v61 = vpop.f32.mrf.mxu3 }
 0x424   : > { %v4002_v44 = vor.u32 1.1754944e-38, %v4001_v21  ;;  %5196 = vst [vmem:[%s8252_s2 + $0x300] sm:$0xff] %v4633_v13  ;;  %6952 = vrcp.f32 %v9712_v38  ;;  %vm4010_vm3 = vweird.f32 %v9679_v43  ;;  %vm9736_vm4 = vcmp.eq.f32.partialorder %v4014_v20, 8.507059e+37 }
 0x425   : > { %v4643_v54 = vsel %vm4642_vm0, %v6943_v4, %v4639_v33  ;;  %v3993_v62 = vmul.f32 %v6947_v16, %v3992_v57  ;;  %v4007_v45 = vsub.f32 1.0, %v4006_v35  ;;  %v4017_v17 = vor.u32 1.1754944e-38, %v4016_v49  ;;  %v2539_v49 = vpop.f32.mrf.mxu0 }
 0x426   : > { %v4648_v60 = vsel %vm9700_vm12, %v4647_v63, %v4643_v54  ;;  %vm4011_vm5 = vweird.f32 %v6949_v7  ;;  %vm4685_vm6 = vweird.f32 %v9708_v23  ;;  %6954 = vpow2.f32 %v6208_v48 }
 0x427   : > { %5197 = vst [vmem:[%s8252_s2 + $0x308] sm:$0xff] %v4648_v60  ;;  %v3994_v3 = vadd.f32 %v6947_v16, %v3993_v62  ;;  %v4008_v30 = vmul.f32 %v6949_v7, %v4007_v45  ;;  %v2624_v52 = vadd.f32 %v2623_v53, %v8724_v31  ;;  %v2387_v15 = vadd.f32 %v2386_v37, %v8142_v19  ;;  %vm4012_vm8 = vmor %vm4010_vm3, %vm4011_vm5 }
 0x428   : > { %v6951_v41 = vpop.eup %6950  ;;  %v2476_v34 = vadd.f32 %v2475_v1, %v8144_v25  ;;  %v4689_v39 = vand.u32 2147483647, %v9708_v23  ;;  %v4691_v2 = vand.u32 2147483648, %v9708_v23  ;;  %v4704_v28 = vand.u32 2147483647, %v9712_v38 }
 0x429   : > { %v3998_v14 = vsel %vm3997_vm7, %v6947_v16, %v3994_v3  ;;  %v4009_v5 = vadd.f32 %v6949_v7, %v4008_v30  ;;  %v4681_v46 = vmul.f32 %v6951_v41, %v9708_v23  ;;  %v6209_v32 = vmul.f32 -1.442695, %v2624_v52 }
 0x42a   : > { %v4003_v24 = vsel %vm9727_vm2, %v4002_v44, %v3998_v14  ;;  %v6953_v4 = vpop.eup %6952  ;;  %v6254_v12 = vmul.f32 -1.442695, %v2387_v15  ;;  %v6255_v42 = vmul.f32 -1.442695, %v2476_v34  ;;  %vm4686_vm9 = vweird.f32 %v6951_v41 }
 0x42b   : > { %5154 = vst [vmem:[%s8252_s2 + $0x1b0] sm:$0xff] %v4003_v24  ;;  %v4013_v29 = vsel %vm4012_vm8, %v6949_v7, %v4009_v5  ;;  %v4682_v56 = vsub.f32 1.0, %v4681_v46  ;;  %v4696_v43 = vmul.f32 %v6953_v4, %v9712_v38  ;;  %6956 = vpow2.f32 %v6209_v32  ;;  %vm4687_vm10 = vmor %vm4685_vm6, %vm4686_vm9 }
 0x42c   : > { %v4018_v55 = vsel %vm9736_vm4, %v4017_v17, %v4013_v29  ;;  %6958 = vpow2.f32 %v6254_v12  ;;  %v2537_v58 = vadd.f32 %v2536_v40, %v8686_v10  ;;  %v2626_v63 = vadd.f32 %v2625_v26, %v8724_v31  ;;  %v6955_v48 = vpop.eup %6954 }
 0x42d   : > { %5155 = vst [vmem:[%s8252_s2 + $0x1b8] sm:$0xff] %v4018_v55  ;;  %v4683_v27 = vmul.f32 %v6951_v41, %v4682_v56  ;;  %v4697_v18 = vsub.f32 1.0, %v4696_v43  ;;  %v4706_v11 = vand.u32 2147483648, %v9712_v38  ;;  %6960 = vpow2.f32 %v6255_v42 }
 0x42e   : > { %v2389_v50 = vadd.f32 %v2388_v51, %v8142_v19  ;;  %v9765_v8 = vadd.f32 1.0, %v6955_v48  ;;  %v6212_v16 = vmul.f32 -1.442695, %v2537_v58  ;;  %v6213_v22 = vmul.f32 -1.442695, %v2626_v63 }
 0x42f   : > { %v4684_v6 = vadd.f32 %v6951_v41, %v4683_v27  ;;  %v4692_v21 = vor.u32 1.1754944e-38, %v4691_v2  ;;  %v4698_v53 = vmul.f32 %v6953_v4, %v4697_v18  ;;  %vm4701_vm11 = vweird.f32 %v6953_v4  ;;  %v2628_v18 = vpop.f32.mrf.mxu1 }
 0x430   : > { %v6258_v36 = vmul.f32 -1.442695, %v2389_v50  ;;  %vm4690_vm12 = vcmp.eq.f32.partialorder %v4689_v39, 8.507059e+37  ;;  %vm4700_vm13 = vweird.f32 %v9712_v38  ;;  %6962 = vrcp.f32 %v9765_v8 }
 0x431   : > { %v4688_v0 = vsel %vm4687_vm10, %v6951_v41, %v4684_v6  ;;  %v6957_v37 = vpop.eup %6956  ;;  %v4699_v20 = vadd.f32 %v6953_v4, %v4698_v53  ;;  %vm4705_vm14 = vcmp.eq.f32.partialorder %v4704_v28, 8.507059e+37  ;;  %6964 = vpow2.f32 %v6212_v16  ;;  %vm4702_vm15 = vmor %vm4700_vm13, %vm4701_vm11 }
 0x432   : > { %v4693_v7 = vsel %vm4690_vm12, %v4692_v21, %v4688_v0  ;;  %v6959_v23 = vpop.eup %6958  ;;  %v4707_v59 = vor.u32 1.1754944e-38, %v4706_v11  ;;  %v9774_v33 = vadd.f32 1.0, %v6957_v37  ;;  %6966 = vpow2.f32 %v6213_v22 }
 0x433   : > { %5200 = vst [vmem:[%s8252_s2 + $0x320] sm:$0xff] %v4693_v7  ;;  %v2478_v57 = vadd.f32 %v2477_v61, %v8144_v25  ;;  %v6961_v38 = vpop.eup %6960  ;;  %v4703_v35 = vsel %vm4702_vm15, %v6953_v4, %v4699_v20  ;;  %v4059_v13 = vand.u32 2147483647, %v9765_v8  ;;  %v9778_v47 = vadd.f32 1.0, %v6959_v23 }
 0x434   : > { %6968 = vpow2.f32 %v6258_v36  ;;  %v4708_v44 = vsel %vm4705_vm14, %v4707_v59, %v4703_v35  ;;  %v2540_v54 = vadd.f32 %v2539_v49, %v8686_v10  ;;  %v4061_v62 = vand.u32 2147483648, %v9765_v8 }
 0x435   : > { %6970 = vrcp.f32 %v9774_v33  ;;  %5201 = vst [vmem:[%s8252_s2 + $0x328] sm:$0xff] %v4708_v44  ;;  %vm4055_vm0 = vweird.f32 %v9765_v8  ;;  %v9786_v1 = vadd.f32 1.0, %v6961_v38  ;;  %v6259_v60 = vmul.f32 -1.442695, %v2478_v57  ;;  %v2391_v38 = vpop.f32.mrf.mxu2 }
 0x436   : > { %6972 = vrcp.f32 %v9778_v47  ;;  %v6963_v45 = vpop.eup %6962  ;;  %vm9789_vm1 = vcmp.eq.f32.partialorder %v4059_v13, 8.507059e+37  ;;  %v4074_v30 = vand.u32 2147483647, %v9774_v33  ;;  %v4076_v41 = vand.u32 2147483648, %v9774_v33 }
 0x437   : > { %v6965_v9 = vpop.eup %6964  ;;  %v4051_v17 = vmul.f32 %v6963_v45, %v9765_v8  ;;  %v4749_v15 = vand.u32 2147483647, %v9778_v47  ;;  %v4751_v34 = vand.u32 2147483648, %v9778_v47  ;;  %6974 = vrcp.f32 %v9786_v1 }
 0x438   : > { %v6967_v52 = vpop.eup %6966  ;;  %v6216_v40 = vmul.f32 -1.442695, %v2540_v54  ;;  %v4062_v46 = vor.u32 1.1754944e-38, %v4061_v62  ;;  %vm4070_vm2 = vweird.f32 %v9774_v33  ;;  %v9799_v39 = vadd.f32 1.0, %v6965_v9 }
 0x439   : > { %v4052_v5 = vsub.f32 1.0, %v4051_v17  ;;  %vm4056_vm3 = vweird.f32 %v6963_v45  ;;  %vm4745_vm4 = vweird.f32 %v9778_v47  ;;  %v9802_v2 = vadd.f32 1.0, %v6967_v52 }
 0x43a   : > { %v6969_v14 = vpop.eup %6968  ;;  %6976 = vpow2.f32 %v6259_v60  ;;  %vm9805_vm5 = vcmp.eq.f32.partialorder %v4074_v30, 8.507059e+37  ;;  %v4077_v29 = vor.u32 1.1754944e-38, %v4076_v41  ;;  %v4764_v56 = vand.u32 2147483647, %v9786_v1  ;;  %vm4057_vm7 = vmor %vm4055_vm0, %vm4056_vm3 }
 0x43b   : > { %v6971_v24 = vpop.eup %6970  ;;  %v4053_v32 = vmul.f32 %v6963_v45, %v4052_v5  ;;  %vm9811_vm6 = vcmp.eq.f32.partialorder %v4749_v15, 8.507059e+37  ;;  %v4752_v51 = vor.u32 1.1754944e-38, %v4751_v34  ;;  %6978 = vrcp.f32 %v9799_v39  ;;  %v2480_v5 = vpop.f32.mrf.mxu3 }
 0x43c   : > { %v6973_v28 = vpop.eup %6972  ;;  %v4066_v26 = vmul.f32 %v6971_v24, %v9774_v33  ;;  %v4766_v27 = vand.u32 2147483648, %v9786_v1  ;;  %6980 = vpow2.f32 %v6216_v40  ;;  %vm4760_vm8 = vweird.f32 %v9786_v1 }
 0x43d   : > { %v4741_v12 = vmul.f32 %v6973_v28, %v9778_v47  ;;  %v4054_v55 = vadd.f32 %v6963_v45, %v4053_v32  ;;  %v6975_v58 = vpop.eup %6974  ;;  %6982 = vrcp.f32 %v9802_v2  ;;  %v9822_v48 = vadd.f32 1.0, %v6969_v14 }
 0x43e   : > { %v4067_v43 = vsub.f32 1.0, %v4066_v26  ;;  %vm4071_vm9 = vweird.f32 %v6971_v24  ;;  %v4756_v6 = vmul.f32 %v6975_v58, %v9786_v1  ;;  %vm9825_vm10 = vcmp.eq.f32.partialorder %v4764_v56, 8.507059e+37  ;;  %v2630_v56 = vpop.f32.mrf.mxu1 }
 0x43f   : > { %v4742_v63 = vsub.f32 1.0, %v4741_v12  ;;  %v4058_v11 = vsel %vm4057_vm7, %v6963_v45, %v4054_v55  ;;  %vm4746_vm11 = vweird.f32 %v6973_v28  ;;  %v4119_v53 = vand.u32 2147483647, %v9799_v39  ;;  %vm4072_vm12 = vmor %vm4070_vm2, %vm4071_vm9 }
 0x440   : > { %v4068_v50 = vmul.f32 %v6971_v24, %v4067_v43  ;;  %v6977_v8 = vpop.eup %6976  ;;  %v4063_v22 = vsel %vm9789_vm1, %v4062_v46, %v4058_v11  ;;  %v4757_v61 = vsub.f32 1.0, %v4756_v6  ;;  %v4767_v0 = vor.u32 1.1754944e-38, %v4766_v27  ;;  %vm4747_vm14 = vmor %vm4745_vm4, %vm4746_vm11  ;;  %v2393_v11 = vpop.f32.mrf.mxu2 }
 0x441   : > { %v4743_v21 = vmul.f32 %v6973_v28, %v4742_v63  ;;  %5158 = vst [vmem:[%s8252_s2 + $0x1d0] sm:$0xff] %v4063_v22  ;;  %v2629_v37 = vadd.f32 %v2628_v18, %v8724_v31  ;;  %v6979_v7 = vpop.eup %6978  ;;  %vm4115_vm13 = vweird.f32 %v9799_v39  ;;  %v4121_v49 = vand.u32 2147483648, %v9799_v39 }
 0x442   : > { %v4069_v36 = vadd.f32 %v6971_v24, %v4068_v50  ;;  %6984 = vrcp.f32 %v9822_v48  ;;  %v6981_v23 = vpop.eup %6980  ;;  %v4758_v57 = vmul.f32 %v6975_v58, %v4757_v61  ;;  %vm4761_vm15 = vweird.f32 %v6975_v58 }
 0x443   : > { %v4744_v20 = vadd.f32 %v6973_v28, %v4743_v21  ;;  %v4111_v33 = vmul.f32 %v6979_v7, %v9799_v39  ;;  %vm4130_vm0 = vweird.f32 %v9802_v2  ;;  %v6983_v35 = vpop.eup %6982  ;;  %vm9846_vm1 = vcmp.eq.f32.partialorder %v4119_v53, 8.507059e+37  ;;  %vm4762_vm2 = vmor %vm4760_vm8, %vm4761_vm15 }
 0x444   : > { %v4073_v59 = vsel %vm4072_vm12, %v6971_v24, %v4069_v36  ;;  %v4134_v47 = vand.u32 2147483647, %v9802_v2  ;;  %v4759_v45 = vadd.f32 %v6975_v58, %v4758_v57  ;;  %v4126_v9 = vmul.f32 %v6983_v35, %v9802_v2 }
 0x445   : > { %v4078_v13 = vsel %vm9805_vm5, %v4077_v29, %v4073_v59  ;;  %v4748_v44 = vsel %vm4747_vm14, %v6973_v28, %v4744_v20  ;;  %v4112_v60 = vsub.f32 1.0, %v4111_v33  ;;  %v4136_v17 = vand.u32 2147483648, %v9802_v2  ;;  %v2541_v29 = vpop.f32.mrf.mxu0 }
 0x446   : > { %5159 = vst [vmem:[%s8252_s2 + $0x1d8] sm:$0xff] %v4078_v13  ;;  %v4753_v62 = vsel %vm9811_vm6, %v4752_v51, %v4748_v44  ;;  %v4809_v3 = vand.u32 2147483647, %v9822_v48  ;;  %v9861_v30 = vadd.f32 1.0, %v6977_v8  ;;  %v9863_v41 = vadd.f32 1.0, %v6981_v23 }
 0x447   : > { %5204 = vst [vmem:[%s8252_s2 + $0x340] sm:$0xff] %v4753_v62  ;;  %v4763_v52 = vsel %vm4762_vm2, %v6975_v58, %v4759_v45  ;;  %v4113_v15 = vmul.f32 %v6979_v7, %v4112_v60  ;;  %vm4116_vm3 = vweird.f32 %v6979_v7  ;;  %v4127_v34 = vsub.f32 1.0, %v4126_v9  ;;  %v2633_v60 = vpop.f32.mrf.mxu1 }
 0x448   : > { %v6985_v40 = vpop.eup %6984  ;;  %v4768_v14 = vsel %vm9825_vm10, %v4767_v0, %v4763_v52  ;;  %vm4131_vm4 = vweird.f32 %v6983_v35  ;;  %v4811_v1 = vand.u32 2147483648, %v9822_v48  ;;  %6986 = vrcp.f32 %v9861_v30  ;;  %vm4117_vm5 = vmor %vm4115_vm13, %vm4116_vm3 }
 0x449   : > { %5205 = vst [vmem:[%s8252_s2 + $0x348] sm:$0xff] %v4768_v14  ;;  %v4114_v46 = vadd.f32 %v6979_v7, %v4113_v15  ;;  %v4128_v24 = vmul.f32 %v6983_v35, %v4127_v34  ;;  %v4801_v28 = vmul.f32 %v6985_v40, %v9822_v48  ;;  %v6217_v32 = vmul.f32 -1.442695, %v2629_v37  ;;  %vm4132_vm8 = vmor %vm4130_vm0, %vm4131_vm4 }
 0x44a   : > { %v4122_v26 = vor.u32 1.1754944e-38, %v4121_v49  ;;  %vm9873_vm6 = vcmp.eq.f32.partialorder %v4134_v47, 8.507059e+37  ;;  %vm4805_vm7 = vweird.f32 %v9822_v48  ;;  %6988 = vrcp.f32 %v9863_v41  ;;  %v2482_v48 = vpop.f32.mrf.mxu3 }
 0x44b   : > { %v4118_v12 = vsel %vm4117_vm5, %v6979_v7, %v4114_v46  ;;  %v4129_v42 = vadd.f32 %v6983_v35, %v4128_v24  ;;  %v4137_v51 = vor.u32 1.1754944e-38, %v4136_v17  ;;  %v4802_v55 = vsub.f32 1.0, %v4801_v28 }
 0x44c   : > { %v4123_v39 = vsel %vm9846_vm1, %v4122_v26, %v4118_v12  ;;  %vm4806_vm9 = vweird.f32 %v6985_v40  ;;  %vm9884_vm10 = vcmp.eq.f32.partialorder %v4809_v3, 8.507059e+37  ;;  %v4812_v27 = vor.u32 1.1754944e-38, %v4811_v1 }
 0x44d   : > { %5162 = vst [vmem:[%s8252_s2 + $0x1f0] sm:$0xff] %v4123_v39  ;;  %v4133_v58 = vsel %vm4132_vm8, %v6983_v35, %v4129_v42  ;;  %v4803_v63 = vmul.f32 %v6985_v40, %v4802_v55  ;;  %vm4820_vm11 = vweird.f32 %v9861_v30  ;;  %v4824_v18 = vand.u32 2147483647, %v9861_v30  ;;  %vm4807_vm12 = vmor %vm4805_vm7, %vm4806_vm9  ;;  %v2544_v45 = vpop.f32.mrf.mxu0 }
 0x44e   : > { %6990 = vpow2.f32 %v6217_v32  ;;  %v6987_v50 = vpop.eup %6986  ;;  %v4138_v2 = vsel %vm9873_vm6, %v4137_v51, %v4133_v58  ;;  %v4826_v6 = vand.u32 2147483648, %v9861_v30  ;;  %v2392_v16 = vadd.f32 %v2391_v38, %v8142_v19 }
 0x44f   : > { %v2481_v8 = vadd.f32 %v2480_v5, %v8144_v25  ;;  %5163 = vst [vmem:[%s8252_s2 + $0x1f8] sm:$0xff] %v4138_v2  ;;  %v4804_v22 = vadd.f32 %v6985_v40, %v4803_v63  ;;  %v4816_v21 = vmul.f32 %v6987_v50, %v9861_v30  ;;  %v4179_v53 = vand.u32 2147483647, %v9863_v41  ;;  %v2396_v63 = vpop.f32.mrf.mxu2 }
 0x450   : > { %v2542_v36 = vadd.f32 %v2541_v29, %v8686_v10  ;;  %v6989_v61 = vpop.eup %6988  ;;  %v6262_v0 = vmul.f32 -1.442695, %v2392_v16  ;;  %v2631_v7 = vadd.f32 %v2630_v56, %v8724_v31  ;;  %v2394_v20 = vadd.f32 %v2393_v11, %v8142_v19  ;;  %v9946_v16 = vpop.f32.mrf.mxu1 }
 0x451   : > { %v6263_v37 = vmul.f32 -1.442695, %v2481_v8  ;;  %v4808_v49 = vsel %vm4807_vm12, %v6985_v40, %v4804_v22  ;;  %v4817_v23 = vsub.f32 1.0, %v4816_v21  ;;  %vm4821_vm13 = vweird.f32 %v6987_v50 }
 0x452   : > { %v4171_v59 = vmul.f32 %v6989_v61, %v9863_v41  ;;  %v4813_v57 = vsel %vm9884_vm10, %v4812_v27, %v4808_v49  ;;  %6992 = vpow2.f32 %v6262_v0  ;;  %v6220_v33 = vmul.f32 -1.442695, %v2542_v36  ;;  %vm4822_vm15 = vmor %vm4820_vm11, %vm4821_vm13 }
 0x453   : > { %v6221_v38 = vmul.f32 -1.442695, %v2631_v7  ;;  %5208 = vst [vmem:[%s8252_s2 + $0x360] sm:$0xff] %v4813_v57  ;;  %v4818_v13 = vmul.f32 %v6987_v50, %v4817_v23  ;;  %6994 = vpow2.f32 %v6263_v37  ;;  %v6266_v54 = vmul.f32 -1.442695, %v2394_v20 }
 0x454   : > { %v6991_v35 = vpop.eup %6990  ;;  %v4172_v44 = vsub.f32 1.0, %v4171_v59  ;;  %vm4176_vm14 = vweird.f32 %v6989_v61  ;;  %v4181_v47 = vand.u32 2147483648, %v9863_v41  ;;  %6996 = vpow2.f32 %v6220_v33 }
 0x455   : > { %v9910_v62 = vadd.f32 1.0, %v6991_v35  ;;  %v4819_v9 = vadd.f32 %v6987_v50, %v4818_v13  ;;  %6998 = vpow2.f32 %v6221_v38  ;;  %v2483_v3 = vadd.f32 %v2482_v48, %v8144_v25 }
 0x456   : > { %v4173_v17 = vmul.f32 %v6989_v61, %v4172_v44  ;;  %vm4825_vm0 = vcmp.eq.f32.partialorder %v4824_v18, 8.507059e+37  ;;  %v4827_v52 = vor.u32 1.1754944e-38, %v4826_v6  ;;  %vm4175_vm1 = vweird.f32 %v9863_v41  ;;  %v9944_v6 = vpop.f32.mrf.mxu0 }
 0x457   : > { %7000 = vrcp.f32 %v9910_v62  ;;  %v4823_v15 = vsel %vm4822_vm15, %v6987_v50, %v4819_v9  ;;  %v2545_v40 = vadd.f32 %v2544_v45, %v8686_v10  ;;  %vm4177_vm2 = vmor %vm4175_vm1, %vm4176_vm14  ;;  %vm4180_vm3 = vcmp.eq.f32.partialorder %v4179_v53, 8.507059e+37 }
 0x458   : > { %v4174_v34 = vadd.f32 %v6989_v61, %v4173_v17  ;;  %7002 = vpow2.f32 %v6266_v54  ;;  %v6993_v14 = vpop.eup %6992  ;;  %v4828_v1 = vsel %vm4825_vm0, %v4827_v52, %v4823_v15  ;;  %v4182_v30 = vor.u32 1.1754944e-38, %v4181_v47 }
 0x459   : > { %v4194_v5 = vand.u32 2147483647, %v9910_v62  ;;  %v6995_v46 = vpop.eup %6994  ;;  %5209 = vst [vmem:[%s8252_s2 + $0x368] sm:$0xff] %v4828_v1  ;;  %v4196_v41 = vand.u32 2147483648, %v9910_v62  ;;  %v9923_v28 = vadd.f32 1.0, %v6993_v14  ;;  %v2634_v42 = vadd.f32 %v2633_v60, %v8724_v31 }
 0x45a   : > { %v4178_v24 = vsel %vm4177_vm2, %v6989_v61, %v4174_v34  ;;  %v6267_v32 = vmul.f32 -1.442695, %v2483_v3  ;;  %v6997_v26 = vpop.eup %6996  ;;  %v9925_v29 = vadd.f32 1.0, %v6995_v46  ;;  %v6224_v12 = vmul.f32 -1.442695, %v2545_v40 }
 0x45b   : > { %v4183_v4 = vsel %vm4180_vm3, %v4182_v30, %v4178_v24  ;;  %v6999_v56 = vpop.eup %6998  ;;  %7004 = vrcp.f32 %v9923_v28  ;;  %vm4190_vm4 = vweird.f32 %v9910_v62  ;;  %vm9933_vm5 = vcmp.eq.f32.partialorder %v4194_v5, 8.507059e+37  ;;  %v9991_v24 = vpop.f32.mrf.mxu1 }
 0x45c   : > { %5166 = vst [vmem:[%s8252_s2 + $0x210] sm:$0xff] %v4183_v4  ;;  %7006 = vrcp.f32 %v9925_v29  ;;  %v4197_v27 = vor.u32 1.1754944e-38, %v4196_v41  ;;  %v4869_v58 = vand.u32 2147483647, %v9923_v28  ;;  %v4871_v18 = vand.u32 2147483648, %v9923_v28 }
 0x45d   : > { %v7001_v51 = vpop.eup %7000  ;;  %7008 = vpow2.f32 %v6267_v32  ;;  %v4886_v11 = vand.u32 2147483648, %v9925_v29  ;;  %v9940_v50 = vadd.f32 1.0, %v6997_v26  ;;  %v9942_v2 = vadd.f32 1.0, %v6999_v56 }
 0x45e   : > { %v7003_v55 = vpop.eup %7002  ;;  %v4186_v39 = vmul.f32 %v7001_v51, %v9910_v62  ;;  %v4884_v22 = vand.u32 2147483647, %v9925_v29  ;;  %7010 = vpow2.f32 %v6224_v12  ;;  %v6225_v21 = vmul.f32 -1.442695, %v2634_v42  ;;  %v9989_v46 = vpop.f32.mrf.mxu0 }
 0x45f   : > { %vm4865_vm6 = vweird.f32 %v9923_v28  ;;  %7012 = vrcp.f32 %v9940_v50  ;;  %v9951_v53 = vadd.f32 1.0, %v7003_v55  ;;  %v2397_v36 = vadd.f32 %v2396_v63, %v8142_v19 }
 0x460   : > { %v4187_v8 = vsub.f32 1.0, %v4186_v39  ;;  %vm4191_vm7 = vweird.f32 %v7001_v51  ;;  %vm4880_vm8 = vweird.f32 %v9925_v29  ;;  %7014 = vrcp.f32 %v9942_v2 }
 0x461   : > { %v7005_v61 = vpop.eup %7004  ;;  %vm9957_vm9 = vcmp.eq.f32.partialorder %v4869_v58, 8.507059e+37  ;;  %v4872_v49 = vor.u32 1.1754944e-38, %v4871_v18  ;;  %v4887_v23 = vor.u32 1.1754944e-38, %v4886_v11  ;;  %vm9962_vm10 = vcmp.eq.f32.partialorder %v4884_v22, 8.507059e+37  ;;  %vm4192_vm11 = vmor %vm4190_vm4, %vm4191_vm7  ;;  %v2485_v22 = vpop.f32.mrf.mxu3 }
 0x462   : > { %v4188_v0 = vmul.f32 %v7001_v51, %v4187_v8  ;;  %v7007_v37 = vpop.eup %7006  ;;  %v4861_v7 = vmul.f32 %v7005_v61, %v9923_v28  ;;  %v4239_v48 = vand.u32 2147483647, %v9940_v50  ;;  %7016 = vpow2.f32 %v6225_v21 }
 0x463   : > { %v7009_v59 = vpop.eup %7008  ;;  %v4876_v33 = vmul.f32 %v7007_v37, %v9925_v29  ;;  %v4241_v13 = vand.u32 2147483648, %v9940_v50  ;;  %v4254_v44 = vand.u32 2147483647, %v9942_v2  ;;  %7018 = vrcp.f32 %v9951_v53 }
 0x464   : > { %v4189_v57 = vadd.f32 %v7001_v51, %v4188_v0  ;;  %v4862_v35 = vsub.f32 1.0, %v4861_v7  ;;  %v7011_v54 = vpop.eup %7010  ;;  %vm4235_vm12 = vweird.f32 %v9940_v50  ;;  %v6270_v60 = vmul.f32 -1.442695, %v2397_v36 }
 0x465   : > { %v4877_v45 = vsub.f32 1.0, %v4876_v33  ;;  %v7013_v9 = vpop.eup %7012  ;;  %vm4866_vm13 = vweird.f32 %v7005_v61  ;;  %vm4250_vm14 = vweird.f32 %v9942_v2  ;;  %v9976_v3 = vadd.f32 1.0, %v7009_v59 }
 0x466   : > { %v4193_v47 = vsel %vm4192_vm11, %v7001_v51, %v4189_v57  ;;  %v4863_v62 = vmul.f32 %v7005_v61, %v4862_v35  ;;  %v7015_v52 = vpop.eup %7014  ;;  %vm4881_vm15 = vweird.f32 %v7007_v37  ;;  %v4231_v34 = vmul.f32 %v7013_v9, %v9940_v50  ;;  %vm4867_vm2 = vmor %vm4865_vm6, %vm4866_vm13  ;;  %v10035_v35 = vpop.f32.mrf.mxu1 }
 0x467   : > { %v4198_v17 = vsel %vm9933_vm5, %v4197_v27, %v4193_v47  ;;  %v4878_v15 = vmul.f32 %v7007_v37, %v4877_v45  ;;  %vm9980_vm0 = vcmp.eq.f32.partialorder %v4239_v48, 8.507059e+37  ;;  %v4242_v1 = vor.u32 1.1754944e-38, %v4241_v13  ;;  %vm4882_vm3 = vmor %vm4880_vm8, %vm4881_vm15  ;;  %v10033_v48 = vpop.f32.mrf.mxu0 }
 0x468   : > { %5167 = vst [vmem:[%s8252_s2 + $0x218] sm:$0xff] %v4198_v17  ;;  %v4864_v14 = vadd.f32 %v7005_v61, %v4863_v62  ;;  %v4246_v30 = vmul.f32 %v7015_v52, %v9942_v2  ;;  %vm9985_vm1 = vcmp.eq.f32.partialorder %v4254_v44, 8.507059e+37  ;;  %v7017_v41 = vpop.eup %7016  ;;  %v4232_v26 = vsub.f32 1.0, %v4231_v34 }
 0x469   : > { %v4879_v32 = vadd.f32 %v7007_v37, %v4878_v15  ;;  %v4256_v4 = vand.u32 2147483648, %v9942_v2  ;;  %7020 = vrcp.f32 %v9976_v3  ;;  %v7019_v56 = vpop.eup %7018  ;;  %vm4236_vm4 = vweird.f32 %v7013_v9 }
 0x46a   : > { %v4868_v12 = vsel %vm4867_vm2, %v7005_v61, %v4864_v14  ;;  %v4247_v42 = vsub.f32 1.0, %v4246_v30  ;;  %v4929_v51 = vand.u32 2147483647, %v9951_v53  ;;  %v4233_v39 = vmul.f32 %v7013_v9, %v4232_v26  ;;  %vm4237_vm6 = vmor %vm4235_vm12, %vm4236_vm4  ;;  %v2487_v26 = vpop.f32.mrf.mxu3 }
 0x46b   : > { %v4873_v28 = vsel %vm9957_vm9, %v4872_v49, %v4868_v12  ;;  %v4883_v55 = vsel %vm4882_vm3, %v7007_v37, %v4879_v32  ;;  %v4921_v43 = vmul.f32 %v7019_v56, %v9951_v53  ;;  %vm4251_vm5 = vweird.f32 %v7015_v52 }
 0x46c   : > { %5212 = vst [vmem:[%s8252_s2 + $0x380] sm:$0xff] %v4873_v28  ;;  %v4888_v27 = vsel %vm9962_vm10, %v4887_v23, %v4883_v55  ;;  %v4248_v58 = vmul.f32 %v7015_v52, %v4247_v42  ;;  %v4931_v29 = vand.u32 2147483648, %v9951_v53  ;;  %v4234_v63 = vadd.f32 %v7013_v9, %v4233_v39  ;;  %vm4252_vm7 = vmor %vm4250_vm14, %vm4251_vm5 }
 0x46d   : > { %5213 = vst [vmem:[%s8252_s2 + $0x388] sm:$0xff] %v4888_v27  ;;  %v4257_v18 = vor.u32 1.1754944e-38, %v4256_v4  ;;  %v4922_v11 = vsub.f32 1.0, %v4921_v43  ;;  %v10010_v8 = vadd.f32 1.0, %v7011_v54  ;;  %v4944_v36 = vand.u32 2147483647, %v9976_v3 }
 0x46e   : > { %v4249_v21 = vadd.f32 %v7015_v52, %v4248_v58  ;;  %v10016_v61 = vadd.f32 1.0, %v7017_v41  ;;  %7022 = vpow2.f32 %v6270_v60  ;;  %v4238_v37 = vsel %vm4237_vm6, %v7013_v9, %v4234_v63 }
 0x46f   : > { %v7021_v0 = vpop.eup %7020  ;;  %v4923_v7 = vmul.f32 %v7019_v56, %v4922_v11  ;;  %vm4926_vm8 = vweird.f32 %v7019_v56  ;;  %7024 = vrcp.f32 %v10010_v8  ;;  %v4243_v50 = vsel %vm9980_vm0, %v4242_v1, %v4238_v37  ;;  %v10072_v63 = vpop.f32.mrf.mxu0 }
 0x470   : > { %v4253_v20 = vsel %vm4252_vm7, %v7015_v52, %v4249_v21  ;;  %v4936_v49 = vmul.f32 %v7021_v0, %v9976_v3  ;;  %v2486_v23 = vadd.f32 %v2485_v22, %v8144_v25  ;;  %5170 = vst [vmem:[%s8252_s2 + $0x230] sm:$0xff] %v4243_v50  ;;  %vm4925_vm9 = vweird.f32 %v9951_v53 }
 0x471   : > { %v4258_v59 = vsel %vm9985_vm1, %v4257_v18, %v4253_v20  ;;  %v4924_v57 = vadd.f32 %v7019_v56, %v4923_v7  ;;  %vm4930_vm10 = vcmp.eq.f32.partialorder %v4929_v51, 8.507059e+37  ;;  %vm4927_vm11 = vmor %vm4925_vm9, %vm4926_vm8  ;;  %v4932_v2 = vor.u32 1.1754944e-38, %v4931_v29  ;;  %v10074_v18 = vpop.f32.mrf.mxu1 }
 0x472   : > { %5171 = vst [vmem:[%s8252_s2 + $0x238] sm:$0xff] %v4258_v59  ;;  %v4937_v33 = vsub.f32 1.0, %v4936_v49  ;;  %v4946_v38 = vand.u32 2147483648, %v9976_v3  ;;  %7026 = vrcp.f32 %v10016_v61  ;;  %vm4940_vm12 = vweird.f32 %v9976_v3 }
 0x473   : > { %v4928_v13 = vsel %vm4927_vm11, %v7019_v56, %v4924_v57  ;;  %vm4941_vm13 = vweird.f32 %v7021_v0  ;;  %vm10038_vm14 = vcmp.eq.f32.partialorder %v4944_v36, 8.507059e+37  ;;  %v4299_v45 = vand.u32 2147483647, %v10010_v8 }
 0x474   : > { %v7023_v44 = vpop.eup %7022  ;;  %v4933_v54 = vsel %vm4930_vm10, %v4932_v2, %v4928_v13  ;;  %v4938_v47 = vmul.f32 %v7021_v0, %v4937_v33  ;;  %v6271_v60 = vmul.f32 -1.442695, %v2486_v23  ;;  %v4301_v17 = vand.u32 2147483648, %v10010_v8  ;;  %vm4942_vm15 = vmor %vm4940_vm12, %vm4941_vm13 }
 0x475   : > { %v7025_v9 = vpop.eup %7024  ;;  %5216 = vst [vmem:[%s8252_s2 + $0x3a0] sm:$0xff] %v4933_v54  ;;  %v10045_v62 = vadd.f32 1.0, %v7023_v44  ;;  %v2547_v52 = vadd.f32 %v9944_v6, %v8686_v10  ;;  %v2636_v15 = vadd.f32 %v9946_v16, %v8724_v31  ;;  %v4947_v40 = vor.u32 1.1754944e-38, %v4946_v38  ;;  %v2398_v6 = vpop.f32.mrf.mxu2 }
 0x476   : > { %v4939_v34 = vadd.f32 %v7021_v0, %v4938_v47  ;;  %v4291_v14 = vmul.f32 %v7025_v9, %v10010_v8  ;;  %7028 = vpow2.f32 %v6271_v60  ;;  %vm4295_vm0 = vweird.f32 %v10010_v8 }
 0x477   : > { %vm4310_vm1 = vweird.f32 %v10016_v61  ;;  %v4314_v1 = vand.u32 2147483647, %v10016_v61  ;;  %7030 = vrcp.f32 %v10045_v62  ;;  %v6228_v41 = vmul.f32 -1.442695, %v2547_v52 }
 0x478   : > { %v7027_v16 = vpop.eup %7026  ;;  %v4943_v30 = vsel %vm4942_vm15, %v7021_v0, %v4939_v34  ;;  %v4292_v5 = vsub.f32 1.0, %v4291_v14  ;;  %v6229_v32 = vmul.f32 -1.442695, %v2636_v15  ;;  %vm10061_vm2 = vcmp.eq.f32.partialorder %v4299_v45, 8.507059e+37  ;;  %v10105_v45 = vpop.f32.mrf.mxu0 }
 0x479   : > { %v4948_v3 = vsel %vm10038_vm14, %v4947_v40, %v4943_v30  ;;  %v4302_v56 = vor.u32 1.1754944e-38, %v4301_v17  ;;  %v4306_v12 = vmul.f32 %v7027_v16, %v10016_v61  ;;  %vm4296_vm3 = vweird.f32 %v7025_v9 }
 0x47a   : > { %5217 = vst [vmem:[%s8252_s2 + $0x3a8] sm:$0xff] %v4948_v3  ;;  %v4293_v42 = vmul.f32 %v7025_v9, %v4292_v5  ;;  %7032 = vpow2.f32 %v6228_v41  ;;  %v2399_v51 = vadd.f32 %v2398_v6, %v8142_v19  ;;  %v2488_v55 = vadd.f32 %v2487_v26, %v8144_v25  ;;  %vm4297_vm5 = vmor %vm4295_vm0, %vm4296_vm3 }
 0x47b   : > { %v4307_v28 = vsub.f32 1.0, %v4306_v12  ;;  %7034 = vpow2.f32 %v6229_v32  ;;  %v2550_v39 = vadd.f32 %v9989_v46, %v8686_v10  ;;  %vm4311_vm4 = vweird.f32 %v7027_v16 }
 0x47c   : > { %v7029_v43 = vpop.eup %7028  ;;  %v4294_v27 = vadd.f32 %v7025_v9, %v4293_v42  ;;  %v4316_v58 = vand.u32 2147483648, %v10016_v61  ;;  %v6274_v29 = vmul.f32 -1.442695, %v2399_v51  ;;  %v6275_v46 = vmul.f32 -1.442695, %v2488_v55  ;;  %vm4312_vm7 = vmor %vm4310_vm1, %vm4311_vm4 }
 0x47d   : > { %v7031_v11 = vpop.eup %7030  ;;  %v4308_v19 = vmul.f32 %v7027_v16, %v4307_v28  ;;  %v10079_v25 = vadd.f32 1.0, %v7029_v43  ;;  %v2639_v22 = vadd.f32 %v9991_v24, %v8724_v31  ;;  %v6232_v0 = vmul.f32 -1.442695, %v2550_v39 }
 0x47e   : > { %v4298_v21 = vsel %vm4297_vm5, %v7025_v9, %v4294_v27  ;;  %v4981_v36 = vmul.f32 %v7031_v11, %v10045_v62  ;;  %7036 = vpow2.f32 %v6274_v29  ;;  %vm4315_vm6 = vcmp.eq.f32.partialorder %v4314_v1, 8.507059e+37 }
 0x47f   : > { %v4303_v37 = vsel %vm10061_vm2, %v4302_v56, %v4298_v21  ;;  %v4309_v7 = vadd.f32 %v7027_v16, %v4308_v19  ;;  %7038 = vrcp.f32 %v10079_v25  ;;  %v4317_v24 = vor.u32 1.1754944e-38, %v4316_v58 }
 0x480   : > { %v7033_v8 = vpop.eup %7032  ;;  %5174 = vst [vmem:[%s8252_s2 + $0x250] sm:$0xff] %v4303_v37  ;;  %v4982_v50 = vsub.f32 1.0, %v4981_v36  ;;  %v4989_v20 = vand.u32 2147483647, %v10045_v62  ;;  %7040 = vpow2.f32 %v6275_v46  ;;  %v4991_v59 = vand.u32 2147483648, %v10045_v62 }
 0x481   : > { %v7035_v49 = vpop.eup %7034  ;;  %v4313_v23 = vsel %vm4312_vm7, %v7027_v16, %v4309_v7  ;;  %v10093_v57 = vadd.f32 1.0, %v7033_v8  ;;  %v6233_v2 = vmul.f32 -1.442695, %v2639_v22  ;;  %vm4986_vm8 = vweird.f32 %v7031_v11 }
 0x482   : > { %v4318_v33 = vsel %vm4315_vm6, %v4317_v24, %v4313_v23  ;;  %v4983_v38 = vmul.f32 %v7031_v11, %v4982_v50  ;;  %7042 = vpow2.f32 %v6232_v0  ;;  %vm4985_vm9 = vweird.f32 %v10045_v62  ;;  %v10119_v62 = vpop.f32.mrf.mxu1 }
 0x483   : > { %5175 = vst [vmem:[%s8252_s2 + $0x258] sm:$0xff] %v4318_v33  ;;  %v5004_v61 = vand.u32 2147483647, %v10079_v25  ;;  %7044 = vrcp.f32 %v10093_v57  ;;  %v2552_v13 = vadd.f32 %v10033_v48, %v8686_v10  ;;  %v5006_v54 = vand.u32 2147483648, %v10079_v25  ;;  %vm4987_vm10 = vmor %vm4985_vm9, %vm4986_vm8 }
 0x484   : > { %v7037_v53 = vpop.eup %7036  ;;  %v4984_v44 = vadd.f32 %v7031_v11, %v4983_v38  ;;  %v10103_v47 = vadd.f32 1.0, %v7035_v49  ;;  %7046 = vpow2.f32 %v6233_v2  ;;  %vm4990_vm11 = vcmp.eq.f32.partialorder %v4989_v20, 8.507059e+37 }
 0x485   : > { %v10113_v60 = vpop.eup %7038  ;;  %v4992_v48 = vor.u32 1.1754944e-38, %v4991_v59  ;;  %v4361_v9 = vand.u32 2147483648, %v10093_v57  ;;  %v10117_v17 = vadd.f32 1.0, %v7037_v53  ;;  %v4359_v40 = vand.u32 2147483647, %v10093_v57 }
 0x486   : > { %v7041_v52 = vpop.eup %7040  ;;  %v4988_v15 = vsel %vm4987_vm10, %v7031_v11, %v4984_v44  ;;  %v4996_v34 = vmul.f32 %v10113_v60, %v10079_v25  ;;  %7048 = vrcp.f32 %v10103_v47  ;;  %vm5000_vm12 = vweird.f32 %v10079_v25 }
 0x487   : > { %v4993_v14 = vsel %vm4990_vm11, %v4992_v48, %v4988_v15  ;;  %vm10130_vm13 = vcmp.eq.f32.partialorder %v5004_v61, 8.507059e+37  ;;  %v4376_v6 = vand.u32 2147483648, %v10103_v47  ;;  %v5007_v5 = vor.u32 1.1754944e-38, %v5006_v54 }
 0x488   : > { %v7043_v16 = vpop.eup %7042  ;;  %5220 = vst [vmem:[%s8252_s2 + $0x3c0] sm:$0xff] %v4993_v14  ;;  %v4997_v30 = vsub.f32 1.0, %v4996_v34  ;;  %7050 = vrcp.f32 %v10117_v17  ;;  %v10137_v41 = vmul.f32 -1.442695, %v2552_v13  ;;  %vm4355_vm14 = vweird.f32 %v10093_v57 }
 0x489   : > { %v10146_v32 = vpop.eup %7044  ;;  %v10149_v26 = vor.u32 1.1754944e-38, %v4361_v9  ;;  %v4374_v3 = vand.u32 2147483647, %v10103_v47  ;;  %v10152_v4 = vadd.f32 1.0, %v7041_v52 }
 0x48a   : > { %7354 = shalt.err (!%p7351_p9)
}
 0x48b   : > { %s7481_s24 = smov 128   ;;  %s7482_s3 = smov 8   ;;  %v7047_v56 = vpop.eup %7046  ;;  %v4998_v12 = vmul.f32 %v10113_v60, %v4997_v30  ;;  %vm5001_vm15 = vweird.f32 %v10113_v60  ;;  %v4351_v42 = vmul.f32 %v10146_v32, %v10093_v57  ;;  %vm10179_vm0 = vcmp.eq.f32.partialorder %v4359_v40, 8.507059e+37  ;;  %v10224_v7 = vpop.f32.mrf.mxu0 }
 0x48c   : > { %6478 = dma.vmem_to_hbm [thread:$0]  (%p7635_p5), %s10121_s28, 4096, %s10127_s26, %s10156_s6, %s7481_s24, %s7481_s24, %s7482_s3   ;;  %v10185_v28 = vadd.f32 %v10035_v35, %v8724_v31  ;;  %vm4370_vm1 = vweird.f32 %v10103_v47  ;;  %v10188_v55 = vor.u32 1.1754944e-38, %v4376_v6  ;;  %v5049_v39 = vand.u32 2147483647, %v10117_v17  ;;  %v10193_v43 = vpop.eup %7048  ;;  %vm10201_vm2 = vmor %vm5000_vm12, %vm5001_vm15  ;;  %v10237_v49 = vpop.f32.mrf.mxu1 }
 0x48d   : > { %7052 = vrcp.f32 %v10152_v4  ;;  %s5352_s27 = sshll.u32 %s10144_s19, 4  ;;  %v4999_v27 = vadd.f32 %v10113_v60, %v4998_v12  ;;  %v4352_v58 = vsub.f32 1.0, %v4351_v42  ;;  %v5051_v29 = vand.u32 2147483648, %v10117_v17  ;;  %s5350_s21 = sshll.u32 %s7952_s23, 4  ;;  %s10226_s27 = int_to_ptr.hbm [resolvable:$true] %s5352_s27  ;;  %s5351_s21 = int_to_ptr.vmem [resolvable:$true] %s5350_s21 }
 0x48e   : > { %v10197_v11 = vadd.f32 1.0, %v7043_v16  ;;  %vm4356_vm3 = vweird.f32 %v10146_v32  ;;  %v4366_v19 = vmul.f32 %v10193_v43, %v10103_v47  ;;  %vm10208_vm4 = vcmp.eq.f32.partialorder %v4374_v3, 8.507059e+37  ;;  %v10216_v25 = vpop.eup %7050  ;;  %s7369_s23 = sshra.s32 %s10226_s27, 4  ;;  %s7375_s30 = scalar_lea.hbm %s10700_s10, 512  ;;  %s7370_s23 = int_to_ptr.hbm [resolvable:$true] %s7369_s23 }
 0x48f   : > { %vm5045_vm5 = vweird.f32 %v10117_v17  ;;  %v5064_v22 = vand.u32 2147483647, %v10152_v4  ;;  %v10214_v21 = vadd.f32 1.0, %v7047_v56  ;;  %v5003_v36 = vsel %vm10201_vm2, %v10113_v60, %v4999_v27  ;;  %vm10249_vm8 = vmor %vm4355_vm14, %vm4356_vm3  ;;  %s7371_s28 = scalar_lea.hbm %s7370_s23, 256  ;;  %p7376_p3 = scmp.lt.s32.totalorder %s7370_s23, %s10700_s10 }
 0x490   : > { %v4353_v0 = vmul.f32 %v10146_v32, %v4352_v58  ;;  %v5066_v37 = vand.u32 2147483648, %v10152_v4  ;;  %7054 = vrcp.f32 %v10197_v11  ;;  %v5008_v8 = vsel %vm10130_vm13, %v5007_v5, %v5003_v36  ;;  %p7372_p12 = scmp.ne.s32.totalorder %s7370_s23, %s7371_s28  ;;  %p7377_p7 = scmp.lt.s32.totalorder %s7375_s30, %s7371_s28 }
 0x491   : > { %v4367_v24 = vsub.f32 1.0, %v4366_v19  ;;  %v5041_v50 = vmul.f32 %v10216_v25, %v10117_v17  ;;  %vm10233_vm6 = vcmp.eq.f32.partialorder %v5049_v39, 8.507059e+37  ;;  %5221 = vst [vmem:[%s8252_s2 + $0x3c8] sm:$0xff] %v5008_v8  ;;  %v5052_v59 = vor.u32 1.1754944e-38, %v5051_v29 }
 0x492   : > { %v4354_v23 = vadd.f32 %v10146_v32, %v4353_v0  ;;  %vm5060_vm7 = vweird.f32 %v10152_v4  ;;  %v4421_v2 = vand.u32 2147483648, %v10197_v11  ;;  %vm4371_vm9 = vweird.f32 %v10193_v43  ;;  %p7373_p13 = pnand %p7372_p12, %p7635_p5  ;;  %p7378_p1 = por %p7377_p7, %p7376_p3 }
 0x493   : > { %v10243_v33 = vpop.eup %7052  ;;  %v4368_v61 = vmul.f32 %v10193_v43, %v4367_v24  ;;  %v5042_v13 = vsub.f32 1.0, %v5041_v50  ;;  %7056 = vrcp.f32 %v10214_v21 }
 0x494   : > { %p7374_p0 = pneg %p7373_p13 }
 0x496   : > { %p7379_p4 = pnand %p7378_p1, %p7374_p0 }
 0x498   : > { %7382 = shalt.err (!%p7379_p4)
}
 0x499   : > { %6479 = dma.vmem_to_hbm [thread:$0]  (%p7635_p5), %s5351_s21, 4096, %s10226_s27, %s10156_s6, %s7481_s24, %s7481_s24, %s7482_s3   ;;  %v4358_v57 = vsel %vm10249_vm8, %v10146_v32, %v4354_v23  ;;  %vm5046_vm10 = vweird.f32 %v10216_v25  ;;  %v5056_v53 = vmul.f32 %v10243_v33, %v10152_v4  ;;  %vm10278_vm11 = vcmp.eq.f32.partialorder %v5064_v22, 8.507059e+37  ;;  %v7055_v15 = vpop.eup %7054  ;;  %vm4372_vm13 = vmor %vm4370_vm1, %vm4371_vm9  ;;  %v2561_v51 = vpop.f32.mrf.mxu0 }
 0x49a   : > { %v5067_v54 = vor.u32 1.1754944e-38, %v5066_v37  ;;  %v4363_v60 = vsel %vm10179_vm0, %v10149_v26, %v4358_v57  ;;  %v4369_v48 = vadd.f32 %v10193_v43, %v4368_v61  ;;  %v5043_v9 = vmul.f32 %v10216_v25, %v5042_v13  ;;  %vm5047_vm15 = vmor %vm5045_vm5, %vm5046_vm10  ;;  %v10325_v39 = vpop.f32.mrf.mxu1  ;;  %s6438_s6 = sshll.u32 %s7561_s17, 10  ;;  %s5316_s18 = sshll.u32 %s8252_s2, 4  ;;  %s5317_s18 = int_to_ptr.vmem [resolvable:$true] %s5316_s18 }
 0x49b   : > { %vm4415_vm12 = vweird.f32 %v10197_v11  ;;  %v4419_v52 = vand.u32 2147483647, %v10197_v11  ;;  %5178 = vst [vmem:[%s8252_s2 + $0x270] sm:$0xff] %v4363_v60  ;;  %v5057_v34 = vsub.f32 1.0, %v5056_v53  ;;  %vm5061_vm14 = vweird.f32 %v10243_v33  ;;  %s5315_s4 = scalar_lea.hbm %s10698_s8, %s6438_s6  ;;  %s5293_s15 = scalar_lea.sflag [#allocation4], %s7692_s20 }
 0x49c   : > { %v4422_v40 = vor.u32 1.1754944e-38, %v4421_v2  ;;  %7058 = vpow2.f32 %v10137_v41  ;;  %v4373_v14 = vsel %vm4372_vm13, %v10193_v43, %v4369_v48  ;;  %v5044_v1 = vadd.f32 %v10216_v25, %v5043_v9  ;;  %v7057_v41 = vpop.eup %7056  ;;  %vm5062_vm2 = vmor %vm5060_vm7, %vm5061_vm14  ;;  %s5318_s12 = sshll.u32 %s5315_s4, 4  ;;  %s7403_s21 = scalar_lea.hbm %s10698_s8, 2048  ;;  %s5319_s12 = int_to_ptr.hbm [resolvable:$true] %s5318_s12 }
 0x49d   : > { %v4411_v6 = vmul.f32 %v7055_v15, %v10197_v11  ;;  %v4434_v16 = vand.u32 2147483647, %v10214_v21  ;;  %v4378_v47 = vsel %vm10208_vm4, %v10188_v55, %v4373_v14  ;;  %v5058_v30 = vmul.f32 %v10243_v33, %v5057_v34  ;;  %s7397_s13 = sshra.s32 %s5319_s12, 4  ;;  %s7398_s13 = int_to_ptr.hbm [resolvable:$true] %s7397_s13 }
 0x49e   : > { %vm4416_vm0 = vweird.f32 %v7055_v15  ;;  %v4436_v5 = vand.u32 2147483648, %v10214_v21  ;;  %5179 = vst [vmem:[%s8252_s2 + $0x278] sm:$0xff] %v4378_v47  ;;  %v5048_v32 = vsel %vm5047_vm15, %v10216_v25, %v5044_v1  ;;  %v6237_v3 = vmul.f32 -1.442695, %v10185_v28  ;;  %s7399_s24 = scalar_lea.hbm %s7398_s13, 1024  ;;  %p7404_p11 = scmp.lt.s32.totalorder %s7398_s13, %s10698_s8 }
 0x49f   : > { %v4412_v26 = vsub.f32 1.0, %v4411_v6  ;;  %v2555_v56 = vadd.f32 %v10072_v63, %v8686_v10  ;;  %v5053_v17 = vsel %vm10233_vm6, %v5052_v59, %v5048_v32  ;;  %v5059_v12 = vadd.f32 %v10243_v33, %v5058_v30  ;;  %vm4417_vm3 = vmor %vm4415_vm12, %vm4416_vm0  ;;  %p7400_p8 = scmp.ne.s32.totalorder %s7398_s13, %s7399_s24  ;;  %p7405_p9 = scmp.lt.s32.totalorder %s7403_s21, %s7399_s24 }
 0x4a0   : > { %v4426_v42 = vmul.f32 %v7057_v41, %v10214_v21  ;;  %vm4431_vm1 = vweird.f32 %v7057_v41  ;;  %5224 = vst [vmem:[%s8252_s2 + $0x3e0] sm:$0xff] %v5053_v17  ;;  %7060 = vpow2.f32 %v6237_v3  ;;  %v2644_v63 = vadd.f32 %v10074_v18, %v8724_v31 }
 0x4a1   : > { %v4413_v28 = vmul.f32 %v7055_v15, %v4412_v26  ;;  %v6240_v55 = vmul.f32 -1.442695, %v2555_v56  ;;  %v5063_v27 = vsel %vm5062_vm2, %v10243_v33, %v5059_v12  ;;  %v2557_v29 = vadd.f32 %v10105_v45, %v8686_v10  ;;  %v10354_v33 = vpop.f32.mrf.mxu0  ;;  %p7401_p2 = pnand %p7400_p8, %p7635_p5  ;;  %p7406_p12 = por %p7405_p9, %p7404_p11 }
 0x4a2   : > { %v7059_v43 = vpop.eup %7058  ;;  %v4427_v58 = vsub.f32 1.0, %v4426_v42  ;;  %v2646_v4 = vadd.f32 %v10119_v62, %v8724_v31  ;;  %v5068_v35 = vsel %vm10278_vm11, %v5067_v54, %v5063_v27  ;;  %v6241_v22 = vmul.f32 -1.442695, %v2644_v63  ;;  %v10359_v53 = vpop.f32.mrf.mxu1 }
 0x4a3   : > { %v4414_v19 = vadd.f32 %v7055_v15, %v4413_v28  ;;  %v10334_v46 = vadd.f32 1.0, %v7059_v43  ;;  %7062 = vpow2.f32 %v6240_v55  ;;  %5225 = vst [vmem:[%s8252_s2 + $0x3e8] sm:$0xff] %v5068_v35  ;;  %v6244_v25 = vmul.f32 -1.442695, %v2557_v29  ;;  %p7402_p10 = pneg %p7401_p2 }
 0x4a4   : > { %v4428_v18 = vmul.f32 %v7057_v41, %v4427_v58  ;;  %v2560_v45 = vadd.f32 %v10224_v7, %v8686_v10  ;;  %vm4420_vm4 = vcmp.eq.f32.partialorder %v4419_v52, 8.507059e+37  ;;  %vm4430_vm5 = vweird.f32 %v10214_v21 }
 0x4a5   : > { %v4418_v62 = vsel %vm4417_vm3, %v7055_v15, %v4414_v19  ;;  %7064 = vrcp.f32 %v10334_v46  ;;  %vm4435_vm6 = vcmp.eq.f32.partialorder %v4434_v16, 8.507059e+37  ;;  %vm4432_vm7 = vmor %vm4430_vm5, %vm4431_vm1  ;;  %v4437_v11 = vor.u32 1.1754944e-38, %v4436_v5  ;;  %p7407_p13 = pnand %p7406_p12, %p7402_p10 }
 0x4a6   : > { %v4423_v36 = vsel %vm4420_vm4, %v4422_v40, %v4418_v62  ;;  %v4429_v0 = vadd.f32 %v7057_v41, %v4428_v18  ;;  %7066 = vpow2.f32 %v6241_v22  ;;  %v7061_v37 = vpop.eup %7060  ;;  %v4479_v8 = vand.u32 2147483647, %v10334_v46 }
 0x4a7   : > { %5182 = vst [vmem:[%s8252_s2 + $0x290] sm:$0xff] %v4423_v36  ;;  %7068 = vpow2.f32 %v6244_v25  ;;  %v6245_v7 = vmul.f32 -1.442695, %v2646_v4  ;;  %v10347_v50 = vadd.f32 1.0, %v7061_v37  ;;  %v6248_v21 = vmul.f32 -1.442695, %v2560_v45 }
 0x4a8   : > { %v4433_v24 = vsel %vm4432_vm7, %v7057_v41, %v4429_v0  ;;  %v2649_v20 = vadd.f32 %v10237_v49, %v8724_v31  ;;  %v2562_v2 = vadd.f32 %v2561_v51, %v8686_v10  ;;  %v4481_v61 = vand.u32 2147483648, %v10334_v46 }
 0x4a9   : > { %v7063_v23 = vpop.eup %7062  ;;  %v4438_v59 = vsel %vm4435_vm6, %v4437_v11, %v4433_v24  ;;  %7070 = vpow2.f32 %v6245_v7  ;;  %vm4475_vm8 = vweird.f32 %v10334_v46  ;;  %vm10363_vm9 = vcmp.eq.f32.partialorder %v4479_v8, 8.507059e+37  ;;  %v10399_v58 = vpop.f32.mrf.mxu0 }
 0x4aa   : > { %5183 = vst [vmem:[%s8252_s2 + $0x298] sm:$0xff] %v4438_v59  ;;  %7072 = vrcp.f32 %v10347_v50  ;;  %v10357_v13 = vadd.f32 1.0, %v7063_v23  ;;  %v6249_v57 = vmul.f32 -1.442695, %v2649_v20  ;;  %v4494_v48 = vand.u32 2147483647, %v10347_v50 }
 0x4ab   : > { %v7065_v38 = vpop.eup %7064  ;;  %7074 = vpow2.f32 %v6248_v21  ;;  %v4496_v9 = vand.u32 2147483648, %v10347_v50  ;;  %v6252_v52 = vmul.f32 -1.442695, %v2562_v2  ;;  %v4482_v6 = vor.u32 1.1754944e-38, %v4481_v61 }
 0x4ac   : > { %v7067_v44 = vpop.eup %7066  ;;  %v4471_v49 = vmul.f32 %v7065_v38, %v10334_v46  ;;  %7076 = vrcp.f32 %v10357_v13  ;;  %v4541_v34 = vand.u32 2147483648, %v10357_v13  ;;  %vm4490_vm10 = vweird.f32 %v10347_v50  ;;  %v10405_v46 = vpop.f32.mrf.mxu1 }
 0x4ad   : > { %v7069_v60 = vpop.eup %7068  ;;  %v10371_v40 = vadd.f32 1.0, %v7067_v44  ;;  %7078 = vpow2.f32 %v6249_v57  ;;  %v2651_v16 = vadd.f32 %v10325_v39, %v8724_v31  ;;  %vm4476_vm11 = vweird.f32 %v7065_v38 }
 0x4ae   : > { %v4472_v15 = vsub.f32 1.0, %v4471_v49  ;;  %v10373_v14 = vadd.f32 1.0, %v7069_v60  ;;  %v4539_v5 = vand.u32 2147483647, %v10357_v13  ;;  %vm10381_vm12 = vcmp.eq.f32.partialorder %v4494_v48, 8.507059e+37  ;;  %vm4477_vm14 = vmor %vm4475_vm8, %vm4476_vm11 }
 0x4af   : > { %v7071_v1 = vpop.eup %7070  ;;  %7080 = vrcp.f32 %v10371_v40  ;;  %v4497_v26 = vor.u32 1.1754944e-38, %v4496_v9  ;;  %vm4535_vm13 = vweird.f32 %v10357_v13  ;;  %v4542_v17 = vor.u32 1.1754944e-38, %v4541_v34 }
 0x4b0   : > { %v7073_v47 = vpop.eup %7072  ;;  %v4473_v30 = vmul.f32 %v7065_v38, %v4472_v15  ;;  %7082 = vrcp.f32 %v10373_v14  ;;  %v4554_v51 = vand.u32 2147483647, %v10371_v40  ;;  %v4556_v28 = vand.u32 2147483648, %v10371_v40 }
 0x4b1   : > { %v4486_v41 = vmul.f32 %v7073_v47, %v10347_v50  ;;  %v7075_v3 = vpop.eup %7074  ;;  %7084 = vpow2.f32 %v6252_v52  ;;  %v10391_v55 = vadd.f32 1.0, %v7071_v1  ;;  %vm4491_vm15 = vweird.f32 %v7073_v47 }
 0x4b2   : > { %v4474_v56 = vadd.f32 %v7065_v38, %v4473_v30  ;;  %v7077_v12 = vpop.eup %7076  ;;  %vm10394_vm0 = vcmp.eq.f32.partialorder %v4539_v5, 8.507059e+37  ;;  %v4599_v27 = vand.u32 2147483647, %v10373_v14  ;;  %v4601_v19 = vand.u32 2147483648, %v10373_v14  ;;  %vm4492_vm4 = vmor %vm4490_vm10, %vm4491_vm15 }
 0x4b3   : > { %v4487_v42 = vsub.f32 1.0, %v4486_v41  ;;  %v4531_v39 = vmul.f32 %v7077_v12, %v10357_v13  ;;  %v7079_v29 = vpop.eup %7078  ;;  %7086 = vrcp.f32 %v10391_v55  ;;  %vm4550_vm1 = vweird.f32 %v10371_v40 }
 0x4b4   : > { %v4478_v63 = vsel %vm4477_vm14, %v7065_v38, %v4474_v56  ;;  %vm4595_vm2 = vweird.f32 %v10373_v14  ;;  %v10410_v25 = vmul.f32 -1.442695, %v2651_v16  ;;  %vm10413_vm3 = vcmp.eq.f32.partialorder %v4554_v51, 8.507059e+37  ;;  %v2569_v16 = vpop.f32.mrf.mxu0  ;;  %v2658_v41 = vpop.f32.mrf.mxu1 }
 0x4b5   : > { %v4483_v4 = vsel %vm10363_vm9, %v4482_v6, %v4478_v63  ;;  %v4488_v35 = vmul.f32 %v7073_v47, %v4487_v42  ;;  %v7081_v18 = vpop.eup %7080  ;;  %v4532_v22 = vsub.f32 1.0, %v4531_v39  ;;  %v4557_v37 = vor.u32 1.1754944e-38, %v4556_v28 }
 0x4b6   : > { %5186 = vst [vmem:[%s8252_s2 + $0x2b0] sm:$0xff] %v4483_v4  ;;  %v7083_v45 = vpop.eup %7082  ;;  %v4546_v36 = vmul.f32 %v7081_v18, %v10371_v40  ;;  %v10417_v11 = vadd.f32 1.0, %v7075_v3  ;;  %vm4536_vm5 = vweird.f32 %v7077_v12  ;;  %vm10423_vm6 = vcmp.eq.f32.partialorder %v4599_v27, 8.507059e+37 }
 0x4b7   : > { %v4489_v62 = vadd.f32 %v7073_v47, %v4488_v35  ;;  %v7085_v8 = vpop.eup %7084  ;;  %v4533_v7 = vmul.f32 %v7077_v12, %v4532_v22  ;;  %v4591_v24 = vmul.f32 %v7083_v45, %v10373_v14  ;;  %v4602_v59 = vor.u32 1.1754944e-38, %v4601_v19  ;;  %vm4537_vm7 = vmor %vm4535_vm13, %vm4536_vm5 }
 0x4b8   : > { %v4547_v23 = vsub.f32 1.0, %v4546_v36  ;;  %7088 = vrcp.f32 %v10417_v11  ;;  %v4614_v50 = vand.u32 2147483647, %v10391_v55  ;;  %vm4551_vm8 = vweird.f32 %v7081_v18 }
 0x4b9   : > { %v4493_v20 = vsel %vm4492_vm4, %v7073_v47, %v4489_v62  ;;  %v4534_v38 = vadd.f32 %v7077_v12, %v4533_v7  ;;  %v4592_v61 = vsub.f32 1.0, %v4591_v24  ;;  %v7087_v57 = vpop.eup %7086  ;;  %v4616_v49 = vand.u32 2147483648, %v10391_v55  ;;  %vm4552_vm11 = vmor %vm4550_vm1, %vm4551_vm8 }
 0x4ba   : > { %v4498_v2 = vsel %vm10381_vm12, %v4497_v26, %v4493_v20  ;;  %v4548_v44 = vmul.f32 %v7081_v18, %v4547_v23  ;;  %v10435_v54 = vadd.f32 1.0, %v7079_v29  ;;  %vm4596_vm9 = vweird.f32 %v7083_v45 }
 0x4bb   : > { %5187 = vst [vmem:[%s8252_s2 + $0x2b8] sm:$0xff] %v4498_v2  ;;  %v4538_v60 = vsel %vm4537_vm7, %v7077_v12, %v4534_v38  ;;  %v4593_v48 = vmul.f32 %v7083_v45, %v4592_v61  ;;  %v4606_v9 = vmul.f32 %v7087_v57, %v10391_v55  ;;  %vm4610_vm10 = vweird.f32 %v10391_v55  ;;  %vm4597_vm13 = vmor %vm4595_vm2, %vm4596_vm9 }
 0x4bc   : > { %v4543_v52 = vsel %vm10394_vm0, %v4542_v17, %v4538_v60  ;;  %v4549_v15 = vadd.f32 %v7081_v18, %v4548_v44  ;;  %v4659_v13 = vand.u32 2147483647, %v10417_v11  ;;  %vm10445_vm12 = vcmp.eq.f32.partialorder %v4614_v50, 8.507059e+37  ;;  %v2571_v24 = vpop.f32.mrf.mxu0 }
 0x4bd   : > { %5190 = vst [vmem:[%s8252_s2 + $0x2d0] sm:$0xff] %v4543_v52  ;;  %v4594_v34 = vadd.f32 %v7083_v45, %v4593_v48  ;;  %v4607_v1 = vsub.f32 1.0, %v4606_v9  ;;  %7090 = vrcp.f32 %v10435_v54  ;;  %vm4611_vm14 = vweird.f32 %v7087_v57 }
 0x4be   : > { %v7089_v47 = vpop.eup %7088  ;;  %v4553_v30 = vsel %vm4552_vm11, %v7081_v18, %v4549_v15  ;;  %v4617_v40 = vor.u32 1.1754944e-38, %v4616_v49  ;;  %v10453_v5 = vadd.f32 1.0, %v7085_v8  ;;  %vm4655_vm15 = vweird.f32 %v10417_v11  ;;  %vm4612_vm1 = vmor %vm4610_vm10, %vm4611_vm14 }
 0x4bf   : > { %v4558_v32 = vsel %vm10413_vm3, %v4557_v37, %v4553_v30  ;;  %v4598_v26 = vsel %vm4597_vm13, %v7083_v45, %v4594_v34  ;;  %v4608_v3 = vmul.f32 %v7087_v57, %v4607_v1  ;;  %v4651_v56 = vmul.f32 %v7089_v47, %v10417_v11 }
 0x4c0   : > { %5191 = vst [vmem:[%s8252_s2 + $0x2d8] sm:$0xff] %v4558_v32  ;;  %v4603_v17 = vsel %vm10423_vm6, %v4602_v59, %v4598_v26  ;;  %vm10462_vm0 = vcmp.eq.f32.partialorder %v4659_v13, 8.507059e+37  ;;  %v4661_v12 = vand.u32 2147483648, %v10417_v11  ;;  %v4674_v28 = vand.u32 2147483647, %v10435_v54  ;;  %v2660_v59 = vpop.f32.mrf.mxu1 }
 0x4c1   : > { %5194 = vst [vmem:[%s8252_s2 + $0x2f0] sm:$0xff] %v4603_v17  ;;  %v4609_v42 = vadd.f32 %v7087_v57, %v4608_v3  ;;  %v4652_v51 = vsub.f32 1.0, %v4651_v56  ;;  %7092 = vrcp.f32 %v10453_v5  ;;  %vm4656_vm2 = vweird.f32 %v7089_v47 }
 0x4c2   : > { %v4676_v63 = vand.u32 2147483648, %v10435_v54  ;;  %7094 = vpow2.f32 %v10410_v25  ;;  %v2565_v39 = vadd.f32 %v10354_v33, %v8686_v10  ;;  %v2654_v4 = vadd.f32 %v10359_v53, %v8724_v31  ;;  %vm4657_vm5 = vmor %vm4655_vm15, %vm4656_vm2 }
 0x4c3   : > { %v7091_v43 = vpop.eup %7090  ;;  %v4613_v27 = vsel %vm4612_vm1, %v7087_v57, %v4609_v42  ;;  %v4653_v29 = vmul.f32 %v7089_v47, %v4652_v51  ;;  %v2567_v35 = vadd.f32 %v10399_v58, %v8686_v10  ;;  %v4662_v19 = vor.u32 1.1754944e-38, %v4661_v12 }
 0x4c4   : > { %v4618_v55 = vsel %vm10445_vm12, %v4617_v40, %v4613_v27  ;;  %v4666_v18 = vmul.f32 %v7091_v43, %v10435_v54  ;;  %vm4670_vm3 = vweird.f32 %v10435_v54  ;;  %vm10486_vm4 = vcmp.eq.f32.partialorder %v4674_v28, 8.507059e+37  ;;  %v2574_v17 = vpop.f32.mrf.mxu0 }
 0x4c5   : > { %5195 = vst [vmem:[%s8252_s2 + $0x2f8] sm:$0xff] %v4618_v55  ;;  %v4654_v22 = vadd.f32 %v7089_v47, %v4653_v29  ;;  %v6256_v25 = vmul.f32 -1.442695, %v2565_v39  ;;  %v6257_v45 = vmul.f32 -1.442695, %v2654_v4  ;;  %v2656_v62 = vadd.f32 %v10405_v46, %v8724_v31 }
 0x4c6   : > { %v4667_v53 = vsub.f32 1.0, %v4666_v18  ;;  %v6260_v58 = vmul.f32 -1.442695, %v2567_v35  ;;  %v2570_v36 = vadd.f32 %v2569_v16, %v8686_v10  ;;  %v4677_v8 = vor.u32 1.1754944e-38, %v4676_v63 }
 0x4c7   : > { %v7093_v0 = vpop.eup %7092  ;;  %v4658_v37 = vsel %vm4657_vm5, %v7089_v47, %v4654_v22  ;;  %7096 = vpow2.f32 %v6256_v25  ;;  %v2659_v7 = vadd.f32 %v2658_v41, %v8724_v31  ;;  %vm4671_vm6 = vweird.f32 %v7091_v43 }
 0x4c8   : > { %v7095_v21 = vpop.eup %7094  ;;  %v4663_v11 = vsel %vm10462_vm0, %v4662_v19, %v4658_v37  ;;  %v4668_v20 = vmul.f32 %v7091_v43, %v4667_v53  ;;  %v4711_v23 = vmul.f32 %v7093_v0, %v10453_v5  ;;  %7098 = vpow2.f32 %v6257_v45  ;;  %vm4672_vm7 = vmor %vm4670_vm3, %vm4671_vm6  ;;  %v2663_v14 = vpop.f32.mrf.mxu1 }
 0x4c9   : > { %5198 = vst [vmem:[%s8252_s2 + $0x310] sm:$0xff] %v4663_v11  ;;  %v10501_v46 = vadd.f32 1.0, %v7095_v21  ;;  %v6261_v2 = vmul.f32 -1.442695, %v2656_v62  ;;  %v6264_v38 = vmul.f32 -1.442695, %v2570_v36  ;;  %7100 = vpow2.f32 %v6260_v58 }
 0x4ca   : > { %v4669_v61 = vadd.f32 %v7091_v43, %v4668_v20  ;;  %v4712_v50 = vsub.f32 1.0, %v4711_v23  ;;  %v2572_v57 = vadd.f32 %v2571_v24, %v8686_v10  ;;  %v4719_v44 = vand.u32 2147483647, %v10453_v5 }
 0x4cb   : > { %v4721_v49 = vand.u32 2147483648, %v10453_v5  ;;  %7102 = vrcp.f32 %v10501_v46  ;;  %v6265_v60 = vmul.f32 -1.442695, %v2659_v7  ;;  %vm4716_vm8 = vweird.f32 %v7093_v0 }
 0x4cc   : > { %v4673_v48 = vsel %vm4672_vm7, %v7091_v43, %v4669_v61  ;;  %v4713_v9 = vmul.f32 %v7093_v0, %v4712_v50  ;;  %7104 = vpow2.f32 %v6261_v2  ;;  %vm4715_vm9 = vweird.f32 %v10453_v5  ;;  %v2576_v39 = vpop.f32.mrf.mxu0 }
 0x4cd   : > { %v7097_v52 = vpop.eup %7096  ;;  %v4678_v15 = vsel %vm10486_vm4, %v4677_v8, %v4673_v48  ;;  %7106 = vpow2.f32 %v6264_v38  ;;  %v6268_v34 = vmul.f32 -1.442695, %v2572_v57  ;;  %vm4717_vm10 = vmor %vm4715_vm9, %vm4716_vm8  ;;  %vm4720_vm11 = vcmp.eq.f32.partialorder %v4719_v44, 8.507059e+37 }
 0x4ce   : > { %5199 = vst [vmem:[%s8252_s2 + $0x318] sm:$0xff] %v4678_v15  ;;  %v4714_v13 = vadd.f32 %v7093_v0, %v4713_v9  ;;  %v10513_v54 = vadd.f32 1.0, %v7097_v52  ;;  %v7099_v1 = vpop.eup %7098  ;;  %v4722_v6 = vor.u32 1.1754944e-38, %v4721_v49  ;;  %7108 = vpow2.f32 %v6265_v60 }
 0x4cf   : > { %v7101_v16 = vpop.eup %7100  ;;  %v4734_v30 = vand.u32 2147483647, %v10501_v46  ;;  %v4736_v40 = vand.u32 2147483648, %v10501_v46  ;;  %v10518_v5 = vadd.f32 1.0, %v7099_v1  ;;  %vm4730_vm12 = vweird.f32 %v10501_v46 }
 0x4d0   : > { %v4718_v47 = vsel %vm4717_vm10, %v7093_v0, %v4714_v13  ;;  %7110 = vrcp.f32 %v10513_v54  ;;  %v10520_v26 = vadd.f32 1.0, %v7101_v16  ;;  %v4779_v42 = vand.u32 2147483647, %v10513_v54 }
 0x4d1   : > { %v7103_v41 = vpop.eup %7102  ;;  %v4723_v32 = vsel %vm4720_vm11, %v4722_v6, %v4718_v47  ;;  %7112 = vpow2.f32 %v6268_v34  ;;  %v4781_v51 = vand.u32 2147483648, %v10513_v54  ;;  %v2661_v28 = vadd.f32 %v2660_v59, %v8724_v31 }
 0x4d2   : > { %v7105_v3 = vpop.eup %7104  ;;  %5202 = vst [vmem:[%s8252_s2 + $0x330] sm:$0xff] %v4723_v32  ;;  %v4726_v56 = vmul.f32 %v7103_v41, %v10501_v46  ;;  %7114 = vrcp.f32 %v10518_v5  ;;  %vm10529_vm13 = vcmp.eq.f32.partialorder %v4734_v30, 8.507059e+37  ;;  %v4737_v43 = vor.u32 1.1754944e-38, %v4736_v40 }
 0x4d3   : > { %v7107_v12 = vpop.eup %7106  ;;  %7116 = vrcp.f32 %v10520_v26  ;;  %vm4775_vm14 = vweird.f32 %v10513_v54  ;;  %v10535_v29 = vadd.f32 1.0, %v7105_v3  ;;  %v10538_v4 = vadd.f32 %v2574_v17, %v8686_v10 }
 0x4d4   : > { %v4727_v63 = vsub.f32 1.0, %v4726_v56  ;;  %v7109_v27 = vpop.eup %7108  ;;  %v10541_v35 = vadd.f32 %v2663_v14, %v8724_v31  ;;  %vm4731_vm15 = vweird.f32 %v7103_v41  ;;  %v4794_v18 = vand.u32 2147483647, %v10518_v5 }
 0x4d5   : > { %v10544_v22 = vadd.f32 1.0, %v7107_v12  ;;  %vm10547_vm0 = vcmp.eq.f32.partialorder %v4779_v42, 8.507059e+37  ;;  %v4782_v45 = vor.u32 1.1754944e-38, %v4781_v51  ;;  %v6269_v53 = vmul.f32 -1.442695, %v2661_v28  ;;  %vm4732_vm2 = vmor %vm4730_vm12, %vm4731_vm15 }
 0x4d6   : > { %v7111_v55 = vpop.eup %7110  ;;  %v4728_v19 = vmul.f32 %v7103_v41, %v4727_v63  ;;  %vm4790_vm1 = vweird.f32 %v10518_v5  ;;  %v4796_v36 = vand.u32 2147483648, %v10518_v5  ;;  %v4839_v0 = vand.u32 2147483647, %v10520_v26 }
 0x4d7   : > { %v4771_v33 = vmul.f32 %v7111_v55, %v10513_v54  ;;  %v7113_v58 = vpop.eup %7112  ;;  %7118 = vrcp.f32 %v10535_v29  ;;  %vm4835_vm3 = vweird.f32 %v10520_v26  ;;  %v4841_v7 = vand.u32 2147483648, %v10520_v26 }
 0x4d8   : > { %v4729_v62 = vadd.f32 %v7103_v41, %v4728_v19  ;;  %v7115_v37 = vpop.eup %7114  ;;  %7120 = vrcp.f32 %v10544_v22  ;;  %v10560_v24 = vadd.f32 1.0, %v7109_v27  ;;  %vm4776_vm4 = vweird.f32 %v7111_v55 }
 0x4d9   : > { %v4772_v8 = vsub.f32 1.0, %v4771_v33  ;;  %v7117_v21 = vpop.eup %7116  ;;  %v4786_v20 = vmul.f32 %v7115_v37, %v10518_v5  ;;  %vm10563_vm5 = vcmp.eq.f32.partialorder %v4794_v18, 8.507059e+37  ;;  %v4854_v38 = vand.u32 2147483647, %v10535_v29  ;;  %vm4777_vm7 = vmor %vm4775_vm14, %vm4776_vm4 }
 0x4da   : > { %v4733_v11 = vsel %vm4732_vm2, %v7103_v41, %v4729_v62  ;;  %v4831_v2 = vmul.f32 %v7117_v21, %v10520_v26  ;;  %v4797_v50 = vor.u32 1.1754944e-38, %v4796_v36  ;;  %vm10572_vm6 = vcmp.eq.f32.partialorder %v4839_v0, 8.507059e+37 }
 0x4db   : > { %v4738_v59 = vsel %vm10529_vm13, %v4737_v43, %v4733_v11  ;;  %v4773_v46 = vmul.f32 %v7111_v55, %v4772_v8  ;;  %v4787_v61 = vsub.f32 1.0, %v4786_v20  ;;  %v4856_v44 = vand.u32 2147483648, %v10535_v29 }
 0x4dc   : > { %5203 = vst [vmem:[%s8252_s2 + $0x338] sm:$0xff] %v4738_v59  ;;  %v4832_v60 = vsub.f32 1.0, %v4831_v2  ;;  %v4842_v48 = vor.u32 1.1754944e-38, %v4841_v7  ;;  %7122 = vrcp.f32 %v10560_v24  ;;  %vm4791_vm8 = vweird.f32 %v7115_v37 }
 0x4dd   : > { %v4774_v49 = vadd.f32 %v7111_v55, %v4773_v46  ;;  %v7119_v9 = vpop.eup %7118  ;;  %v4788_v52 = vmul.f32 %v7115_v37, %v4787_v61  ;;  %vm4850_vm9 = vweird.f32 %v10535_v29  ;;  %vm4895_vm10 = vweird.f32 %v10544_v22  ;;  %vm4792_vm13 = vmor %vm4790_vm1, %vm4791_vm8 }
 0x4de   : > { %v7121_v15 = vpop.eup %7120  ;;  %v4833_v34 = vmul.f32 %v7117_v21, %v4832_v60  ;;  %vm4836_vm11 = vweird.f32 %v7117_v21  ;;  %v4846_v1 = vmul.f32 %v7119_v9, %v10535_v29  ;;  %vm10584_vm12 = vcmp.eq.f32.partialorder %v4854_v38, 8.507059e+37  ;;  %v2665_v29 = vpop.f32.mrf.mxu1 }
 0x4df   : > { %v4778_v13 = vsel %vm4777_vm7, %v7111_v55, %v4774_v49  ;;  %v4789_v16 = vadd.f32 %v7115_v37, %v4788_v52  ;;  %v4857_v47 = vor.u32 1.1754944e-38, %v4856_v44  ;;  %v4891_v30 = vmul.f32 %v7121_v15, %v10544_v22  ;;  %vm4837_vm14 = vmor %vm4835_vm3, %vm4836_vm11 }
 0x4e0   : > { %v4783_v54 = vsel %vm10547_vm0, %v4782_v45, %v4778_v13  ;;  %v4834_v40 = vadd.f32 %v7117_v21, %v4833_v34  ;;  %v4847_v41 = vsub.f32 1.0, %v4846_v1  ;;  %v4899_v32 = vand.u32 2147483647, %v10544_v22 }
 0x4e1   : > { %5206 = vst [vmem:[%s8252_s2 + $0x350] sm:$0xff] %v4783_v54  ;;  %v4901_v3 = vand.u32 2147483648, %v10544_v22  ;;  %v4793_v56 = vsel %vm4792_vm13, %v7115_v37, %v4789_v16  ;;  %v4892_v17 = vsub.f32 1.0, %v4891_v30  ;;  %v10598_v14 = vadd.f32 1.0, %v7113_v58 }
 0x4e2   : > { %7124 = vpow2.f32 %v6269_v53  ;;  %v7123_v12 = vpop.eup %7122  ;;  %v4798_v5 = vsel %vm10563_vm5, %v4797_v50, %v4793_v56  ;;  %v4838_v42 = vsel %vm4837_vm14, %v7117_v21, %v4834_v40  ;;  %v4848_v51 = vmul.f32 %v7119_v9, %v4847_v41 }
 0x4e3   : > { %vm4851_vm15 = vweird.f32 %v7119_v9  ;;  %5207 = vst [vmem:[%s8252_s2 + $0x358] sm:$0xff] %v4798_v5  ;;  %v4843_v28 = vsel %vm10572_vm6, %v4842_v48, %v4838_v42  ;;  %v4893_v63 = vmul.f32 %v7121_v15, %v4892_v17  ;;  %vm4896_vm0 = vweird.f32 %v7121_v15 }
 0x4e4   : > { %v4906_v26 = vmul.f32 %v7123_v12, %v10560_v24  ;;  %5210 = vst [vmem:[%s8252_s2 + $0x370] sm:$0xff] %v4843_v28  ;;  %v4849_v43 = vadd.f32 %v7119_v9, %v4848_v51  ;;  %vm10607_vm1 = vcmp.eq.f32.partialorder %v4899_v32, 8.507059e+37  ;;  %v4902_v55 = vor.u32 1.1754944e-38, %v4901_v3  ;;  %vm4852_vm2 = vmor %vm4850_vm9, %vm4851_vm15 }
 0x4e5   : > { %7126 = vrcp.f32 %v10598_v14  ;;  %v4894_v19 = vadd.f32 %v7121_v15, %v4893_v63  ;;  %v4914_v33 = vand.u32 2147483647, %v10560_v24  ;;  %v6272_v25 = vmul.f32 -1.442695, %v10538_v4  ;;  %vm4897_vm3 = vmor %vm4895_vm10, %vm4896_vm0 }
 0x4e6   : > { %v4907_v18 = vsub.f32 1.0, %v4906_v26  ;;  %v4853_v45 = vsel %vm4852_vm2, %v7119_v9, %v4849_v43  ;;  %v4916_v53 = vand.u32 2147483648, %v10560_v24  ;;  %v6273_v58 = vmul.f32 -1.442695, %v10541_v35 }
 0x4e7   : > { %v2577_v62 = vadd.f32 %v2576_v39, %v8686_v10  ;;  %v4858_v0 = vsel %vm10584_vm12, %v4857_v47, %v4853_v45  ;;  %v4898_v37 = vsel %vm4897_vm3, %v7121_v15, %v4894_v19  ;;  %vm4911_vm4 = vweird.f32 %v7123_v12 }
 0x4e8   : > { %v7125_v36 = vpop.eup %7124  ;;  %v4908_v8 = vmul.f32 %v7123_v12, %v4907_v18  ;;  %5211 = vst [vmem:[%s8252_s2 + $0x378] sm:$0xff] %v4858_v0  ;;  %v4903_v4 = vsel %vm10607_vm1, %v4902_v55, %v4898_v37  ;;  %7128 = vpow2.f32 %v6272_v25  ;;  %vm4910_vm5 = vweird.f32 %v10560_v24 }
 0x4e9   : > { %v3171_v22 = vadd.f32 1.0, %v7125_v36  ;;  %v6276_v7 = vmul.f32 -1.442695, %v2577_v62  ;;  %5214 = vst [vmem:[%s8252_s2 + $0x390] sm:$0xff] %v4903_v4  ;;  %7130 = vpow2.f32 %v6273_v58  ;;  %v2666_v10 = vadd.f32 %v2665_v29, %v8724_v31  ;;  %vm4912_vm6 = vmor %vm4910_vm5, %vm4911_vm4 }
 0x4ea   : > { %v4909_v35 = vadd.f32 %v7123_v12, %v4908_v8  ;;  %v4917_v11 = vor.u32 1.1754944e-38, %v4916_v53  ;;  %vm4915_vm7 = vcmp.eq.f32.partialorder %v4914_v33, 8.507059e+37  ;;  %v4961_v61 = vand.u32 2147483648, %v10598_v14 }
 0x4eb   : > { %v7127_v21 = vpop.eup %7126  ;;  %7132 = vrcp.f32 %v3171_v22  ;;  %v6277_v46 = vmul.f32 -1.442695, %v2666_v10  ;;  %v4959_v31 = vand.u32 2147483647, %v10598_v14  ;;  %vm4955_vm9 = vweird.f32 %v10598_v14 }
 0x4ec   : > { %v4913_v20 = vsel %vm4912_vm6, %v7123_v12, %v4909_v35  ;;  %v4951_v23 = vmul.f32 %v7127_v21, %v10598_v14  ;;  %7134 = vpow2.f32 %v6276_v7  ;;  %vm4956_vm8 = vweird.f32 %v7127_v21 }
 0x4ed   : > { %v4918_v59 = vsel %vm4915_vm7, %v4917_v11, %v4913_v20  ;;  %7136 = vpow2.f32 %v6277_v46  ;;  %vm4957_vm10 = vmor %vm4955_vm9, %vm4956_vm8  ;;  %v4962_v52 = vor.u32 1.1754944e-38, %v4961_v61  ;;  %vm4960_vm11 = vcmp.eq.f32.partialorder %v4959_v31, 8.507059e+37 }
 0x4ee   : > { %5215 = vst [vmem:[%s8252_s2 + $0x398] sm:$0xff] %v4918_v59  ;;  %v4952_v2 = vsub.f32 1.0, %v4951_v23  ;;  %v7129_v38 = vpop.eup %7128  ;;  %v4974_v6 = vand.u32 2147483647, %v3171_v22  ;;  %v4976_v54 = vand.u32 2147483648, %v3171_v22  ;;  %vm4970_vm13 = vweird.f32 %v3171_v22 }
 0x4ef   : > { %v7131_v24 = vpop.eup %7130  ;;  %v3174_v57 = vadd.f32 1.0, %v7129_v38 }
 0x4f0   : > { %v4953_v50 = vmul.f32 %v7127_v21, %v4952_v2  ;;  %v3175_v49 = vadd.f32 1.0, %v7131_v24  ;;  %v4977_v3 = vor.u32 1.1754944e-38, %v4976_v54  ;;  %vm4975_vm15 = vcmp.eq.f32.partialorder %v4974_v6, 8.507059e+37 }
 0x4f1   : > { %v7133_v44 = vpop.eup %7132  ;;  %7138 = vrcp.f32 %v3174_v57  ;;  %v5019_v42 = vand.u32 2147483647, %v3174_v57  ;;  %v5021_v51 = vand.u32 2147483648, %v3174_v57  ;;  %vm5015_vm1 = vweird.f32 %v3174_v57 }
 0x4f2   : > { %v4954_v60 = vadd.f32 %v7127_v21, %v4953_v50  ;;  %v4966_v48 = vmul.f32 %v7133_v44, %v3171_v22  ;;  %v7135_v9 = vpop.eup %7134  ;;  %7140 = vrcp.f32 %v3175_v49  ;;  %vm4971_vm12 = vweird.f32 %v7133_v44 }
 0x4f3   : > { %v7137_v34 = vpop.eup %7136  ;;  %v10635_v47 = vadd.f32 1.0, %v7135_v9  ;;  %vm4972_vm14 = vmor %vm4970_vm13, %vm4971_vm12  ;;  %v5034_v63 = vand.u32 2147483647, %v3175_v49  ;;  %v5036_v39 = vand.u32 2147483648, %v3175_v49  ;;  %vm5020_vm3 = vcmp.eq.f32.partialorder %v5019_v42, 8.507059e+37 }
 0x4f4   : > { %v4958_v15 = vsel %vm4957_vm10, %v7127_v21, %v4954_v60  ;;  %v4967_v13 = vsub.f32 1.0, %v4966_v48  ;;  %v10637_v30 = vadd.f32 1.0, %v7137_v34  ;;  %vm5030_vm4 = vweird.f32 %v3175_v49 }
 0x4f5   : > { %v4963_v1 = vsel %vm4960_vm11, %v4962_v52, %v4958_v15  ;;  %7142 = vrcp.f32 %v10635_v47  ;;  %v5022_v33 = vor.u32 1.1754944e-38, %v5021_v51  ;;  %vm5035_vm6 = vcmp.eq.f32.partialorder %v5034_v63, 8.507059e+37 }
 0x4f6   : > { %5218 = vst [vmem:[%s8252_s2 + $0x3b0] sm:$0xff] %v4963_v1  ;;  %v4968_v16 = vmul.f32 %v7133_v44, %v4967_v13  ;;  %7144 = vrcp.f32 %v10637_v30  ;;  %v5037_v58 = vor.u32 1.1754944e-38, %v5036_v39  ;;  %v5079_v29 = vand.u32 2147483647, %v10635_v47 }
 0x4f7   : > { %v7139_v40 = vpop.eup %7138  ;;  %v5081_v37 = vand.u32 2147483648, %v10635_v47  ;;  %v5096_v7 = vand.u32 2147483648, %v10637_v30  ;;  %v5094_v10 = vand.u32 2147483647, %v10637_v30  ;;  %vm5075_vm10 = vweird.f32 %v10635_v47 }
 0x4f8   : > { %v4969_v41 = vadd.f32 %v7133_v44, %v4968_v16  ;;  %v7141_v32 = vpop.eup %7140  ;;  %v5011_v56 = vmul.f32 %v7139_v40, %v3174_v57  ;;  %vm5016_vm0 = vweird.f32 %v7139_v40  ;;  %vm5090_vm12 = vweird.f32 %v10637_v30 }
 0x4f9   : > { %v5026_v14 = vmul.f32 %v7141_v32, %v3175_v49  ;;  %vm5031_vm2 = vweird.f32 %v7141_v32  ;;  %vm5017_vm5 = vmor %vm5015_vm1, %vm5016_vm0  ;;  %v5082_v11 = vor.u32 1.1754944e-38, %v5081_v37  ;;  %vm5080_vm13 = vcmp.eq.f32.partialorder %v5079_v29, 8.507059e+37 }
 0x4fa   : > { %v4973_v17 = vsel %vm4972_vm14, %v7133_v44, %v4969_v41  ;;  %v5012_v5 = vsub.f32 1.0, %v5011_v56  ;;  %vm5032_vm7 = vmor %vm5030_vm4, %vm5031_vm2  ;;  %v5097_v59 = vor.u32 1.1754944e-38, %v5096_v7 }
 0x4fb   : > { %v4978_v12 = vsel %vm4975_vm15, %v4977_v3, %v4973_v17  ;;  %v5027_v28 = vsub.f32 1.0, %v5026_v14  ;;  %v7143_v43 = vpop.eup %7142  ;;  %vm5095_vm15 = vcmp.eq.f32.partialorder %v5094_v10, 8.507059e+37 }
 0x4fc   : > { %5219 = vst [vmem:[%s8252_s2 + $0x3b8] sm:$0xff] %v4978_v12  ;;  %v5013_v26 = vmul.f32 %v7139_v40, %v5012_v5  ;;  %v7145_v55 = vpop.eup %7144  ;;  %v5071_v18 = vmul.f32 %v7143_v43, %v10635_v47  ;;  %vm5076_vm8 = vweird.f32 %v7143_v43 }
 0x4fd   : > { %v5028_v27 = vmul.f32 %v7141_v32, %v5027_v28  ;;  %v5086_v45 = vmul.f32 %v7145_v55, %v10637_v30  ;;  %vm5091_vm9 = vweird.f32 %v7145_v55  ;;  %vm5077_vm11 = vmor %vm5075_vm10, %vm5076_vm8 }
 0x4fe   : > { %v5014_v19 = vadd.f32 %v7139_v40, %v5013_v26  ;;  %v5072_v62 = vsub.f32 1.0, %v5071_v18  ;;  %vm5092_vm14 = vmor %vm5090_vm12, %vm5091_vm9 }
 0x4ff   : > { %v5029_v25 = vadd.f32 %v7141_v32, %v5028_v27  ;;  %v5087_v8 = vsub.f32 1.0, %v5086_v45 }
 0x500   : > { %v5018_v53 = vsel %vm5017_vm5, %v7139_v40, %v5014_v19  ;;  %v5073_v22 = vmul.f32 %v7143_v43, %v5072_v62 }
 0x501   : > { %v5023_v36 = vsel %vm5020_vm3, %v5022_v33, %v5018_v53  ;;  %v5033_v0 = vsel %vm5032_vm7, %v7141_v32, %v5029_v25  ;;  %v5088_v35 = vmul.f32 %v7145_v55, %v5087_v8 }
 0x502   : > { %5222 = vst [vmem:[%s8252_s2 + $0x3d0] sm:$0xff] %v5023_v36  ;;  %v5038_v4 = vsel %vm5035_vm6, %v5037_v58, %v5033_v0  ;;  %v5074_v21 = vadd.f32 %v7143_v43, %v5073_v22 }
 0x503   : > { %5223 = vst [vmem:[%s8252_s2 + $0x3d8] sm:$0xff] %v5038_v4  ;;  %v5089_v20 = vadd.f32 %v7145_v55, %v5088_v35 }
 0x504   : > { %v5078_v23 = vsel %vm5077_vm11, %v7143_v43, %v5074_v21 }
 0x505   : > { %v5083_v46 = vsel %vm5080_vm13, %v5082_v11, %v5078_v23  ;;  %v5093_v2 = vsel %vm5092_vm14, %v7145_v55, %v5089_v20 }
 0x506   : > { %5226 = vst [vmem:[%s8252_s2 + $0x3f0] sm:$0xff] %v5083_v46  ;;  %v5098_v38 = vsel %vm5095_vm15, %v5097_v59, %v5093_v2 }
 0x507   : > { %5227 = vst [vmem:[%s8252_s2 + $0x3f8] sm:$0xff] %v5098_v38 }
 0x508   : > { %7410 = shalt.err (!%p7407_p13)
}
 0x509   : > { %s7483_s20 = smov 512   ;;  %s7484_s2 = smov 32  }
 0x50a   : > { %6477 = dma.vmem_to_hbm [thread:$0]  (%p7635_p5), %s5317_s18, 16384, %s5319_s12, %s5293_s15, %s7483_s20, %s7483_s20, %s7484_s2  }
 0x50b PF: > { %s10948_s26 = sld [smem:[#allocation24_spill]]  ;;  %p10950_p0 = scmp.ge.s32.totalorder %s7469_s16, 2 }
 0x50d   : > { %p6504_p3 = pnand %p10950_p0, %p7577_p6 }
 0x50f   : > { %p6505_p7 = pneg %p6504_p3 }
 0x511   : > { %s5367_s30 = sand.u32 1, %s10948_s26  }
 0x512   : > { %s5368_s19 = scalar_lea.sflag [#allocation4], %s5367_s30 }
 0x513   : > { %7448 = dma.done.wait (%p6505_p7), %s5368_s19, 16384  }
 0x514   : > { %7450 = vsyncadd (%p6505_p7), %s5368_s19, 4294950912  ;;  %s10951_s22 = sadd.s32 4294967294, %s7469_s16  }
 0x515   : > { %s5377_s6 = sand.u32 1, %s10951_s22  }
 0x516   : > { %s5378_s17 = scalar_lea.sflag [#allocation15], %s5377_s6 }
 0x517   : > { %7452 = dma.done.wait (%p6505_p7), %s5378_s17, 8192  }
 0x518   : > { %7454 = vsyncadd (%p6505_p7), %s5378_s17, 4294959104  ;;  %s10952_s16 = sld [smem:[#allocation27_spill]]  ;;  %s10955_s13 = smov %s7461_s14 }
 0x519   : > { %s10953_s25 = sld [smem:[#allocation25_spill]] }
 0x51a   : > { %s10954_s15 = sld [smem:[#allocation28_spill]] }
 0x51e   : > { %p32_p5 = scmp.ge.s32.totalorder %s10952_s16, 4  }
 0x51f   : > { %s10956_s14 = smov %s10953_s25 }
 0x520   :  { %34 = sbr.rel (!%p32_p5) target bundleno = 16 (0x10), region = 158 }
 0x525   :  { %5394 = vsyncpa [#allocation3], 1 }
 0x526   :  { %5396 = vsyncpa [#allocation3 + $0x1], 1 }
 0x527   :  { %5397 = vsyncpa [#allocation6], 1 }
 0x528   :  { %5399 = vsyncpa [#allocation6 + $0x1], 1 }
 0x529   :  { %5400 = vsyncpa [#allocation9], 1 }
 0x52a   :  { %5401 = vsyncpa [#allocation12], 1 }
 0x52b   :  { %5402 = vsyncpa [#allocation4], 1 }
 0x52c   :  { %5404 = vsyncpa [#allocation4 + $0x1], 1 }
 0x52d   :  { %5405 = vsyncpa [#allocation15], 1 }
 0x52e   :  { %5407 = vsyncpa [#allocation15 + $0x1], 1 }

</bundles_post_ra>
